<compile_context>
chip_gen: v7x
topology: tpu7x:2x2x1
jax: 0.10.0
libtpu: 0.0.40
codegen_flags: <defaults>
</compile_context>

<pallas_src>
import functools
import numpy as np
import jax
import jax.numpy as jnp
from jax.experimental import pallas as pl
from jax.experimental.pallas import tpu as pltpu

EPS = 1e-5


# --------------------------------------------------------------------------
# In-kernel helpers
# --------------------------------------------------------------------------
def _ln_lastdim(x, g, b):
    mu = jnp.mean(x, axis=-1, keepdims=True)
    var = jnp.mean(jnp.square(x - mu), axis=-1, keepdims=True)
    return (x - mu) * jax.lax.rsqrt(var + EPS) * g + b


def _gelu_tanh(x):
    # TODO(synk): nn.GELU uses exact erf; erf has no guaranteed Mosaic lowering,
    # so the fused kernel uses the tanh approximation (<=~1e-3 rel. deviation).
    c = 0.7978845608028654  # sqrt(2/pi)
    return 0.5 * x * (1.0 + jnp.tanh(c * (x + 0.044715 * x * x * x)))


# --------------------------------------------------------------------------
# Pallas kernels (one fused kernel per stage of the network)
# --------------------------------------------------------------------------
def _patch_embed_kernel(p_ref, w_ref, b_ref, g_ref, bb_ref, o_ref):
    """Conv2d(3, C, 4, stride=4) as im2col matmul + LayerNorm, one batch elem."""
    y = jnp.dot(p_ref[0], w_ref[...], preferred_element_type=jnp.float32) + b_ref[...]
    o_ref[0] = _ln_lastdim(y, g_ref[...], bb_ref[...])


def _swin_block_kernel(x_ref, n1g_ref, n1b_ref, wq_ref, wk_ref, wv_ref,
                       bq_ref, bk_ref, bv_ref, wp_ref, bp_ref,
                       n2g_ref, n2b_ref, w1_ref, b1_ref, w2_ref, b2_ref,
                       bias_ref, o_ref):
    """One full Swin block (W-MSA/SW-MSA + MLP) for one batch element.

    x_ref[0] is (L, C) with tokens already in (window-partition o roll) order,
    so the whole block is per-window / per-token independent and stays in VMEM.
    """
    _, L, C = x_ref.shape
    nH, _, Dh = wq_ref.shape
    N = bias_ref.shape[-1]
    nW = L // N
    scale = float(Dh) ** -0.5

    x = x_ref[0]                                               # (L, C)
    h = _ln_lastdim(x, n1g_ref[...], n1b_ref[...])

    attn = jnp.zeros((L, C), jnp.float32)
    for hh in range(nH):                                       # unrolled, heads VMEM-resident
        q = (jnp.dot(h, wq_ref[hh], preferred_element_type=jnp.float32)
             + bq_ref[hh]) * scale                             # (L, Dh)
        k = jnp.dot(h, wk_ref[hh], preferred_element_type=jnp.float32) + bk_ref[hh]
        v = jnp.dot(h, wv_ref[hh], preferred_element_type=jnp.float32) + bv_ref[hh]
        q3 = q.reshape(nW, N, Dh)
        k3 = k.reshape(nW, N, Dh)
        v3 = v.reshape(nW, N, Dh)
        s = jax.lax.dot_general(q3, k3, (((2,), (2,)), ((0,), (0,))),
                                preferred_element_type=jnp.float32)       # (nW, N, N)
        s = s + bias_ref[hh]                                   # rel-pos bias (+ shift mask)
        s = s - jnp.max(s, axis=-1, keepdims=True)
        p = jnp.exp(s)
        p = p / jnp.sum(p, axis=-1, keepdims=True)
        o = jax.lax.dot_general(p, v3, (((2,), (1,)), ((0,), (0,))),
                                preferred_element_type=jnp.float32)       # (nW, N, Dh)
        attn = attn + jnp.dot(o.reshape(L, Dh), wp_ref[hh],
                              preferred_element_type=jnp.float32)         # head-wise proj
    x1 = x + attn + bp_ref[...]

    h2 = _ln_lastdim(x1, n2g_ref[...], n2b_ref[...])
    m = jnp.dot(h2, w1_ref[...], preferred_element_type=jnp.float32) + b1_ref[...]
    m = _gelu_tanh(m)
    m = jnp.dot(m, w2_ref[...], preferred_element_type=jnp.float32) + b2_ref[...]
    o_ref[0] = x1 + m


def _merge_kernel(x_ref, g_ref, b_ref, w_ref, o_ref):
    """Swin patch merging: LayerNorm(4C) + Linear(4C -> 2C, no bias)."""
    h = _ln_lastdim(x_ref[0], g_ref[...], b_ref[...])
    o_ref[0] = jnp.dot(h, w_ref[...], preferred_element_type=jnp.float32)


def _decoder_kernel(t_ref, g_ref, b_ref, st_ref, w1_ref, b1_ref,
                    ut_ref, w2_ref, b2_ref, o_ref):
    """Final LN + Conv3x3(pad=1)+ReLU + bilinear x4 + Conv1x1 + Sigmoid.

    Channels-first (C, L) so every matmul keeps pixels on the lane axis and the
    final output is a lane-dense (1, Ho*Wo) slab.
    """
    x = t_ref[0]                                               # (Clast, L)
    mu = jnp.mean(x, axis=0, keepdims=True)
    var = jnp.mean(jnp.square(x - mu), axis=0, keepdims=True)
    xn = (x - mu) * jax.lax.rsqrt(var + EPS) * g_ref[...] + b_ref[...]

    n_taps, cout, _ = w1_ref.shape
    L = x.shape[1]
    acc = jnp.zeros((cout, L), jnp.float32)
    for t in range(n_taps):                                    # conv3x3 as 9 shifted matmuls
        shifted = jnp.dot(xn, st_ref[t], preferred_element_type=jnp.float32)   # (Clast, L)
        acc = acc + jnp.dot(w1_ref[t], shifted, preferred_element_type=jnp.float32)
    y = jnp.maximum(acc + b1_ref[...], 0.0)                    # (256, L)

    # Conv1x1 (channels) and bilinear upsample (pixels) are both linear and
    # commute exactly; reducing channels first avoids a (256, 256) intermediate.
    r = jnp.dot(w2_ref[...], y, preferred_element_type=jnp.float32)               # (1, L)
    z = jnp.dot(r, ut_ref[...], preferred_element_type=jnp.float32) + b2_ref[...]  # (1, Lout)
    o_ref[0] = jax.nn.sigmoid(z)


# --------------------------------------------------------------------------
# pallas_call wrapper: grid over batch (parallel -> uses both TCs on v7x)
# --------------------------------------------------------------------------
def _batch_spec(shape):
    nd = len(shape)
    return pl.BlockSpec((1,) + tuple(shape[1:]),
                        lambda b, _nd=nd: (b,) + (0,) * (_nd - 1))


def _const_spec(a):
    nd = a.ndim
    return pl.BlockSpec(tuple(a.shape), lambda b, _nd=nd: (0,) * _nd)


def _run_per_batch(kernel, x, shared, out_shape):
    B = x.shape[0]
    in_specs = [_batch_spec(x.shape)] + [_const_spec(a) for a in shared]
    return pl.pallas_call(
        kernel,
        grid=(B,),
        in_specs=in_specs,
        out_specs=_batch_spec(out_shape),
        out_shape=jax.ShapeDtypeStruct(tuple(out_shape), jnp.float32),
        compiler_params=pltpu.CompilerParams(dimension_semantics=("parallel",)),
    )(x, *shared)


# --------------------------------------------------------------------------
# Static helpers (numpy, computed once at build time)
# --------------------------------------------------------------------------
def rel_position_index(ws):
    coords = np.stack(np.meshgrid(np.arange(ws), np.arange(ws), indexing="ij"))
    cf = coords.reshape(2, -1)
    rel = (cf[:, :, None] - cf[:, None, :]).transpose(1, 2, 0).astype(np.int64)
    rel[..., 0] += ws - 1
    rel[..., 1] += ws - 1
    rel[..., 0] *= 2 * ws - 1
    return rel.sum(-1)                                         # (ws*ws, ws*ws)


def shifted_window_mask(H, W, ws, shift):
    if shift == 0:
        return None
    img = np.zeros((H, W), np.float32)
    cnt = 0
    for hs in (slice(0, -ws), slice(-ws, -shift), slice(-shift, None)):
        for wsl in (slice(0, -ws), slice(-ws, -shift), slice(-shift, None)):
            img[hs, wsl] = cnt
            cnt += 1
    mw = img.reshape(H // ws, ws, W // ws, ws).transpose(0, 2, 1, 3).reshape(-1, ws * ws)
    diff = mw[:, None, :] - mw[:, :, None]
    return np.where(diff != 0, -100.0, 0.0).astype(np.float32)  # (nW, N, N)


def window_permutation(H, W, ws, shift):
    """Token permutation = window_partition o roll(-shift, -shift)."""
    perm = np.zeros(H * W, np.int32)
    m = 0
    for wh in range(H // ws):
        for ww in range(W // ws):
            for i in range(ws):
                for j in range(ws):
                    h = (wh * ws + i + shift) % H
                    w = (ww * ws + j + shift) % W
                    perm[m] = h * W + w
                    m += 1
    inv = np.argsort(perm).astype(np.int32)
    return perm, inv


def bilinear_upsample_matrix(in_size, scale):
    # PyTorch Upsample(mode='bilinear', align_corners=False) 1-D weights.
    out_size = in_size * scale
    m = np.zeros((out_size, in_size), np.float32)
    for o in range(out_size):
        src = (o + 0.5) / scale - 0.5
        src = max(src, 0.0)
        i0 = min(int(np.floor(src)), in_size - 1)
        i1 = min(i0 + 1, in_size - 1)
        lam = src - i0
        m[o, i0] += 1.0 - lam
        m[o, i1] += lam
    return m


def conv3x3_shift_matrices(H, W):
    """st[t, q, p] = 1 iff output pixel p reads input pixel q for tap t (zero pad)."""
    L = H * W
    st = np.zeros((9, L, L), np.float32)
    for kh in range(3):
        for kw in range(3):
            t = kh * 3 + kw
            for i in range(H):
                for j in range(W):
                    si, sj = i + kh - 1, j + kw - 1
                    if 0 <= si < H and 0 <= sj < W:
                        st[t, si * W + sj, i * W + j] = 1.0
    return st


# --------------------------------------------------------------------------
# Model construction (deterministic synthetic weights, pre-laid-out for TPU)
# --------------------------------------------------------------------------
def build_model(key):
    cfg = dict(img=32, patch=4, in_chans=3, embed_dim=16,
               depths=(2, 2), heads=(2, 4), window=4, mlp_ratio=4)
    keys = iter(jax.random.split(key, 256))

    def rnd(shape, scale=0.02):
        return scale * jax.random.normal(next(keys), shape, jnp.float32)

    P, meta = {}, {"cfg": cfg}
    ed = cfg["embed_dim"]
    P["pe_w"] = rnd((cfg["in_chans"] * cfg["patch"] ** 2, ed))
    P["pe_b"] = jnp.zeros((1, ed), jnp.float32)
    P["pe_ng"] = jnp.ones((1, ed), jnp.float32)
    P["pe_nb"] = jnp.zeros((1, ed), jnp.float32)

    H = W = cfg["img"] // cfg["patch"]
    stages, smeta = [], []
    for s, (depth, nH) in enumerate(zip(cfg["depths"], cfg["heads"])):
        C = ed * (2 ** s)
        Dh = C // nH
        blocks, bmeta = [], []
        for d in range(depth):
            ws = min(cfg["window"], H, W)
            shift = 0 if (d % 2 == 0 or min(H, W) <= cfg["window"]) else ws // 2
            N = ws * ws
            nW = (H // ws) * (W // ws)
            hidden = C * cfg["mlp_ratio"]

            qkv_w = rnd((C, 3 * C))
            qkv_b = jnp.zeros((3 * C,), jnp.float32)
            proj_w = rnd((C, C))
            rel_table = rnd(((2 * ws - 1) ** 2, nH))

            # Per-head weight splits done ONCE here (no in-kernel head transposes).
            def split_heads(wcols):
                return wcols.reshape(C, nH, Dh).transpose(1, 0, 2)      # (nH, C, Dh)
            wq = split_heads(qkv_w[:, 0 * C:1 * C])
            wk = split_heads(qkv_w[:, 1 * C:2 * C])
            wv = split_heads(qkv_w[:, 2 * C:3 * C])
            bq = qkv_b[0 * C:1 * C].reshape(nH, 1, Dh)
            bk = qkv_b[1 * C:2 * C].reshape(nH, 1, Dh)
            bv = qkv_b[2 * C:3 * C].reshape(nH, 1, Dh)
            wp = proj_w.reshape(nH, Dh, C)                               # (nH, Dh, C)

            # Relative-position bias (+ shift mask), per (head, window) — no batch
            # broadcast is ever materialized.
            rel_idx = rel_position_index(ws).reshape(-1)
            rel = rel_table[rel_idx].reshape(N, N, nH).transpose(2, 0, 1)  # (nH, N, N)
            mask = shifted_window_mask(H, W, ws, shift)
            if mask is None:
                attn_bias = rel[:, None, :, :]                           # (nH, 1, N, N)
            else:
                attn_bias = rel[:, None, :, :] + jnp.asarray(mask)[None]  # (nH, nW, N, N)

            perm, inv = window_permutation(H, W, ws, shift)
            blocks.append(dict(
                n1g=jnp.ones((1, C), jnp.float32), n1b=jnp.zeros((1, C), jnp.float32),
                wq=wq, wk=wk, wv=wv, bq=bq, bk=bk, bv=bv,
                wp=wp, bp=jnp.zeros((1, C), jnp.float32),
                n2g=jnp.ones((1, C), jnp.float32), n2b=jnp.zeros((1, C), jnp.float32),
                w1=rnd((C, hidden)), b1=jnp.zeros((1, hidden), jnp.float32),
                w2=rnd((hidden, C)), b2=jnp.zeros((1, C), jnp.float32),
                attn_bias=attn_bias,
            ))
            bmeta.append(dict(nW=nW, N=N, nH=nH, Dh=Dh, perm=perm, inv=inv,
                              identity=bool(np.array_equal(perm, np.arange(H * W)))))
        merge = None
        if s < len(cfg["depths"]) - 1:
            merge = dict(ng=jnp.ones((1, 4 * C), jnp.float32),
                         nb=jnp.zeros((1, 4 * C), jnp.float32),
                         w=rnd((4 * C, 2 * C)))
            H, W = H // 2, W // 2
        stages.append(dict(blocks=blocks, merge=merge))
        smeta.append(bmeta)
    P["stages"] = stages
    meta["stages"] = smeta

    Clast = ed * (2 ** (len(cfg["depths"]) - 1))
    meta["Clast"] = Clast
    meta["feat_hw"] = (H, W)

    # decoder params (Conv3x3 as 9 per-tap (Cout, Cin) weights, channels-first)
    P["final_ng"] = jnp.ones((Clast, 1), jnp.float32)
    P["final_nb"] = jnp.zeros((Clast, 1), jnp.float32)
    P["c1_w"] = rnd((9, 256, Clast))
    P["c1_b"] = jnp.zeros((256, 1), jnp.float32)
    P["c2_wT"] = rnd((1, 256))
    P["c2_b"] = jnp.zeros((1, 1), jnp.float32)
    mh = bilinear_upsample_matrix(H, 4)
    mw = bilinear_upsample_matrix(W, 4)
    P["up_T"] = jnp.asarray(np.kron(mh, mw).T)                   # (H*W, 16*H*W)
    P["conv_shifts"] = jnp.asarray(conv3x3_shift_matrices(H, W))  # (9, H*W, H*W)
    return P, meta


# --------------------------------------------------------------------------
# Forward pass
# --------------------------------------------------------------------------
def swin_block(x, blk, m):
    B, L, C = x.shape
    xw = x if m["identity"] else x[:, m["perm"], :]     # static token permutation (roll+partition)
    shared = [blk["n1g"], blk["n1b"], blk["wq"], blk["wk"], blk["wv"],
              blk["bq"], blk["bk"], blk["bv"], blk["wp"], blk["bp"],
              blk["n2g"], blk["n2b"], blk["w1"], blk["b1"], blk["w2"], blk["b2"],
              blk["attn_bias"]]
    y = _run_per_batch(_swin_block_kernel, xw, shared, (B, L, C))
    return y if m["identity"] else y[:, m["inv"], :]


def patch_merge(x, H, W, p):
    B, _, C = x.shape
    xh = x.reshape(B, H, W, C)
    xc = jnp.concatenate([xh[:, 0::2, 0::2], xh[:, 1::2, 0::2],
                          xh[:, 0::2, 1::2], xh[:, 1::2, 1::2]], axis=-1)
    xc = xc.reshape(B, (H // 2) * (W // 2), 4 * C)
    return _run_per_batch(_merge_kernel, xc, [p["ng"], p["nb"], p["w"]],
                          (B, (H // 2) * (W // 2), 2 * C))


def forward(params, meta, x):
    cfg = meta["cfg"]
    B = x.shape[0]
    p4 = cfg["patch"]
    Hp = Wp = cfg["img"] // p4
    ed = cfg["embed_dim"]

    # ---- backbone ----
    # patch embed: Conv2d(3, ed, 4, stride=4) via im2col (wrapper glue) + fused matmul+LN kernel
    patches = x.reshape(B, cfg["in_chans"], Hp, p4, Wp, p4).transpose(0, 2, 4, 1, 3, 5)
    patches = patches.reshape(B, Hp * Wp, cfg["in_chans"] * p4 * p4)
    t = _run_per_batch(_patch_embed_kernel, patches,
                       [params["pe_w"], params["pe_b"], params["pe_ng"], params["pe_nb"]],
                       (B, Hp * Wp, ed))

    H, W = Hp, Wp
    for s, stage in enumerate(params["stages"]):
        for d, blk in enumerate(stage["blocks"]):
            t = swin_block(t, blk, meta["stages"][s][d])      # one pallas_call per block
        if stage["merge"] is not None:
            t = patch_merge(t, H, W, stage["merge"])
            H, W = H // 2, W // 2

    # ---- decoder (single fused kernel, lane-dense output) ----
    Clast = meta["Clast"]
    tT = t.reshape(B, H * W, Clast).transpose(0, 2, 1)        # (B, Clast, H*W), channels-first
    Ho, Wo = 4 * H, 4 * W
    out = _run_per_batch(
        _decoder_kernel, tT,
        [params["final_ng"], params["final_nb"], params["conv_shifts"],
         params["c1_w"], params["c1_b"], params["up_T"], params["c2_wT"], params["c2_b"]],
        (B, 1, Ho * Wo))
    return out.reshape(B, 1, Ho, Wo)                          # NCHW (B, 1, 16, 16)


# --------------------------------------------------------------------------
if __name__ == "__main__":
    key = jax.random.PRNGKey(0)
    pkey, xkey = jax.random.split(key)
    params, meta = build_model(pkey)
    x = jax.random.normal(xkey, (2, 3, 32, 32), jnp.float32)

    fwd = jax.jit(functools.partial(forward, params, meta))
    out = jax.block_until_ready(fwd(x))

    assert out.shape == (2, 1, 16, 16), out.shape
    assert out.dtype == jnp.float32
    assert bool(jnp.all(jnp.isfinite(out)))
    assert bool(jnp.all((out >= 0.0) & (out <= 1.0)))   # sigmoid output
    print("KERNEL_OK")
</pallas_src>

<mosaic_0001>
module attributes {stable_mosaic.version = 11 : i64} {
  func.func @_patch_embed_kernel(%arg0: i32, %arg1: memref<1x64x48xf32, #tpu.memory_space<vmem>>, %arg2: memref<48x16xf32, #tpu.memory_space<vmem>>, %arg3: memref<1x16xf32, #tpu.memory_space<vmem>>, %arg4: memref<1x16xf32, #tpu.memory_space<vmem>>, %arg5: memref<1x16xf32, #tpu.memory_space<vmem>>, %arg6: memref<1x64x16xf32, #tpu.memory_space<vmem>>) attributes {dimension_semantics = [#tpu.dimension_semantics<parallel>], iteration_bounds = array<i64: 2>, scalar_prefetch = 0 : i64, scratch_operands = 0 : i64, tpu.core_type = #tpu.core_type<tc>, window_params = [{transform_indices = @transform_0, window_bounds = array<i64: 1, 64, 48>}, {pipeline_mode = #tpu.pipeline_mode<synchronous>, transform_indices = @transform_1, window_bounds = array<i64: 48, 16>}, {pipeline_mode = #tpu.pipeline_mode<synchronous>, transform_indices = @transform_2, window_bounds = array<i64: 1, 16>}, {pipeline_mode = #tpu.pipeline_mode<synchronous>, transform_indices = @transform_3, window_bounds = array<i64: 1, 16>}, {pipeline_mode = #tpu.pipeline_mode<synchronous>, transform_indices = @transform_4, window_bounds = array<i64: 1, 16>}, {transform_indices = @transform_5, window_bounds = array<i64: 1, 64, 16>}]} {
    %c0 = arith.constant 0 : index
    %c0_0 = arith.constant 0 : index
    %c0_1 = arith.constant 0 : index
    %0 = vector.load %arg1[%c0, %c0_0, %c0_1] : memref<1x64x48xf32, #tpu.memory_space<vmem>>, vector<1x64x48xf32>
    %1 = vector.shape_cast %0 : vector<1x64x48xf32> to vector<64x48xf32>
    %c0_2 = arith.constant 0 : index
    %c0_3 = arith.constant 0 : index
    %2 = vector.load %arg2[%c0_2, %c0_3] : memref<48x16xf32, #tpu.memory_space<vmem>>, vector<48x16xf32>
    %cst = arith.constant dense<0.000000e+00> : vector<64x16xf32>
    %3 = tpu.matmul %1, %2, %cst {dimension_numbers = #tpu.dot_dimension_numbers<[1], [0], [0], [1], [0, 0, 1, 1], [], []>} : vector<64x48xf32>, vector<48x16xf32>, vector<64x16xf32> -> vector<64x16xf32>
    %c0_4 = arith.constant 0 : index
    %c0_5 = arith.constant 0 : index
    %4 = vector.load %arg3[%c0_4, %c0_5] : memref<1x16xf32, #tpu.memory_space<vmem>>, vector<1x16xf32>
    %5 = vector.broadcast %4 : vector<1x16xf32> to vector<64x16xf32>
    %6 = arith.addf %3, %5 : vector<64x16xf32>
    %c0_6 = arith.constant 0 : index
    %c0_7 = arith.constant 0 : index
    %7 = vector.load %arg4[%c0_6, %c0_7] : memref<1x16xf32, #tpu.memory_space<vmem>>, vector<1x16xf32>
    %c0_8 = arith.constant 0 : index
    %c0_9 = arith.constant 0 : index
    %8 = vector.load %arg5[%c0_8, %c0_9] : memref<1x16xf32, #tpu.memory_space<vmem>>, vector<1x16xf32>
    %cst_10 = arith.constant dense<0.000000e+00> : vector<64xf32>
    %9 = vector.multi_reduction <add>, %6, %cst_10 [1] : vector<64x16xf32> to vector<64xf32>
    %10 = vector.shape_cast %9 : vector<64xf32> to vector<64x1xf32>
    %cst_11 = arith.constant 1.600000e+01 : f32
    %11 = vector.broadcast %cst_11 : f32 to vector<64x1xf32>
    %12 = arith.divf %10, %11 : vector<64x1xf32>
    %13 = vector.broadcast %12 : vector<64x1xf32> to vector<64x16xf32>
    %14 = arith.subf %6, %13 : vector<64x16xf32>
    %15 = arith.mulf %14, %14 : vector<64x16xf32>
    %cst_12 = arith.constant dense<0.000000e+00> : vector<64xf32>
    %16 = vector.multi_reduction <add>, %15, %cst_12 [1] : vector<64x16xf32> to vector<64xf32>
    %17 = vector.shape_cast %16 : vector<64xf32> to vector<64x1xf32>
    %cst_13 = arith.constant 1.600000e+01 : f32
    %18 = vector.broadcast %cst_13 : f32 to vector<64x1xf32>
    %19 = arith.divf %17, %18 : vector<64x1xf32>
    %20 = vector.broadcast %12 : vector<64x1xf32> to vector<64x16xf32>
    %21 = arith.subf %6, %20 : vector<64x16xf32>
    %cst_14 = arith.constant 9.99999974E-6 : f32
    %22 = vector.broadcast %cst_14 : f32 to vector<64x1xf32>
    %23 = arith.addf %19, %22 : vector<64x1xf32>
    %24 = math.rsqrt %23 : vector<64x1xf32>
    %25 = vector.broadcast %24 : vector<64x1xf32> to vector<64x16xf32>
    %26 = arith.mulf %21, %25 : vector<64x16xf32>
    %27 = vector.broadcast %7 : vector<1x16xf32> to vector<64x16xf32>
    %28 = arith.mulf %26, %27 : vector<64x16xf32>
    %29 = vector.broadcast %8 : vector<1x16xf32> to vector<64x16xf32>
    %30 = arith.addf %28, %29 : vector<64x16xf32>
    %c0_15 = arith.constant 0 : index
    %c0_16 = arith.constant 0 : index
    %c0_17 = arith.constant 0 : index
    %31 = vector.load %arg6[%c0_15, %c0_16, %c0_17] : memref<1x64x16xf32, #tpu.memory_space<vmem>>, vector<1x64x16xf32>
    %32 = vector.shape_cast %31 : vector<1x64x16xf32> to vector<64x16xf32>
    %33 = vector.shape_cast %30 : vector<64x16xf32> to vector<1x64x16xf32>
    tpu.vector_store %arg6[%c0_15, %c0_16, %c0_17], %33 {strides = array<i32>} : memref<1x64x16xf32, #tpu.memory_space<vmem>>, vector<1x64x16xf32>,
    return
  }
  func.func @transform_0(%arg0: i32) -> (i32, i32, i32) {
    %c0_i32 = arith.constant 0 : i32
    %c0_i32_0 = arith.constant 0 : i32
    %c0_i32_1 = arith.constant 0 : i32
    return %arg0, %c0_i32, %c0_i32_0 : i32, i32, i32
  }
  func.func @transform_1(%arg0: i32) -> (i32, i32) {
    %c0_i32 = arith.constant 0 : i32
    %c0_i32_0 = arith.constant 0 : i32
    %c0_i32_1 = arith.constant 0 : i32
    return %c0_i32, %c0_i32_0 : i32, i32
  }
  func.func @transform_2(%arg0: i32) -> (i32, i32) {
    %c0_i32 = arith.constant 0 : i32
    %c0_i32_0 = arith.constant 0 : i32
    %c0_i32_1 = arith.constant 0 : i32
    return %c0_i32, %c0_i32_0 : i32, i32
  }
  func.func @transform_3(%arg0: i32) -> (i32, i32) {
    %c0_i32 = arith.constant 0 : i32
    %c0_i32_0 = arith.constant 0 : i32
    %c0_i32_1 = arith.constant 0 : i32
    return %c0_i32, %c0_i32_0 : i32, i32
  }
  func.func @transform_4(%arg0: i32) -> (i32, i32) {
    %c0_i32 = arith.constant 0 : i32
    %c0_i32_0 = arith.constant 0 : i32
    %c0_i32_1 = arith.constant 0 : i32
    return %c0_i32, %c0_i32_0 : i32, i32
  }
  func.func @transform_5(%arg0: i32) -> (i32, i32, i32) {
    %c0_i32 = arith.constant 0 : i32
    %c0_i32_0 = arith.constant 0 : i32
    %c0_i32_1 = arith.constant 0 : i32
    return %arg0, %c0_i32, %c0_i32_0 : i32, i32, i32
  }
}

module attributes {stable_mosaic.version = 11 : i64} {
  func.func @_swin_block_kernel(%arg0: i32, %arg1: memref<1x64x16xf32, #tpu.memory_space<vmem>>, %arg2: memref<1x16xf32, #tpu.memory_space<vmem>>, %arg3: memref<1x16xf32, #tpu.memory_space<vmem>>, %arg4: memref<2x16x8xf32, #tpu.memory_space<vmem>>, %arg5: memref<2x16x8xf32, #tpu.memory_space<vmem>>, %arg6: memref<2x16x8xf32, #tpu.memory_space<vmem>>, %arg7: memref<2x1x8xf32, #tpu.memory_space<vmem>>, %arg8: memref<2x1x8xf32, #tpu.memory_space<vmem>>, %arg9: memref<2x1x8xf32, #tpu.memory_space<vmem>>, %arg10: memref<2x8x16xf32, #tpu.memory_space<vmem>>, %arg11: memref<1x16xf32, #tpu.memory_space<vmem>>, %arg12: memref<1x16xf32, #tpu.memory_space<vmem>>, %arg13: memref<1x16xf32, #tpu.memory_space<vmem>>, %arg14: memref<16x64xf32, #tpu.memory_space<vmem>>, %arg15: memref<1x64xf32, #tpu.memory_space<vmem>>, %arg16: memref<64x16xf32, #tpu.memory_space<vmem>>, %arg17: memref<1x16xf32, #tpu.memory_space<vmem>>, %arg18: memref<2x1x16x16xf32, #tpu.memory_space<vmem>>, %arg19: memref<1x64x16xf32, #tpu.memory_space<vmem>>) attributes {dimension_semantics = [#tpu.dimension_semantics<parallel>], iteration_bounds = array<i64: 2>, scalar_prefetch = 0 : i64, scratch_operands = 0 : i64, tpu.core_type = #tpu.core_type<tc>, window_params = [{transform_indices = @transform_0, window_bounds = array<i64: 1, 64, 16>}, {pipeline_mode = #tpu.pipeline_mode<synchronous>, transform_indices = @transform_1, window_bounds = array<i64: 1, 16>}, {pipeline_mode = #tpu.pipeline_mode<synchronous>, transform_indices = @transform_2, window_bounds = array<i64: 1, 16>}, {pipeline_mode = #tpu.pipeline_mode<synchronous>, transform_indices = @transform_3, window_bounds = array<i64: 2, 16, 8>}, {pipeline_mode = #tpu.pipeline_mode<synchronous>, transform_indices = @transform_4, window_bounds = array<i64: 2, 16, 8>}, {pipeline_mode = #tpu.pipeline_mode<synchronous>, transform_indices = @transform_5, window_bounds = array<i64: 2, 16, 8>}, {pipeline_mode = #tpu.pipeline_mode<synchronous>, transform_indices = @transform_6, window_bounds = array<i64: 2, 1, 8>}, {pipeline_mode = #tpu.pipeline_mode<synchronous>, transform_indices = @transform_7, window_bounds = array<i64: 2, 1, 8>}, {pipeline_mode = #tpu.pipeline_mode<synchronous>, transform_indices = @transform_8, window_bounds = array<i64: 2, 1, 8>}, {pipeline_mode = #tpu.pipeline_mode<synchronous>, transform_indices = @transform_9, window_bounds = array<i64: 2, 8, 16>}, {pipeline_mode = #tpu.pipeline_mode<synchronous>, transform_indices = @transform_10, window_bounds = array<i64: 1, 16>}, {pipeline_mode = #tpu.pipeline_mode<synchronous>, transform_indices = @transform_11, window_bounds = array<i64: 1, 16>}, {pipeline_mode = #tpu.pipeline_mode<synchronous>, transform_indices = @transform_12, window_bounds = array<i64: 1, 16>}, {pipeline_mode = #tpu.pipeline_mode<synchronous>, transform_indices = @transform_13, window_bounds = array<i64: 16, 64>}, {pipeline_mode = #tpu.pipeline_mode<synchronous>, transform_indices = @transform_14, window_bounds = array<i64: 1, 64>}, {pipeline_mode = #tpu.pipeline_mode<synchronous>, transform_indices = @transform_15, window_bounds = array<i64: 64, 16>}, {pipeline_mode = #tpu.pipeline_mode<synchronous>, transform_indices = @transform_16, window_bounds = array<i64: 1, 16>}, {pipeline_mode = #tpu.pipeline_mode<synchronous>, transform_indices = @transform_17, window_bounds = array<i64: 2, 1, 16, 16>}, {transform_indices = @transform_18, window_bounds = array<i64: 1, 64, 16>}]} {
    %c0 = arith.constant 0 : index
    %c0_0 = arith.constant 0 : index
    %c0_1 = arith.constant 0 : index
    %0 = vector.load %arg1[%c0, %c0_0, %c0_1] : memref<1x64x16xf32, #tpu.memory_space<vmem>>, vector<1x64x16xf32>
    %1 = vector.shape_cast %0 : vector<1x64x16xf32> to vector<64x16xf32>
    %c0_2 = arith.constant 0 : index
    %c0_3 = arith.constant 0 : index
    %2 = vector.load %arg2[%c0_2, %c0_3] : memref<1x16xf32, #tpu.memory_space<vmem>>, vector<1x16xf32>
    %c0_4 = arith.constant 0 : index
    %c0_5 = arith.constant 0 : index
    %3 = vector.load %arg3[%c0_4, %c0_5] : memref<1x16xf32, #tpu.memory_space<vmem>>, vector<1x16xf32>
    %cst = arith.constant dense<0.000000e+00> : vector<64xf32>
    %4 = vector.multi_reduction <add>, %1, %cst [1] : vector<64x16xf32> to vector<64xf32>
    %5 = vector.shape_cast %4 : vector<64xf32> to vector<64x1xf32>
    %cst_6 = arith.constant 1.600000e+01 : f32
    %6 = vector.broadcast %cst_6 : f32 to vector<64x1xf32>
    %7 = arith.divf %5, %6 : vector<64x1xf32>
    %8 = vector.broadcast %7 : vector<64x1xf32> to vector<64x16xf32>
    %9 = arith.subf %1, %8 : vector<64x16xf32>
    %10 = arith.mulf %9, %9 : vector<64x16xf32>
    %cst_7 = arith.constant dense<0.000000e+00> : vector<64xf32>
    %11 = vector.multi_reduction <add>, %10, %cst_7 [1] : vector<64x16xf32> to vector<64xf32>
    %12 = vector.shape_cast %11 : vector<64xf32> to vector<64x1xf32>
    %cst_8 = arith.constant 1.600000e+01 : f32
    %13 = vector.broadcast %cst_8 : f32 to vector<64x1xf32>
    %14 = arith.divf %12, %13 : vector<64x1xf32>
    %15 = vector.broadcast %7 : vector<64x1xf32> to vector<64x16xf32>
    %16 = arith.subf %1, %15 : vector<64x16xf32>
    %cst_9 = arith.constant 9.99999974E-6 : f32
    %17 = vector.broadcast %cst_9 : f32 to vector<64x1xf32>
    %18 = arith.addf %14, %17 : vector<64x1xf32>
    %19 = math.rsqrt %18 : vector<64x1xf32>
    %20 = vector.broadcast %19 : vector<64x1xf32> to vector<64x16xf32>
    %21 = arith.mulf %16, %20 : vector<64x16xf32>
    %22 = vector.broadcast %2 : vector<1x16xf32> to vector<64x16xf32>
    %23 = arith.mulf %21, %22 : vector<64x16xf32>
    %24 = vector.broadcast %3 : vector<1x16xf32> to vector<64x16xf32>
    %25 = arith.addf %23, %24 : vector<64x16xf32>
    %cst_10 = arith.constant 0.000000e+00 : f32
    %26 = vector.broadcast %cst_10 : f32 to vector<64x16xf32>
    %c0_11 = arith.constant 0 : index
    %c0_12 = arith.constant 0 : index
    %c0_13 = arith.constant 0 : index
    %27 = vector.load %arg4[%c0_11, %c0_12, %c0_13] : memref<2x16x8xf32, #tpu.memory_space<vmem>>, vector<1x16x8xf32>
    %28 = vector.shape_cast %27 : vector<1x16x8xf32> to vector<16x8xf32>
    %cst_14 = arith.constant dense<0.000000e+00> : vector<64x8xf32>
    %29 = tpu.matmul %25, %28, %cst_14 {dimension_numbers = #tpu.dot_dimension_numbers<[1], [0], [0], [1], [0, 0, 1, 1], [], []>} : vector<64x16xf32>, vector<16x8xf32>, vector<64x8xf32> -> vector<64x8xf32>
    %c0_15 = arith.constant 0 : index
    %c0_16 = arith.constant 0 : index
    %c0_17 = arith.constant 0 : index
    %30 = vector.load %arg7[%c0_15, %c0_16, %c0_17] : memref<2x1x8xf32, #tpu.memory_space<vmem>>, vector<1x1x8xf32>
    %31 = vector.shape_cast %30 : vector<1x1x8xf32> to vector<1x8xf32>
    %32 = vector.broadcast %31 : vector<1x8xf32> to vector<64x8xf32>
    %33 = arith.addf %29, %32 : vector<64x8xf32>
    %cst_18 = arith.constant 0.353553385 : f32
    %34 = vector.broadcast %cst_18 : f32 to vector<64x8xf32>
    %35 = arith.mulf %33, %34 : vector<64x8xf32>
    %c0_19 = arith.constant 0 : index
    %c0_20 = arith.constant 0 : index
    %c0_21 = arith.constant 0 : index
    %36 = vector.load %arg5[%c0_19, %c0_20, %c0_21] : memref<2x16x8xf32, #tpu.memory_space<vmem>>, vector<1x16x8xf32>
    %37 = vector.shape_cast %36 : vector<1x16x8xf32> to vector<16x8xf32>
    %cst_22 = arith.constant dense<0.000000e+00> : vector<64x8xf32>
    %38 = tpu.matmul %25, %37, %cst_22 {dimension_numbers = #tpu.dot_dimension_numbers<[1], [0], [0], [1], [0, 0, 1, 1], [], []>} : vector<64x16xf32>, vector<16x8xf32>, vector<64x8xf32> -> vector<64x8xf32>
    %c0_23 = arith.constant 0 : index
    %c0_24 = arith.constant 0 : index
    %c0_25 = arith.constant 0 : index
    %39 = vector.load %arg8[%c0_23, %c0_24, %c0_25] : memref<2x1x8xf32, #tpu.memory_space<vmem>>, vector<1x1x8xf32>
    %40 = vector.shape_cast %39 : vector<1x1x8xf32> to vector<1x8xf32>
    %41 = vector.broadcast %40 : vector<1x8xf32> to vector<64x8xf32>
    %42 = arith.addf %38, %41 : vector<64x8xf32>
    %c0_26 = arith.constant 0 : index
    %c0_27 = arith.constant 0 : index
    %c0_28 = arith.constant 0 : index
    %43 = vector.load %arg6[%c0_26, %c0_27, %c0_28] : memref<2x16x8xf32, #tpu.memory_space<vmem>>, vector<1x16x8xf32>
    %44 = vector.shape_cast %43 : vector<1x16x8xf32> to vector<16x8xf32>
    %cst_29 = arith.constant dense<0.000000e+00> : vector<64x8xf32>
    %45 = tpu.matmul %25, %44, %cst_29 {dimension_numbers = #tpu.dot_dimension_numbers<[1], [0], [0], [1], [0, 0, 1, 1], [], []>} : vector<64x16xf32>, vector<16x8xf32>, vector<64x8xf32> -> vector<64x8xf32>
    %c0_30 = arith.constant 0 : index
    %c0_31 = arith.constant 0 : index
    %c0_32 = arith.constant 0 : index
    %46 = vector.load %arg9[%c0_30, %c0_31, %c0_32] : memref<2x1x8xf32, #tpu.memory_space<vmem>>, vector<1x1x8xf32>
    %47 = vector.shape_cast %46 : vector<1x1x8xf32> to vector<1x8xf32>
    %48 = vector.broadcast %47 : vector<1x8xf32> to vector<64x8xf32>
    %49 = arith.addf %45, %48 : vector<64x8xf32>
    %50 = vector.shape_cast %35 : vector<64x8xf32> to vector<4x16x8xf32>
    %51 = vector.shape_cast %42 : vector<64x8xf32> to vector<4x16x8xf32>
    %52 = vector.shape_cast %49 : vector<64x8xf32> to vector<4x16x8xf32>
    %cst_33 = arith.constant dense<0.000000e+00> : vector<4x16x16xf32>
    %53 = tpu.matmul %50, %51, %cst_33 {dimension_numbers = #tpu.dot_dimension_numbers<[2], [2], [1], [1], [0, 0, 0, 1, 1, 1], [0], [0]>} : vector<4x16x8xf32>, vector<4x16x8xf32>, vector<4x16x16xf32> -> vector<4x16x16xf32>
    %c0_34 = arith.constant 0 : index
    %c0_35 = arith.constant 0 : index
    %c0_36 = arith.constant 0 : index
    %c0_37 = arith.constant 0 : index
    %54 = vector.load %arg18[%c0_34, %c0_35, %c0_36, %c0_37] : memref<2x1x16x16xf32, #tpu.memory_space<vmem>>, vector<1x1x16x16xf32>
    %55 = vector.shape_cast %54 : vector<1x1x16x16xf32> to vector<1x16x16xf32>
    %56 = vector.broadcast %55 : vector<1x16x16xf32> to vector<4x16x16xf32>
    %57 = arith.addf %53, %56 : vector<4x16x16xf32>
    %cst_38 = arith.constant dense<0xFF800000> : vector<4x16xf32>
    %58 = vector.multi_reduction <maximumf>, %57, %cst_38 [2] : vector<4x16x16xf32> to vector<4x16xf32>
    %59 = vector.shape_cast %58 : vector<4x16xf32> to vector<4x16x1xf32>
    %60 = vector.broadcast %59 : vector<4x16x1xf32> to vector<4x16x16xf32>
    %61 = arith.subf %57, %60 : vector<4x16x16xf32>
    %62 = math.exp %61 : vector<4x16x16xf32>
    %cst_39 = arith.constant dense<0.000000e+00> : vector<4x16xf32>
    %63 = vector.multi_reduction <add>, %62, %cst_39 [2] : vector<4x16x16xf32> to vector<4x16xf32>
    %64 = vector.shape_cast %63 : vector<4x16xf32> to vector<4x16x1xf32>
    %65 = vector.broadcast %64 : vector<4x16x1xf32> to vector<4x16x16xf32>
    %66 = arith.divf %62, %65 : vector<4x16x16xf32>
    %cst_40 = arith.constant dense<0.000000e+00> : vector<4x16x8xf32>
    %67 = tpu.matmul %66, %52, %cst_40 {dimension_numbers = #tpu.dot_dimension_numbers<[2], [1], [1], [2], [0, 0, 0, 1, 1, 2], [0], [0]>} : vector<4x16x16xf32>, vector<4x16x8xf32>, vector<4x16x8xf32> -> vector<4x16x8xf32>
    %68 = vector.shape_cast %67 : vector<4x16x8xf32> to vector<64x8xf32>
    %c0_41 = arith.constant 0 : index
    %c0_42 = arith.constant 0 : index
    %c0_43 = arith.constant 0 : index
    %69 = vector.load %arg10[%c0_41, %c0_42, %c0_43] : memref<2x8x16xf32, #tpu.memory_space<vmem>>, vector<1x8x16xf32>
    %70 = vector.shape_cast %69 : vector<1x8x16xf32> to vector<8x16xf32>
    %cst_44 = arith.constant dense<0.000000e+00> : vector<64x16xf32>
    %71 = tpu.matmul %68, %70, %cst_44 {dimension_numbers = #tpu.dot_dimension_numbers<[1], [0], [0], [1], [0, 0, 1, 1], [], []>} : vector<64x8xf32>, vector<8x16xf32>, vector<64x16xf32> -> vector<64x16xf32>
    %72 = arith.addf %26, %71 : vector<64x16xf32>
    %c1 = arith.constant 1 : index
    %c0_45 = arith.constant 0 : index
    %c0_46 = arith.constant 0 : index
    %73 = vector.load %arg4[%c1, %c0_45, %c0_46] : memref<2x16x8xf32, #tpu.memory_space<vmem>>, vector<1x16x8xf32>
    %74 = vector.shape_cast %73 : vector<1x16x8xf32> to vector<16x8xf32>
    %cst_47 = arith.constant dense<0.000000e+00> : vector<64x8xf32>
    %75 = tpu.matmul %25, %74, %cst_47 {dimension_numbers = #tpu.dot_dimension_numbers<[1], [0], [0], [1], [0, 0, 1, 1], [], []>} : vector<64x16xf32>, vector<16x8xf32>, vector<64x8xf32> -> vector<64x8xf32>
    %c1_48 = arith.constant 1 : index
    %c0_49 = arith.constant 0 : index
    %c0_50 = arith.constant 0 : index
    %76 = vector.load %arg7[%c1_48, %c0_49, %c0_50] : memref<2x1x8xf32, #tpu.memory_space<vmem>>, vector<1x1x8xf32>
    %77 = vector.shape_cast %76 : vector<1x1x8xf32> to vector<1x8xf32>
    %78 = vector.broadcast %77 : vector<1x8xf32> to vector<64x8xf32>
    %79 = arith.addf %75, %78 : vector<64x8xf32>
    %cst_51 = arith.constant 0.353553385 : f32
    %80 = vector.broadcast %cst_51 : f32 to vector<64x8xf32>
    %81 = arith.mulf %79, %80 : vector<64x8xf32>
    %c1_52 = arith.constant 1 : index
    %c0_53 = arith.constant 0 : index
    %c0_54 = arith.constant 0 : index
    %82 = vector.load %arg5[%c1_52, %c0_53, %c0_54] : memref<2x16x8xf32, #tpu.memory_space<vmem>>, vector<1x16x8xf32>
    %83 = vector.shape_cast %82 : vector<1x16x8xf32> to vector<16x8xf32>
    %cst_55 = arith.constant dense<0.000000e+00> : vector<64x8xf32>
    %84 = tpu.matmul %25, %83, %cst_55 {dimension_numbers = #tpu.dot_dimension_numbers<[1], [0], [0], [1], [0, 0, 1, 1], [], []>} : vector<64x16xf32>, vector<16x8xf32>, vector<64x8xf32> -> vector<64x8xf32>
    %c1_56 = arith.constant 1 : index
    %c0_57 = arith.constant 0 : index
    %c0_58 = arith.constant 0 : index
    %85 = vector.load %arg8[%c1_56, %c0_57, %c0_58] : memref<2x1x8xf32, #tpu.memory_space<vmem>>, vector<1x1x8xf32>
    %86 = vector.shape_cast %85 : vector<1x1x8xf32> to vector<1x8xf32>
    %87 = vector.broadcast %86 : vector<1x8xf32> to vector<64x8xf32>
    %88 = arith.addf %84, %87 : vector<64x8xf32>
    %c1_59 = arith.constant 1 : index
    %c0_60 = arith.constant 0 : index
    %c0_61 = arith.constant 0 : index
    %89 = vector.load %arg6[%c1_59, %c0_60, %c0_61] : memref<2x16x8xf32, #tpu.memory_space<vmem>>, vector<1x16x8xf32>
    %90 = vector.shape_cast %89 : vector<1x16x8xf32> to vector<16x8xf32>
    %cst_62 = arith.constant dense<0.000000e+00> : vector<64x8xf32>
    %91 = tpu.matmul %25, %90, %cst_62 {dimension_numbers = #tpu.dot_dimension_numbers<[1], [0], [0], [1], [0, 0, 1, 1], [], []>} : vector<64x16xf32>, vector<16x8xf32>, vector<64x8xf32> -> vector<64x8xf32>
    %c1_63 = arith.constant 1 : index
    %c0_64 = arith.constant 0 : index
    %c0_65 = arith.constant 0 : index
    %92 = vector.load %arg9[%c1_63, %c0_64, %c0_65] : memref<2x1x8xf32, #tpu.memory_space<vmem>>, vector<1x1x8xf32>
    %93 = vector.shape_cast %92 : vector<1x1x8xf32> to vector<1x8xf32>
    %94 = vector.broadcast %93 : vector<1x8xf32> to vector<64x8xf32>
    %95 = arith.addf %91, %94 : vector<64x8xf32>
    %96 = vector.shape_cast %81 : vector<64x8xf32> to vector<4x16x8xf32>
    %97 = vector.shape_cast %88 : vector<64x8xf32> to vector<4x16x8xf32>
    %98 = vector.shape_cast %95 : vector<64x8xf32> to vector<4x16x8xf32>
    %cst_66 = arith.constant dense<0.000000e+00> : vector<4x16x16xf32>
    %99 = tpu.matmul %96, %97, %cst_66 {dimension_numbers = #tpu.dot_dimension_numbers<[2], [2], [1], [1], [0, 0, 0, 1, 1, 1], [0], [0]>} : vector<4x16x8xf32>, vector<4x16x8xf32>, vector<4x16x16xf32> -> vector<4x16x16xf32>
    %c1_67 = arith.constant 1 : index
    %c0_68 = arith.constant 0 : index
    %c0_69 = arith.constant 0 : index
    %c0_70 = arith.constant 0 : index
    %100 = vector.load %arg18[%c1_67, %c0_68, %c0_69, %c0_70] : memref<2x1x16x16xf32, #tpu.memory_space<vmem>>, vector<1x1x16x16xf32>
    %101 = vector.shape_cast %100 : vector<1x1x16x16xf32> to vector<1x16x16xf32>
    %102 = vector.broadcast %101 : vector<1x16x16xf32> to vector<4x16x16xf32>
    %103 = arith.addf %99, %102 : vector<4x16x16xf32>
    %cst_71 = arith.constant dense<0xFF800000> : vector<4x16xf32>
    %104 = vector.multi_reduction <maximumf>, %103, %cst_71 [2] : vector<4x16x16xf32> to vector<4x16xf32>
    %105 = vector.shape_cast %104 : vector<4x16xf32> to vector<4x16x1xf32>
    %106 = vector.broadcast %105 : vector<4x16x1xf32> to vector<4x16x16xf32>
    %107 = arith.subf %103, %106 : vector<4x16x16xf32>
    %108 = math.exp %107 : vector<4x16x16xf32>
    %cst_72 = arith.constant dense<0.000000e+00> : vector<4x16xf32>
    %109 = vector.multi_reduction <add>, %108, %cst_72 [2] : vector<4x16x16xf32> to vector<4x16xf32>
    %110 = vector.shape_cast %109 : vector<4x16xf32> to vector<4x16x1xf32>
    %111 = vector.broadcast %110 : vector<4x16x1xf32> to vector<4x16x16xf32>
    %112 = arith.divf %108, %111 : vector<4x16x16xf32>
    %cst_73 = arith.constant dense<0.000000e+00> : vector<4x16x8xf32>
    %113 = tpu.matmul %112, %98, %cst_73 {dimension_numbers = #tpu.dot_dimension_numbers<[2], [1], [1], [2], [0, 0, 0, 1, 1, 2], [0], [0]>} : vector<4x16x16xf32>, vector<4x16x8xf32>, vector<4x16x8xf32> -> vector<4x16x8xf32>
    %114 = vector.shape_cast %113 : vector<4x16x8xf32> to vector<64x8xf32>
    %c1_74 = arith.constant 1 : index
    %c0_75 = arith.constant 0 : index
    %c0_76 = arith.constant 0 : index
    %115 = vector.load %arg10[%c1_74, %c0_75, %c0_76] : memref<2x8x16xf32, #tpu.memory_space<vmem>>, vector<1x8x16xf32>
    %116 = vector.shape_cast %115 : vector<1x8x16xf32> to vector<8x16xf32>
    %cst_77 = arith.constant dense<0.000000e+00> : vector<64x16xf32>
    %117 = tpu.matmul %114, %116, %cst_77 {dimension_numbers = #tpu.dot_dimension_numbers<[1], [0], [0], [1], [0, 0, 1, 1], [], []>} : vector<64x8xf32>, vector<8x16xf32>, vector<64x16xf32> -> vector<64x16xf32>
    %118 = arith.addf %72, %117 : vector<64x16xf32>
    %119 = arith.addf %1, %118 : vector<64x16xf32>
    %c0_78 = arith.constant 0 : index
    %c0_79 = arith.constant 0 : index
    %120 = vector.load %arg11[%c0_78, %c0_79] : memref<1x16xf32, #tpu.memory_space<vmem>>, vector<1x16xf32>
    %121 = vector.broadcast %120 : vector<1x16xf32> to vector<64x16xf32>
    %122 = arith.addf %119, %121 : vector<64x16xf32>
    %c0_80 = arith.constant 0 : index
    %c0_81 = arith.constant 0 : index
    %123 = vector.load %arg12[%c0_80, %c0_81] : memref<1x16xf32, #tpu.memory_space<vmem>>, vector<1x16xf32>
    %c0_82 = arith.constant 0 : index
    %c0_83 = arith.constant 0 : index
    %124 = vector.load %arg13[%c0_82, %c0_83] : memref<1x16xf32, #tpu.memory_space<vmem>>, vector<1x16xf32>
    %cst_84 = arith.constant dense<0.000000e+00> : vector<64xf32>
    %125 = vector.multi_reduction <add>, %122, %cst_84 [1] : vector<64x16xf32> to vector<64xf32>
    %126 = vector.shape_cast %125 : vector<64xf32> to vector<64x1xf32>
    %cst_85 = arith.constant 1.600000e+01 : f32
    %127 = vector.broadcast %cst_85 : f32 to vector<64x1xf32>
    %128 = arith.divf %126, %127 : vector<64x1xf32>
    %129 = vector.broadcast %128 : vector<64x1xf32> to vector<64x16xf32>
    %130 = arith.subf %122, %129 : vector<64x16xf32>
    %131 = arith.mulf %130, %130 : vector<64x16xf32>
    %cst_86 = arith.constant dense<0.000000e+00> : vector<64xf32>
    %132 = vector.multi_reduction <add>, %131, %cst_86 [1] : vector<64x16xf32> to vector<64xf32>
    %133 = vector.shape_cast %132 : vector<64xf32> to vector<64x1xf32>
    %cst_87 = arith.constant 1.600000e+01 : f32
    %134 = vector.broadcast %cst_87 : f32 to vector<64x1xf32>
    %135 = arith.divf %133, %134 : vector<64x1xf32>
    %136 = vector.broadcast %128 : vector<64x1xf32> to vector<64x16xf32>
    %137 = arith.subf %122, %136 : vector<64x16xf32>
    %cst_88 = arith.constant 9.99999974E-6 : f32
    %138 = vector.broadcast %cst_88 : f32 to vector<64x1xf32>
    %139 = arith.addf %135, %138 : vector<64x1xf32>
    %140 = math.rsqrt %139 : vector<64x1xf32>
    %141 = vector.broadcast %140 : vector<64x1xf32> to vector<64x16xf32>
    %142 = arith.mulf %137, %141 : vector<64x16xf32>
    %143 = vector.broadcast %123 : vector<1x16xf32> to vector<64x16xf32>
    %144 = arith.mulf %142, %143 : vector<64x16xf32>
    %145 = vector.broadcast %124 : vector<1x16xf32> to vector<64x16xf32>
    %146 = arith.addf %144, %145 : vector<64x16xf32>
    %c0_89 = arith.constant 0 : index
    %c0_90 = arith.constant 0 : index
    %147 = vector.load %arg14[%c0_89, %c0_90] : memref<16x64xf32, #tpu.memory_space<vmem>>, vector<16x64xf32>
    %cst_91 = arith.constant dense<0.000000e+00> : vector<64x64xf32>
    %148 = tpu.matmul %146, %147, %cst_91 {dimension_numbers = #tpu.dot_dimension_numbers<[1], [0], [0], [1], [0, 0, 1, 1], [], []>} : vector<64x16xf32>, vector<16x64xf32>, vector<64x64xf32> -> vector<64x64xf32>
    %c0_92 = arith.constant 0 : index
    %c0_93 = arith.constant 0 : index
    %149 = vector.load %arg15[%c0_92, %c0_93] : memref<1x64xf32, #tpu.memory_space<vmem>>, vector<1x64xf32>
    %150 = vector.broadcast %149 : vector<1x64xf32> to vector<64x64xf32>
    %151 = arith.addf %148, %150 : vector<64x64xf32>
    %cst_94 = arith.constant 5.000000e-01 : f32
    %152 = vector.broadcast %cst_94 : f32 to vector<64x64xf32>
    %153 = arith.mulf %152, %151 : vector<64x64xf32>
    %cst_95 = arith.constant 4.471500e-02 : f32
    %154 = vector.broadcast %cst_95 : f32 to vector<64x64xf32>
    %155 = arith.mulf %154, %151 : vector<64x64xf32>
    %156 = arith.mulf %155, %151 : vector<64x64xf32>
    %157 = arith.mulf %156, %151 : vector<64x64xf32>
    %158 = arith.addf %151, %157 : vector<64x64xf32>
    %cst_96 = arith.constant 0.797884583 : f32
    %159 = vector.broadcast %cst_96 : f32 to vector<64x64xf32>
    %160 = arith.mulf %159, %158 : vector<64x64xf32>
    %161 = math.tanh %160 : vector<64x64xf32>
    %cst_97 = arith.constant 1.000000e+00 : f32
    %162 = vector.broadcast %cst_97 : f32 to vector<64x64xf32>
    %163 = arith.addf %162, %161 : vector<64x64xf32>
    %164 = arith.mulf %153, %163 : vector<64x64xf32>
    %c0_98 = arith.constant 0 : index
    %c0_99 = arith.constant 0 : index
    %165 = vector.load %arg16[%c0_98, %c0_99] : memref<64x16xf32, #tpu.memory_space<vmem>>, vector<64x16xf32>
    %cst_100 = arith.constant dense<0.000000e+00> : vector<64x16xf32>
    %166 = tpu.matmul %164, %165, %cst_100 {dimension_numbers = #tpu.dot_dimension_numbers<[1], [0], [0], [1], [0, 0, 1, 1], [], []>} : vector<64x64xf32>, vector<64x16xf32>, vector<64x16xf32> -> vector<64x16xf32>
    %c0_101 = arith.constant 0 : index
    %c0_102 = arith.constant 0 : index
    %167 = vector.load %arg17[%c0_101, %c0_102] : memref<1x16xf32, #tpu.memory_space<vmem>>, vector<1x16xf32>
    %168 = vector.broadcast %167 : vector<1x16xf32> to vector<64x16xf32>
    %169 = arith.addf %166, %168 : vector<64x16xf32>
    %170 = arith.addf %122, %169 : vector<64x16xf32>
    %c0_103 = arith.constant 0 : index
    %c0_104 = arith.constant 0 : index
    %c0_105 = arith.constant 0 : index
    %171 = vector.load %arg19[%c0_103, %c0_104, %c0_105] : memref<1x64x16xf32, #tpu.memory_space<vmem>>, vector<1x64x16xf32>
    %172 = vector.shape_cast %171 : vector<1x64x16xf32> to vector<64x16xf32>
    %173 = vector.shape_cast %170 : vector<64x16xf32> to vector<1x64x16xf32>
    tpu.vector_store %arg19[%c0_103, %c0_104, %c0_105], %173 {strides = array<i32>} : memref<1x64x16xf32, #tpu.memory_space<vmem>>, vector<1x64x16xf32>,
    return
  }
  func.func @transform_0(%arg0: i32) -> (i32, i32, i32) {
    %c0_i32 = arith.constant 0 : i32
    %c0_i32_0 = arith.constant 0 : i32
    %c0_i32_1 = arith.constant 0 : i32
    return %arg0, %c0_i32, %c0_i32_0 : i32, i32, i32
  }
  func.func @transform_1(%arg0: i32) -> (i32, i32) {
    %c0_i32 = arith.constant 0 : i32
    %c0_i32_0 = arith.constant 0 : i32
    %c0_i32_1 = arith.constant 0 : i32
    return %c0_i32, %c0_i32_0 : i32, i32
  }
  func.func @transform_2(%arg0: i32) -> (i32, i32) {
    %c0_i32 = arith.constant 0 : i32
    %c0_i32_0 = arith.constant 0 : i32
    %c0_i32_1 = arith.constant 0 : i32
    return %c0_i32, %c0_i32_0 : i32, i32
  }
  func.func @transform_3(%arg0: i32) -> (i32, i32, i32) {
    %c0_i32 = arith.constant 0 : i32
    %c0_i32_0 = arith.constant 0 : i32
    %c0_i32_1 = arith.constant 0 : i32
    %c0_i32_2 = arith.constant 0 : i32
    return %c0_i32, %c0_i32_0, %c0_i32_1 : i32, i32, i32
  }
  func.func @transform_4(%arg0: i32) -> (i32, i32, i32) {
    %c0_i32 = arith.constant 0 : i32
    %c0_i32_0 = arith.constant 0 : i32
    %c0_i32_1 = arith.constant 0 : i32
    %c0_i32_2 = arith.constant 0 : i32
    return %c0_i32, %c0_i32_0, %c0_i32_1 : i32, i32, i32
  }
  func.func @transform_5(%arg0: i32) -> (i32, i32, i32) {
    %c0_i32 = arith.constant 0 : i32
    %c0_i32_0 = arith.constant 0 : i32
    %c0_i32_1 = arith.constant 0 : i32
    %c0_i32_2 = arith.constant 0 : i32
    return %c0_i32, %c0_i32_0, %c0_i32_1 : i32, i32, i32
  }
  func.func @transform_6(%arg0: i32) -> (i32, i32, i32) {
    %c0_i32 = arith.constant 0 : i32
    %c0_i32_0 = arith.constant 0 : i32
    %c0_i32_1 = arith.constant 0 : i32
    %c0_i32_2 = arith.constant 0 : i32
    return %c0_i32, %c0_i32_0, %c0_i32_1 : i32, i32, i32
  }
  func.func @transform_7(%arg0: i32) -> (i32, i32, i32) {
    %c0_i32 = arith.constant 0 : i32
    %c0_i32_0 = arith.constant 0 : i32
    %c0_i32_1 = arith.constant 0 : i32
    %c0_i32_2 = arith.constant 0 : i32
    return %c0_i32, %c0_i32_0, %c0_i32_1 : i32, i32, i32
  }
  func.func @transform_8(%arg0: i32) -> (i32, i32, i32) {
    %c0_i32 = arith.constant 0 : i32
    %c0_i32_0 = arith.constant 0 : i32
    %c0_i32_1 = arith.constant 0 : i32
    %c0_i32_2 = arith.constant 0 : i32
    return %c0_i32, %c0_i32_0, %c0_i32_1 : i32, i32, i32
  }
  func.func @transform_9(%arg0: i32) -> (i32, i32, i32) {
    %c0_i32 = arith.constant 0 : i32
    %c0_i32_0 = arith.constant 0 : i32
    %c0_i32_1 = arith.constant 0 : i32
    %c0_i32_2 = arith.constant 0 : i32
    return %c0_i32, %c0_i32_0, %c0_i32_1 : i32, i32, i32
  }
  func.func @transform_10(%arg0: i32) -> (i32, i32) {
    %c0_i32 = arith.constant 0 : i32
    %c0_i32_0 = arith.constant 0 : i32
    %c0_i32_1 = arith.constant 0 : i32
    return %c0_i32, %c0_i32_0 : i32, i32
  }
  func.func @transform_11(%arg0: i32) -> (i32, i32) {
    %c0_i32 = arith.constant 0 : i32
    %c0_i32_0 = arith.constant 0 : i32
    %c0_i32_1 = arith.constant 0 : i32
    return %c0_i32, %c0_i32_0 : i32, i32
  }
  func.func @transform_12(%arg0: i32) -> (i32, i32) {
    %c0_i32 = arith.constant 0 : i32
    %c0_i32_0 = arith.constant 0 : i32
    %c0_i32_1 = arith.constant 0 : i32
    return %c0_i32, %c0_i32_0 : i32, i32
  }
  func.func @transform_13(%arg0: i32) -> (i32, i32) {
    %c0_i32 = arith.constant 0 : i32
    %c0_i32_0 = arith.constant 0 : i32
    %c0_i32_1 = arith.constant 0 : i32
    return %c0_i32, %c0_i32_0 : i32, i32
  }
  func.func @transform_14(%arg0: i32) -> (i32, i32) {
    %c0_i32 = arith.constant 0 : i32
    %c0_i32_0 = arith.constant 0 : i32
    %c0_i32_1 = arith.constant 0 : i32
    return %c0_i32, %c0_i32_0 : i32, i32
  }
  func.func @transform_15(%arg0: i32) -> (i32, i32) {
    %c0_i32 = arith.constant 0 : i32
    %c0_i32_0 = arith.constant 0 : i32
    %c0_i32_1 = arith.constant 0 : i32
    return %c0_i32, %c0_i32_0 : i32, i32
  }
  func.func @transform_16(%arg0: i32) -> (i32, i32) {
    %c0_i32 = arith.constant 0 : i32
    %c0_i32_0 = arith.constant 0 : i32
    %c0_i32_1 = arith.constant 0 : i32
    return %c0_i32, %c0_i32_0 : i32, i32
  }
  func.func @transform_17(%arg0: i32) -> (i32, i32, i32, i32) {
    %c0_i32 = arith.constant 0 : i32
    %c0_i32_0 = arith.constant 0 : i32
    %c0_i32_1 = arith.constant 0 : i32
    %c0_i32_2 = arith.constant 0 : i32
    %c0_i32_3 = arith.constant 0 : i32
    return %c0_i32, %c0_i32_0, %c0_i32_1, %c0_i32_2 : i32, i32, i32, i32
  }
  func.func @transform_18(%arg0: i32) -> (i32, i32, i32) {
    %c0_i32 = arith.constant 0 : i32
    %c0_i32_0 = arith.constant 0 : i32
    %c0_i32_1 = arith.constant 0 : i32
    return %arg0, %c0_i32, %c0_i32_0 : i32, i32, i32
  }
}

module attributes {stable_mosaic.version = 11 : i64} {
  func.func @_swin_block_kernel(%arg0: i32, %arg1: memref<1x64x16xf32, #tpu.memory_space<vmem>>, %arg2: memref<1x16xf32, #tpu.memory_space<vmem>>, %arg3: memref<1x16xf32, #tpu.memory_space<vmem>>, %arg4: memref<2x16x8xf32, #tpu.memory_space<vmem>>, %arg5: memref<2x16x8xf32, #tpu.memory_space<vmem>>, %arg6: memref<2x16x8xf32, #tpu.memory_space<vmem>>, %arg7: memref<2x1x8xf32, #tpu.memory_space<vmem>>, %arg8: memref<2x1x8xf32, #tpu.memory_space<vmem>>, %arg9: memref<2x1x8xf32, #tpu.memory_space<vmem>>, %arg10: memref<2x8x16xf32, #tpu.memory_space<vmem>>, %arg11: memref<1x16xf32, #tpu.memory_space<vmem>>, %arg12: memref<1x16xf32, #tpu.memory_space<vmem>>, %arg13: memref<1x16xf32, #tpu.memory_space<vmem>>, %arg14: memref<16x64xf32, #tpu.memory_space<vmem>>, %arg15: memref<1x64xf32, #tpu.memory_space<vmem>>, %arg16: memref<64x16xf32, #tpu.memory_space<vmem>>, %arg17: memref<1x16xf32, #tpu.memory_space<vmem>>, %arg18: memref<2x4x16x16xf32, #tpu.memory_space<vmem>>, %arg19: memref<1x64x16xf32, #tpu.memory_space<vmem>>) attributes {dimension_semantics = [#tpu.dimension_semantics<parallel>], iteration_bounds = array<i64: 2>, scalar_prefetch = 0 : i64, scratch_operands = 0 : i64, tpu.core_type = #tpu.core_type<tc>, window_params = [{transform_indices = @transform_0, window_bounds = array<i64: 1, 64, 16>}, {pipeline_mode = #tpu.pipeline_mode<synchronous>, transform_indices = @transform_1, window_bounds = array<i64: 1, 16>}, {pipeline_mode = #tpu.pipeline_mode<synchronous>, transform_indices = @transform_2, window_bounds = array<i64: 1, 16>}, {pipeline_mode = #tpu.pipeline_mode<synchronous>, transform_indices = @transform_3, window_bounds = array<i64: 2, 16, 8>}, {pipeline_mode = #tpu.pipeline_mode<synchronous>, transform_indices = @transform_4, window_bounds = array<i64: 2, 16, 8>}, {pipeline_mode = #tpu.pipeline_mode<synchronous>, transform_indices = @transform_5, window_bounds = array<i64: 2, 16, 8>}, {pipeline_mode = #tpu.pipeline_mode<synchronous>, transform_indices = @transform_6, window_bounds = array<i64: 2, 1, 8>}, {pipeline_mode = #tpu.pipeline_mode<synchronous>, transform_indices = @transform_7, window_bounds = array<i64: 2, 1, 8>}, {pipeline_mode = #tpu.pipeline_mode<synchronous>, transform_indices = @transform_8, window_bounds = array<i64: 2, 1, 8>}, {pipeline_mode = #tpu.pipeline_mode<synchronous>, transform_indices = @transform_9, window_bounds = array<i64: 2, 8, 16>}, {pipeline_mode = #tpu.pipeline_mode<synchronous>, transform_indices = @transform_10, window_bounds = array<i64: 1, 16>}, {pipeline_mode = #tpu.pipeline_mode<synchronous>, transform_indices = @transform_11, window_bounds = array<i64: 1, 16>}, {pipeline_mode = #tpu.pipeline_mode<synchronous>, transform_indices = @transform_12, window_bounds = array<i64: 1, 16>}, {pipeline_mode = #tpu.pipeline_mode<synchronous>, transform_indices = @transform_13, window_bounds = array<i64: 16, 64>}, {pipeline_mode = #tpu.pipeline_mode<synchronous>, transform_indices = @transform_14, window_bounds = array<i64: 1, 64>}, {pipeline_mode = #tpu.pipeline_mode<synchronous>, transform_indices = @transform_15, window_bounds = array<i64: 64, 16>}, {pipeline_mode = #tpu.pipeline_mode<synchronous>, transform_indices = @transform_16, window_bounds = array<i64: 1, 16>}, {pipeline_mode = #tpu.pipeline_mode<synchronous>, transform_indices = @transform_17, window_bounds = array<i64: 2, 4, 16, 16>}, {transform_indices = @transform_18, window_bounds = array<i64: 1, 64, 16>}]} {
    %c0 = arith.constant 0 : index
    %c0_0 = arith.constant 0 : index
    %c0_1 = arith.constant 0 : index
    %0 = vector.load %arg1[%c0, %c0_0, %c0_1] : memref<1x64x16xf32, #tpu.memory_space<vmem>>, vector<1x64x16xf32>
    %1 = vector.shape_cast %0 : vector<1x64x16xf32> to vector<64x16xf32>
    %c0_2 = arith.constant 0 : index
    %c0_3 = arith.constant 0 : index
    %2 = vector.load %arg2[%c0_2, %c0_3] : memref<1x16xf32, #tpu.memory_space<vmem>>, vector<1x16xf32>
    %c0_4 = arith.constant 0 : index
    %c0_5 = arith.constant 0 : index
    %3 = vector.load %arg3[%c0_4, %c0_5] : memref<1x16xf32, #tpu.memory_space<vmem>>, vector<1x16xf32>
    %cst = arith.constant dense<0.000000e+00> : vector<64xf32>
    %4 = vector.multi_reduction <add>, %1, %cst [1] : vector<64x16xf32> to vector<64xf32>
    %5 = vector.shape_cast %4 : vector<64xf32> to vector<64x1xf32>
    %cst_6 = arith.constant 1.600000e+01 : f32
    %6 = vector.broadcast %cst_6 : f32 to vector<64x1xf32>
    %7 = arith.divf %5, %6 : vector<64x1xf32>
    %8 = vector.broadcast %7 : vector<64x1xf32> to vector<64x16xf32>
    %9 = arith.subf %1, %8 : vector<64x16xf32>
    %10 = arith.mulf %9, %9 : vector<64x16xf32>
    %cst_7 = arith.constant dense<0.000000e+00> : vector<64xf32>
    %11 = vector.multi_reduction <add>, %10, %cst_7 [1] : vector<64x16xf32> to vector<64xf32>
    %12 = vector.shape_cast %11 : vector<64xf32> to vector<64x1xf32>
    %cst_8 = arith.constant 1.600000e+01 : f32
    %13 = vector.broadcast %cst_8 : f32 to vector<64x1xf32>
    %14 = arith.divf %12, %13 : vector<64x1xf32>
    %15 = vector.broadcast %7 : vector<64x1xf32> to vector<64x16xf32>
    %16 = arith.subf %1, %15 : vector<64x16xf32>
    %cst_9 = arith.constant 9.99999974E-6 : f32
    %17 = vector.broadcast %cst_9 : f32 to vector<64x1xf32>
    %18 = arith.addf %14, %17 : vector<64x1xf32>
    %19 = math.rsqrt %18 : vector<64x1xf32>
    %20 = vector.broadcast %19 : vector<64x1xf32> to vector<64x16xf32>
    %21 = arith.mulf %16, %20 : vector<64x16xf32>
    %22 = vector.broadcast %2 : vector<1x16xf32> to vector<64x16xf32>
    %23 = arith.mulf %21, %22 : vector<64x16xf32>
    %24 = vector.broadcast %3 : vector<1x16xf32> to vector<64x16xf32>
    %25 = arith.addf %23, %24 : vector<64x16xf32>
    %cst_10 = arith.constant 0.000000e+00 : f32
    %26 = vector.broadcast %cst_10 : f32 to vector<64x16xf32>
    %c0_11 = arith.constant 0 : index
    %c0_12 = arith.constant 0 : index
    %c0_13 = arith.constant 0 : index
    %27 = vector.load %arg4[%c0_11, %c0_12, %c0_13] : memref<2x16x8xf32, #tpu.memory_space<vmem>>, vector<1x16x8xf32>
    %28 = vector.shape_cast %27 : vector<1x16x8xf32> to vector<16x8xf32>
    %cst_14 = arith.constant dense<0.000000e+00> : vector<64x8xf32>
    %29 = tpu.matmul %25, %28, %cst_14 {dimension_numbers = #tpu.dot_dimension_numbers<[1], [0], [0], [1], [0, 0, 1, 1], [], []>} : vector<64x16xf32>, vector<16x8xf32>, vector<64x8xf32> -> vector<64x8xf32>
    %c0_15 = arith.constant 0 : index
    %c0_16 = arith.constant 0 : index
    %c0_17 = arith.constant 0 : index
    %30 = vector.load %arg7[%c0_15, %c0_16, %c0_17] : memref<2x1x8xf32, #tpu.memory_space<vmem>>, vector<1x1x8xf32>
    %31 = vector.shape_cast %30 : vector<1x1x8xf32> to vector<1x8xf32>
    %32 = vector.broadcast %31 : vector<1x8xf32> to vector<64x8xf32>
    %33 = arith.addf %29, %32 : vector<64x8xf32>
    %cst_18 = arith.constant 0.353553385 : f32
    %34 = vector.broadcast %cst_18 : f32 to vector<64x8xf32>
    %35 = arith.mulf %33, %34 : vector<64x8xf32>
    %c0_19 = arith.constant 0 : index
    %c0_20 = arith.constant 0 : index
    %c0_21 = arith.constant 0 : index
    %36 = vector.load %arg5[%c0_19, %c0_20, %c0_21] : memref<2x16x8xf32, #tpu.memory_space<vmem>>, vector<1x16x8xf32>
    %37 = vector.shape_cast %36 : vector<1x16x8xf32> to vector<16x8xf32>
    %cst_22 = arith.constant dense<0.000000e+00> : vector<64x8xf32>
    %38 = tpu.matmul %25, %37, %cst_22 {dimension_numbers = #tpu.dot_dimension_numbers<[1], [0], [0], [1], [0, 0, 1, 1], [], []>} : vector<64x16xf32>, vector<16x8xf32>, vector<64x8xf32> -> vector<64x8xf32>
    %c0_23 = arith.constant 0 : index
    %c0_24 = arith.constant 0 : index
    %c0_25 = arith.constant 0 : index
    %39 = vector.load %arg8[%c0_23, %c0_24, %c0_25] : memref<2x1x8xf32, #tpu.memory_space<vmem>>, vector<1x1x8xf32>
    %40 = vector.shape_cast %39 : vector<1x1x8xf32> to vector<1x8xf32>
    %41 = vector.broadcast %40 : vector<1x8xf32> to vector<64x8xf32>
    %42 = arith.addf %38, %41 : vector<64x8xf32>
    %c0_26 = arith.constant 0 : index
    %c0_27 = arith.constant 0 : index
    %c0_28 = arith.constant 0 : index
    %43 = vector.load %arg6[%c0_26, %c0_27, %c0_28] : memref<2x16x8xf32, #tpu.memory_space<vmem>>, vector<1x16x8xf32>
    %44 = vector.shape_cast %43 : vector<1x16x8xf32> to vector<16x8xf32>
    %cst_29 = arith.constant dense<0.000000e+00> : vector<64x8xf32>
    %45 = tpu.matmul %25, %44, %cst_29 {dimension_numbers = #tpu.dot_dimension_numbers<[1], [0], [0], [1], [0, 0, 1, 1], [], []>} : vector<64x16xf32>, vector<16x8xf32>, vector<64x8xf32> -> vector<64x8xf32>
    %c0_30 = arith.constant 0 : index
    %c0_31 = arith.constant 0 : index
    %c0_32 = arith.constant 0 : index
    %46 = vector.load %arg9[%c0_30, %c0_31, %c0_32] : memref<2x1x8xf32, #tpu.memory_space<vmem>>, vector<1x1x8xf32>
    %47 = vector.shape_cast %46 : vector<1x1x8xf32> to vector<1x8xf32>
    %48 = vector.broadcast %47 : vector<1x8xf32> to vector<64x8xf32>
    %49 = arith.addf %45, %48 : vector<64x8xf32>
    %50 = vector.shape_cast %35 : vector<64x8xf32> to vector<4x16x8xf32>
    %51 = vector.shape_cast %42 : vector<64x8xf32> to vector<4x16x8xf32>
    %52 = vector.shape_cast %49 : vector<64x8xf32> to vector<4x16x8xf32>
    %cst_33 = arith.constant dense<0.000000e+00> : vector<4x16x16xf32>
    %53 = tpu.matmul %50, %51, %cst_33 {dimension_numbers = #tpu.dot_dimension_numbers<[2], [2], [1], [1], [0, 0, 0, 1, 1, 1], [0], [0]>} : vector<4x16x8xf32>, vector<4x16x8xf32>, vector<4x16x16xf32> -> vector<4x16x16xf32>
    %c0_34 = arith.constant 0 : index
    %c0_35 = arith.constant 0 : index
    %c0_36 = arith.constant 0 : index
    %c0_37 = arith.constant 0 : index
    %54 = vector.load %arg18[%c0_34, %c0_35, %c0_36, %c0_37] : memref<2x4x16x16xf32, #tpu.memory_space<vmem>>, vector<1x4x16x16xf32>
    %55 = vector.shape_cast %54 : vector<1x4x16x16xf32> to vector<4x16x16xf32>
    %56 = arith.addf %53, %55 : vector<4x16x16xf32>
    %cst_38 = arith.constant dense<0xFF800000> : vector<4x16xf32>
    %57 = vector.multi_reduction <maximumf>, %56, %cst_38 [2] : vector<4x16x16xf32> to vector<4x16xf32>
    %58 = vector.shape_cast %57 : vector<4x16xf32> to vector<4x16x1xf32>
    %59 = vector.broadcast %58 : vector<4x16x1xf32> to vector<4x16x16xf32>
    %60 = arith.subf %56, %59 : vector<4x16x16xf32>
    %61 = math.exp %60 : vector<4x16x16xf32>
    %cst_39 = arith.constant dense<0.000000e+00> : vector<4x16xf32>
    %62 = vector.multi_reduction <add>, %61, %cst_39 [2] : vector<4x16x16xf32> to vector<4x16xf32>
    %63 = vector.shape_cast %62 : vector<4x16xf32> to vector<4x16x1xf32>
    %64 = vector.broadcast %63 : vector<4x16x1xf32> to vector<4x16x16xf32>
    %65 = arith.divf %61, %64 : vector<4x16x16xf32>
    %cst_40 = arith.constant dense<0.000000e+00> : vector<4x16x8xf32>
    %66 = tpu.matmul %65, %52, %cst_40 {dimension_numbers = #tpu.dot_dimension_numbers<[2], [1], [1], [2], [0, 0, 0, 1, 1, 2], [0], [0]>} : vector<4x16x16xf32>, vector<4x16x8xf32>, vector<4x16x8xf32> -> vector<4x16x8xf32>
    %67 = vector.shape_cast %66 : vector<4x16x8xf32> to vector<64x8xf32>
    %c0_41 = arith.constant 0 : index
    %c0_42 = arith.constant 0 : index
    %c0_43 = arith.constant 0 : index
    %68 = vector.load %arg10[%c0_41, %c0_42, %c0_43] : memref<2x8x16xf32, #tpu.memory_space<vmem>>, vector<1x8x16xf32>
    %69 = vector.shape_cast %68 : vector<1x8x16xf32> to vector<8x16xf32>
    %cst_44 = arith.constant dense<0.000000e+00> : vector<64x16xf32>
    %70 = tpu.matmul %67, %69, %cst_44 {dimension_numbers = #tpu.dot_dimension_numbers<[1], [0], [0], [1], [0, 0, 1, 1], [], []>} : vector<64x8xf32>, vector<8x16xf32>, vector<64x16xf32> -> vector<64x16xf32>
    %71 = arith.addf %26, %70 : vector<64x16xf32>
    %c1 = arith.constant 1 : index
    %c0_45 = arith.constant 0 : index
    %c0_46 = arith.constant 0 : index
    %72 = vector.load %arg4[%c1, %c0_45, %c0_46] : memref<2x16x8xf32, #tpu.memory_space<vmem>>, vector<1x16x8xf32>
    %73 = vector.shape_cast %72 : vector<1x16x8xf32> to vector<16x8xf32>
    %cst_47 = arith.constant dense<0.000000e+00> : vector<64x8xf32>
    %74 = tpu.matmul %25, %73, %cst_47 {dimension_numbers = #tpu.dot_dimension_numbers<[1], [0], [0], [1], [0, 0, 1, 1], [], []>} : vector<64x16xf32>, vector<16x8xf32>, vector<64x8xf32> -> vector<64x8xf32>
    %c1_48 = arith.constant 1 : index
    %c0_49 = arith.constant 0 : index
    %c0_50 = arith.constant 0 : index
    %75 = vector.load %arg7[%c1_48, %c0_49, %c0_50] : memref<2x1x8xf32, #tpu.memory_space<vmem>>, vector<1x1x8xf32>
    %76 = vector.shape_cast %75 : vector<1x1x8xf32> to vector<1x8xf32>
    %77 = vector.broadcast %76 : vector<1x8xf32> to vector<64x8xf32>
    %78 = arith.addf %74, %77 : vector<64x8xf32>
    %cst_51 = arith.constant 0.353553385 : f32
    %79 = vector.broadcast %cst_51 : f32 to vector<64x8xf32>
    %80 = arith.mulf %78, %79 : vector<64x8xf32>
    %c1_52 = arith.constant 1 : index
    %c0_53 = arith.constant 0 : index
    %c0_54 = arith.constant 0 : index
    %81 = vector.load %arg5[%c1_52, %c0_53, %c0_54] : memref<2x16x8xf32, #tpu.memory_space<vmem>>, vector<1x16x8xf32>
    %82 = vector.shape_cast %81 : vector<1x16x8xf32> to vector<16x8xf32>
    %cst_55 = arith.constant dense<0.000000e+00> : vector<64x8xf32>
    %83 = tpu.matmul %25, %82, %cst_55 {dimension_numbers = #tpu.dot_dimension_numbers<[1], [0], [0], [1], [0, 0, 1, 1], [], []>} : vector<64x16xf32>, vector<16x8xf32>, vector<64x8xf32> -> vector<64x8xf32>
    %c1_56 = arith.constant 1 : index
    %c0_57 = arith.constant 0 : index
    %c0_58 = arith.constant 0 : index
    %84 = vector.load %arg8[%c1_56, %c0_57, %c0_58] : memref<2x1x8xf32, #tpu.memory_space<vmem>>, vector<1x1x8xf32>
    %85 = vector.shape_cast %84 : vector<1x1x8xf32> to vector<1x8xf32>
    %86 = vector.broadcast %85 : vector<1x8xf32> to vector<64x8xf32>
    %87 = arith.addf %83, %86 : vector<64x8xf32>
    %c1_59 = arith.constant 1 : index
    %c0_60 = arith.constant 0 : index
    %c0_61 = arith.constant 0 : index
    %88 = vector.load %arg6[%c1_59, %c0_60, %c0_61] : memref<2x16x8xf32, #tpu.memory_space<vmem>>, vector<1x16x8xf32>
    %89 = vector.shape_cast %88 : vector<1x16x8xf32> to vector<16x8xf32>
    %cst_62 = arith.constant dense<0.000000e+00> : vector<64x8xf32>
    %90 = tpu.matmul %25, %89, %cst_62 {dimension_numbers = #tpu.dot_dimension_numbers<[1], [0], [0], [1], [0, 0, 1, 1], [], []>} : vector<64x16xf32>, vector<16x8xf32>, vector<64x8xf32> -> vector<64x8xf32>
    %c1_63 = arith.constant 1 : index
    %c0_64 = arith.constant 0 : index
    %c0_65 = arith.constant 0 : index
    %91 = vector.load %arg9[%c1_63, %c0_64, %c0_65] : memref<2x1x8xf32, #tpu.memory_space<vmem>>, vector<1x1x8xf32>
    %92 = vector.shape_cast %91 : vector<1x1x8xf32> to vector<1x8xf32>
    %93 = vector.broadcast %92 : vector<1x8xf32> to vector<64x8xf32>
    %94 = arith.addf %90, %93 : vector<64x8xf32>
    %95 = vector.shape_cast %80 : vector<64x8xf32> to vector<4x16x8xf32>
    %96 = vector.shape_cast %87 : vector<64x8xf32> to vector<4x16x8xf32>
    %97 = vector.shape_cast %94 : vector<64x8xf32> to vector<4x16x8xf32>
    %cst_66 = arith.constant dense<0.000000e+00> : vector<4x16x16xf32>
    %98 = tpu.matmul %95, %96, %cst_66 {dimension_numbers = #tpu.dot_dimension_numbers<[2], [2], [1], [1], [0, 0, 0, 1, 1, 1], [0], [0]>} : vector<4x16x8xf32>, vector<4x16x8xf32>, vector<4x16x16xf32> -> vector<4x16x16xf32>
    %c1_67 = arith.constant 1 : index
    %c0_68 = arith.constant 0 : index
    %c0_69 = arith.constant 0 : index
    %c0_70 = arith.constant 0 : index
    %99 = vector.load %arg18[%c1_67, %c0_68, %c0_69, %c0_70] : memref<2x4x16x16xf32, #tpu.memory_space<vmem>>, vector<1x4x16x16xf32>
    %100 = vector.shape_cast %99 : vector<1x4x16x16xf32> to vector<4x16x16xf32>
    %101 = arith.addf %98, %100 : vector<4x16x16xf32>
    %cst_71 = arith.constant dense<0xFF800000> : vector<4x16xf32>
    %102 = vector.multi_reduction <maximumf>, %101, %cst_71 [2] : vector<4x16x16xf32> to vector<4x16xf32>
    %103 = vector.shape_cast %102 : vector<4x16xf32> to vector<4x16x1xf32>
    %104 = vector.broadcast %103 : vector<4x16x1xf32> to vector<4x16x16xf32>
    %105 = arith.subf %101, %104 : vector<4x16x16xf32>
    %106 = math.exp %105 : vector<4x16x16xf32>
    %cst_72 = arith.constant dense<0.000000e+00> : vector<4x16xf32>
    %107 = vector.multi_reduction <add>, %106, %cst_72 [2] : vector<4x16x16xf32> to vector<4x16xf32>
    %108 = vector.shape_cast %107 : vector<4x16xf32> to vector<4x16x1xf32>
    %109 = vector.broadcast %108 : vector<4x16x1xf32> to vector<4x16x16xf32>
    %110 = arith.divf %106, %109 : vector<4x16x16xf32>
    %cst_73 = arith.constant dense<0.000000e+00> : vector<4x16x8xf32>
    %111 = tpu.matmul %110, %97, %cst_73 {dimension_numbers = #tpu.dot_dimension_numbers<[2], [1], [1], [2], [0, 0, 0, 1, 1, 2], [0], [0]>} : vector<4x16x16xf32>, vector<4x16x8xf32>, vector<4x16x8xf32> -> vector<4x16x8xf32>
    %112 = vector.shape_cast %111 : vector<4x16x8xf32> to vector<64x8xf32>
    %c1_74 = arith.constant 1 : index
    %c0_75 = arith.constant 0 : index
    %c0_76 = arith.constant 0 : index
    %113 = vector.load %arg10[%c1_74, %c0_75, %c0_76] : memref<2x8x16xf32, #tpu.memory_space<vmem>>, vector<1x8x16xf32>
    %114 = vector.shape_cast %113 : vector<1x8x16xf32> to vector<8x16xf32>
    %cst_77 = arith.constant dense<0.000000e+00> : vector<64x16xf32>
    %115 = tpu.matmul %112, %114, %cst_77 {dimension_numbers = #tpu.dot_dimension_numbers<[1], [0], [0], [1], [0, 0, 1, 1], [], []>} : vector<64x8xf32>, vector<8x16xf32>, vector<64x16xf32> -> vector<64x16xf32>
    %116 = arith.addf %71, %115 : vector<64x16xf32>
    %117 = arith.addf %1, %116 : vector<64x16xf32>
    %c0_78 = arith.constant 0 : index
    %c0_79 = arith.constant 0 : index
    %118 = vector.load %arg11[%c0_78, %c0_79] : memref<1x16xf32, #tpu.memory_space<vmem>>, vector<1x16xf32>
    %119 = vector.broadcast %118 : vector<1x16xf32> to vector<64x16xf32>
    %120 = arith.addf %117, %119 : vector<64x16xf32>
    %c0_80 = arith.constant 0 : index
    %c0_81 = arith.constant 0 : index
    %121 = vector.load %arg12[%c0_80, %c0_81] : memref<1x16xf32, #tpu.memory_space<vmem>>, vector<1x16xf32>
    %c0_82 = arith.constant 0 : index
    %c0_83 = arith.constant 0 : index
    %122 = vector.load %arg13[%c0_82, %c0_83] : memref<1x16xf32, #tpu.memory_space<vmem>>, vector<1x16xf32>
    %cst_84 = arith.constant dense<0.000000e+00> : vector<64xf32>
    %123 = vector.multi_reduction <add>, %120, %cst_84 [1] : vector<64x16xf32> to vector<64xf32>
    %124 = vector.shape_cast %123 : vector<64xf32> to vector<64x1xf32>
    %cst_85 = arith.constant 1.600000e+01 : f32
    %125 = vector.broadcast %cst_85 : f32 to vector<64x1xf32>
    %126 = arith.divf %124, %125 : vector<64x1xf32>
    %127 = vector.broadcast %126 : vector<64x1xf32> to vector<64x16xf32>
    %128 = arith.subf %120, %127 : vector<64x16xf32>
    %129 = arith.mulf %128, %128 : vector<64x16xf32>
    %cst_86 = arith.constant dense<0.000000e+00> : vector<64xf32>
    %130 = vector.multi_reduction <add>, %129, %cst_86 [1] : vector<64x16xf32> to vector<64xf32>
    %131 = vector.shape_cast %130 : vector<64xf32> to vector<64x1xf32>
    %cst_87 = arith.constant 1.600000e+01 : f32
    %132 = vector.broadcast %cst_87 : f32 to vector<64x1xf32>
    %133 = arith.divf %131, %132 : vector<64x1xf32>
    %134 = vector.broadcast %126 : vector<64x1xf32> to vector<64x16xf32>
    %135 = arith.subf %120, %134 : vector<64x16xf32>
    %cst_88 = arith.constant 9.99999974E-6 : f32
    %136 = vector.broadcast %cst_88 : f32 to vector<64x1xf32>
    %137 = arith.addf %133, %136 : vector<64x1xf32>
    %138 = math.rsqrt %137 : vector<64x1xf32>
    %139 = vector.broadcast %138 : vector<64x1xf32> to vector<64x16xf32>
    %140 = arith.mulf %135, %139 : vector<64x16xf32>
    %141 = vector.broadcast %121 : vector<1x16xf32> to vector<64x16xf32>
    %142 = arith.mulf %140, %141 : vector<64x16xf32>
    %143 = vector.broadcast %122 : vector<1x16xf32> to vector<64x16xf32>
    %144 = arith.addf %142, %143 : vector<64x16xf32>
    %c0_89 = arith.constant 0 : index
    %c0_90 = arith.constant 0 : index
    %145 = vector.load %arg14[%c0_89, %c0_90] : memref<16x64xf32, #tpu.memory_space<vmem>>, vector<16x64xf32>
    %cst_91 = arith.constant dense<0.000000e+00> : vector<64x64xf32>
    %146 = tpu.matmul %144, %145, %cst_91 {dimension_numbers = #tpu.dot_dimension_numbers<[1], [0], [0], [1], [0, 0, 1, 1], [], []>} : vector<64x16xf32>, vector<16x64xf32>, vector<64x64xf32> -> vector<64x64xf32>
    %c0_92 = arith.constant 0 : index
    %c0_93 = arith.constant 0 : index
    %147 = vector.load %arg15[%c0_92, %c0_93] : memref<1x64xf32, #tpu.memory_space<vmem>>, vector<1x64xf32>
    %148 = vector.broadcast %147 : vector<1x64xf32> to vector<64x64xf32>
    %149 = arith.addf %146, %148 : vector<64x64xf32>
    %cst_94 = arith.constant 5.000000e-01 : f32
    %150 = vector.broadcast %cst_94 : f32 to vector<64x64xf32>
    %151 = arith.mulf %150, %149 : vector<64x64xf32>
    %cst_95 = arith.constant 4.471500e-02 : f32
    %152 = vector.broadcast %cst_95 : f32 to vector<64x64xf32>
    %153 = arith.mulf %152, %149 : vector<64x64xf32>
    %154 = arith.mulf %153, %149 : vector<64x64xf32>
    %155 = arith.mulf %154, %149 : vector<64x64xf32>
    %156 = arith.addf %149, %155 : vector<64x64xf32>
    %cst_96 = arith.constant 0.797884583 : f32
    %157 = vector.broadcast %cst_96 : f32 to vector<64x64xf32>
    %158 = arith.mulf %157, %156 : vector<64x64xf32>
    %159 = math.tanh %158 : vector<64x64xf32>
    %cst_97 = arith.constant 1.000000e+00 : f32
    %160 = vector.broadcast %cst_97 : f32 to vector<64x64xf32>
    %161 = arith.addf %160, %159 : vector<64x64xf32>
    %162 = arith.mulf %151, %161 : vector<64x64xf32>
    %c0_98 = arith.constant 0 : index
    %c0_99 = arith.constant 0 : index
    %163 = vector.load %arg16[%c0_98, %c0_99] : memref<64x16xf32, #tpu.memory_space<vmem>>, vector<64x16xf32>
    %cst_100 = arith.constant dense<0.000000e+00> : vector<64x16xf32>
    %164 = tpu.matmul %162, %163, %cst_100 {dimension_numbers = #tpu.dot_dimension_numbers<[1], [0], [0], [1], [0, 0, 1, 1], [], []>} : vector<64x64xf32>, vector<64x16xf32>, vector<64x16xf32> -> vector<64x16xf32>
    %c0_101 = arith.constant 0 : index
    %c0_102 = arith.constant 0 : index
    %165 = vector.load %arg17[%c0_101, %c0_102] : memref<1x16xf32, #tpu.memory_space<vmem>>, vector<1x16xf32>
    %166 = vector.broadcast %165 : vector<1x16xf32> to vector<64x16xf32>
    %167 = arith.addf %164, %166 : vector<64x16xf32>
    %168 = arith.addf %120, %167 : vector<64x16xf32>
    %c0_103 = arith.constant 0 : index
    %c0_104 = arith.constant 0 : index
    %c0_105 = arith.constant 0 : index
    %169 = vector.load %arg19[%c0_103, %c0_104, %c0_105] : memref<1x64x16xf32, #tpu.memory_space<vmem>>, vector<1x64x16xf32>
    %170 = vector.shape_cast %169 : vector<1x64x16xf32> to vector<64x16xf32>
    %171 = vector.shape_cast %168 : vector<64x16xf32> to vector<1x64x16xf32>
    tpu.vector_store %arg19[%c0_103, %c0_104, %c0_105], %171 {strides = array<i32>} : memref<1x64x16xf32, #tpu.memory_space<vmem>>, vector<1x64x16xf32>,
    return
  }
  func.func @transform_0(%arg0: i32) -> (i32, i32, i32) {
    %c0_i32 = arith.constant 0 : i32
    %c0_i32_0 = arith.constant 0 : i32
    %c0_i32_1 = arith.constant 0 : i32
    return %arg0, %c0_i32, %c0_i32_0 : i32, i32, i32
  }
  func.func @transform_1(%arg0: i32) -> (i32, i32) {
    %c0_i32 = arith.constant 0 : i32
    %c0_i32_0 = arith.constant 0 : i32
    %c0_i32_1 = arith.constant 0 : i32
    return %c0_i32, %c0_i32_0 : i32, i32
  }
  func.func @transform_2(%arg0: i32) -> (i32, i32) {
    %c0_i32 = arith.constant 0 : i32
    %c0_i32_0 = arith.constant 0 : i32
    %c0_i32_1 = arith.constant 0 : i32
    return %c0_i32, %c0_i32_0 : i32, i32
  }
  func.func @transform_3(%arg0: i32) -> (i32, i32, i32) {
    %c0_i32 = arith.constant 0 : i32
    %c0_i32_0 = arith.constant 0 : i32
    %c0_i32_1 = arith.constant 0 : i32
    %c0_i32_2 = arith.constant 0 : i32
    return %c0_i32, %c0_i32_0, %c0_i32_1 : i32, i32, i32
  }
  func.func @transform_4(%arg0: i32) -> (i32, i32, i32) {
    %c0_i32 = arith.constant 0 : i32
    %c0_i32_0 = arith.constant 0 : i32
    %c0_i32_1 = arith.constant 0 : i32
    %c0_i32_2 = arith.constant 0 : i32
    return %c0_i32, %c0_i32_0, %c0_i32_1 : i32, i32, i32
  }
  func.func @transform_5(%arg0: i32) -> (i32, i32, i32) {
    %c0_i32 = arith.constant 0 : i32
    %c0_i32_0 = arith.constant 0 : i32
    %c0_i32_1 = arith.constant 0 : i32
    %c0_i32_2 = arith.constant 0 : i32
    return %c0_i32, %c0_i32_0, %c0_i32_1 : i32, i32, i32
  }
  func.func @transform_6(%arg0: i32) -> (i32, i32, i32) {
    %c0_i32 = arith.constant 0 : i32
    %c0_i32_0 = arith.constant 0 : i32
    %c0_i32_1 = arith.constant 0 : i32
    %c0_i32_2 = arith.constant 0 : i32
    return %c0_i32, %c0_i32_0, %c0_i32_1 : i32, i32, i32
  }
  func.func @transform_7(%arg0: i32) -> (i32, i32, i32) {
    %c0_i32 = arith.constant 0 : i32
    %c0_i32_0 = arith.constant 0 : i32
    %c0_i32_1 = arith.constant 0 : i32
    %c0_i32_2 = arith.constant 0 : i32
    return %c0_i32, %c0_i32_0, %c0_i32_1 : i32, i32, i32
  }
  func.func @transform_8(%arg0: i32) -> (i32, i32, i32) {
    %c0_i32 = arith.constant 0 : i32
    %c0_i32_0 = arith.constant 0 : i32
    %c0_i32_1 = arith.constant 0 : i32
    %c0_i32_2 = arith.constant 0 : i32
    return %c0_i32, %c0_i32_0, %c0_i32_1 : i32, i32, i32
  }
  func.func @transform_9(%arg0: i32) -> (i32, i32, i32) {
    %c0_i32 = arith.constant 0 : i32
    %c0_i32_0 = arith.constant 0 : i32
    %c0_i32_1 = arith.constant 0 : i32
    %c0_i32_2 = arith.constant 0 : i32
    return %c0_i32, %c0_i32_0, %c0_i32_1 : i32, i32, i32
  }
  func.func @transform_10(%arg0: i32) -> (i32, i32) {
    %c0_i32 = arith.constant 0 : i32
    %c0_i32_0 = arith.constant 0 : i32
    %c0_i32_1 = arith.constant 0 : i32
    return %c0_i32, %c0_i32_0 : i32, i32
  }
  func.func @transform_11(%arg0: i32) -> (i32, i32) {
    %c0_i32 = arith.constant 0 : i32
    %c0_i32_0 = arith.constant 0 : i32
    %c0_i32_1 = arith.constant 0 : i32
    return %c0_i32, %c0_i32_0 : i32, i32
  }
  func.func @transform_12(%arg0: i32) -> (i32, i32) {
    %c0_i32 = arith.constant 0 : i32
    %c0_i32_0 = arith.constant 0 : i32
    %c0_i32_1 = arith.constant 0 : i32
    return %c0_i32, %c0_i32_0 : i32, i32
  }
  func.func @transform_13(%arg0: i32) -> (i32, i32) {
    %c0_i32 = arith.constant 0 : i32
    %c0_i32_0 = arith.constant 0 : i32
    %c0_i32_1 = arith.constant 0 : i32
    return %c0_i32, %c0_i32_0 : i32, i32
  }
  func.func @transform_14(%arg0: i32) -> (i32, i32) {
    %c0_i32 = arith.constant 0 : i32
    %c0_i32_0 = arith.constant 0 : i32
    %c0_i32_1 = arith.constant 0 : i32
    return %c0_i32, %c0_i32_0 : i32, i32
  }
  func.func @transform_15(%arg0: i32) -> (i32, i32) {
    %c0_i32 = arith.constant 0 : i32
    %c0_i32_0 = arith.constant 0 : i32
    %c0_i32_1 = arith.constant 0 : i32
    return %c0_i32, %c0_i32_0 : i32, i32
  }
  func.func @transform_16(%arg0: i32) -> (i32, i32) {
    %c0_i32 = arith.constant 0 : i32
    %c0_i32_0 = arith.constant 0 : i32
    %c0_i32_1 = arith.constant 0 : i32
    return %c0_i32, %c0_i32_0 : i32, i32
  }
  func.func @transform_17(%arg0: i32) -> (i32, i32, i32, i32) {
    %c0_i32 = arith.constant 0 : i32
    %c0_i32_0 = arith.constant 0 : i32
    %c0_i32_1 = arith.constant 0 : i32
    %c0_i32_2 = arith.constant 0 : i32
    %c0_i32_3 = arith.constant 0 : i32
    return %c0_i32, %c0_i32_0, %c0_i32_1, %c0_i32_2 : i32, i32, i32, i32
  }
  func.func @transform_18(%arg0: i32) -> (i32, i32, i32) {
    %c0_i32 = arith.constant 0 : i32
    %c0_i32_0 = arith.constant 0 : i32
    %c0_i32_1 = arith.constant 0 : i32
    return %arg0, %c0_i32, %c0_i32_0 : i32, i32, i32
  }
}

module attributes {stable_mosaic.version = 11 : i64} {
  func.func @_merge_kernel(%arg0: i32, %arg1: memref<1x16x64xf32, #tpu.memory_space<vmem>>, %arg2: memref<1x64xf32, #tpu.memory_space<vmem>>, %arg3: memref<1x64xf32, #tpu.memory_space<vmem>>, %arg4: memref<64x32xf32, #tpu.memory_space<vmem>>, %arg5: memref<1x16x32xf32, #tpu.memory_space<vmem>>) attributes {dimension_semantics = [#tpu.dimension_semantics<parallel>], iteration_bounds = array<i64: 2>, scalar_prefetch = 0 : i64, scratch_operands = 0 : i64, tpu.core_type = #tpu.core_type<tc>, window_params = [{transform_indices = @transform_0, window_bounds = array<i64: 1, 16, 64>}, {pipeline_mode = #tpu.pipeline_mode<synchronous>, transform_indices = @transform_1, window_bounds = array<i64: 1, 64>}, {pipeline_mode = #tpu.pipeline_mode<synchronous>, transform_indices = @transform_2, window_bounds = array<i64: 1, 64>}, {pipeline_mode = #tpu.pipeline_mode<synchronous>, transform_indices = @transform_3, window_bounds = array<i64: 64, 32>}, {transform_indices = @transform_4, window_bounds = array<i64: 1, 16, 32>}]} {
    %c0 = arith.constant 0 : index
    %c0_0 = arith.constant 0 : index
    %c0_1 = arith.constant 0 : index
    %0 = vector.load %arg1[%c0, %c0_0, %c0_1] : memref<1x16x64xf32, #tpu.memory_space<vmem>>, vector<1x16x64xf32>
    %1 = vector.shape_cast %0 : vector<1x16x64xf32> to vector<16x64xf32>
    %c0_2 = arith.constant 0 : index
    %c0_3 = arith.constant 0 : index
    %2 = vector.load %arg2[%c0_2, %c0_3] : memref<1x64xf32, #tpu.memory_space<vmem>>, vector<1x64xf32>
    %c0_4 = arith.constant 0 : index
    %c0_5 = arith.constant 0 : index
    %3 = vector.load %arg3[%c0_4, %c0_5] : memref<1x64xf32, #tpu.memory_space<vmem>>, vector<1x64xf32>
    %cst = arith.constant dense<0.000000e+00> : vector<16xf32>
    %4 = vector.multi_reduction <add>, %1, %cst [1] : vector<16x64xf32> to vector<16xf32>
    %5 = vector.shape_cast %4 : vector<16xf32> to vector<16x1xf32>
    %cst_6 = arith.constant 6.400000e+01 : f32
    %6 = vector.broadcast %cst_6 : f32 to vector<16x1xf32>
    %7 = arith.divf %5, %6 : vector<16x1xf32>
    %8 = vector.broadcast %7 : vector<16x1xf32> to vector<16x64xf32>
    %9 = arith.subf %1, %8 : vector<16x64xf32>
    %10 = arith.mulf %9, %9 : vector<16x64xf32>
    %cst_7 = arith.constant dense<0.000000e+00> : vector<16xf32>
    %11 = vector.multi_reduction <add>, %10, %cst_7 [1] : vector<16x64xf32> to vector<16xf32>
    %12 = vector.shape_cast %11 : vector<16xf32> to vector<16x1xf32>
    %cst_8 = arith.constant 6.400000e+01 : f32
    %13 = vector.broadcast %cst_8 : f32 to vector<16x1xf32>
    %14 = arith.divf %12, %13 : vector<16x1xf32>
    %15 = vector.broadcast %7 : vector<16x1xf32> to vector<16x64xf32>
    %16 = arith.subf %1, %15 : vector<16x64xf32>
    %cst_9 = arith.constant 9.99999974E-6 : f32
    %17 = vector.broadcast %cst_9 : f32 to vector<16x1xf32>
    %18 = arith.addf %14, %17 : vector<16x1xf32>
    %19 = math.rsqrt %18 : vector<16x1xf32>
    %20 = vector.broadcast %19 : vector<16x1xf32> to vector<16x64xf32>
    %21 = arith.mulf %16, %20 : vector<16x64xf32>
    %22 = vector.broadcast %2 : vector<1x64xf32> to vector<16x64xf32>
    %23 = arith.mulf %21, %22 : vector<16x64xf32>
    %24 = vector.broadcast %3 : vector<1x64xf32> to vector<16x64xf32>
    %25 = arith.addf %23, %24 : vector<16x64xf32>
    %c0_10 = arith.constant 0 : index
    %c0_11 = arith.constant 0 : index
    %26 = vector.load %arg4[%c0_10, %c0_11] : memref<64x32xf32, #tpu.memory_space<vmem>>, vector<64x32xf32>
    %cst_12 = arith.constant dense<0.000000e+00> : vector<16x32xf32>
    %27 = tpu.matmul %25, %26, %cst_12 {dimension_numbers = #tpu.dot_dimension_numbers<[1], [0], [0], [1], [0, 0, 1, 1], [], []>} : vector<16x64xf32>, vector<64x32xf32>, vector<16x32xf32> -> vector<16x32xf32>
    %c0_13 = arith.constant 0 : index
    %c0_14 = arith.constant 0 : index
    %c0_15 = arith.constant 0 : index
    %28 = vector.load %arg5[%c0_13, %c0_14, %c0_15] : memref<1x16x32xf32, #tpu.memory_space<vmem>>, vector<1x16x32xf32>
    %29 = vector.shape_cast %28 : vector<1x16x32xf32> to vector<16x32xf32>
    %30 = vector.shape_cast %27 : vector<16x32xf32> to vector<1x16x32xf32>
    tpu.vector_store %arg5[%c0_13, %c0_14, %c0_15], %30 {strides = array<i32>} : memref<1x16x32xf32, #tpu.memory_space<vmem>>, vector<1x16x32xf32>,
    return
  }
  func.func @transform_0(%arg0: i32) -> (i32, i32, i32) {
    %c0_i32 = arith.constant 0 : i32
    %c0_i32_0 = arith.constant 0 : i32
    %c0_i32_1 = arith.constant 0 : i32
    return %arg0, %c0_i32, %c0_i32_0 : i32, i32, i32
  }
  func.func @transform_1(%arg0: i32) -> (i32, i32) {
    %c0_i32 = arith.constant 0 : i32
    %c0_i32_0 = arith.constant 0 : i32
    %c0_i32_1 = arith.constant 0 : i32
    return %c0_i32, %c0_i32_0 : i32, i32
  }
  func.func @transform_2(%arg0: i32) -> (i32, i32) {
    %c0_i32 = arith.constant 0 : i32
    %c0_i32_0 = arith.constant 0 : i32
    %c0_i32_1 = arith.constant 0 : i32
    return %c0_i32, %c0_i32_0 : i32, i32
  }
  func.func @transform_3(%arg0: i32) -> (i32, i32) {
    %c0_i32 = arith.constant 0 : i32
    %c0_i32_0 = arith.constant 0 : i32
    %c0_i32_1 = arith.constant 0 : i32
    return %c0_i32, %c0_i32_0 : i32, i32
  }
  func.func @transform_4(%arg0: i32) -> (i32, i32, i32) {
    %c0_i32 = arith.constant 0 : i32
    %c0_i32_0 = arith.constant 0 : i32
    %c0_i32_1 = arith.constant 0 : i32
    return %arg0, %c0_i32, %c0_i32_0 : i32, i32, i32
  }
}

module attributes {stable_mosaic.version = 11 : i64} {
  func.func @_swin_block_kernel(%arg0: i32, %arg1: memref<1x16x32xf32, #tpu.memory_space<vmem>>, %arg2: memref<1x32xf32, #tpu.memory_space<vmem>>, %arg3: memref<1x32xf32, #tpu.memory_space<vmem>>, %arg4: memref<4x32x8xf32, #tpu.memory_space<vmem>>, %arg5: memref<4x32x8xf32, #tpu.memory_space<vmem>>, %arg6: memref<4x32x8xf32, #tpu.memory_space<vmem>>, %arg7: memref<4x1x8xf32, #tpu.memory_space<vmem>>, %arg8: memref<4x1x8xf32, #tpu.memory_space<vmem>>, %arg9: memref<4x1x8xf32, #tpu.memory_space<vmem>>, %arg10: memref<4x8x32xf32, #tpu.memory_space<vmem>>, %arg11: memref<1x32xf32, #tpu.memory_space<vmem>>, %arg12: memref<1x32xf32, #tpu.memory_space<vmem>>, %arg13: memref<1x32xf32, #tpu.memory_space<vmem>>, %arg14: memref<32x128xf32, #tpu.memory_space<vmem>>, %arg15: memref<1x128xf32, #tpu.memory_space<vmem>>, %arg16: memref<128x32xf32, #tpu.memory_space<vmem>>, %arg17: memref<1x32xf32, #tpu.memory_space<vmem>>, %arg18: memref<4x1x16x16xf32, #tpu.memory_space<vmem>>, %arg19: memref<1x16x32xf32, #tpu.memory_space<vmem>>) attributes {dimension_semantics = [#tpu.dimension_semantics<parallel>], iteration_bounds = array<i64: 2>, scalar_prefetch = 0 : i64, scratch_operands = 0 : i64, tpu.core_type = #tpu.core_type<tc>, window_params = [{transform_indices = @transform_0, window_bounds = array<i64: 1, 16, 32>}, {pipeline_mode = #tpu.pipeline_mode<synchronous>, transform_indices = @transform_1, window_bounds = array<i64: 1, 32>}, {pipeline_mode = #tpu.pipeline_mode<synchronous>, transform_indices = @transform_2, window_bounds = array<i64: 1, 32>}, {pipeline_mode = #tpu.pipeline_mode<synchronous>, transform_indices = @transform_3, window_bounds = array<i64: 4, 32, 8>}, {pipeline_mode = #tpu.pipeline_mode<synchronous>, transform_indices = @transform_4, window_bounds = array<i64: 4, 32, 8>}, {pipeline_mode = #tpu.pipeline_mode<synchronous>, transform_indices = @transform_5, window_bounds = array<i64: 4, 32, 8>}, {pipeline_mode = #tpu.pipeline_mode<synchronous>, transform_indices = @transform_6, window_bounds = array<i64: 4, 1, 8>}, {pipeline_mode = #tpu.pipeline_mode<synchronous>, transform_indices = @transform_7, window_bounds = array<i64: 4, 1, 8>}, {pipeline_mode = #tpu.pipeline_mode<synchronous>, transform_indices = @transform_8, window_bounds = array<i64: 4, 1, 8>}, {pipeline_mode = #tpu.pipeline_mode<synchronous>, transform_indices = @transform_9, window_bounds = array<i64: 4, 8, 32>}, {pipeline_mode = #tpu.pipeline_mode<synchronous>, transform_indices = @transform_10, window_bounds = array<i64: 1, 32>}, {pipeline_mode = #tpu.pipeline_mode<synchronous>, transform_indices = @transform_11, window_bounds = array<i64: 1, 32>}, {pipeline_mode = #tpu.pipeline_mode<synchronous>, transform_indices = @transform_12, window_bounds = array<i64: 1, 32>}, {pipeline_mode = #tpu.pipeline_mode<synchronous>, transform_indices = @transform_13, window_bounds = array<i64: 32, 128>}, {pipeline_mode = #tpu.pipeline_mode<synchronous>, transform_indices = @transform_14, window_bounds = array<i64: 1, 128>}, {pipeline_mode = #tpu.pipeline_mode<synchronous>, transform_indices = @transform_15, window_bounds = array<i64: 128, 32>}, {pipeline_mode = #tpu.pipeline_mode<synchronous>, transform_indices = @transform_16, window_bounds = array<i64: 1, 32>}, {pipeline_mode = #tpu.pipeline_mode<synchronous>, transform_indices = @transform_17, window_bounds = array<i64: 4, 1, 16, 16>}, {transform_indices = @transform_18, window_bounds = array<i64: 1, 16, 32>}]} {
    %c0 = arith.constant 0 : index
    %c0_0 = arith.constant 0 : index
    %c0_1 = arith.constant 0 : index
    %0 = vector.load %arg1[%c0, %c0_0, %c0_1] : memref<1x16x32xf32, #tpu.memory_space<vmem>>, vector<1x16x32xf32>
    %1 = vector.shape_cast %0 : vector<1x16x32xf32> to vector<16x32xf32>
    %c0_2 = arith.constant 0 : index
    %c0_3 = arith.constant 0 : index
    %2 = vector.load %arg2[%c0_2, %c0_3] : memref<1x32xf32, #tpu.memory_space<vmem>>, vector<1x32xf32>
    %c0_4 = arith.constant 0 : index
    %c0_5 = arith.constant 0 : index
    %3 = vector.load %arg3[%c0_4, %c0_5] : memref<1x32xf32, #tpu.memory_space<vmem>>, vector<1x32xf32>
    %cst = arith.constant dense<0.000000e+00> : vector<16xf32>
    %4 = vector.multi_reduction <add>, %1, %cst [1] : vector<16x32xf32> to vector<16xf32>
    %5 = vector.shape_cast %4 : vector<16xf32> to vector<16x1xf32>
    %cst_6 = arith.constant 3.200000e+01 : f32
    %6 = vector.broadcast %cst_6 : f32 to vector<16x1xf32>
    %7 = arith.divf %5, %6 : vector<16x1xf32>
    %8 = vector.broadcast %7 : vector<16x1xf32> to vector<16x32xf32>
    %9 = arith.subf %1, %8 : vector<16x32xf32>
    %10 = arith.mulf %9, %9 : vector<16x32xf32>
    %cst_7 = arith.constant dense<0.000000e+00> : vector<16xf32>
    %11 = vector.multi_reduction <add>, %10, %cst_7 [1] : vector<16x32xf32> to vector<16xf32>
    %12 = vector.shape_cast %11 : vector<16xf32> to vector<16x1xf32>
    %cst_8 = arith.constant 3.200000e+01 : f32
    %13 = vector.broadcast %cst_8 : f32 to vector<16x1xf32>
    %14 = arith.divf %12, %13 : vector<16x1xf32>
    %15 = vector.broadcast %7 : vector<16x1xf32> to vector<16x32xf32>
    %16 = arith.subf %1, %15 : vector<16x32xf32>
    %cst_9 = arith.constant 9.99999974E-6 : f32
    %17 = vector.broadcast %cst_9 : f32 to vector<16x1xf32>
    %18 = arith.addf %14, %17 : vector<16x1xf32>
    %19 = math.rsqrt %18 : vector<16x1xf32>
    %20 = vector.broadcast %19 : vector<16x1xf32> to vector<16x32xf32>
    %21 = arith.mulf %16, %20 : vector<16x32xf32>
    %22 = vector.broadcast %2 : vector<1x32xf32> to vector<16x32xf32>
    %23 = arith.mulf %21, %22 : vector<16x32xf32>
    %24 = vector.broadcast %3 : vector<1x32xf32> to vector<16x32xf32>
    %25 = arith.addf %23, %24 : vector<16x32xf32>
    %cst_10 = arith.constant 0.000000e+00 : f32
    %26 = vector.broadcast %cst_10 : f32 to vector<16x32xf32>
    %c0_11 = arith.constant 0 : index
    %c0_12 = arith.constant 0 : index
    %c0_13 = arith.constant 0 : index
    %27 = vector.load %arg4[%c0_11, %c0_12, %c0_13] : memref<4x32x8xf32, #tpu.memory_space<vmem>>, vector<1x32x8xf32>
    %28 = vector.shape_cast %27 : vector<1x32x8xf32> to vector<32x8xf32>
    %cst_14 = arith.constant dense<0.000000e+00> : vector<16x8xf32>
    %29 = tpu.matmul %25, %28, %cst_14 {dimension_numbers = #tpu.dot_dimension_numbers<[1], [0], [0], [1], [0, 0, 1, 1], [], []>} : vector<16x32xf32>, vector<32x8xf32>, vector<16x8xf32> -> vector<16x8xf32>
    %c0_15 = arith.constant 0 : index
    %c0_16 = arith.constant 0 : index
    %c0_17 = arith.constant 0 : index
    %30 = vector.load %arg7[%c0_15, %c0_16, %c0_17] : memref<4x1x8xf32, #tpu.memory_space<vmem>>, vector<1x1x8xf32>
    %31 = vector.shape_cast %30 : vector<1x1x8xf32> to vector<1x8xf32>
    %32 = vector.broadcast %31 : vector<1x8xf32> to vector<16x8xf32>
    %33 = arith.addf %29, %32 : vector<16x8xf32>
    %cst_18 = arith.constant 0.353553385 : f32
    %34 = vector.broadcast %cst_18 : f32 to vector<16x8xf32>
    %35 = arith.mulf %33, %34 : vector<16x8xf32>
    %c0_19 = arith.constant 0 : index
    %c0_20 = arith.constant 0 : index
    %c0_21 = arith.constant 0 : index
    %36 = vector.load %arg5[%c0_19, %c0_20, %c0_21] : memref<4x32x8xf32, #tpu.memory_space<vmem>>, vector<1x32x8xf32>
    %37 = vector.shape_cast %36 : vector<1x32x8xf32> to vector<32x8xf32>
    %cst_22 = arith.constant dense<0.000000e+00> : vector<16x8xf32>
    %38 = tpu.matmul %25, %37, %cst_22 {dimension_numbers = #tpu.dot_dimension_numbers<[1], [0], [0], [1], [0, 0, 1, 1], [], []>} : vector<16x32xf32>, vector<32x8xf32>, vector<16x8xf32> -> vector<16x8xf32>
    %c0_23 = arith.constant 0 : index
    %c0_24 = arith.constant 0 : index
    %c0_25 = arith.constant 0 : index
    %39 = vector.load %arg8[%c0_23, %c0_24, %c0_25] : memref<4x1x8xf32, #tpu.memory_space<vmem>>, vector<1x1x8xf32>
    %40 = vector.shape_cast %39 : vector<1x1x8xf32> to vector<1x8xf32>
    %41 = vector.broadcast %40 : vector<1x8xf32> to vector<16x8xf32>
    %42 = arith.addf %38, %41 : vector<16x8xf32>
    %c0_26 = arith.constant 0 : index
    %c0_27 = arith.constant 0 : index
    %c0_28 = arith.constant 0 : index
    %43 = vector.load %arg6[%c0_26, %c0_27, %c0_28] : memref<4x32x8xf32, #tpu.memory_space<vmem>>, vector<1x32x8xf32>
    %44 = vector.shape_cast %43 : vector<1x32x8xf32> to vector<32x8xf32>
    %cst_29 = arith.constant dense<0.000000e+00> : vector<16x8xf32>
    %45 = tpu.matmul %25, %44, %cst_29 {dimension_numbers = #tpu.dot_dimension_numbers<[1], [0], [0], [1], [0, 0, 1, 1], [], []>} : vector<16x32xf32>, vector<32x8xf32>, vector<16x8xf32> -> vector<16x8xf32>
    %c0_30 = arith.constant 0 : index
    %c0_31 = arith.constant 0 : index
    %c0_32 = arith.constant 0 : index
    %46 = vector.load %arg9[%c0_30, %c0_31, %c0_32] : memref<4x1x8xf32, #tpu.memory_space<vmem>>, vector<1x1x8xf32>
    %47 = vector.shape_cast %46 : vector<1x1x8xf32> to vector<1x8xf32>
    %48 = vector.broadcast %47 : vector<1x8xf32> to vector<16x8xf32>
    %49 = arith.addf %45, %48 : vector<16x8xf32>
    %50 = vector.shape_cast %35 : vector<16x8xf32> to vector<1x16x8xf32>
    %51 = vector.shape_cast %42 : vector<16x8xf32> to vector<1x16x8xf32>
    %52 = vector.shape_cast %49 : vector<16x8xf32> to vector<1x16x8xf32>
    %cst_33 = arith.constant dense<0.000000e+00> : vector<1x16x16xf32>
    %53 = tpu.matmul %50, %51, %cst_33 {dimension_numbers = #tpu.dot_dimension_numbers<[2], [2], [1], [1], [0, 0, 0, 1, 1, 1], [0], [0]>} : vector<1x16x8xf32>, vector<1x16x8xf32>, vector<1x16x16xf32> -> vector<1x16x16xf32>
    %c0_34 = arith.constant 0 : index
    %c0_35 = arith.constant 0 : index
    %c0_36 = arith.constant 0 : index
    %c0_37 = arith.constant 0 : index
    %54 = vector.load %arg18[%c0_34, %c0_35, %c0_36, %c0_37] : memref<4x1x16x16xf32, #tpu.memory_space<vmem>>, vector<1x1x16x16xf32>
    %55 = vector.shape_cast %54 : vector<1x1x16x16xf32> to vector<1x16x16xf32>
    %56 = arith.addf %53, %55 : vector<1x16x16xf32>
    %cst_38 = arith.constant dense<0xFF800000> : vector<1x16xf32>
    %57 = vector.multi_reduction <maximumf>, %56, %cst_38 [2] : vector<1x16x16xf32> to vector<1x16xf32>
    %58 = vector.shape_cast %57 : vector<1x16xf32> to vector<1x16x1xf32>
    %59 = vector.broadcast %58 : vector<1x16x1xf32> to vector<1x16x16xf32>
    %60 = arith.subf %56, %59 : vector<1x16x16xf32>
    %61 = math.exp %60 : vector<1x16x16xf32>
    %cst_39 = arith.constant dense<0.000000e+00> : vector<1x16xf32>
    %62 = vector.multi_reduction <add>, %61, %cst_39 [2] : vector<1x16x16xf32> to vector<1x16xf32>
    %63 = vector.shape_cast %62 : vector<1x16xf32> to vector<1x16x1xf32>
    %64 = vector.broadcast %63 : vector<1x16x1xf32> to vector<1x16x16xf32>
    %65 = arith.divf %61, %64 : vector<1x16x16xf32>
    %cst_40 = arith.constant dense<0.000000e+00> : vector<1x16x8xf32>
    %66 = tpu.matmul %65, %52, %cst_40 {dimension_numbers = #tpu.dot_dimension_numbers<[2], [1], [1], [2], [0, 0, 0, 1, 1, 2], [0], [0]>} : vector<1x16x16xf32>, vector<1x16x8xf32>, vector<1x16x8xf32> -> vector<1x16x8xf32>
    %67 = vector.shape_cast %66 : vector<1x16x8xf32> to vector<16x8xf32>
    %c0_41 = arith.constant 0 : index
    %c0_42 = arith.constant 0 : index
    %c0_43 = arith.constant 0 : index
    %68 = vector.load %arg10[%c0_41, %c0_42, %c0_43] : memref<4x8x32xf32, #tpu.memory_space<vmem>>, vector<1x8x32xf32>
    %69 = vector.shape_cast %68 : vector<1x8x32xf32> to vector<8x32xf32>
    %cst_44 = arith.constant dense<0.000000e+00> : vector<16x32xf32>
    %70 = tpu.matmul %67, %69, %cst_44 {dimension_numbers = #tpu.dot_dimension_numbers<[1], [0], [0], [1], [0, 0, 1, 1], [], []>} : vector<16x8xf32>, vector<8x32xf32>, vector<16x32xf32> -> vector<16x32xf32>
    %71 = arith.addf %26, %70 : vector<16x32xf32>
    %c1 = arith.constant 1 : index
    %c0_45 = arith.constant 0 : index
    %c0_46 = arith.constant 0 : index
    %72 = vector.load %arg4[%c1, %c0_45, %c0_46] : memref<4x32x8xf32, #tpu.memory_space<vmem>>, vector<1x32x8xf32>
    %73 = vector.shape_cast %72 : vector<1x32x8xf32> to vector<32x8xf32>
    %cst_47 = arith.constant dense<0.000000e+00> : vector<16x8xf32>
    %74 = tpu.matmul %25, %73, %cst_47 {dimension_numbers = #tpu.dot_dimension_numbers<[1], [0], [0], [1], [0, 0, 1, 1], [], []>} : vector<16x32xf32>, vector<32x8xf32>, vector<16x8xf32> -> vector<16x8xf32>
    %c1_48 = arith.constant 1 : index
    %c0_49 = arith.constant 0 : index
    %c0_50 = arith.constant 0 : index
    %75 = vector.load %arg7[%c1_48, %c0_49, %c0_50] : memref<4x1x8xf32, #tpu.memory_space<vmem>>, vector<1x1x8xf32>
    %76 = vector.shape_cast %75 : vector<1x1x8xf32> to vector<1x8xf32>
    %77 = vector.broadcast %76 : vector<1x8xf32> to vector<16x8xf32>
    %78 = arith.addf %74, %77 : vector<16x8xf32>
    %cst_51 = arith.constant 0.353553385 : f32
    %79 = vector.broadcast %cst_51 : f32 to vector<16x8xf32>
    %80 = arith.mulf %78, %79 : vector<16x8xf32>
    %c1_52 = arith.constant 1 : index
    %c0_53 = arith.constant 0 : index
    %c0_54 = arith.constant 0 : index
    %81 = vector.load %arg5[%c1_52, %c0_53, %c0_54] : memref<4x32x8xf32, #tpu.memory_space<vmem>>, vector<1x32x8xf32>
    %82 = vector.shape_cast %81 : vector<1x32x8xf32> to vector<32x8xf32>
    %cst_55 = arith.constant dense<0.000000e+00> : vector<16x8xf32>
    %83 = tpu.matmul %25, %82, %cst_55 {dimension_numbers = #tpu.dot_dimension_numbers<[1], [0], [0], [1], [0, 0, 1, 1], [], []>} : vector<16x32xf32>, vector<32x8xf32>, vector<16x8xf32> -> vector<16x8xf32>
    %c1_56 = arith.constant 1 : index
    %c0_57 = arith.constant 0 : index
    %c0_58 = arith.constant 0 : index
    %84 = vector.load %arg8[%c1_56, %c0_57, %c0_58] : memref<4x1x8xf32, #tpu.memory_space<vmem>>, vector<1x1x8xf32>
    %85 = vector.shape_cast %84 : vector<1x1x8xf32> to vector<1x8xf32>
    %86 = vector.broadcast %85 : vector<1x8xf32> to vector<16x8xf32>
    %87 = arith.addf %83, %86 : vector<16x8xf32>
    %c1_59 = arith.constant 1 : index
    %c0_60 = arith.constant 0 : index
    %c0_61 = arith.constant 0 : index
    %88 = vector.load %arg6[%c1_59, %c0_60, %c0_61] : memref<4x32x8xf32, #tpu.memory_space<vmem>>, vector<1x32x8xf32>
    %89 = vector.shape_cast %88 : vector<1x32x8xf32> to vector<32x8xf32>
    %cst_62 = arith.constant dense<0.000000e+00> : vector<16x8xf32>
    %90 = tpu.matmul %25, %89, %cst_62 {dimension_numbers = #tpu.dot_dimension_numbers<[1], [0], [0], [1], [0, 0, 1, 1], [], []>} : vector<16x32xf32>, vector<32x8xf32>, vector<16x8xf32> -> vector<16x8xf32>
    %c1_63 = arith.constant 1 : index
    %c0_64 = arith.constant 0 : index
    %c0_65 = arith.constant 0 : index
    %91 = vector.load %arg9[%c1_63, %c0_64, %c0_65] : memref<4x1x8xf32, #tpu.memory_space<vmem>>, vector<1x1x8xf32>
    %92 = vector.shape_cast %91 : vector<1x1x8xf32> to vector<1x8xf32>
    %93 = vector.broadcast %92 : vector<1x8xf32> to vector<16x8xf32>
    %94 = arith.addf %90, %93 : vector<16x8xf32>
    %95 = vector.shape_cast %80 : vector<16x8xf32> to vector<1x16x8xf32>
    %96 = vector.shape_cast %87 : vector<16x8xf32> to vector<1x16x8xf32>
    %97 = vector.shape_cast %94 : vector<16x8xf32> to vector<1x16x8xf32>
    %cst_66 = arith.constant dense<0.000000e+00> : vector<1x16x16xf32>
    %98 = tpu.matmul %95, %96, %cst_66 {dimension_numbers = #tpu.dot_dimension_numbers<[2], [2], [1], [1], [0, 0, 0, 1, 1, 1], [0], [0]>} : vector<1x16x8xf32>, vector<1x16x8xf32>, vector<1x16x16xf32> -> vector<1x16x16xf32>
    %c1_67 = arith.constant 1 : index
    %c0_68 = arith.constant 0 : index
    %c0_69 = arith.constant 0 : index
    %c0_70 = arith.constant 0 : index
    %99 = vector.load %arg18[%c1_67, %c0_68, %c0_69, %c0_70] : memref<4x1x16x16xf32, #tpu.memory_space<vmem>>, vector<1x1x16x16xf32>
    %100 = vector.shape_cast %99 : vector<1x1x16x16xf32> to vector<1x16x16xf32>
    %101 = arith.addf %98, %100 : vector<1x16x16xf32>
    %cst_71 = arith.constant dense<0xFF800000> : vector<1x16xf32>
    %102 = vector.multi_reduction <maximumf>, %101, %cst_71 [2] : vector<1x16x16xf32> to vector<1x16xf32>
    %103 = vector.shape_cast %102 : vector<1x16xf32> to vector<1x16x1xf32>
    %104 = vector.broadcast %103 : vector<1x16x1xf32> to vector<1x16x16xf32>
    %105 = arith.subf %101, %104 : vector<1x16x16xf32>
    %106 = math.exp %105 : vector<1x16x16xf32>
    %cst_72 = arith.constant dense<0.000000e+00> : vector<1x16xf32>
    %107 = vector.multi_reduction <add>, %106, %cst_72 [2] : vector<1x16x16xf32> to vector<1x16xf32>
    %108 = vector.shape_cast %107 : vector<1x16xf32> to vector<1x16x1xf32>
    %109 = vector.broadcast %108 : vector<1x16x1xf32> to vector<1x16x16xf32>
    %110 = arith.divf %106, %109 : vector<1x16x16xf32>
    %cst_73 = arith.constant dense<0.000000e+00> : vector<1x16x8xf32>
    %111 = tpu.matmul %110, %97, %cst_73 {dimension_numbers = #tpu.dot_dimension_numbers<[2], [1], [1], [2], [0, 0, 0, 1, 1, 2], [0], [0]>} : vector<1x16x16xf32>, vector<1x16x8xf32>, vector<1x16x8xf32> -> vector<1x16x8xf32>
    %112 = vector.shape_cast %111 : vector<1x16x8xf32> to vector<16x8xf32>
    %c1_74 = arith.constant 1 : index
    %c0_75 = arith.constant 0 : index
    %c0_76 = arith.constant 0 : index
    %113 = vector.load %arg10[%c1_74, %c0_75, %c0_76] : memref<4x8x32xf32, #tpu.memory_space<vmem>>, vector<1x8x32xf32>
    %114 = vector.shape_cast %113 : vector<1x8x32xf32> to vector<8x32xf32>
    %cst_77 = arith.constant dense<0.000000e+00> : vector<16x32xf32>
    %115 = tpu.matmul %112, %114, %cst_77 {dimension_numbers = #tpu.dot_dimension_numbers<[1], [0], [0], [1], [0, 0, 1, 1], [], []>} : vector<16x8xf32>, vector<8x32xf32>, vector<16x32xf32> -> vector<16x32xf32>
    %116 = arith.addf %71, %115 : vector<16x32xf32>
    %c2 = arith.constant 2 : index
    %c0_78 = arith.constant 0 : index
    %c0_79 = arith.constant 0 : index
    %117 = vector.load %arg4[%c2, %c0_78, %c0_79] : memref<4x32x8xf32, #tpu.memory_space<vmem>>, vector<1x32x8xf32>
    %118 = vector.shape_cast %117 : vector<1x32x8xf32> to vector<32x8xf32>
    %cst_80 = arith.constant dense<0.000000e+00> : vector<16x8xf32>
    %119 = tpu.matmul %25, %118, %cst_80 {dimension_numbers = #tpu.dot_dimension_numbers<[1], [0], [0], [1], [0, 0, 1, 1], [], []>} : vector<16x32xf32>, vector<32x8xf32>, vector<16x8xf32> -> vector<16x8xf32>
    %c2_81 = arith.constant 2 : index
    %c0_82 = arith.constant 0 : index
    %c0_83 = arith.constant 0 : index
    %120 = vector.load %arg7[%c2_81, %c0_82, %c0_83] : memref<4x1x8xf32, #tpu.memory_space<vmem>>, vector<1x1x8xf32>
    %121 = vector.shape_cast %120 : vector<1x1x8xf32> to vector<1x8xf32>
    %122 = vector.broadcast %121 : vector<1x8xf32> to vector<16x8xf32>
    %123 = arith.addf %119, %122 : vector<16x8xf32>
    %cst_84 = arith.constant 0.353553385 : f32
    %124 = vector.broadcast %cst_84 : f32 to vector<16x8xf32>
    %125 = arith.mulf %123, %124 : vector<16x8xf32>
    %c2_85 = arith.constant 2 : index
    %c0_86 = arith.constant 0 : index
    %c0_87 = arith.constant 0 : index
    %126 = vector.load %arg5[%c2_85, %c0_86, %c0_87] : memref<4x32x8xf32, #tpu.memory_space<vmem>>, vector<1x32x8xf32>
    %127 = vector.shape_cast %126 : vector<1x32x8xf32> to vector<32x8xf32>
    %cst_88 = arith.constant dense<0.000000e+00> : vector<16x8xf32>
    %128 = tpu.matmul %25, %127, %cst_88 {dimension_numbers = #tpu.dot_dimension_numbers<[1], [0], [0], [1], [0, 0, 1, 1], [], []>} : vector<16x32xf32>, vector<32x8xf32>, vector<16x8xf32> -> vector<16x8xf32>
    %c2_89 = arith.constant 2 : index
    %c0_90 = arith.constant 0 : index
    %c0_91 = arith.constant 0 : index
    %129 = vector.load %arg8[%c2_89, %c0_90, %c0_91] : memref<4x1x8xf32, #tpu.memory_space<vmem>>, vector<1x1x8xf32>
    %130 = vector.shape_cast %129 : vector<1x1x8xf32> to vector<1x8xf32>
    %131 = vector.broadcast %130 : vector<1x8xf32> to vector<16x8xf32>
    %132 = arith.addf %128, %131 : vector<16x8xf32>
    %c2_92 = arith.constant 2 : index
    %c0_93 = arith.constant 0 : index
    %c0_94 = arith.constant 0 : index
    %133 = vector.load %arg6[%c2_92, %c0_93, %c0_94] : memref<4x32x8xf32, #tpu.memory_space<vmem>>, vector<1x32x8xf32>
    %134 = vector.shape_cast %133 : vector<1x32x8xf32> to vector<32x8xf32>
    %cst_95 = arith.constant dense<0.000000e+00> : vector<16x8xf32>
    %135 = tpu.matmul %25, %134, %cst_95 {dimension_numbers = #tpu.dot_dimension_numbers<[1], [0], [0], [1], [0, 0, 1, 1], [], []>} : vector<16x32xf32>, vector<32x8xf32>, vector<16x8xf32> -> vector<16x8xf32>
    %c2_96 = arith.constant 2 : index
    %c0_97 = arith.constant 0 : index
    %c0_98 = arith.constant 0 : index
    %136 = vector.load %arg9[%c2_96, %c0_97, %c0_98] : memref<4x1x8xf32, #tpu.memory_space<vmem>>, vector<1x1x8xf32>
    %137 = vector.shape_cast %136 : vector<1x1x8xf32> to vector<1x8xf32>
    %138 = vector.broadcast %137 : vector<1x8xf32> to vector<16x8xf32>
    %139 = arith.addf %135, %138 : vector<16x8xf32>
    %140 = vector.shape_cast %125 : vector<16x8xf32> to vector<1x16x8xf32>
    %141 = vector.shape_cast %132 : vector<16x8xf32> to vector<1x16x8xf32>
    %142 = vector.shape_cast %139 : vector<16x8xf32> to vector<1x16x8xf32>
    %cst_99 = arith.constant dense<0.000000e+00> : vector<1x16x16xf32>
    %143 = tpu.matmul %140, %141, %cst_99 {dimension_numbers = #tpu.dot_dimension_numbers<[2], [2], [1], [1], [0, 0, 0, 1, 1, 1], [0], [0]>} : vector<1x16x8xf32>, vector<1x16x8xf32>, vector<1x16x16xf32> -> vector<1x16x16xf32>
    %c2_100 = arith.constant 2 : index
    %c0_101 = arith.constant 0 : index
    %c0_102 = arith.constant 0 : index
    %c0_103 = arith.constant 0 : index
    %144 = vector.load %arg18[%c2_100, %c0_101, %c0_102, %c0_103] : memref<4x1x16x16xf32, #tpu.memory_space<vmem>>, vector<1x1x16x16xf32>
    %145 = vector.shape_cast %144 : vector<1x1x16x16xf32> to vector<1x16x16xf32>
    %146 = arith.addf %143, %145 : vector<1x16x16xf32>
    %cst_104 = arith.constant dense<0xFF800000> : vector<1x16xf32>
    %147 = vector.multi_reduction <maximumf>, %146, %cst_104 [2] : vector<1x16x16xf32> to vector<1x16xf32>
    %148 = vector.shape_cast %147 : vector<1x16xf32> to vector<1x16x1xf32>
    %149 = vector.broadcast %148 : vector<1x16x1xf32> to vector<1x16x16xf32>
    %150 = arith.subf %146, %149 : vector<1x16x16xf32>
    %151 = math.exp %150 : vector<1x16x16xf32>
    %cst_105 = arith.constant dense<0.000000e+00> : vector<1x16xf32>
    %152 = vector.multi_reduction <add>, %151, %cst_105 [2] : vector<1x16x16xf32> to vector<1x16xf32>
    %153 = vector.shape_cast %152 : vector<1x16xf32> to vector<1x16x1xf32>
    %154 = vector.broadcast %153 : vector<1x16x1xf32> to vector<1x16x16xf32>
    %155 = arith.divf %151, %154 : vector<1x16x16xf32>
    %cst_106 = arith.constant dense<0.000000e+00> : vector<1x16x8xf32>
    %156 = tpu.matmul %155, %142, %cst_106 {dimension_numbers = #tpu.dot_dimension_numbers<[2], [1], [1], [2], [0, 0, 0, 1, 1, 2], [0], [0]>} : vector<1x16x16xf32>, vector<1x16x8xf32>, vector<1x16x8xf32> -> vector<1x16x8xf32>
    %157 = vector.shape_cast %156 : vector<1x16x8xf32> to vector<16x8xf32>
    %c2_107 = arith.constant 2 : index
    %c0_108 = arith.constant 0 : index
    %c0_109 = arith.constant 0 : index
    %158 = vector.load %arg10[%c2_107, %c0_108, %c0_109] : memref<4x8x32xf32, #tpu.memory_space<vmem>>, vector<1x8x32xf32>
    %159 = vector.shape_cast %158 : vector<1x8x32xf32> to vector<8x32xf32>
    %cst_110 = arith.constant dense<0.000000e+00> : vector<16x32xf32>
    %160 = tpu.matmul %157, %159, %cst_110 {dimension_numbers = #tpu.dot_dimension_numbers<[1], [0], [0], [1], [0, 0, 1, 1], [], []>} : vector<16x8xf32>, vector<8x32xf32>, vector<16x32xf32> -> vector<16x32xf32>
    %161 = arith.addf %116, %160 : vector<16x32xf32>
    %c3 = arith.constant 3 : index
    %c0_111 = arith.constant 0 : index
    %c0_112 = arith.constant 0 : index
    %162 = vector.load %arg4[%c3, %c0_111, %c0_112] : memref<4x32x8xf32, #tpu.memory_space<vmem>>, vector<1x32x8xf32>
    %163 = vector.shape_cast %162 : vector<1x32x8xf32> to vector<32x8xf32>
    %cst_113 = arith.constant dense<0.000000e+00> : vector<16x8xf32>
    %164 = tpu.matmul %25, %163, %cst_113 {dimension_numbers = #tpu.dot_dimension_numbers<[1], [0], [0], [1], [0, 0, 1, 1], [], []>} : vector<16x32xf32>, vector<32x8xf32>, vector<16x8xf32> -> vector<16x8xf32>
    %c3_114 = arith.constant 3 : index
    %c0_115 = arith.constant 0 : index
    %c0_116 = arith.constant 0 : index
    %165 = vector.load %arg7[%c3_114, %c0_115, %c0_116] : memref<4x1x8xf32, #tpu.memory_space<vmem>>, vector<1x1x8xf32>
    %166 = vector.shape_cast %165 : vector<1x1x8xf32> to vector<1x8xf32>
    %167 = vector.broadcast %166 : vector<1x8xf32> to vector<16x8xf32>
    %168 = arith.addf %164, %167 : vector<16x8xf32>
    %cst_117 = arith.constant 0.353553385 : f32
    %169 = vector.broadcast %cst_117 : f32 to vector<16x8xf32>
    %170 = arith.mulf %168, %169 : vector<16x8xf32>
    %c3_118 = arith.constant 3 : index
    %c0_119 = arith.constant 0 : index
    %c0_120 = arith.constant 0 : index
    %171 = vector.load %arg5[%c3_118, %c0_119, %c0_120] : memref<4x32x8xf32, #tpu.memory_space<vmem>>, vector<1x32x8xf32>
    %172 = vector.shape_cast %171 : vector<1x32x8xf32> to vector<32x8xf32>
    %cst_121 = arith.constant dense<0.000000e+00> : vector<16x8xf32>
    %173 = tpu.matmul %25, %172, %cst_121 {dimension_numbers = #tpu.dot_dimension_numbers<[1], [0], [0], [1], [0, 0, 1, 1], [], []>} : vector<16x32xf32>, vector<32x8xf32>, vector<16x8xf32> -> vector<16x8xf32>
    %c3_122 = arith.constant 3 : index
    %c0_123 = arith.constant 0 : index
    %c0_124 = arith.constant 0 : index
    %174 = vector.load %arg8[%c3_122, %c0_123, %c0_124] : memref<4x1x8xf32, #tpu.memory_space<vmem>>, vector<1x1x8xf32>
    %175 = vector.shape_cast %174 : vector<1x1x8xf32> to vector<1x8xf32>
    %176 = vector.broadcast %175 : vector<1x8xf32> to vector<16x8xf32>
    %177 = arith.addf %173, %176 : vector<16x8xf32>
    %c3_125 = arith.constant 3 : index
    %c0_126 = arith.constant 0 : index
    %c0_127 = arith.constant 0 : index
    %178 = vector.load %arg6[%c3_125, %c0_126, %c0_127] : memref<4x32x8xf32, #tpu.memory_space<vmem>>, vector<1x32x8xf32>
    %179 = vector.shape_cast %178 : vector<1x32x8xf32> to vector<32x8xf32>
    %cst_128 = arith.constant dense<0.000000e+00> : vector<16x8xf32>
    %180 = tpu.matmul %25, %179, %cst_128 {dimension_numbers = #tpu.dot_dimension_numbers<[1], [0], [0], [1], [0, 0, 1, 1], [], []>} : vector<16x32xf32>, vector<32x8xf32>, vector<16x8xf32> -> vector<16x8xf32>
    %c3_129 = arith.constant 3 : index
    %c0_130 = arith.constant 0 : index
    %c0_131 = arith.constant 0 : index
    %181 = vector.load %arg9[%c3_129, %c0_130, %c0_131] : memref<4x1x8xf32, #tpu.memory_space<vmem>>, vector<1x1x8xf32>
    %182 = vector.shape_cast %181 : vector<1x1x8xf32> to vector<1x8xf32>
    %183 = vector.broadcast %182 : vector<1x8xf32> to vector<16x8xf32>
    %184 = arith.addf %180, %183 : vector<16x8xf32>
    %185 = vector.shape_cast %170 : vector<16x8xf32> to vector<1x16x8xf32>
    %186 = vector.shape_cast %177 : vector<16x8xf32> to vector<1x16x8xf32>
    %187 = vector.shape_cast %184 : vector<16x8xf32> to vector<1x16x8xf32>
    %cst_132 = arith.constant dense<0.000000e+00> : vector<1x16x16xf32>
    %188 = tpu.matmul %185, %186, %cst_132 {dimension_numbers = #tpu.dot_dimension_numbers<[2], [2], [1], [1], [0, 0, 0, 1, 1, 1], [0], [0]>} : vector<1x16x8xf32>, vector<1x16x8xf32>, vector<1x16x16xf32> -> vector<1x16x16xf32>
    %c3_133 = arith.constant 3 : index
    %c0_134 = arith.constant 0 : index
    %c0_135 = arith.constant 0 : index
    %c0_136 = arith.constant 0 : index
    %189 = vector.load %arg18[%c3_133, %c0_134, %c0_135, %c0_136] : memref<4x1x16x16xf32, #tpu.memory_space<vmem>>, vector<1x1x16x16xf32>
    %190 = vector.shape_cast %189 : vector<1x1x16x16xf32> to vector<1x16x16xf32>
    %191 = arith.addf %188, %190 : vector<1x16x16xf32>
    %cst_137 = arith.constant dense<0xFF800000> : vector<1x16xf32>
    %192 = vector.multi_reduction <maximumf>, %191, %cst_137 [2] : vector<1x16x16xf32> to vector<1x16xf32>
    %193 = vector.shape_cast %192 : vector<1x16xf32> to vector<1x16x1xf32>
    %194 = vector.broadcast %193 : vector<1x16x1xf32> to vector<1x16x16xf32>
    %195 = arith.subf %191, %194 : vector<1x16x16xf32>
    %196 = math.exp %195 : vector<1x16x16xf32>
    %cst_138 = arith.constant dense<0.000000e+00> : vector<1x16xf32>
    %197 = vector.multi_reduction <add>, %196, %cst_138 [2] : vector<1x16x16xf32> to vector<1x16xf32>
    %198 = vector.shape_cast %197 : vector<1x16xf32> to vector<1x16x1xf32>
    %199 = vector.broadcast %198 : vector<1x16x1xf32> to vector<1x16x16xf32>
    %200 = arith.divf %196, %199 : vector<1x16x16xf32>
    %cst_139 = arith.constant dense<0.000000e+00> : vector<1x16x8xf32>
    %201 = tpu.matmul %200, %187, %cst_139 {dimension_numbers = #tpu.dot_dimension_numbers<[2], [1], [1], [2], [0, 0, 0, 1, 1, 2], [0], [0]>} : vector<1x16x16xf32>, vector<1x16x8xf32>, vector<1x16x8xf32> -> vector<1x16x8xf32>
    %202 = vector.shape_cast %201 : vector<1x16x8xf32> to vector<16x8xf32>
    %c3_140 = arith.constant 3 : index
    %c0_141 = arith.constant 0 : index
    %c0_142 = arith.constant 0 : index
    %203 = vector.load %arg10[%c3_140, %c0_141, %c0_142] : memref<4x8x32xf32, #tpu.memory_space<vmem>>, vector<1x8x32xf32>
    %204 = vector.shape_cast %203 : vector<1x8x32xf32> to vector<8x32xf32>
    %cst_143 = arith.constant dense<0.000000e+00> : vector<16x32xf32>
    %205 = tpu.matmul %202, %204, %cst_143 {dimension_numbers = #tpu.dot_dimension_numbers<[1], [0], [0], [1], [0, 0, 1, 1], [], []>} : vector<16x8xf32>, vector<8x32xf32>, vector<16x32xf32> -> vector<16x32xf32>
    %206 = arith.addf %161, %205 : vector<16x32xf32>
    %207 = arith.addf %1, %206 : vector<16x32xf32>
    %c0_144 = arith.constant 0 : index
    %c0_145 = arith.constant 0 : index
    %208 = vector.load %arg11[%c0_144, %c0_145] : memref<1x32xf32, #tpu.memory_space<vmem>>, vector<1x32xf32>
    %209 = vector.broadcast %208 : vector<1x32xf32> to vector<16x32xf32>
    %210 = arith.addf %207, %209 : vector<16x32xf32>
    %c0_146 = arith.constant 0 : index
    %c0_147 = arith.constant 0 : index
    %211 = vector.load %arg12[%c0_146, %c0_147] : memref<1x32xf32, #tpu.memory_space<vmem>>, vector<1x32xf32>
    %c0_148 = arith.constant 0 : index
    %c0_149 = arith.constant 0 : index
    %212 = vector.load %arg13[%c0_148, %c0_149] : memref<1x32xf32, #tpu.memory_space<vmem>>, vector<1x32xf32>
    %cst_150 = arith.constant dense<0.000000e+00> : vector<16xf32>
    %213 = vector.multi_reduction <add>, %210, %cst_150 [1] : vector<16x32xf32> to vector<16xf32>
    %214 = vector.shape_cast %213 : vector<16xf32> to vector<16x1xf32>
    %cst_151 = arith.constant 3.200000e+01 : f32
    %215 = vector.broadcast %cst_151 : f32 to vector<16x1xf32>
    %216 = arith.divf %214, %215 : vector<16x1xf32>
    %217 = vector.broadcast %216 : vector<16x1xf32> to vector<16x32xf32>
    %218 = arith.subf %210, %217 : vector<16x32xf32>
    %219 = arith.mulf %218, %218 : vector<16x32xf32>
    %cst_152 = arith.constant dense<0.000000e+00> : vector<16xf32>
    %220 = vector.multi_reduction <add>, %219, %cst_152 [1] : vector<16x32xf32> to vector<16xf32>
    %221 = vector.shape_cast %220 : vector<16xf32> to vector<16x1xf32>
    %cst_153 = arith.constant 3.200000e+01 : f32
    %222 = vector.broadcast %cst_153 : f32 to vector<16x1xf32>
    %223 = arith.divf %221, %222 : vector<16x1xf32>
    %224 = vector.broadcast %216 : vector<16x1xf32> to vector<16x32xf32>
    %225 = arith.subf %210, %224 : vector<16x32xf32>
    %cst_154 = arith.constant 9.99999974E-6 : f32
    %226 = vector.broadcast %cst_154 : f32 to vector<16x1xf32>
    %227 = arith.addf %223, %226 : vector<16x1xf32>
    %228 = math.rsqrt %227 : vector<16x1xf32>
    %229 = vector.broadcast %228 : vector<16x1xf32> to vector<16x32xf32>
    %230 = arith.mulf %225, %229 : vector<16x32xf32>
    %231 = vector.broadcast %211 : vector<1x32xf32> to vector<16x32xf32>
    %232 = arith.mulf %230, %231 : vector<16x32xf32>
    %233 = vector.broadcast %212 : vector<1x32xf32> to vector<16x32xf32>
    %234 = arith.addf %232, %233 : vector<16x32xf32>
    %c0_155 = arith.constant 0 : index
    %c0_156 = arith.constant 0 : index
    %235 = vector.load %arg14[%c0_155, %c0_156] : memref<32x128xf32, #tpu.memory_space<vmem>>, vector<32x128xf32>
    %cst_157 = arith.constant dense<0.000000e+00> : vector<16x128xf32>
    %236 = tpu.matmul %234, %235, %cst_157 {dimension_numbers = #tpu.dot_dimension_numbers<[1], [0], [0], [1], [0, 0, 1, 1], [], []>} : vector<16x32xf32>, vector<32x128xf32>, vector<16x128xf32> -> vector<16x128xf32>
    %c0_158 = arith.constant 0 : index
    %c0_159 = arith.constant 0 : index
    %237 = vector.load %arg15[%c0_158, %c0_159] : memref<1x128xf32, #tpu.memory_space<vmem>>, vector<1x128xf32>
    %238 = vector.broadcast %237 : vector<1x128xf32> to vector<16x128xf32>
    %239 = arith.addf %236, %238 : vector<16x128xf32>
    %cst_160 = arith.constant 5.000000e-01 : f32
    %240 = vector.broadcast %cst_160 : f32 to vector<16x128xf32>
    %241 = arith.mulf %240, %239 : vector<16x128xf32>
    %cst_161 = arith.constant 4.471500e-02 : f32
    %242 = vector.broadcast %cst_161 : f32 to vector<16x128xf32>
    %243 = arith.mulf %242, %239 : vector<16x128xf32>
    %244 = arith.mulf %243, %239 : vector<16x128xf32>
    %245 = arith.mulf %244, %239 : vector<16x128xf32>
    %246 = arith.addf %239, %245 : vector<16x128xf32>
    %cst_162 = arith.constant 0.797884583 : f32
    %247 = vector.broadcast %cst_162 : f32 to vector<16x128xf32>
    %248 = arith.mulf %247, %246 : vector<16x128xf32>
    %249 = math.tanh %248 : vector<16x128xf32>
    %cst_163 = arith.constant 1.000000e+00 : f32
    %250 = vector.broadcast %cst_163 : f32 to vector<16x128xf32>
    %251 = arith.addf %250, %249 : vector<16x128xf32>
    %252 = arith.mulf %241, %251 : vector<16x128xf32>
    %c0_164 = arith.constant 0 : index
    %c0_165 = arith.constant 0 : index
    %253 = vector.load %arg16[%c0_164, %c0_165] : memref<128x32xf32, #tpu.memory_space<vmem>>, vector<128x32xf32>
    %cst_166 = arith.constant dense<0.000000e+00> : vector<16x32xf32>
    %254 = tpu.matmul %252, %253, %cst_166 {dimension_numbers = #tpu.dot_dimension_numbers<[1], [0], [0], [1], [0, 0, 1, 1], [], []>} : vector<16x128xf32>, vector<128x32xf32>, vector<16x32xf32> -> vector<16x32xf32>
    %c0_167 = arith.constant 0 : index
    %c0_168 = arith.constant 0 : index
    %255 = vector.load %arg17[%c0_167, %c0_168] : memref<1x32xf32, #tpu.memory_space<vmem>>, vector<1x32xf32>
    %256 = vector.broadcast %255 : vector<1x32xf32> to vector<16x32xf32>
    %257 = arith.addf %254, %256 : vector<16x32xf32>
    %258 = arith.addf %210, %257 : vector<16x32xf32>
    %c0_169 = arith.constant 0 : index
    %c0_170 = arith.constant 0 : index
    %c0_171 = arith.constant 0 : index
    %259 = vector.load %arg19[%c0_169, %c0_170, %c0_171] : memref<1x16x32xf32, #tpu.memory_space<vmem>>, vector<1x16x32xf32>
    %260 = vector.shape_cast %259 : vector<1x16x32xf32> to vector<16x32xf32>
    %261 = vector.shape_cast %258 : vector<16x32xf32> to vector<1x16x32xf32>
    tpu.vector_store %arg19[%c0_169, %c0_170, %c0_171], %261 {strides = array<i32>} : memref<1x16x32xf32, #tpu.memory_space<vmem>>, vector<1x16x32xf32>,
    return
  }
  func.func @transform_0(%arg0: i32) -> (i32, i32, i32) {
    %c0_i32 = arith.constant 0 : i32
    %c0_i32_0 = arith.constant 0 : i32
    %c0_i32_1 = arith.constant 0 : i32
    return %arg0, %c0_i32, %c0_i32_0 : i32, i32, i32
  }
  func.func @transform_1(%arg0: i32) -> (i32, i32) {
    %c0_i32 = arith.constant 0 : i32
    %c0_i32_0 = arith.constant 0 : i32
    %c0_i32_1 = arith.constant 0 : i32
    return %c0_i32, %c0_i32_0 : i32, i32
  }
  func.func @transform_2(%arg0: i32) -> (i32, i32) {
    %c0_i32 = arith.constant 0 : i32
    %c0_i32_0 = arith.constant 0 : i32
    %c0_i32_1 = arith.constant 0 : i32
    return %c0_i32, %c0_i32_0 : i32, i32
  }
  func.func @transform_3(%arg0: i32) -> (i32, i32, i32) {
    %c0_i32 = arith.constant 0 : i32
    %c0_i32_0 = arith.constant 0 : i32
    %c0_i32_1 = arith.constant 0 : i32
    %c0_i32_2 = arith.constant 0 : i32
    return %c0_i32, %c0_i32_0, %c0_i32_1 : i32, i32, i32
  }
  func.func @transform_4(%arg0: i32) -> (i32, i32, i32) {
    %c0_i32 = arith.constant 0 : i32
    %c0_i32_0 = arith.constant 0 : i32
    %c0_i32_1 = arith.constant 0 : i32
    %c0_i32_2 = arith.constant 0 : i32
    return %c0_i32, %c0_i32_0, %c0_i32_1 : i32, i32, i32
  }
  func.func @transform_5(%arg0: i32) -> (i32, i32, i32) {
    %c0_i32 = arith.constant 0 : i32
    %c0_i32_0 = arith.constant 0 : i32
    %c0_i32_1 = arith.constant 0 : i32
    %c0_i32_2 = arith.constant 0 : i32
    return %c0_i32, %c0_i32_0, %c0_i32_1 : i32, i32, i32
  }
  func.func @transform_6(%arg0: i32) -> (i32, i32, i32) {
    %c0_i32 = arith.constant 0 : i32
    %c0_i32_0 = arith.constant 0 : i32
    %c0_i32_1 = arith.constant 0 : i32
    %c0_i32_2 = arith.constant 0 : i32
    return %c0_i32, %c0_i32_0, %c0_i32_1 : i32, i32, i32
  }
  func.func @transform_7(%arg0: i32) -> (i32, i32, i32) {
    %c0_i32 = arith.constant 0 : i32
    %c0_i32_0 = arith.constant 0 : i32
    %c0_i32_1 = arith.constant 0 : i32
    %c0_i32_2 = arith.constant 0 : i32
    return %c0_i32, %c0_i32_0, %c0_i32_1 : i32, i32, i32
  }
  func.func @transform_8(%arg0: i32) -> (i32, i32, i32) {
    %c0_i32 = arith.constant 0 : i32
    %c0_i32_0 = arith.constant 0 : i32
    %c0_i32_1 = arith.constant 0 : i32
    %c0_i32_2 = arith.constant 0 : i32
    return %c0_i32, %c0_i32_0, %c0_i32_1 : i32, i32, i32
  }
  func.func @transform_9(%arg0: i32) -> (i32, i32, i32) {
    %c0_i32 = arith.constant 0 : i32
    %c0_i32_0 = arith.constant 0 : i32
    %c0_i32_1 = arith.constant 0 : i32
    %c0_i32_2 = arith.constant 0 : i32
    return %c0_i32, %c0_i32_0, %c0_i32_1 : i32, i32, i32
  }
  func.func @transform_10(%arg0: i32) -> (i32, i32) {
    %c0_i32 = arith.constant 0 : i32
    %c0_i32_0 = arith.constant 0 : i32
    %c0_i32_1 = arith.constant 0 : i32
    return %c0_i32, %c0_i32_0 : i32, i32
  }
  func.func @transform_11(%arg0: i32) -> (i32, i32) {
    %c0_i32 = arith.constant 0 : i32
    %c0_i32_0 = arith.constant 0 : i32
    %c0_i32_1 = arith.constant 0 : i32
    return %c0_i32, %c0_i32_0 : i32, i32
  }
  func.func @transform_12(%arg0: i32) -> (i32, i32) {
    %c0_i32 = arith.constant 0 : i32
    %c0_i32_0 = arith.constant 0 : i32
    %c0_i32_1 = arith.constant 0 : i32
    return %c0_i32, %c0_i32_0 : i32, i32
  }
  func.func @transform_13(%arg0: i32) -> (i32, i32) {
    %c0_i32 = arith.constant 0 : i32
    %c0_i32_0 = arith.constant 0 : i32
    %c0_i32_1 = arith.constant 0 : i32
    return %c0_i32, %c0_i32_0 : i32, i32
  }
  func.func @transform_14(%arg0: i32) -> (i32, i32) {
    %c0_i32 = arith.constant 0 : i32
    %c0_i32_0 = arith.constant 0 : i32
    %c0_i32_1 = arith.constant 0 : i32
    return %c0_i32, %c0_i32_0 : i32, i32
  }
  func.func @transform_15(%arg0: i32) -> (i32, i32) {
    %c0_i32 = arith.constant 0 : i32
    %c0_i32_0 = arith.constant 0 : i32
    %c0_i32_1 = arith.constant 0 : i32
    return %c0_i32, %c0_i32_0 : i32, i32
  }
  func.func @transform_16(%arg0: i32) -> (i32, i32) {
    %c0_i32 = arith.constant 0 : i32
    %c0_i32_0 = arith.constant 0 : i32
    %c0_i32_1 = arith.constant 0 : i32
    return %c0_i32, %c0_i32_0 : i32, i32
  }
  func.func @transform_17(%arg0: i32) -> (i32, i32, i32, i32) {
    %c0_i32 = arith.constant 0 : i32
    %c0_i32_0 = arith.constant 0 : i32
    %c0_i32_1 = arith.constant 0 : i32
    %c0_i32_2 = arith.constant 0 : i32
    %c0_i32_3 = arith.constant 0 : i32
    return %c0_i32, %c0_i32_0, %c0_i32_1, %c0_i32_2 : i32, i32, i32, i32
  }
  func.func @transform_18(%arg0: i32) -> (i32, i32, i32) {
    %c0_i32 = arith.constant 0 : i32
    %c0_i32_0 = arith.constant 0 : i32
    %c0_i32_1 = arith.constant 0 : i32
    return %arg0, %c0_i32, %c0_i32_0 : i32, i32, i32
  }
}

module attributes {stable_mosaic.version = 11 : i64} {
  func.func @_decoder_kernel(%arg0: i32, %arg1: memref<1x32x16xf32, #tpu.memory_space<vmem>>, %arg2: memref<32x1xf32, #tpu.memory_space<vmem>>, %arg3: memref<32x1xf32, #tpu.memory_space<vmem>>, %arg4: memref<9x16x16xf32, #tpu.memory_space<vmem>>, %arg5: memref<9x256x32xf32, #tpu.memory_space<vmem>>, %arg6: memref<256x1xf32, #tpu.memory_space<vmem>>, %arg7: memref<16x256xf32, #tpu.memory_space<vmem>>, %arg8: memref<1x256xf32, #tpu.memory_space<vmem>>, %arg9: memref<1x1xf32, #tpu.memory_space<vmem>>, %arg10: memref<1x1x256xf32, #tpu.memory_space<vmem>>) attributes {dimension_semantics = [#tpu.dimension_semantics<parallel>], iteration_bounds = array<i64: 2>, scalar_prefetch = 0 : i64, scratch_operands = 0 : i64, tpu.core_type = #tpu.core_type<tc>, window_params = [{transform_indices = @transform_0, window_bounds = array<i64: 1, 32, 16>}, {pipeline_mode = #tpu.pipeline_mode<synchronous>, transform_indices = @transform_1, window_bounds = array<i64: 32, 1>}, {pipeline_mode = #tpu.pipeline_mode<synchronous>, transform_indices = @transform_2, window_bounds = array<i64: 32, 1>}, {pipeline_mode = #tpu.pipeline_mode<synchronous>, transform_indices = @transform_3, window_bounds = array<i64: 9, 16, 16>}, {pipeline_mode = #tpu.pipeline_mode<synchronous>, transform_indices = @transform_4, window_bounds = array<i64: 9, 256, 32>}, {pipeline_mode = #tpu.pipeline_mode<synchronous>, transform_indices = @transform_5, window_bounds = array<i64: 256, 1>}, {pipeline_mode = #tpu.pipeline_mode<synchronous>, transform_indices = @transform_6, window_bounds = array<i64: 16, 256>}, {pipeline_mode = #tpu.pipeline_mode<synchronous>, transform_indices = @transform_7, window_bounds = array<i64: 1, 256>}, {pipeline_mode = #tpu.pipeline_mode<synchronous>, transform_indices = @transform_8, window_bounds = array<i64: 1, 1>}, {transform_indices = @transform_9, window_bounds = array<i64: 1, 1, 256>}]} {
    %c0 = arith.constant 0 : index
    %c0_0 = arith.constant 0 : index
    %c0_1 = arith.constant 0 : index
    %0 = vector.load %arg1[%c0, %c0_0, %c0_1] : memref<1x32x16xf32, #tpu.memory_space<vmem>>, vector<1x32x16xf32>
    %1 = vector.shape_cast %0 : vector<1x32x16xf32> to vector<32x16xf32>
    %cst = arith.constant dense<0.000000e+00> : vector<16xf32>
    %2 = vector.multi_reduction <add>, %1, %cst [0] : vector<32x16xf32> to vector<16xf32>
    %3 = vector.shape_cast %2 : vector<16xf32> to vector<1x16xf32>
    %cst_2 = arith.constant 3.200000e+01 : f32
    %4 = vector.broadcast %cst_2 : f32 to vector<1x16xf32>
    %5 = arith.divf %3, %4 : vector<1x16xf32>
    %6 = vector.broadcast %5 : vector<1x16xf32> to vector<32x16xf32>
    %7 = arith.subf %1, %6 : vector<32x16xf32>
    %8 = arith.mulf %7, %7 : vector<32x16xf32>
    %cst_3 = arith.constant dense<0.000000e+00> : vector<16xf32>
    %9 = vector.multi_reduction <add>, %8, %cst_3 [0] : vector<32x16xf32> to vector<16xf32>
    %10 = vector.shape_cast %9 : vector<16xf32> to vector<1x16xf32>
    %cst_4 = arith.constant 3.200000e+01 : f32
    %11 = vector.broadcast %cst_4 : f32 to vector<1x16xf32>
    %12 = arith.divf %10, %11 : vector<1x16xf32>
    %13 = vector.broadcast %5 : vector<1x16xf32> to vector<32x16xf32>
    %14 = arith.subf %1, %13 : vector<32x16xf32>
    %cst_5 = arith.constant 9.99999974E-6 : f32
    %15 = vector.broadcast %cst_5 : f32 to vector<1x16xf32>
    %16 = arith.addf %12, %15 : vector<1x16xf32>
    %17 = math.rsqrt %16 : vector<1x16xf32>
    %18 = vector.broadcast %17 : vector<1x16xf32> to vector<32x16xf32>
    %19 = arith.mulf %14, %18 : vector<32x16xf32>
    %c0_6 = arith.constant 0 : index
    %c0_7 = arith.constant 0 : index
    %20 = vector.load %arg2[%c0_6, %c0_7] : memref<32x1xf32, #tpu.memory_space<vmem>>, vector<32x1xf32>
    %21 = vector.broadcast %20 : vector<32x1xf32> to vector<32x16xf32>
    %22 = arith.mulf %19, %21 : vector<32x16xf32>
    %c0_8 = arith.constant 0 : index
    %c0_9 = arith.constant 0 : index
    %23 = vector.load %arg3[%c0_8, %c0_9] : memref<32x1xf32, #tpu.memory_space<vmem>>, vector<32x1xf32>
    %24 = vector.broadcast %23 : vector<32x1xf32> to vector<32x16xf32>
    %25 = arith.addf %22, %24 : vector<32x16xf32>
    %cst_10 = arith.constant 0.000000e+00 : f32
    %26 = vector.broadcast %cst_10 : f32 to vector<256x16xf32>
    %c0_11 = arith.constant 0 : index
    %c0_12 = arith.constant 0 : index
    %c0_13 = arith.constant 0 : index
    %27 = vector.load %arg4[%c0_11, %c0_12, %c0_13] : memref<9x16x16xf32, #tpu.memory_space<vmem>>, vector<1x16x16xf32>
    %28 = vector.shape_cast %27 : vector<1x16x16xf32> to vector<16x16xf32>
    %cst_14 = arith.constant dense<0.000000e+00> : vector<32x16xf32>
    %29 = tpu.matmul %25, %28, %cst_14 {dimension_numbers = #tpu.dot_dimension_numbers<[1], [0], [0], [1], [0, 0, 1, 1], [], []>} : vector<32x16xf32>, vector<16x16xf32>, vector<32x16xf32> -> vector<32x16xf32>
    %c0_15 = arith.constant 0 : index
    %c0_16 = arith.constant 0 : index
    %c0_17 = arith.constant 0 : index
    %30 = vector.load %arg5[%c0_15, %c0_16, %c0_17] : memref<9x256x32xf32, #tpu.memory_space<vmem>>, vector<1x256x32xf32>
    %31 = vector.shape_cast %30 : vector<1x256x32xf32> to vector<256x32xf32>
    %cst_18 = arith.constant dense<0.000000e+00> : vector<256x16xf32>
    %32 = tpu.matmul %31, %29, %cst_18 {dimension_numbers = #tpu.dot_dimension_numbers<[1], [0], [0], [1], [0, 0, 1, 1], [], []>} : vector<256x32xf32>, vector<32x16xf32>, vector<256x16xf32> -> vector<256x16xf32>
    %33 = arith.addf %26, %32 : vector<256x16xf32>
    %c1 = arith.constant 1 : index
    %c0_19 = arith.constant 0 : index
    %c0_20 = arith.constant 0 : index
    %34 = vector.load %arg4[%c1, %c0_19, %c0_20] : memref<9x16x16xf32, #tpu.memory_space<vmem>>, vector<1x16x16xf32>
    %35 = vector.shape_cast %34 : vector<1x16x16xf32> to vector<16x16xf32>
    %cst_21 = arith.constant dense<0.000000e+00> : vector<32x16xf32>
    %36 = tpu.matmul %25, %35, %cst_21 {dimension_numbers = #tpu.dot_dimension_numbers<[1], [0], [0], [1], [0, 0, 1, 1], [], []>} : vector<32x16xf32>, vector<16x16xf32>, vector<32x16xf32> -> vector<32x16xf32>
    %c1_22 = arith.constant 1 : index
    %c0_23 = arith.constant 0 : index
    %c0_24 = arith.constant 0 : index
    %37 = vector.load %arg5[%c1_22, %c0_23, %c0_24] : memref<9x256x32xf32, #tpu.memory_space<vmem>>, vector<1x256x32xf32>
    %38 = vector.shape_cast %37 : vector<1x256x32xf32> to vector<256x32xf32>
    %cst_25 = arith.constant dense<0.000000e+00> : vector<256x16xf32>
    %39 = tpu.matmul %38, %36, %cst_25 {dimension_numbers = #tpu.dot_dimension_numbers<[1], [0], [0], [1], [0, 0, 1, 1], [], []>} : vector<256x32xf32>, vector<32x16xf32>, vector<256x16xf32> -> vector<256x16xf32>
    %40 = arith.addf %33, %39 : vector<256x16xf32>
    %c2 = arith.constant 2 : index
    %c0_26 = arith.constant 0 : index
    %c0_27 = arith.constant 0 : index
    %41 = vector.load %arg4[%c2, %c0_26, %c0_27] : memref<9x16x16xf32, #tpu.memory_space<vmem>>, vector<1x16x16xf32>
    %42 = vector.shape_cast %41 : vector<1x16x16xf32> to vector<16x16xf32>
    %cst_28 = arith.constant dense<0.000000e+00> : vector<32x16xf32>
    %43 = tpu.matmul %25, %42, %cst_28 {dimension_numbers = #tpu.dot_dimension_numbers<[1], [0], [0], [1], [0, 0, 1, 1], [], []>} : vector<32x16xf32>, vector<16x16xf32>, vector<32x16xf32> -> vector<32x16xf32>
    %c2_29 = arith.constant 2 : index
    %c0_30 = arith.constant 0 : index
    %c0_31 = arith.constant 0 : index
    %44 = vector.load %arg5[%c2_29, %c0_30, %c0_31] : memref<9x256x32xf32, #tpu.memory_space<vmem>>, vector<1x256x32xf32>
    %45 = vector.shape_cast %44 : vector<1x256x32xf32> to vector<256x32xf32>
    %cst_32 = arith.constant dense<0.000000e+00> : vector<256x16xf32>
    %46 = tpu.matmul %45, %43, %cst_32 {dimension_numbers = #tpu.dot_dimension_numbers<[1], [0], [0], [1], [0, 0, 1, 1], [], []>} : vector<256x32xf32>, vector<32x16xf32>, vector<256x16xf32> -> vector<256x16xf32>
    %47 = arith.addf %40, %46 : vector<256x16xf32>
    %c3 = arith.constant 3 : index
    %c0_33 = arith.constant 0 : index
    %c0_34 = arith.constant 0 : index
    %48 = vector.load %arg4[%c3, %c0_33, %c0_34] : memref<9x16x16xf32, #tpu.memory_space<vmem>>, vector<1x16x16xf32>
    %49 = vector.shape_cast %48 : vector<1x16x16xf32> to vector<16x16xf32>
    %cst_35 = arith.constant dense<0.000000e+00> : vector<32x16xf32>
    %50 = tpu.matmul %25, %49, %cst_35 {dimension_numbers = #tpu.dot_dimension_numbers<[1], [0], [0], [1], [0, 0, 1, 1], [], []>} : vector<32x16xf32>, vector<16x16xf32>, vector<32x16xf32> -> vector<32x16xf32>
    %c3_36 = arith.constant 3 : index
    %c0_37 = arith.constant 0 : index
    %c0_38 = arith.constant 0 : index
    %51 = vector.load %arg5[%c3_36, %c0_37, %c0_38] : memref<9x256x32xf32, #tpu.memory_space<vmem>>, vector<1x256x32xf32>
    %52 = vector.shape_cast %51 : vector<1x256x32xf32> to vector<256x32xf32>
    %cst_39 = arith.constant dense<0.000000e+00> : vector<256x16xf32>
    %53 = tpu.matmul %52, %50, %cst_39 {dimension_numbers = #tpu.dot_dimension_numbers<[1], [0], [0], [1], [0, 0, 1, 1], [], []>} : vector<256x32xf32>, vector<32x16xf32>, vector<256x16xf32> -> vector<256x16xf32>
    %54 = arith.addf %47, %53 : vector<256x16xf32>
    %c4 = arith.constant 4 : index
    %c0_40 = arith.constant 0 : index
    %c0_41 = arith.constant 0 : index
    %55 = vector.load %arg4[%c4, %c0_40, %c0_41] : memref<9x16x16xf32, #tpu.memory_space<vmem>>, vector<1x16x16xf32>
    %56 = vector.shape_cast %55 : vector<1x16x16xf32> to vector<16x16xf32>
    %cst_42 = arith.constant dense<0.000000e+00> : vector<32x16xf32>
    %57 = tpu.matmul %25, %56, %cst_42 {dimension_numbers = #tpu.dot_dimension_numbers<[1], [0], [0], [1], [0, 0, 1, 1], [], []>} : vector<32x16xf32>, vector<16x16xf32>, vector<32x16xf32> -> vector<32x16xf32>
    %c4_43 = arith.constant 4 : index
    %c0_44 = arith.constant 0 : index
    %c0_45 = arith.constant 0 : index
    %58 = vector.load %arg5[%c4_43, %c0_44, %c0_45] : memref<9x256x32xf32, #tpu.memory_space<vmem>>, vector<1x256x32xf32>
    %59 = vector.shape_cast %58 : vector<1x256x32xf32> to vector<256x32xf32>
    %cst_46 = arith.constant dense<0.000000e+00> : vector<256x16xf32>
    %60 = tpu.matmul %59, %57, %cst_46 {dimension_numbers = #tpu.dot_dimension_numbers<[1], [0], [0], [1], [0, 0, 1, 1], [], []>} : vector<256x32xf32>, vector<32x16xf32>, vector<256x16xf32> -> vector<256x16xf32>
    %61 = arith.addf %54, %60 : vector<256x16xf32>
    %c5 = arith.constant 5 : index
    %c0_47 = arith.constant 0 : index
    %c0_48 = arith.constant 0 : index
    %62 = vector.load %arg4[%c5, %c0_47, %c0_48] : memref<9x16x16xf32, #tpu.memory_space<vmem>>, vector<1x16x16xf32>
    %63 = vector.shape_cast %62 : vector<1x16x16xf32> to vector<16x16xf32>
    %cst_49 = arith.constant dense<0.000000e+00> : vector<32x16xf32>
    %64 = tpu.matmul %25, %63, %cst_49 {dimension_numbers = #tpu.dot_dimension_numbers<[1], [0], [0], [1], [0, 0, 1, 1], [], []>} : vector<32x16xf32>, vector<16x16xf32>, vector<32x16xf32> -> vector<32x16xf32>
    %c5_50 = arith.constant 5 : index
    %c0_51 = arith.constant 0 : index
    %c0_52 = arith.constant 0 : index
    %65 = vector.load %arg5[%c5_50, %c0_51, %c0_52] : memref<9x256x32xf32, #tpu.memory_space<vmem>>, vector<1x256x32xf32>
    %66 = vector.shape_cast %65 : vector<1x256x32xf32> to vector<256x32xf32>
    %cst_53 = arith.constant dense<0.000000e+00> : vector<256x16xf32>
    %67 = tpu.matmul %66, %64, %cst_53 {dimension_numbers = #tpu.dot_dimension_numbers<[1], [0], [0], [1], [0, 0, 1, 1], [], []>} : vector<256x32xf32>, vector<32x16xf32>, vector<256x16xf32> -> vector<256x16xf32>
    %68 = arith.addf %61, %67 : vector<256x16xf32>
    %c6 = arith.constant 6 : index
    %c0_54 = arith.constant 0 : index
    %c0_55 = arith.constant 0 : index
    %69 = vector.load %arg4[%c6, %c0_54, %c0_55] : memref<9x16x16xf32, #tpu.memory_space<vmem>>, vector<1x16x16xf32>
    %70 = vector.shape_cast %69 : vector<1x16x16xf32> to vector<16x16xf32>
    %cst_56 = arith.constant dense<0.000000e+00> : vector<32x16xf32>
    %71 = tpu.matmul %25, %70, %cst_56 {dimension_numbers = #tpu.dot_dimension_numbers<[1], [0], [0], [1], [0, 0, 1, 1], [], []>} : vector<32x16xf32>, vector<16x16xf32>, vector<32x16xf32> -> vector<32x16xf32>
    %c6_57 = arith.constant 6 : index
    %c0_58 = arith.constant 0 : index
    %c0_59 = arith.constant 0 : index
    %72 = vector.load %arg5[%c6_57, %c0_58, %c0_59] : memref<9x256x32xf32, #tpu.memory_space<vmem>>, vector<1x256x32xf32>
    %73 = vector.shape_cast %72 : vector<1x256x32xf32> to vector<256x32xf32>
    %cst_60 = arith.constant dense<0.000000e+00> : vector<256x16xf32>
    %74 = tpu.matmul %73, %71, %cst_60 {dimension_numbers = #tpu.dot_dimension_numbers<[1], [0], [0], [1], [0, 0, 1, 1], [], []>} : vector<256x32xf32>, vector<32x16xf32>, vector<256x16xf32> -> vector<256x16xf32>
    %75 = arith.addf %68, %74 : vector<256x16xf32>
    %c7 = arith.constant 7 : index
    %c0_61 = arith.constant 0 : index
    %c0_62 = arith.constant 0 : index
    %76 = vector.load %arg4[%c7, %c0_61, %c0_62] : memref<9x16x16xf32, #tpu.memory_space<vmem>>, vector<1x16x16xf32>
    %77 = vector.shape_cast %76 : vector<1x16x16xf32> to vector<16x16xf32>
    %cst_63 = arith.constant dense<0.000000e+00> : vector<32x16xf32>
    %78 = tpu.matmul %25, %77, %cst_63 {dimension_numbers = #tpu.dot_dimension_numbers<[1], [0], [0], [1], [0, 0, 1, 1], [], []>} : vector<32x16xf32>, vector<16x16xf32>, vector<32x16xf32> -> vector<32x16xf32>
    %c7_64 = arith.constant 7 : index
    %c0_65 = arith.constant 0 : index
    %c0_66 = arith.constant 0 : index
    %79 = vector.load %arg5[%c7_64, %c0_65, %c0_66] : memref<9x256x32xf32, #tpu.memory_space<vmem>>, vector<1x256x32xf32>
    %80 = vector.shape_cast %79 : vector<1x256x32xf32> to vector<256x32xf32>
    %cst_67 = arith.constant dense<0.000000e+00> : vector<256x16xf32>
    %81 = tpu.matmul %80, %78, %cst_67 {dimension_numbers = #tpu.dot_dimension_numbers<[1], [0], [0], [1], [0, 0, 1, 1], [], []>} : vector<256x32xf32>, vector<32x16xf32>, vector<256x16xf32> -> vector<256x16xf32>
    %82 = arith.addf %75, %81 : vector<256x16xf32>
    %c8 = arith.constant 8 : index
    %c0_68 = arith.constant 0 : index
    %c0_69 = arith.constant 0 : index
    %83 = vector.load %arg4[%c8, %c0_68, %c0_69] : memref<9x16x16xf32, #tpu.memory_space<vmem>>, vector<1x16x16xf32>
    %84 = vector.shape_cast %83 : vector<1x16x16xf32> to vector<16x16xf32>
    %cst_70 = arith.constant dense<0.000000e+00> : vector<32x16xf32>
    %85 = tpu.matmul %25, %84, %cst_70 {dimension_numbers = #tpu.dot_dimension_numbers<[1], [0], [0], [1], [0, 0, 1, 1], [], []>} : vector<32x16xf32>, vector<16x16xf32>, vector<32x16xf32> -> vector<32x16xf32>
    %c8_71 = arith.constant 8 : index
    %c0_72 = arith.constant 0 : index
    %c0_73 = arith.constant 0 : index
    %86 = vector.load %arg5[%c8_71, %c0_72, %c0_73] : memref<9x256x32xf32, #tpu.memory_space<vmem>>, vector<1x256x32xf32>
    %87 = vector.shape_cast %86 : vector<1x256x32xf32> to vector<256x32xf32>
    %cst_74 = arith.constant dense<0.000000e+00> : vector<256x16xf32>
    %88 = tpu.matmul %87, %85, %cst_74 {dimension_numbers = #tpu.dot_dimension_numbers<[1], [0], [0], [1], [0, 0, 1, 1], [], []>} : vector<256x32xf32>, vector<32x16xf32>, vector<256x16xf32> -> vector<256x16xf32>
    %89 = arith.addf %82, %88 : vector<256x16xf32>
    %c0_75 = arith.constant 0 : index
    %c0_76 = arith.constant 0 : index
    %90 = vector.load %arg6[%c0_75, %c0_76] : memref<256x1xf32, #tpu.memory_space<vmem>>, vector<256x1xf32>
    %91 = vector.broadcast %90 : vector<256x1xf32> to vector<256x16xf32>
    %92 = arith.addf %89, %91 : vector<256x16xf32>
    %cst_77 = arith.constant 0.000000e+00 : f32
    %93 = vector.broadcast %cst_77 : f32 to vector<256x16xf32>
    %94 = arith.maximumf %92, %93 : vector<256x16xf32>
    %c0_78 = arith.constant 0 : index
    %c0_79 = arith.constant 0 : index
    %95 = vector.load %arg8[%c0_78, %c0_79] : memref<1x256xf32, #tpu.memory_space<vmem>>, vector<1x256xf32>
    %cst_80 = arith.constant dense<0.000000e+00> : vector<1x16xf32>
    %96 = tpu.matmul %95, %94, %cst_80 {dimension_numbers = #tpu.dot_dimension_numbers<[1], [0], [0], [1], [0, 0, 1, 1], [], []>} : vector<1x256xf32>, vector<256x16xf32>, vector<1x16xf32> -> vector<1x16xf32>
    %c0_81 = arith.constant 0 : index
    %c0_82 = arith.constant 0 : index
    %97 = vector.load %arg7[%c0_81, %c0_82] : memref<16x256xf32, #tpu.memory_space<vmem>>, vector<16x256xf32>
    %cst_83 = arith.constant dense<0.000000e+00> : vector<1x256xf32>
    %98 = tpu.matmul %96, %97, %cst_83 {dimension_numbers = #tpu.dot_dimension_numbers<[1], [0], [0], [1], [0, 0, 1, 1], [], []>} : vector<1x16xf32>, vector<16x256xf32>, vector<1x256xf32> -> vector<1x256xf32>
    %c0_84 = arith.constant 0 : index
    %c0_85 = arith.constant 0 : index
    %99 = vector.load %arg9[%c0_84, %c0_85] : memref<1x1xf32, #tpu.memory_space<vmem>>, vector<1x1xf32>
    %100 = vector.broadcast %99 : vector<1x1xf32> to vector<1x256xf32>
    %101 = arith.addf %98, %100 : vector<1x256xf32>
    %102 = arith.negf %101 : vector<1x256xf32>
    %103 = math.exp %102 : vector<1x256xf32>
    %cst_86 = arith.constant 1.000000e+00 : f32
    %104 = vector.broadcast %cst_86 : f32 to vector<1x256xf32>
    %105 = arith.addf %104, %103 : vector<1x256xf32>
    %106 = arith.divf %104, %105 : vector<1x256xf32>
    %c0_87 = arith.constant 0 : index
    %c0_88 = arith.constant 0 : index
    %c0_89 = arith.constant 0 : index
    %107 = vector.load %arg10[%c0_87, %c0_88, %c0_89] : memref<1x1x256xf32, #tpu.memory_space<vmem>>, vector<1x1x256xf32>
    %108 = vector.shape_cast %107 : vector<1x1x256xf32> to vector<1x256xf32>
    %109 = vector.shape_cast %106 : vector<1x256xf32> to vector<1x1x256xf32>
    tpu.vector_store %arg10[%c0_87, %c0_88, %c0_89], %109 {strides = array<i32>} : memref<1x1x256xf32, #tpu.memory_space<vmem>>, vector<1x1x256xf32>,
    return
  }
  func.func @transform_0(%arg0: i32) -> (i32, i32, i32) {
    %c0_i32 = arith.constant 0 : i32
    %c0_i32_0 = arith.constant 0 : i32
    %c0_i32_1 = arith.constant 0 : i32
    return %arg0, %c0_i32, %c0_i32_0 : i32, i32, i32
  }
  func.func @transform_1(%arg0: i32) -> (i32, i32) {
    %c0_i32 = arith.constant 0 : i32
    %c0_i32_0 = arith.constant 0 : i32
    %c0_i32_1 = arith.constant 0 : i32
    return %c0_i32, %c0_i32_0 : i32, i32
  }
  func.func @transform_2(%arg0: i32) -> (i32, i32) {
    %c0_i32 = arith.constant 0 : i32
    %c0_i32_0 = arith.constant 0 : i32
    %c0_i32_1 = arith.constant 0 : i32
    return %c0_i32, %c0_i32_0 : i32, i32
  }
  func.func @transform_3(%arg0: i32) -> (i32, i32, i32) {
    %c0_i32 = arith.constant 0 : i32
    %c0_i32_0 = arith.constant 0 : i32
    %c0_i32_1 = arith.constant 0 : i32
    %c0_i32_2 = arith.constant 0 : i32
    return %c0_i32, %c0_i32_0, %c0_i32_1 : i32, i32, i32
  }
  func.func @transform_4(%arg0: i32) -> (i32, i32, i32) {
    %c0_i32 = arith.constant 0 : i32
    %c0_i32_0 = arith.constant 0 : i32
    %c0_i32_1 = arith.constant 0 : i32
    %c0_i32_2 = arith.constant 0 : i32
    return %c0_i32, %c0_i32_0, %c0_i32_1 : i32, i32, i32
  }
  func.func @transform_5(%arg0: i32) -> (i32, i32) {
    %c0_i32 = arith.constant 0 : i32
    %c0_i32_0 = arith.constant 0 : i32
    %c0_i32_1 = arith.constant 0 : i32
    return %c0_i32, %c0_i32_0 : i32, i32
  }
  func.func @transform_6(%arg0: i32) -> (i32, i32) {
    %c0_i32 = arith.constant 0 : i32
    %c0_i32_0 = arith.constant 0 : i32
    %c0_i32_1 = arith.constant 0 : i32
    return %c0_i32, %c0_i32_0 : i32, i32
  }
  func.func @transform_7(%arg0: i32) -> (i32, i32) {
    %c0_i32 = arith.constant 0 : i32
    %c0_i32_0 = arith.constant 0 : i32
    %c0_i32_1 = arith.constant 0 : i32
    return %c0_i32, %c0_i32_0 : i32, i32
  }
  func.func @transform_8(%arg0: i32) -> (i32, i32) {
    %c0_i32 = arith.constant 0 : i32
    %c0_i32_0 = arith.constant 0 : i32
    %c0_i32_1 = arith.constant 0 : i32
    return %c0_i32, %c0_i32_0 : i32, i32
  }
  func.func @transform_9(%arg0: i32) -> (i32, i32, i32) {
    %c0_i32 = arith.constant 0 : i32
    %c0_i32_0 = arith.constant 0 : i32
    %c0_i32_1 = arith.constant 0 : i32
    return %arg0, %c0_i32, %c0_i32_0 : i32, i32, i32
  }
}

</mosaic_0001>

<bundles_post_ra>
// kernel: forward.7
= control target key start
LH: loop header
LB: loop body
LE: loop exit
PB: predicated region body
PF: predicated region fallthrough
CT: control target
= control target key end

     0   :  { %s717_s18 = smov 0   ;;  %s850_s0 = inlined_call_operand.vmem [shape: f32[2,64,48], index: 0, kind: input, shape index: {}]   ;;  %s851_s1 = inlined_call_operand.vmem [shape: f32[48,16], index: 1, kind: input, shape index: {}]   ;;  %s852_s2 = inlined_call_operand.vmem [shape: f32[1,16], index: 2, kind: input, shape index: {}, may-alias: {2,4}]   ;;  %s853_s3 = inlined_call_operand.vmem [shape: f32[1,16], index: 3, kind: input, shape index: {}]   ;;  %s854_s4 = inlined_call_operand.vmem [shape: f32[1,16], index: 4, kind: input, shape index: {}, may-alias: {2,4}]   ;;  %s855_s5 = inlined_call_operand.vmem [shape: f32[2,64,16], index: 5, kind: output, shape index: {}]  }
   0x1 LB: > { %s575_s19 = sadd.s32 4294967295, %s685_s18   ;;  %p579_p0 = scmp.ge.s32.totalorder %s685_s18, 1  ;;  %s685_s18 = sphi %s717_s18, %s15_s18  }
   0x2   : > { %p187_p1 = scmp.lt.s32.totalorder %s685_s18, 3 }
   0x4   : > { %p188_p2 = pnand %p579_p0, %p187_p1 }
   0x5   : > { %v233_v0 = vld [vmem:[%s851_s1] sm:$0xff] (!%p188_p2)  ;;  %v234_v1 = vld [vmem:[%s851_s1 + $0x8] sm:$0xff] (!%p188_p2)  ;;  %v235_v2 = vld [vmem:[%s851_s1 + $0x10] sm:$0xff] (!%p188_p2)  ;;  %p215_p3 = scmp.lt.s32.totalorder (!%p188_p2), %s575_s19, 1  ;;  %vm246_vm0 = vcmask (!%p188_p2), 392192   ;;  %vm378_vm1 = vcmask (!%p188_p2), 130048  }
   0x6   : > { %191 = sbr.rel (%p188_p2) target bundleno = 564 (0x234), region = 40  ;;  %v637_v3 = vpack.c.bf16 (!%p188_p2), %v234_v1, %v233_v0  ;;  %v236_v4 = vld [vmem:[%s851_s1 + $0x18] sm:$0xff] (!%p188_p2)  ;;  %v237_v6 = vld [vmem:[%s851_s1 + $0x20] sm:$0xff] (!%p188_p2)  ;;  %v238_v7 = vld [vmem:[%s851_s1 + $0x28] sm:$0xff] (!%p188_p2) }
   0x7   : > { %v641_v5 = vpack.c.bf16 (!%p188_p2), %v236_v4, %v235_v2  ;;  %v645_v8 = vpack.c.bf16 (!%p188_p2), %v238_v7, %v237_v6  ;;  %v584_v17 = vld [vmem:[%s852_s2] ss:$0 sm:$0xff] (!%p188_p2) }
   0x8   : > { %638 = vmatprep.subr.bf16.mxu0 (!%p188_p2), %v637_v3  ;;  %649 = vmatprep.subr.bf16.mxu1 (!%p188_p2), %v637_v3 }
   0x9   : > { %640 = vmatpush3.bf16.msra.mxu0 (!%p188_p2), %v637_v3  ;;  %652 = vmatpush3.bf16.msra.mxu1 (!%p188_p2), %v637_v3 }
   0xa   : > { %642 = vmatprep.subr.bf16.mxu0 (!%p188_p2), %v641_v5  ;;  %650 = vmatprep.subr.bf16.mxu1 (!%p188_p2), %v641_v5 }
   0xd   : > { %s857_s19 = smov (!%p215_p3, %s575_s19), 1  ;;  %644 = vmatpush3.bf16.msra.mxu0 %v641_v5  ;;  %653 = vmatpush3.bf16.msra.mxu1 %v641_v5 }
   0xe   : > { %s597_s7 = sshll.u32 %s857_s19, 6  ;;  %646 = vmatprep.subr.bf16.mxu0 %v645_v8  ;;  %651 = vmatprep.subr.bf16.mxu1 %v645_v8 }
   0xf   : > { %s219_s10 = scalar_lea.vmem %s850_s0, %s597_s7  ;;  %s822_s21 = scalar_lea.vmem %s855_s5, %s597_s7 }
  0x10   : > { %v225_v9 = vld [vmem:[%s219_s10] sm:$0xff]  ;;  %v226_v11 = vld [vmem:[%s219_s10 + $0x8] sm:$0xff]  ;;  %v227_v13 = vld [vmem:[%s219_s10 + $0x10] sm:$0xff] }
  0x11   : > { %v229_v10 = vld [vmem:[%s219_s10 + $0x20] sm:$0xff]  ;;  %625 = vmatprep.mubr.msk.f32.mxu0 %vm246_vm0, %v225_v9  ;;  %648 = vmatpush3.bf16.msra.mxu0 %v645_v8  ;;  %v230_v12 = vld [vmem:[%s219_s10 + $0x28] sm:$0xff]  ;;  %v231_v14 = vld [vmem:[%s219_s10 + $0x30] sm:$0xff] }
  0x12   : > { %631 = vmatprep.mubr.msk.f32.mxu1 %vm246_vm0, %v229_v10  ;;  %654 = vmatpush3.bf16.msra.mxu1 %v645_v8  ;;  %v228_v15 = vld [vmem:[%s219_s10 + $0x18] sm:$0xff] }
  0x13   : > { %v232_v16 = vld [vmem:[%s219_s10 + $0x38] sm:$0xff] }
  0x14   : > { %626 = vmatmul.mubr.msk.f32.vlgmr.msra.gmra.mrb[0].mxu0 %vm246_vm0, %v226_v11 }
  0x15   : > { %632 = vmatmul.mubr.msk.f32.vlgmr.msra.gmra.mrb[0].mxu1 %vm246_vm0, %v230_v12  ;;  %628 = vmatprep.mubr.msk.f32.mxu0 %vm246_vm0, %v227_v13 }
  0x16   : > { %634 = vmatprep.mubr.msk.f32.mxu1 %vm246_vm0, %v231_v14 }
  0x18   : > { %629 = vmatmul.mubr.msk.f32.gmra.mrb[2].mxu0 %vm246_vm0, %v228_v15 }
  0x19   : > { %635 = vmatmul.mubr.msk.f32.gmra.mrb[2].mxu1 %vm246_vm0, %v232_v16 }
  0xe7   : > { %v627_v18 = vpop.f32.mrb[0].mxu0 }
  0xe8   : > { %v633_v19 = vpop.f32.mrb[0].mxu1  ;;  %v343_v20 = vadd.f32 %v627_v18, %v584_v17  ;;  %v337_v22 = vpop.f32.mrb[1].mxu0 }
  0xe9   : > { %v363_v21 = vadd.f32 %v633_v19, %v584_v17  ;;  %v357_v23 = vpop.f32.mrb[1].mxu1  ;;  %v338_v24 = vadd.f32 %v584_v17, %v337_v22 }
  0xea   : > { %v382_v26 = vsel %vm378_vm1, %v343_v20, 0.0  ;;  %v358_v33 = vadd.f32 %v584_v17, %v357_v23 }
  0xeb   : > { %v394_v25 = vsel %vm378_vm1, %v363_v21, 0.0  ;;  %383 = vadd.xlane.f32.xlu0 %v382_v26  ;;  %v630_v27 = vpop.f32.mrb[2].mxu0  ;;  %v379_v35 = vsel %vm378_vm1, %v338_v24, 0.0 }
  0xec   : > { %395 = vadd.xlane.f32.xlu1 %v394_v25  ;;  %v636_v28 = vpop.f32.mrb[2].mxu1  ;;  %v353_v29 = vadd.f32 %v630_v27, %v584_v17  ;;  %v347_v30 = vpop.f32.mrb[3].mxu0  ;;  %v391_v39 = vsel %vm378_vm1, %v358_v33, 0.0 }
  0xed   : > { %v367_v31 = vpop.f32.mrb[3].mxu1  ;;  %v348_v32 = vadd.f32 %v584_v17, %v347_v30  ;;  %v373_v36 = vadd.f32 %v636_v28, %v584_v17 }
  0xee   : > { %v388_v34 = vsel %vm378_vm1, %v353_v29, 0.0  ;;  %v368_v37 = vadd.f32 %v584_v17, %v367_v31 }
  0xef   : > { %380 = vadd.xlane.f32.xlu0 %v379_v35  ;;  %v385_v38 = vsel %vm378_vm1, %v348_v32, 0.0  ;;  %v400_v40 = vsel %vm378_vm1, %v373_v36, 0.0 }
  0xf0   : > { %389 = vadd.xlane.f32.xlu1 %v388_v34  ;;  %v397_v41 = vsel %vm378_vm1, %v368_v37, 0.0 }
  0xf3   : > { %392 = vadd.xlane.f32.xlu0 %v391_v39 }
  0xf4   : > { %386 = vadd.xlane.f32.xlu1 %v385_v38  ;;  %v593_v38 = vld [vmem:[%s853_s3] ss:$0 sm:$0xff] }
  0xf7   : > { %398 = vadd.xlane.f32.xlu0 %v397_v41 }
  0xf8   : > { %401 = vadd.xlane.f32.xlu1 %v400_v40 }
 0x178   : > { %v384_v43 = vpop.xlane.xlu0 %383 }
 0x179   : > { %v396_v42 = vpop.xlane.xlu1 %395  ;;  %v405_v45 = vmul.f32 0.0625, %v384_v43  ;;  %v594_v43 = vld [vmem:[%s854_s4] ss:$0 sm:$0xff] }
 0x17a   : > { %v409_v44 = vmul.f32 0.0625, %v396_v42 }
 0x17b   : > { %v772_v47 = vsub.f32 %v343_v20, %v405_v45 }
 0x17c   : > { %v770_v46 = vsub.f32 %v363_v21, %v409_v44  ;;  %v381_v49 = vpop.xlane.xlu0 %380 }
 0x17d   : > { %v390_v48 = vpop.xlane.xlu1 %389  ;;  %v404_v51 = vmul.f32 0.0625, %v381_v49  ;;  %v421_v52 = vmul.f32 %v772_v47, %v772_v47 }
 0x17e   : > { %v407_v50 = vmul.f32 0.0625, %v390_v48  ;;  %v425_v56 = vmul.f32 %v770_v46, %v770_v46 }
 0x17f   : > { %v778_v54 = vsub.f32 %v338_v24, %v404_v51  ;;  %v431_v55 = vsel %vm378_vm1, %v421_v52, 0.0 }
 0x180   : > { %v776_v53 = vsub.f32 %v353_v29, %v407_v50  ;;  %432 = vadd.xlane.f32.xlu1 %v431_v55  ;;  %v393_v58 = vpop.xlane.xlu0 %392  ;;  %v443_v1 = vsel %vm378_vm1, %v425_v56, 0.0 }
 0x181   : > { %v387_v57 = vpop.xlane.xlu1 %386  ;;  %v408_v60 = vmul.f32 0.0625, %v393_v58  ;;  %v420_v61 = vmul.f32 %v778_v54, %v778_v54 }
 0x182   : > { %v406_v59 = vmul.f32 0.0625, %v387_v57  ;;  %v423_v62 = vmul.f32 %v776_v53, %v776_v53 }
 0x183   : > { %v789_v0 = vsub.f32 %v358_v33, %v408_v60  ;;  %v428_v2 = vsel %vm378_vm1, %v420_v61, 0.0 }
 0x184   : > { %v787_v63 = vsub.f32 %v348_v32, %v406_v59  ;;  %444 = vadd.xlane.f32.xlu1 %v443_v1  ;;  %429 = vadd.xlane.f32.xlu0 %v428_v2  ;;  %v399_v4 = vpop.xlane.xlu0 %398  ;;  %v437_v8 = vsel %vm378_vm1, %v423_v62, 0.0 }
 0x185   : > { %v402_v3 = vpop.xlane.xlu1 %401  ;;  %v410_v6 = vmul.f32 0.0625, %v399_v4  ;;  %v424_v7 = vmul.f32 %v789_v0, %v789_v0 }
 0x186   : > { %v411_v5 = vmul.f32 0.0625, %v402_v3  ;;  %v422_v12 = vmul.f32 %v787_v63, %v787_v63 }
 0x187   : > { %v798_v10 = vsub.f32 %v368_v37, %v410_v6  ;;  %v440_v11 = vsel %vm378_vm1, %v424_v7, 0.0 }
 0x188   : > { %v796_v9 = vsub.f32 %v373_v36, %v411_v5  ;;  %438 = vadd.xlane.f32.xlu1 %v437_v8  ;;  %441 = vadd.xlane.f32.xlu0 %v440_v11  ;;  %v434_v15 = vsel %vm378_vm1, %v422_v12, 0.0 }
 0x189   : > { %v426_v16 = vmul.f32 %v798_v10, %v798_v10 }
 0x18a   : > { %v427_v13 = vmul.f32 %v796_v9, %v796_v9 }
 0x18b   : > { %v446_v17 = vsel %vm378_vm1, %v426_v16, 0.0 }
 0x18c   : > { %v449_v14 = vsel %vm378_vm1, %v427_v13, 0.0  ;;  %435 = vadd.xlane.f32.xlu0 %v434_v15 }
 0x18d   : > { %450 = vadd.xlane.f32.xlu1 %v449_v14 }
 0x190   : > { %447 = vadd.xlane.f32.xlu0 %v446_v17 }
 0x20d   : > { %v433_v18 = vpop.xlane.xlu1 %432 }
 0x20e   : > { %v453_v19 = vmul.f32 0.0625, %v433_v18 }
 0x210   : > { %v461_v20 = vadd.f32 1e-05, %v453_v19 }
 0x211   : > { %v445_v21 = vpop.xlane.xlu1 %444  ;;  %v430_v22 = vpop.xlane.xlu0 %429 }
 0x212   : > { %663 = vrsqrt.f32 %v461_v20  ;;  %v457_v23 = vmul.f32 0.0625, %v445_v21  ;;  %v452_v24 = vmul.f32 0.0625, %v430_v22 }
 0x214   : > { %v465_v25 = vadd.f32 1e-05, %v457_v23  ;;  %v460_v26 = vadd.f32 1e-05, %v452_v24 }
 0x215   : > { %v439_v27 = vpop.xlane.xlu1 %438  ;;  %v442_v28 = vpop.xlane.xlu0 %441 }
 0x216   : > { %665 = vrsqrt.f32 %v465_v25  ;;  %v455_v29 = vmul.f32 0.0625, %v439_v27  ;;  %v456_v30 = vmul.f32 0.0625, %v442_v28 }
 0x217   : > { %667 = vrsqrt.f32 %v460_v26 }
 0x218   : > { %v463_v31 = vadd.f32 1e-05, %v455_v29  ;;  %v464_v32 = vadd.f32 1e-05, %v456_v30 }
 0x219   : > { %v436_v34 = vpop.xlane.xlu0 %435 }
 0x21a   : > { %v451_v33 = vpop.xlane.xlu1 %450  ;;  %669 = vrsqrt.f32 %v463_v31  ;;  %v454_v36 = vmul.f32 0.0625, %v436_v34 }
 0x21b   : > { %v459_v35 = vmul.f32 0.0625, %v451_v33  ;;  %671 = vrsqrt.f32 %v464_v32 }
 0x21c   : > { %v664_v37 = vpop.eup %663  ;;  %v462_v40 = vadd.f32 1e-05, %v454_v36 }
 0x21d   : > { %v467_v39 = vadd.f32 1e-05, %v459_v35  ;;  %v477_v41 = vmul.f32 %v664_v37, %v772_v47  ;;  %v448_v42 = vpop.xlane.xlu0 %447 }
 0x21e   : > { %v458_v44 = vmul.f32 0.0625, %v448_v42 }
 0x21f   : > { %673 = vrsqrt.f32 %v467_v39  ;;  %v491_v45 = vmul.f32 %v593_v38, %v477_v41 }
 0x220   : > { %675 = vrsqrt.f32 %v462_v40  ;;  %v666_v48 = vpop.eup %665  ;;  %v466_v49 = vadd.f32 1e-05, %v458_v44 }
 0x221   : > { %v668_v47 = vpop.eup %667  ;;  %v505_v50 = vadd.f32 %v594_v43, %v491_v45  ;;  %v481_v51 = vmul.f32 %v666_v48, %v770_v46 }
 0x222   : > { %v476_v52 = vmul.f32 %v668_v47, %v778_v54  ;;  %677 = vrsqrt.f32 %v466_v49 }
 0x223   : > { %513 = vst.msk [vmem:[%s822_s21 + $0x8] sm:$0xff] %vm378_vm1, %v505_v50  ;;  %v495_v55 = vmul.f32 %v593_v38, %v481_v51 }
 0x224   : > { %v670_v56 = vpop.eup %669  ;;  %v490_v57 = vmul.f32 %v593_v38, %v476_v52 }
 0x225   : > { %v672_v58 = vpop.eup %671  ;;  %v509_v59 = vadd.f32 %v594_v43, %v495_v55  ;;  %v479_v60 = vmul.f32 %v670_v56, %v776_v53 }
 0x226   : > { %v504_v61 = vadd.f32 %v594_v43, %v490_v57  ;;  %v480_v62 = vmul.f32 %v672_v58, %v789_v0 }
 0x227   : > { %517 = vst.msk [vmem:[%s822_s21 + $0x28] sm:$0xff] %vm378_vm1, %v509_v59  ;;  %v493_v46 = vmul.f32 %v593_v38, %v479_v60 }
 0x228   : > { %512 = vst.msk [vmem:[%s822_s21] sm:$0xff] %vm378_vm1, %v504_v61  ;;  %v494_v54 = vmul.f32 %v593_v38, %v480_v62 }
 0x229   : > { %v674_v1 = vpop.eup %673  ;;  %v507_v3 = vadd.f32 %v594_v43, %v493_v46 }
 0x22a   : > { %v676_v2 = vpop.eup %675  ;;  %v483_v4 = vmul.f32 %v674_v1, %v796_v9  ;;  %v508_v5 = vadd.f32 %v594_v43, %v494_v54 }
 0x22b   : > { %v478_v53 = vmul.f32 %v676_v2, %v787_v63  ;;  %515 = vst.msk [vmem:[%s822_s21 + $0x18] sm:$0xff] %vm378_vm1, %v507_v3 }
 0x22c   : > { %v497_v0 = vmul.f32 %v593_v38, %v483_v4  ;;  %v678_v6 = vpop.eup %677  ;;  %516 = vst.msk [vmem:[%s822_s21 + $0x20] sm:$0xff] %vm378_vm1, %v508_v5 }
 0x22d   : > { %v492_v7 = vmul.f32 %v593_v38, %v478_v53  ;;  %v482_v11 = vmul.f32 %v678_v6, %v798_v10 }
 0x22e   : > { %v511_v8 = vadd.f32 %v594_v43, %v497_v0 }
 0x22f   : > { %v506_v12 = vadd.f32 %v594_v43, %v492_v7  ;;  %v496_v13 = vmul.f32 %v593_v38, %v482_v11 }
 0x230   : > { %519 = vst.msk [vmem:[%s822_s21 + $0x38] sm:$0xff] %vm378_vm1, %v511_v8 }
 0x231   : > { %514 = vst.msk [vmem:[%s822_s21 + $0x10] sm:$0xff] %vm378_vm1, %v506_v12  ;;  %v510_v9 = vadd.f32 %v594_v43, %v496_v13 }
 0x233   : > { %518 = vst.msk [vmem:[%s822_s21 + $0x30] sm:$0xff] %vm378_vm1, %v510_v9 }
 0x234 PF: > { %s15_s18 = sadd.s32 1, %s685_s18  }
 0x235   : > { %p12_p4 = scmp.ge.s32.totalorder %s15_s18, 4  }
 0x237   :  { %14 = sbr.rel (!%p12_p4) target bundleno = 1 (0x1), region = 70 }

// kernel: forward.10
= control target key start
LH: loop header
LB: loop body
LE: loop exit
PB: predicated region body
PF: predicated region fallthrough
CT: control target
= control target key end

     0   :  { %s500_s15 = smov 0   ;;  %s560_s0 = inlined_call_operand.vmem [shape: f32[2,16,64], index: 0, kind: input, shape index: {}]   ;;  %s561_s1 = inlined_call_operand.vmem [shape: f32[1,64], index: 1, kind: input, shape index: {}]   ;;  %s562_s2 = inlined_call_operand.vmem [shape: f32[1,64], index: 2, kind: input, shape index: {}]   ;;  %s563_s3 = inlined_call_operand.vmem [shape: f32[64,32], index: 3, kind: input, shape index: {}]   ;;  %s564_s4 = inlined_call_operand.vmem [shape: f32[2,16,32], index: 4, kind: output, shape index: {}]  }
   0x1 LB: > { %s393_s16 = sadd.s32 4294967295, %s473_s15   ;;  %p397_p0 = scmp.ge.s32.totalorder %s473_s15, 1  ;;  %s473_s15 = sphi %s500_s15, %s14_s15  }
   0x2   : > { %p162_p1 = scmp.lt.s32.totalorder %s473_s15, 3 }
   0x4   : > { %p163_p2 = pnand %p397_p0, %p162_p1 }
   0x5   : > { %p188_p3 = scmp.lt.s32.totalorder (!%p163_p2), %s393_s16, 1  ;;  %vm202_vm0 = vcmask (!%p163_p2), 523264   ;;  %v246_v14 = vld [vmem:[%s563_s3] sm:$0xff] (!%p163_p2)  ;;  %v247_v15 = vld [vmem:[%s563_s3 + $0x8] sm:$0xff] (!%p163_p2)  ;;  %v248_v17 = vld [vmem:[%s563_s3 + $0x10] sm:$0xff] (!%p163_p2)  ;;  %vm335_vm1 = vcmask (!%p163_p2), 261120  }
   0x6   : > { %166 = sbr.rel (%p163_p2) target bundleno = 548 (0x224), region = 36  ;;  %v439_v16 = vpack.c.bf16 (!%p163_p2), %v247_v15, %v246_v14  ;;  %v249_v18 = vld [vmem:[%s563_s3 + $0x18] sm:$0xff] (!%p163_p2)  ;;  %v250_v19 = vld [vmem:[%s563_s3 + $0x20] sm:$0xff] (!%p163_p2)  ;;  %v251_v21 = vld [vmem:[%s563_s3 + $0x28] sm:$0xff] (!%p163_p2) }
   0x7   : > { %v443_v20 = vpack.c.bf16 (!%p163_p2), %v249_v18, %v248_v17  ;;  %v447_v22 = vpack.c.bf16 (!%p163_p2), %v251_v21, %v250_v19  ;;  %v252_v23 = vld [vmem:[%s563_s3 + $0x30] sm:$0xff] (!%p163_p2)  ;;  %v253_v24 = vld [vmem:[%s563_s3 + $0x38] sm:$0xff] (!%p163_p2)  ;;  %v402_v33 = vld [vmem:[%s561_s1] ss:$0 sm:$0xff] (!%p163_p2) }
   0x8   : > { %440 = vmatprep.subr.bf16.mxu0 (!%p163_p2), %v439_v16  ;;  %v451_v25 = vpack.c.bf16 (!%p163_p2), %v253_v24, %v252_v23  ;;  %v403_v35 = vld [vmem:[%s562_s2] ss:$0 sm:$0xff] (!%p163_p2) }
   0x9   : > { %442 = vmatpush3.bf16.msra.mxu0 (!%p163_p2), %v439_v16 }
   0xa   : > { %444 = vmatprep.subr.bf16.mxu0 (!%p163_p2), %v443_v20 }
   0xd   : > { %s566_s16 = smov (!%p188_p3, %s393_s16), 1  ;;  %446 = vmatpush3.bf16.msra.mxu0 %v443_v20 }
   0xe   : > { %s408_s17 = sshll.u32 %s566_s16, 4  ;;  %448 = vmatprep.subr.bf16.mxu0 %v447_v22 }
   0xf   : > { %s192_s20 = scalar_lea.vmem %s560_s0, %s408_s17 }
  0x10   : > { %v198_v0 = vld [vmem:[%s192_s20] sm:$0xff]  ;;  %v199_v1 = vld [vmem:[%s192_s20 + $0x8] sm:$0xff]  ;;  %s197_s20 = scalar_lea.vmem %s564_s4, %s408_s17 }
  0x11   : > { %v203_v2 = vsel %vm202_vm0, %v198_v0, 0.0  ;;  %v206_v3 = vsel %vm202_vm0, %v199_v1, 0.0  ;;  %450 = vmatpush3.bf16.msra.mxu0 %v447_v22 }
  0x12   : > { %204 = vadd.xlane.f32.xlu0 %v203_v2  ;;  %452 = vmatprep.subr.bf16.mxu0 %v451_v25 }
  0x15   : > { %454 = vmatpush3.bf16.msra.mxu0 %v451_v25 }
  0x16   : > { %207 = vadd.xlane.f32.xlu0 %v206_v3 }
  0x9f   : > { %v205_v4 = vpop.xlane.xlu0 %204 }
  0xa0   : > { %v210_v5 = vmul.f32 0.015625, %v205_v4 }
  0xa2   : > { %v212_v6 = vsub.f32 %v198_v0, %v210_v5 }
  0xa3   : > { %v208_v7 = vpop.xlane.xlu0 %207 }
  0xa4   : > { %v211_v8 = vmul.f32 0.015625, %v208_v7  ;;  %v214_v9 = vmul.f32 %v212_v6, %v212_v6 }
  0xa6   : > { %v213_v10 = vsub.f32 %v199_v1, %v211_v8  ;;  %v216_v11 = vsel %vm202_vm0, %v214_v9, 0.0 }
  0xa7   : > { %217 = vadd.xlane.f32.xlu1 %v216_v11 }
  0xa8   : > { %v215_v12 = vmul.f32 %v213_v10, %v213_v10 }
  0xaa   : > { %v219_v13 = vsel %vm202_vm0, %v215_v12, 0.0 }
  0xab   : > { %220 = vadd.xlane.f32.xlu1 %v219_v13 }
 0x134   : > { %v218_v26 = vpop.xlane.xlu1 %217 }
 0x135   : > { %v222_v27 = vmul.f32 0.015625, %v218_v26 }
 0x137   : > { %v224_v28 = vadd.f32 1e-05, %v222_v27 }
 0x138   : > { %v221_v29 = vpop.xlane.xlu1 %220 }
 0x139   : > { %463 = vrsqrt.f32 %v224_v28  ;;  %v223_v30 = vmul.f32 0.015625, %v221_v29 }
 0x13b   : > { %v225_v31 = vadd.f32 1e-05, %v223_v30 }
 0x13d   : > { %465 = vrsqrt.f32 %v225_v31 }
 0x143   : > { %v464_v32 = vpop.eup %463 }
 0x144   : > { %v228_v34 = vmul.f32 %v464_v32, %v212_v6 }
 0x146   : > { %v236_v36 = vmul.f32 %v402_v33, %v228_v34 }
 0x147   : > { %v466_v37 = vpop.eup %465 }
 0x148   : > { %v229_v38 = vmul.f32 %v466_v37, %v213_v10  ;;  %v244_v39 = vadd.f32 %v403_v35, %v236_v36 }
 0x14a   : > { %v237_v40 = vmul.f32 %v402_v33, %v229_v38  ;;  %436 = vmatprep.mubr.msk.f32.mxu0 %vm202_vm0, %v244_v39 }
 0x14c   : > { %v245_v41 = vadd.f32 %v403_v35, %v237_v40 }
 0x14e   : > { %437 = vmatmul.mubr.msk.f32.vlgmr.msra.gmra.mrb[0].mxu0 %vm202_vm0, %v245_v41 }
 0x221   : > { %v438_v42 = vpop.f32.mrb[0].mxu0 }
 0x222   : > { %337 = vst.msk [vmem:[%s197_s20 + $0x8] sm:$0xff] %vm335_vm1, %v438_v42  ;;  %v326_v43 = vpop.f32.mrb[1].mxu0 }
 0x223   : > { %336 = vst.msk [vmem:[%s197_s20] sm:$0xff] %vm335_vm1, %v326_v43 }
 0x224 PF: > { %s14_s15 = sadd.s32 1, %s473_s15  }
 0x225   : > { %p11_p4 = scmp.ge.s32.totalorder %s14_s15, 4  }
 0x227   :  { %13 = sbr.rel (!%p11_p4) target bundleno = 1 (0x1), region = 66 }

// kernel: forward.8
= control target key start
LH: loop header
LB: loop body
LE: loop exit
PB: predicated region body
PF: predicated region fallthrough
CT: control target
= control target key end

     0   :  { %s4797_s27 = smov 0   ;;  %s5464_s0 = inlined_call_operand.vmem [shape: f32[2,64,16], index: 0, kind: input, shape index: {}]   ;;  %s5465_s1 = inlined_call_operand.vmem [shape: f32[1,16], index: 1, kind: input, shape index: {}, may-alias: {1,11}]   ;;  %s5466_s2 = inlined_call_operand.vmem [shape: f32[1,16], index: 2, kind: input, shape index: {}, may-alias: {2,10,12,16}]   ;;  %s5467_s3 = inlined_call_operand.vmem [shape: f32[2,16,8], index: 3, kind: input, shape index: {}]   ;;  %s5468_s4 = inlined_call_operand.vmem [shape: f32[2,16,8], index: 4, kind: input, shape index: {}]   ;;  %s5469_s5 = inlined_call_operand.vmem [shape: f32[2,16,8], index: 5, kind: input, shape index: {}]   ;;  %s5470_s6 = inlined_call_operand.vmem [shape: f32[2,1,8], index: 6, kind: input, shape index: {}, may-alias: {6,7,8}]   ;;  %s5471_s7 = inlined_call_operand.vmem [shape: f32[2,1,8], index: 7, kind: input, shape index: {}, may-alias: {6,7,8}]   ;;  %s5472_s8 = inlined_call_operand.vmem [shape: f32[2,1,8], index: 8, kind: input, shape index: {}, may-alias: {6,7,8}]   ;;  %s5473_s9 = inlined_call_operand.vmem [shape: f32[2,8,16], index: 9, kind: input, shape index: {}]   ;;  %s5474_s10 = inlined_call_operand.vmem [shape: f32[1,16], index: 10, kind: input, shape index: {}, may-alias: {2,10,12,16}]   ;;  %s5475_s11 = inlined_call_operand.vmem [shape: f32[1,16], index: 11, kind: input, shape index: {}, may-alias: {1,11}]   ;;  %s5476_s12 = inlined_call_operand.vmem [shape: f32[1,16], index: 12, kind: input, shape index: {}, may-alias: {2,10,12,16}]   ;;  %s5477_s13 = inlined_call_operand.vmem [shape: f32[16,64], index: 13, kind: input, shape index: {}]   ;;  %s5478_s14 = inlined_call_operand.vmem [shape: f32[1,64], index: 14, kind: input, shape index: {}]   ;;  %s5479_s15 = inlined_call_operand.vmem [shape: f32[64,16], index: 15, kind: input, shape index: {}]   ;;  %s5480_s16 = inlined_call_operand.vmem [shape: f32[1,16], index: 16, kind: input, shape index: {}, may-alias: {2,10,12,16}]   ;;  %s5481_s17 = inlined_call_operand.vmem [shape: f32[2,1,16,16], index: 17, kind: input, shape index: {}]   ;;  %s5482_s18 = inlined_call_operand.vmem [shape: f32[2,64,16], index: 18, kind: output, shape index: {}]  }
   0x1   :  { %5483 = sst [smem:[#allocation2_spill]] %s5464_s0 }
   0x2   :  { %5484 = sst [smem:[#allocation3_spill]] %s5465_s1 }
   0x3   :  { %5485 = sst [smem:[#allocation4_spill]] %s5466_s2 }
   0x4 LB: > { %s3820_s28 = sadd.s32 4294967295, %s4700_s27   ;;  %p3824_p0 = scmp.ge.s32.totalorder %s4700_s27, 1  ;;  %s4700_s27 = sphi %s4797_s27, %s28_s27  }
   0x5   : > { %p512_p1 = scmp.lt.s32.totalorder %s4700_s27, 3 }
   0x7   : > { %p513_p2 = pnand %p3824_p0, %p512_p1 }
   0x8   : > { %p566_p3 = scmp.lt.s32.totalorder (!%p513_p2), %s3820_s28, 1  ;;  %vm586_vm0 = vcmask (!%p513_p2), 130048   ;;  %s5486_s19 = sld [smem:[#allocation2_spill]] (!%p513_p2)  ;;  %v720_v56 = vld [vmem:[%s5467_s3] sm:$0xff] (!%p513_p2)  ;;  %v721_v57 = vld [vmem:[%s5467_s3 + $0x8] sm:$0xff] (!%p513_p2)  ;;  %vm1096_vm1 = vcmask (!%p513_p2), 64512  }
   0x9   : > { %516 = sbr.rel (%p513_p2) target bundleno = 3104 (0xc20), region = 92  ;;  %v866_v58 = vld [vmem:[%s5468_s4] sm:$0xff] (!%p513_p2)  ;;  %v4434_v59 = vpack.c.bf16 (!%p513_p2), %v721_v57, %v720_v56  ;;  %v867_v60 = vld [vmem:[%s5468_s4 + $0x8] sm:$0xff] (!%p513_p2)  ;;  %s5487_s2 = sld [smem:[#allocation3_spill]] (!%p513_p2)  ;;  %vm4982_vm2 = vmpackc.low (!%p513_p2), %vm1096_vm1, %vm1096_vm1  ;;  %vm3619_vm3 = vcmask (!%p513_p2), 523264  }
   0xa   : > { %v4438_v61 = vpack.c.bf16 (!%p513_p2), %v867_v60, %v866_v58  ;;  %v980_v62 = vld [vmem:[%s5469_s5] sm:$0xff] (!%p513_p2)  ;;  %v981_v63 = vld [vmem:[%s5469_s5 + $0x8] sm:$0xff] (!%p513_p2)  ;;  %s5488_s25 = sld [smem:[#allocation4_spill]] (!%p513_p2) }
   0xb   : > { %4435 = vmatprep.subr.bf16.mxu0 (!%p513_p2), %v4434_v59  ;;  %v4977_v60 = vld [vmem:[%s5470_s6] ss:$0 sm:$0xff] (!%p513_p2) }
   0xc   : > { %4439 = vmatprep.subr.bf16.mxu1 (!%p513_p2), %v4438_v61  ;;  %4437 = vmatpush3.bf16.msra.mxu0 (!%p513_p2), %v4434_v59 }
   0xd   : > { %4441 = vmatpush3.bf16.msra.mxu1 (!%p513_p2), %v4438_v61 }
  0x10   : > { %s5492_s28 = smov (!%p566_p3, %s3820_s28), 1 }
  0x11   : > { %s3984_s29 = sshll.u32 %s5492_s28, 6 }
  0x12   : > { %s4813_s1 = scalar_lea.vmem %s5486_s19, %s3984_s29 }
  0x13   : > { %v576_v0 = vld [vmem:[%s4813_s1] sm:$0xff]  ;;  %v578_v1 = vld [vmem:[%s4813_s1 + $0x10] sm:$0xff]  ;;  %v577_v2 = vld [vmem:[%s4813_s1 + $0x8] sm:$0xff] }
  0x14   : > { %v587_v3 = vsel %vm586_vm0, %v576_v0, 0.0  ;;  %v593_v4 = vsel %vm586_vm0, %v578_v1, 0.0  ;;  %v579_v5 = vld [vmem:[%s4813_s1 + $0x18] sm:$0xff]  ;;  %v590_v6 = vsel %vm586_vm0, %v577_v2, 0.0  ;;  %v580_v8 = vld [vmem:[%s4813_s1 + $0x20] sm:$0xff]  ;;  %v581_v9 = vld [vmem:[%s4813_s1 + $0x28] sm:$0xff] }
  0x15   : > { %588 = vadd.xlane.f32.xlu0 %v587_v3  ;;  %594 = vadd.xlane.f32.xlu1 %v593_v4  ;;  %v596_v7 = vsel %vm586_vm0, %v579_v5, 0.0  ;;  %v599_v10 = vsel %vm586_vm0, %v580_v8, 0.0  ;;  %v602_v11 = vsel %vm586_vm0, %v581_v9, 0.0  ;;  %v582_v12 = vld [vmem:[%s4813_s1 + $0x30] sm:$0xff]  ;;  %v583_v13 = vld [vmem:[%s4813_s1 + $0x38] sm:$0xff] }
  0x16   : > { %v605_v14 = vsel %vm586_vm0, %v582_v12, 0.0  ;;  %v608_v15 = vsel %vm586_vm0, %v583_v13, 0.0 }
  0x19   : > { %591 = vadd.xlane.f32.xlu0 %v590_v6  ;;  %597 = vadd.xlane.f32.xlu1 %v596_v7 }
  0x1d   : > { %600 = vadd.xlane.f32.xlu0 %v599_v10  ;;  %603 = vadd.xlane.f32.xlu1 %v602_v11 }
  0x21   : > { %606 = vadd.xlane.f32.xlu0 %v605_v14  ;;  %609 = vadd.xlane.f32.xlu1 %v608_v15 }
  0xa2   : > { %v589_v16 = vpop.xlane.xlu0 %588  ;;  %v595_v17 = vpop.xlane.xlu1 %594 }
  0xa3   : > { %v612_v18 = vmul.f32 0.0625, %v589_v16  ;;  %v614_v19 = vmul.f32 0.0625, %v595_v17 }
  0xa5   : > { %v4831_v20 = vsub.f32 %v576_v0, %v612_v18  ;;  %v4833_v21 = vsub.f32 %v578_v1, %v614_v19  ;;  %v4889_v0 = vpack.c.bf16 %v981_v63, %v980_v62 }
  0xa6   : > { %v592_v22 = vpop.xlane.xlu0 %591  ;;  %v598_v23 = vpop.xlane.xlu1 %597 }
  0xa7   : > { %v613_v24 = vmul.f32 0.0625, %v592_v22  ;;  %v615_v25 = vmul.f32 0.0625, %v598_v23  ;;  %v628_v26 = vmul.f32 %v4831_v20, %v4831_v20  ;;  %v630_v27 = vmul.f32 %v4833_v21, %v4833_v21  ;;  %4443 = vmatprep.subr.bf16.mxu0 %v4889_v0  ;;  %v3829_v23 = vld [vmem:[%s5487_s2] ss:$0 sm:$0xff] }
  0xa9   : > { %v4839_v28 = vsub.f32 %v577_v2, %v613_v24  ;;  %v4841_v29 = vsub.f32 %v579_v5, %v615_v25  ;;  %v636_v30 = vsel %vm586_vm0, %v628_v26, 0.0  ;;  %v642_v33 = vsel %vm586_vm0, %v630_v27, 0.0 }
  0xaa   : > { %637 = vadd.xlane.f32.xlu0 %v636_v30  ;;  %v601_v31 = vpop.xlane.xlu0 %600  ;;  %v604_v32 = vpop.xlane.xlu1 %603  ;;  %v3830_v30 = vld [vmem:[%s5488_s25] ss:$0 sm:$0xff]  ;;  %s575_s25 = scalar_lea.vmem %s5482_s18, %s3984_s29 }
  0xab   : > { %v616_v34 = vmul.f32 0.0625, %v601_v31  ;;  %v617_v35 = vmul.f32 0.0625, %v604_v32  ;;  %v629_v36 = vmul.f32 %v4839_v28, %v4839_v28  ;;  %v631_v37 = vmul.f32 %v4841_v29, %v4841_v29 }
  0xad   : > { %v4849_v38 = vsub.f32 %v580_v8, %v616_v34  ;;  %v4851_v39 = vsub.f32 %v581_v9, %v617_v35  ;;  %v639_v40 = vsel %vm586_vm0, %v629_v36, 0.0  ;;  %v645_v43 = vsel %vm586_vm0, %v631_v37, 0.0 }
  0xae   : > { %643 = vadd.xlane.f32.xlu0 %v642_v33  ;;  %640 = vadd.xlane.f32.xlu1 %v639_v40  ;;  %v607_v41 = vpop.xlane.xlu0 %606  ;;  %v610_v42 = vpop.xlane.xlu1 %609 }
  0xaf   : > { %v618_v44 = vmul.f32 0.0625, %v607_v41  ;;  %v619_v45 = vmul.f32 0.0625, %v610_v42  ;;  %v632_v46 = vmul.f32 %v4849_v38, %v4849_v38  ;;  %v633_v47 = vmul.f32 %v4851_v39, %v4851_v39 }
  0xb1   : > { %v4859_v48 = vsub.f32 %v582_v12, %v618_v44  ;;  %v4861_v49 = vsub.f32 %v583_v13, %v619_v45  ;;  %v648_v50 = vsel %vm586_vm0, %v632_v46, 0.0  ;;  %v651_v51 = vsel %vm586_vm0, %v633_v47, 0.0 }
  0xb2   : > { %646 = vadd.xlane.f32.xlu1 %v645_v43  ;;  %649 = vadd.xlane.f32.xlu0 %v648_v50 }
  0xb3   : > { %v634_v52 = vmul.f32 %v4859_v48, %v4859_v48  ;;  %v635_v53 = vmul.f32 %v4861_v49, %v4861_v49 }
  0xb5   : > { %v654_v54 = vsel %vm586_vm0, %v634_v52, 0.0  ;;  %v657_v55 = vsel %vm586_vm0, %v635_v53, 0.0 }
  0xb6   : > { %652 = vadd.xlane.f32.xlu1 %v651_v51  ;;  %655 = vadd.xlane.f32.xlu0 %v654_v54 }
  0xba   : > { %658 = vadd.xlane.f32.xlu1 %v657_v55 }
 0x137   : > { %v638_v1 = vpop.xlane.xlu0 %637 }
 0x138   : > { %v660_v2 = vmul.f32 0.0625, %v638_v1 }
 0x13a   : > { %v668_v3 = vadd.f32 1e-05, %v660_v2 }
 0x13b   : > { %v641_v4 = vpop.xlane.xlu1 %640  ;;  %v644_v5 = vpop.xlane.xlu0 %643 }
 0x13c   : > { %4574 = vrsqrt.f32 %v668_v3  ;;  %v661_v6 = vmul.f32 0.0625, %v641_v4  ;;  %v662_v7 = vmul.f32 0.0625, %v644_v5 }
 0x13e   : > { %v669_v8 = vadd.f32 1e-05, %v661_v6  ;;  %v670_v9 = vadd.f32 1e-05, %v662_v7 }
 0x13f   : > { %v647_v10 = vpop.xlane.xlu1 %646  ;;  %v650_v11 = vpop.xlane.xlu0 %649 }
 0x140   : > { %4576 = vrsqrt.f32 %v669_v8  ;;  %v663_v12 = vmul.f32 0.0625, %v647_v10  ;;  %v664_v13 = vmul.f32 0.0625, %v650_v11 }
 0x141   : > { %4578 = vrsqrt.f32 %v670_v9 }
 0x142   : > { %v671_v14 = vadd.f32 1e-05, %v663_v12  ;;  %v672_v15 = vadd.f32 1e-05, %v664_v13 }
 0x143   : > { %v653_v16 = vpop.xlane.xlu1 %652  ;;  %v656_v17 = vpop.xlane.xlu0 %655 }
 0x144   : > { %4580 = vrsqrt.f32 %v671_v14  ;;  %v665_v18 = vmul.f32 0.0625, %v653_v16  ;;  %v666_v19 = vmul.f32 0.0625, %v656_v17 }
 0x145   : > { %4582 = vrsqrt.f32 %v672_v15 }
 0x146   : > { %v4575_v22 = vpop.eup %4574  ;;  %v673_v24 = vadd.f32 1e-05, %v665_v18  ;;  %v674_v25 = vadd.f32 1e-05, %v666_v19 }
 0x147   : > { %v684_v26 = vmul.f32 %v4575_v22, %v4831_v20  ;;  %v659_v27 = vpop.xlane.xlu1 %658 }
 0x148   : > { %4584 = vrsqrt.f32 %v673_v24  ;;  %v667_v31 = vmul.f32 0.0625, %v659_v27 }
 0x149   : > { %v698_v32 = vmul.f32 %v3829_v23, %v684_v26  ;;  %4586 = vrsqrt.f32 %v674_v25 }
 0x14a   : > { %v4577_v33 = vpop.eup %4576  ;;  %v675_v34 = vadd.f32 1e-05, %v667_v31 }
 0x14b   : > { %v4579_v35 = vpop.eup %4578  ;;  %v4899_v36 = vadd.f32 %v3830_v30, %v698_v32  ;;  %v685_v37 = vmul.f32 %v4577_v33, %v4839_v28 }
 0x14c   : > { %v686_v40 = vmul.f32 %v4579_v35, %v4833_v21  ;;  %4588 = vrsqrt.f32 %v675_v34 }
 0x14d   : > { %v699_v20 = vmul.f32 %v3829_v23, %v685_v37  ;;  %4158 = vmatprep.mubr.msk.f32.mxu0 %vm586_vm0, %v4899_v36  ;;  %4174 = vmatprep.mubr.msk.f32.mxu1 %vm586_vm0, %v4899_v36 }
 0x14e   : > { %v4581_v41 = vpop.eup %4580  ;;  %v700_v42 = vmul.f32 %v3829_v23, %v686_v40  ;;  %v3849_v40 = vld [vmem:[%s5472_s8] ss:$0 sm:$0xff] }
 0x14f   : > { %v4583_v43 = vpop.eup %4582  ;;  %v4907_v44 = vadd.f32 %v3830_v30, %v699_v20  ;;  %v687_v45 = vmul.f32 %v4581_v41, %v4841_v29 }
 0x150   : > { %v4910_v46 = vadd.f32 %v3830_v30, %v700_v42  ;;  %v688_v28 = vmul.f32 %v4583_v43, %v4849_v38 }
 0x151   : > { %v701_v21 = vmul.f32 %v3829_v23, %v687_v45  ;;  %4159 = vmatmul.mubr.msk.f32.vlgmr.msra.gmra.mrb[0].mxu0 %vm586_vm0, %v4907_v44  ;;  %4175 = vmatmul.mubr.msk.f32.vlgmr.msra.gmra.mrb[0].mxu1 %vm586_vm0, %v4907_v44 }
 0x152   : > { %v4585_v47 = vpop.eup %4584  ;;  %v702_v50 = vmul.f32 %v3829_v23, %v688_v28  ;;  %4161 = vmatprep.mubr.msk.f32.mxu0 %vm586_vm0, %v4910_v46  ;;  %4177 = vmatprep.mubr.msk.f32.mxu1 %vm586_vm0, %v4910_v46 }
 0x153   : > { %v4587_v29 = vpop.eup %4586  ;;  %v4921_v51 = vadd.f32 %v3830_v30, %v701_v21  ;;  %v689_v38 = vmul.f32 %v4585_v47, %v4851_v39  ;;  %4445 = vmatpush3.bf16.msra.mxu0 %v4889_v0 }
 0x154   : > { %v4925_v52 = vadd.f32 %v3830_v30, %v702_v50  ;;  %v690_v53 = vmul.f32 %v4587_v29, %v4859_v48 }
 0x155   : > { %v703_v54 = vmul.f32 %v3829_v23, %v689_v38  ;;  %4162 = vmatmul.mubr.msk.f32.gmra.mrb[2].mxu0 %vm586_vm0, %v4921_v51  ;;  %4178 = vmatmul.mubr.msk.f32.gmra.mrb[2].mxu1 %vm586_vm0, %v4921_v51 }
 0x156   : > { %v4589_v55 = vpop.eup %4588  ;;  %v704_v56 = vmul.f32 %v3829_v23, %v690_v53  ;;  %4164 = vmatprep.mubr.msk.f32.mxu0 %vm586_vm0, %v4925_v52  ;;  %4180 = vmatprep.mubr.msk.f32.mxu1 %vm586_vm0, %v4925_v52 }
 0x157   : > { %v4936_v39 = vadd.f32 %v3830_v30, %v703_v54  ;;  %v691_v57 = vmul.f32 %v4589_v55, %v4861_v49  ;;  %v3840_v49 = vld [vmem:[%s5471_s7] ss:$0 sm:$0xff] }
 0x158   : > { %v4939_v48 = vadd.f32 %v3830_v30, %v704_v56 }
 0x159   : > { %v705_v58 = vmul.f32 %v3829_v23, %v691_v57  ;;  %4165 = vmatmul.mubr.msk.f32.gmra.mrb[4].mxu0 %vm586_vm0, %v4936_v39  ;;  %4181 = vmatmul.mubr.msk.f32.gmra.mrb[4].mxu1 %vm586_vm0, %v4936_v39 }
 0x15a   : > { %4167 = vmatprep.mubr.msk.f32.mxu0 %vm586_vm0, %v4939_v48  ;;  %4183 = vmatprep.mubr.msk.f32.mxu1 %vm586_vm0, %v4939_v48 }
 0x15b   : > { %v4949_v59 = vadd.f32 %v3830_v30, %v705_v58 }
 0x15d   : > { %4168 = vmatmul.mubr.msk.f32.gmra.mrb[6].mxu0 %vm586_vm0, %v4949_v59  ;;  %4184 = vmatmul.mubr.msk.f32.gmra.mrb[6].mxu1 %vm586_vm0, %v4949_v59 }
 0x15e   : > { %4190 = vmatprep.mubr.msk.f32.mxu0 %vm586_vm0, %v4899_v36 }
 0x161   : > { %4191 = vmatmul.mubr.msk.f32.vlgmr.msra.gmra.mrb[8].mxu0 %vm586_vm0, %v4907_v44 }
 0x162   : > { %4193 = vmatprep.mubr.msk.f32.mxu0 %vm586_vm0, %v4910_v46 }
 0x165   : > { %4194 = vmatmul.mubr.msk.f32.gmra.mrb[10].mxu0 %vm586_vm0, %v4921_v51 }
 0x166   : > { %4196 = vmatprep.mubr.msk.f32.mxu0 %vm586_vm0, %v4925_v52 }
 0x169   : > { %4197 = vmatmul.mubr.msk.f32.gmra.mrb[12].mxu0 %vm586_vm0, %v4936_v39 }
 0x16a   : > { %4199 = vmatprep.mubr.msk.f32.mxu0 %vm586_vm0, %v4939_v48 }
 0x16d   : > { %4200 = vmatmul.mubr.msk.f32.gmra.mrb[14].mxu0 %vm586_vm0, %v4949_v59 }
 0x224   : > { %v4160_v61 = vpop.f32.mrb[0].mxu0  ;;  %v4176_v62 = vpop.f32.mrb[0].mxu1 }
 0x225   : > { %v947_v63 = vadd.f32 %v4176_v62, %v3840_v49  ;;  %v819_v0 = vpop.f32.mrb[1].mxu0  ;;  %v941_v1 = vpop.f32.mrb[1].mxu1  ;;  %v825_v13 = vadd.f32 %v4160_v61, %v4977_v60 }
 0x226   : > { %v820_v2 = vadd.f32 %v4977_v60, %v819_v0  ;;  %v942_v3 = vadd.f32 %v3840_v49, %v941_v1 }
 0x227   : > { %v859_v25 = vmul.f32 0.35355338, %v825_v13 }
 0x228   : > { %v858_v5 = vmul.f32 0.35355338, %v820_v2  ;;  %v4446_v6 = vpack.c.bf16 %v947_v63, %v942_v3  ;;  %v4163_v7 = vpop.f32.mrb[2].mxu0  ;;  %v4179_v8 = vpop.f32.mrb[2].mxu1 }
 0x229   : > { %v957_v9 = vadd.f32 %v4179_v8, %v3840_v49  ;;  %v829_v10 = vpop.f32.mrb[3].mxu0  ;;  %v951_v11 = vpop.f32.mrb[3].mxu1  ;;  %v835_v20 = vadd.f32 %v4163_v7, %v4977_v60 }
 0x22a   : > { %v952_v12 = vadd.f32 %v3840_v49, %v951_v11  ;;  %4448 = vmatprep.subr.msk.bf16.mxu1 %vm4982_vm2, %v4446_v6  ;;  %4206 = vmatprep.mubr.msk.f32.mxu1 %vm1096_vm1, %v858_v5  ;;  %v830_v22 = vadd.f32 %v4977_v60, %v829_v10  ;;  %v1095_v10 = vld [vmem:[%s5481_s17 + $0x8] sm:$0xff] }
 0x22b   : > { %4451 = vmatpush3.bf16.xpose.msk.msra.mxu1 %vm4982_vm2, %v4446_v6  ;;  %v861_v50 = vmul.f32 0.35355338, %v835_v20 }
 0x22c   : > { %v4452_v14 = vpack.c.bf16 %v957_v9, %v952_v12  ;;  %v4166_v15 = vpop.f32.mrb[4].mxu0  ;;  %v4182_v16 = vpop.f32.mrb[4].mxu1  ;;  %v860_v35 = vmul.f32 0.35355338, %v830_v22  ;;  %v1094_v12 = vld [vmem:[%s5481_s17] sm:$0xff] }
 0x22d   : > { %v967_v17 = vadd.f32 %v4182_v16, %v3840_v49  ;;  %v839_v18 = vpop.f32.mrb[5].mxu0  ;;  %v961_v19 = vpop.f32.mrb[5].mxu1  ;;  %v845_v43 = vadd.f32 %v4166_v15, %v4977_v60 }
 0x22e   : > { %v840_v23 = vadd.f32 %v4977_v60, %v839_v18  ;;  %v962_v24 = vadd.f32 %v3840_v49, %v961_v19  ;;  %4454 = vmatprep.subr.msk.bf16.mxu1 %vm4982_vm2, %v4452_v14 }
 0x22f   : > { %v863_v53 = vmul.f32 0.35355338, %v845_v43 }
 0x230   : > { %v862_v26 = vmul.f32 0.35355338, %v840_v23  ;;  %v4458_v27 = vpack.c.bf16 %v967_v17, %v962_v24  ;;  %v4169_v30 = vpop.f32.mrb[6].mxu0  ;;  %v4185_v31 = vpop.f32.mrb[6].mxu1 }
 0x231   : > { %v977_v32 = vadd.f32 %v4185_v31, %v3840_v49  ;;  %v849_v33 = vpop.f32.mrb[7].mxu0  ;;  %v971_v34 = vpop.f32.mrb[7].mxu1  ;;  %v855_v58 = vadd.f32 %v4169_v30, %v4977_v60 }
 0x232   : > { %v972_v37 = vadd.f32 %v3840_v49, %v971_v34  ;;  %4207 = vmatmul.mubr.msk.f32.vlgmr.msra.gmra.mrb[8].mxu1 %vm1096_vm1, %v859_v25  ;;  %4460 = vmatprep.subr.msk.bf16.mxu0 %vm4982_vm2, %v4458_v27  ;;  %v850_v21 = vadd.f32 %v4977_v60, %v849_v33 }
 0x233   : > { %4220 = vmatprep.mubr.msk.f32.mxu0 %vm1096_vm1, %v862_v26  ;;  %4457 = vmatpush3.bf16.xpose.msk.msra.mxu1 %vm4982_vm2, %v4452_v14  ;;  %v865_v1 = vmul.f32 0.35355338, %v855_v58 }
 0x234   : > { %v4464_v41 = vpack.c.bf16 %v977_v32, %v972_v37  ;;  %4213 = vmatprep.mubr.msk.f32.mxu1 %vm1096_vm1, %v860_v35  ;;  %4463 = vmatpush3.bf16.xpose.msk.msra.mxu0 %vm4982_vm2, %v4458_v27  ;;  %v4192_v42 = vpop.f32.mrb[8].mxu0  ;;  %v864_v56 = vmul.f32 0.35355338, %v850_v21 }
 0x235   : > { %v1061_v45 = vadd.f32 %v4192_v42, %v3849_v40  ;;  %v1055_v28 = vpop.f32.mrb[9].mxu0 }
 0x236   : > { %v1056_v47 = vadd.f32 %v3849_v40, %v1055_v28  ;;  %4466 = vmatprep.subr.msk.bf16.mxu1 %vm4982_vm2, %v4464_v41 }
 0x238   : > { %v4470_v29 = vpack.c.bf16 %v1061_v45, %v1056_v47  ;;  %v4195_v38 = vpop.f32.mrb[10].mxu0 }
 0x239   : > { %v1071_v54 = vadd.f32 %v4195_v38, %v3849_v40  ;;  %v1065_v55 = vpop.f32.mrb[11].mxu0 }
 0x23a   : > { %v1066_v57 = vadd.f32 %v3849_v40, %v1065_v55  ;;  %4214 = vmatmul.mubr.msk.f32.vlgmr.msra.gmra.mrb[10].mxu1 %vm1096_vm1, %v861_v50  ;;  %4471 = vmatprep.subr.bf16.mxu0 %v4470_v29 }
 0x23b   : > { %4221 = vmatmul.mubr.msk.f32.vlgmr.msra.gmra.mrb[16].mxu0 %vm1096_vm1, %v863_v53  ;;  %4469 = vmatpush3.bf16.xpose.msk.msra.mxu1 %vm4982_vm2, %v4464_v41 }
 0x23c   : > { %v4474_v49 = vpack.c.bf16 %v1071_v54, %v1066_v57  ;;  %4227 = vmatprep.mubr.msk.f32.mxu1 %vm1096_vm1, %v864_v56  ;;  %4473 = vmatpush3.bf16.msra.mxu0 %v4470_v29  ;;  %v4198_v61 = vpop.f32.mrb[12].mxu0 }
 0x23d   : > { %v1081_v62 = vadd.f32 %v4198_v61, %v3849_v40  ;;  %v1075_v63 = vpop.f32.mrb[13].mxu0 }
 0x23e   : > { %v1076_v0 = vadd.f32 %v3849_v40, %v1075_v63  ;;  %4475 = vmatprep.subr.bf16.mxu1 %v4474_v49 }
 0x240   : > { %v5019_v2 = vpack.c.bf16 %v1081_v62, %v1076_v0  ;;  %v4201_v3 = vpop.f32.mrb[14].mxu0 }
 0x241   : > { %v1091_v5 = vadd.f32 %v4201_v3, %v3849_v40  ;;  %v1085_v6 = vpop.f32.mrb[15].mxu0 }
 0x242   : > { %v1086_v7 = vadd.f32 %v3849_v40, %v1085_v6  ;;  %4228 = vmatmul.mubr.msk.f32.vlgmr.msra.gmra.mrb[12].mxu1 %vm1096_vm1, %v865_v1  ;;  %4479 = vmatprep.subr.bf16.mxu0 %v5019_v2 }
 0x243   : > { %4477 = vmatpush3.bf16.msra.mxu1 %v4474_v49 }
 0x244   : > { %v5023_v60 = vpack.c.bf16 %v1091_v5, %v1086_v7 }
 0x246   : > { %4483 = vmatprep.subr.bf16.mxu1 %v5023_v60 }
 0x305   : > { %v4208_v8 = vpop.f32.mrb[8].mxu1 }
 0x306   : > { %v1175_v9 = vpop.f32.mrb[9].mxu1  ;;  %v1181_v26 = vadd.f32 %v4208_v8, %v1095_v10 }
 0x307   : > { %v1176_v30 = vadd.f32 %v1175_v9, %v1094_v12 }
 0x308   : > { %v1448_v33 = vsel %vm586_vm0, %v1181_v26, -inf }
 0x309   : > { %v1445_v35 = vsel %vm586_vm0, %v1176_v30, -inf }
 0x30d   : > { %v4215_v11 = vpop.f32.mrb[10].mxu1 }
 0x30e   : > { %v1268_v13 = vadd.f32 %v4215_v11, %v1095_v10  ;;  %v4222_v14 = vpop.f32.mrb[16].mxu0  ;;  %v1262_v15 = vpop.f32.mrb[11].mxu1 }
 0x30f   : > { %v1263_v16 = vadd.f32 %v1262_v15, %v1094_v12  ;;  %v1349_v17 = vpop.f32.mrb[17].mxu0  ;;  %v1355_v32 = vadd.f32 %v4222_v14, %v1095_v10 }
 0x310   : > { %v1454_v18 = vsel %vm586_vm0, %v1268_v13, -inf  ;;  %v1350_v34 = vadd.f32 %v1349_v17, %v1094_v12 }
 0x311   : > { %1455 = vmax.xlane.f32.xlu1 %v1454_v18  ;;  %v1451_v19 = vsel %vm586_vm0, %v1263_v16, -inf  ;;  %v1460_v37 = vsel %vm586_vm0, %v1355_v32, -inf }
 0x312   : > { %1452 = vmax.xlane.f32.xlu0 %v1451_v19  ;;  %v1457_v40 = vsel %vm586_vm0, %v1350_v34, -inf }
 0x315   : > { %v4229_v22 = vpop.f32.mrb[12].mxu1 }
 0x316   : > { %v1442_v23 = vadd.f32 %v4229_v22, %v1095_v10  ;;  %v1436_v24 = vpop.f32.mrb[13].mxu1 }
 0x317   : > { %v1437_v25 = vadd.f32 %v1436_v24, %v1094_v12 }
 0x318   : > { %v1466_v27 = vsel %vm586_vm0, %v1442_v23, -inf }
 0x319   : > { %1467 = vmax.xlane.f32.xlu1 %v1466_v27  ;;  %v1463_v31 = vsel %vm586_vm0, %v1437_v25, -inf }
 0x31a   : > { %1464 = vmax.xlane.f32.xlu0 %v1463_v31  ;;  %v3895_v31 = vld [vmem:[%s5468_s4 + $0x18] sm:$0xff] }
 0x31d   : > { %1449 = vmax.xlane.f32.xlu1 %v1448_v33 }
 0x31e   : > { %1446 = vmax.xlane.f32.xlu0 %v1445_v35 }
 0x321   : > { %1461 = vmax.xlane.f32.xlu1 %v1460_v37 }
 0x322   : > { %1458 = vmax.xlane.f32.xlu0 %v1457_v40 }
 0x39e   : > { %v1456_v20 = vpop.xlane.xlu1 %1455 }
 0x39f   : > { %v1472_v41 = vsub.f32 %v1268_v13, %v1456_v20  ;;  %v1453_v42 = vpop.xlane.xlu0 %1452 }
 0x3a0   : > { %v1471_v43 = vsub.f32 %v1263_v16, %v1453_v42 }
 0x3a1   : > { %v1483_v45 = vmul.f32 1.442695, %v1472_v41 }
 0x3a2   : > { %v1481_v28 = vmul.f32 1.442695, %v1471_v43 }
 0x3a3   : > { %4590 = vpow2.f32 %v1483_v45 }
 0x3a4   : > { %4592 = vpow2.f32 %v1481_v28 }
 0x3a6   : > { %v1468_v21 = vpop.xlane.xlu1 %1467 }
 0x3a7   : > { %v1476_v47 = vsub.f32 %v1442_v23, %v1468_v21  ;;  %v1465_v50 = vpop.xlane.xlu0 %1464 }
 0x3a8   : > { %v1475_v29 = vsub.f32 %v1437_v25, %v1465_v50  ;;  %v3883_v50 = vld [vmem:[%s5467_s3 + $0x18] sm:$0xff] }
 0x3a9   : > { %v1491_v38 = vmul.f32 1.442695, %v1476_v47  ;;  %v3882_v47 = vld [vmem:[%s5467_s3 + $0x10] sm:$0xff] }
 0x3aa   : > { %v1489_v53 = vmul.f32 1.442695, %v1475_v29  ;;  %v1450_v54 = vpop.xlane.xlu1 %1449 }
 0x3ab   : > { %4594 = vpow2.f32 %v1491_v38  ;;  %v1470_v55 = vsub.f32 %v1181_v26, %v1450_v54  ;;  %v1447_v56 = vpop.xlane.xlu0 %1446 }
 0x3ac   : > { %4596 = vpow2.f32 %v1489_v53  ;;  %v1469_v57 = vsub.f32 %v1176_v30, %v1447_v56  ;;  %v3894_v30 = vld [vmem:[%s5468_s4 + $0x10] sm:$0xff]  ;;  %v4486_v53 = vpack.c.bf16 %v3883_v50, %v3882_v47  ;;  %v3907_v56 = vld [vmem:[%s5469_s5 + $0x18] sm:$0xff]  ;;  %v3909_v50 = vld [vmem:[%s5472_s8 + $0x1] ss:$0 sm:$0xff] }
 0x3ad   : > { %v4591_v58 = vpop.eup %4590  ;;  %v1479_v49 = vmul.f32 1.442695, %v1470_v55  ;;  %v4490_v40 = vpack.c.bf16 %v3895_v31, %v3894_v30  ;;  %v3906_v55 = vld [vmem:[%s5469_s5 + $0x10] sm:$0xff] }
 0x3ae   : > { %v4593_v61 = vpop.eup %4592  ;;  %v1477_v62 = vmul.f32 1.442695, %v1469_v57  ;;  %v1462_v63 = vpop.xlane.xlu1 %1461  ;;  %v1502_v0 = vsel %vm586_vm0, %v4591_v58, 0.0 }
 0x3af   : > { %4598 = vpow2.f32 %v1479_v49  ;;  %v1474_v1 = vsub.f32 %v1355_v32, %v1462_v63  ;;  %1503 = vadd.xlane.f32.xlu1 %v1502_v0  ;;  %v1459_v3 = vpop.xlane.xlu0 %1458  ;;  %v1499_v5 = vsel %vm586_vm0, %v4593_v61, 0.0 }
 0x3b0   : > { %4600 = vpow2.f32 %v1477_v62  ;;  %v1473_v6 = vsub.f32 %v1350_v34, %v1459_v3  ;;  %1500 = vadd.xlane.f32.xlu0 %v1499_v5 }
 0x3b1   : > { %v1487_v7 = vmul.f32 1.442695, %v1474_v1 }
 0x3b2   : > { %v1485_v8 = vmul.f32 1.442695, %v1473_v6 }
 0x3b3   : > { %4602 = vpow2.f32 %v1487_v7 }
 0x3b4   : > { %4604 = vpow2.f32 %v1485_v8 }
 0x3b5   : > { %v4595_v9 = vpop.eup %4594 }
 0x3b6   : > { %v4597_v10 = vpop.eup %4596  ;;  %v1514_v11 = vsel %vm586_vm0, %v4595_v9, 0.0 }
 0x3b7   : > { %1515 = vadd.xlane.f32.xlu1 %v1514_v11  ;;  %v1511_v12 = vsel %vm586_vm0, %v4597_v10, 0.0 }
 0x3b8   : > { %1512 = vadd.xlane.f32.xlu0 %v1511_v12 }
 0x3b9   : > { %v4599_v13 = vpop.eup %4598 }
 0x3ba   : > { %v4601_v14 = vpop.eup %4600  ;;  %v1496_v15 = vsel %vm586_vm0, %v4599_v13, 0.0 }
 0x3bb   : > { %1497 = vadd.xlane.f32.xlu1 %v1496_v15  ;;  %v1493_v16 = vsel %vm586_vm0, %v4601_v14, 0.0 }
 0x3bc   : > { %1494 = vadd.xlane.f32.xlu0 %v1493_v16 }
 0x3bd   : > { %v4603_v17 = vpop.eup %4602 }
 0x3be   : > { %v4605_v18 = vpop.eup %4604  ;;  %v1508_v19 = vsel %vm586_vm0, %v4603_v17, 0.0 }
 0x3bf   : > { %1509 = vadd.xlane.f32.xlu1 %v1508_v19  ;;  %v1505_v22 = vsel %vm586_vm0, %v4605_v18, 0.0 }
 0x3c0   : > { %1506 = vadd.xlane.f32.xlu0 %v1505_v22 }
 0x43c   : > { %v1504_v23 = vpop.xlane.xlu1 %1503 }
 0x43d   : > { %4606 = vrcp.f32 %v1504_v23  ;;  %v1501_v24 = vpop.xlane.xlu0 %1500 }
 0x43e   : > { %4608 = vrcp.f32 %v1501_v24 }
 0x444   : > { %v1516_v25 = vpop.xlane.xlu1 %1515 }
 0x445   : > { %4610 = vrcp.f32 %v1516_v25  ;;  %v1513_v26 = vpop.xlane.xlu0 %1512 }
 0x446   : > { %4612 = vrcp.f32 %v1513_v26 }
 0x447   : > { %v4607_v27 = vpop.eup %4606 }
 0x448   : > { %v4609_v32 = vpop.eup %4608  ;;  %v1498_v33 = vpop.xlane.xlu1 %1497  ;;  %v1524_v37 = vmul.f32 %v4607_v27, %v4591_v58 }
 0x449   : > { %4614 = vrcp.f32 %v1498_v33  ;;  %v1495_v34 = vpop.xlane.xlu0 %1494  ;;  %v1522_v35 = vmul.f32 %v4609_v32, %v4593_v61  ;;  %v4494_v61 = vpack.c.bf16 %v3907_v56, %v3906_v55 }
 0x44a   : > { %4616 = vrcp.f32 %v1495_v34 }
 0x44b   : > { %4241 = vmatprep.mubr.msk.f32.mxu1 %vm586_vm0, %v1522_v35 }
 0x44c   : > { %v1510_v20 = vpop.xlane.xlu1 %1509  ;;  %4242 = vmatmul.mubr.msk.f32.vlgmr.msra.gmra.mrb[14].mxu1 %vm586_vm0, %v1524_v37 }
 0x44d   : > { %4618 = vrcp.f32 %v1510_v20  ;;  %4485 = vmatpush3.bf16.msra.mxu1 %v5023_v60  ;;  %v1507_v41 = vpop.xlane.xlu0 %1506 }
 0x44e   : > { %4620 = vrcp.f32 %v1507_v41  ;;  %4491 = vmatprep.subr.bf16.mxu1 %v4490_v40 }
 0x44f   : > { %v4611_v42 = vpop.eup %4610 }
 0x450   : > { %v4613_v43 = vpop.eup %4612  ;;  %v1532_v28 = vmul.f32 %v4611_v42, %v4595_v9  ;;  %v3885_v9 = vld [vmem:[%s5470_s6 + $0x1] ss:$0 sm:$0xff] }
 0x451   : > { %v1530_v45 = vmul.f32 %v4613_v43, %v4597_v10 }
 0x453   : > { %v4615_v21 = vpop.eup %4614  ;;  %4255 = vmatprep.mubr.msk.f32.mxu1 %vm586_vm0, %v1530_v45 }
 0x454   : > { %v4617_v29 = vpop.eup %4616  ;;  %4256 = vmatmul.mubr.msk.f32.vlgmr.msra.gmra.mrb[16].mxu1 %vm586_vm0, %v1532_v28  ;;  %v1520_v38 = vmul.f32 %v4615_v21, %v4599_v13 }
 0x455   : > { %4493 = vmatpush3.bf16.msra.mxu1 %v4490_v40  ;;  %4278 = vmatprep.mubr.msk.f32.mxu1 %vm586_vm0, %v4899_v36  ;;  %v1518_v60 = vmul.f32 %v4617_v29, %v4601_v14 }
 0x457   : > { %v4619_v54 = vpop.eup %4618  ;;  %4234 = vmatprep.mubr.msk.f32.mxu0 %vm586_vm0, %v1518_v60 }
 0x458   : > { %v4621_v57 = vpop.eup %4620  ;;  %4235 = vmatmul.mubr.msk.f32.vlgmr.msra.gmra.mrb[18].mxu0 %vm586_vm0, %v1520_v38  ;;  %4279 = vmatmul.mubr.msk.f32.vlgmr.msra.gmra.mrb[18].mxu1 %vm586_vm0, %v4907_v44  ;;  %v1528_v49 = vmul.f32 %v4619_v54, %v4603_v17 }
 0x459   : > { %4481 = vmatpush3.bf16.msra.mxu0 %v5019_v2  ;;  %4281 = vmatprep.mubr.msk.f32.mxu1 %vm586_vm0, %v4910_v46  ;;  %v1526_v58 = vmul.f32 %v4621_v57, %v4605_v18 }
 0x45a   : > { %4487 = vmatprep.subr.bf16.mxu0 %v4486_v53 }
 0x45b   : > { %4248 = vmatprep.mubr.msk.f32.mxu0 %vm586_vm0, %v1526_v58 }
 0x45c   : > { %4249 = vmatmul.mubr.msk.f32.vlgmr.msra.gmra.mrb[20].mxu0 %vm586_vm0, %v1528_v49  ;;  %4282 = vmatmul.mubr.msk.f32.gmra.mrb[20].mxu1 %vm586_vm0, %v4921_v51 }
 0x45d   : > { %4489 = vmatpush3.bf16.msra.mxu0 %v4486_v53  ;;  %4262 = vmatprep.mubr.msk.f32.mxu0 %vm586_vm0, %v4899_v36 }
 0x45e   : > { %4284 = vmatprep.mubr.msk.f32.mxu1 %vm586_vm0, %v4925_v52  ;;  %4495 = vmatprep.subr.bf16.mxu0 %v4494_v61 }
 0x460   : > { %4263 = vmatmul.mubr.msk.f32.vlgmr.msra.gmra.mrb[22].mxu0 %vm586_vm0, %v4907_v44  ;;  %4285 = vmatmul.mubr.msk.f32.gmra.mrb[22].mxu1 %vm586_vm0, %v4936_v39 }
 0x461   : > { %4265 = vmatprep.mubr.msk.f32.mxu0 %vm586_vm0, %v4910_v46  ;;  %4287 = vmatprep.mubr.msk.f32.mxu1 %vm586_vm0, %v4939_v48 }
 0x462   : > { %4497 = vmatpush3.bf16.msra.mxu0 %v4494_v61 }
 0x464   : > { %4266 = vmatmul.mubr.msk.f32.gmra.mrb[24].mxu0 %vm586_vm0, %v4921_v51  ;;  %4288 = vmatmul.mubr.msk.f32.gmra.mrb[24].mxu1 %vm586_vm0, %v4949_v59 }
 0x465   : > { %4268 = vmatprep.mubr.msk.f32.mxu0 %vm586_vm0, %v4925_v52 }
 0x468   : > { %4269 = vmatmul.mubr.msk.f32.gmra.mrb[26].mxu0 %vm586_vm0, %v4936_v39 }
 0x469   : > { %4271 = vmatprep.mubr.msk.f32.mxu0 %vm586_vm0, %v4939_v48 }
 0x46c   : > { %4272 = vmatmul.mubr.msk.f32.gmra.mrb[28].mxu0 %vm586_vm0, %v4949_v59 }
 0x46d   : > { %4294 = vmatprep.mubr.msk.f32.mxu0 %vm586_vm0, %v4899_v36 }
 0x470   : > { %4295 = vmatmul.mubr.msk.f32.vlgmr.msra.gmra.mrb[30].mxu0 %vm586_vm0, %v4907_v44 }
 0x471   : > { %4297 = vmatprep.mubr.msk.f32.mxu0 %vm586_vm0, %v4910_v46 }
 0x474   : > { %4298 = vmatmul.mubr.msk.f32.gmra.mrb[32].mxu0 %vm586_vm0, %v4921_v51  ;;  %v3897_v51 = vld [vmem:[%s5471_s7 + $0x1] ss:$0 sm:$0xff] }
 0x475   : > { %4300 = vmatprep.mubr.msk.f32.mxu0 %vm586_vm0, %v4925_v52 }
 0x478   : > { %4301 = vmatmul.mubr.msk.f32.gmra.mrb[34].mxu0 %vm586_vm0, %v4936_v39 }
 0x479   : > { %4303 = vmatprep.mubr.msk.f32.mxu0 %vm586_vm0, %v4939_v48 }
 0x47c   : > { %4304 = vmatmul.mubr.msk.f32.gmra.mrb[36].mxu0 %vm586_vm0, %v4949_v59 }
 0x51f   : > { %v5124_v36 = vpop.f32.mrb[14].mxu1 }
 0x520   : > { %v5126_v44 = vpop.f32.mrb[15].mxu1 }
 0x527   : > { %v5128_v46 = vpop.f32.mrb[16].mxu1 }
 0x528   : > { %v5130_v2 = vpop.f32.mrb[17].mxu1 }
 0x52b   : > { %v5135_v52 = vpop.f32.mrb[18].mxu0  ;;  %v4280_v39 = vpop.f32.mrb[18].mxu1 }
 0x52c   : > { %v2065_v62 = vadd.f32 %v4280_v39, %v3897_v51  ;;  %v5137_v48 = vpop.f32.mrb[19].mxu0  ;;  %v2059_v63 = vpop.f32.mrb[19].mxu1 }
 0x52d   : > { %v2060_v59 = vadd.f32 %v3897_v51, %v2059_v63 }
 0x52f   : > { %v4498_v0 = vpack.c.bf16 %v2065_v62, %v2060_v59  ;;  %v5139_v1 = vpop.f32.mrb[20].mxu0  ;;  %v4283_v3 = vpop.f32.mrb[20].mxu1 }
 0x530   : > { %v2075_v5 = vadd.f32 %v4283_v3, %v3897_v51  ;;  %v5141_v6 = vpop.f32.mrb[21].mxu0  ;;  %v2069_v7 = vpop.f32.mrb[21].mxu1 }
 0x531   : > { %v2070_v8 = vadd.f32 %v3897_v51, %v2069_v7  ;;  %4500 = vmatprep.subr.msk.bf16.mxu1 %vm4982_vm2, %v4498_v0 }
 0x532   : > { %4503 = vmatpush3.bf16.xpose.msk.msra.mxu1 %vm4982_vm2, %v4498_v0 }
 0x533   : > { %v4504_v10 = vpack.c.bf16 %v2075_v5, %v2070_v8  ;;  %v4264_v11 = vpop.f32.mrb[22].mxu0  ;;  %v4286_v12 = vpop.f32.mrb[22].mxu1 }
 0x534   : > { %v1941_v13 = vadd.f32 %v4264_v11, %v3885_v9  ;;  %v2085_v14 = vadd.f32 %v4286_v12, %v3897_v51  ;;  %v1935_v15 = vpop.f32.mrb[23].mxu0  ;;  %v2079_v16 = vpop.f32.mrb[23].mxu1  ;;  %v3918_v11 = vld [vmem:[%s5481_s17 + $0x10] sm:$0xff] }
 0x535   : > { %v1936_v17 = vadd.f32 %v3885_v9, %v1935_v15  ;;  %v2080_v18 = vadd.f32 %v3897_v51, %v2079_v16  ;;  %4506 = vmatprep.subr.msk.bf16.mxu1 %vm4982_vm2, %v4504_v10 }
 0x536   : > { %v1975_v25 = vmul.f32 0.35355338, %v1941_v13 }
 0x537   : > { %v1974_v19 = vmul.f32 0.35355338, %v1936_v17  ;;  %v4510_v22 = vpack.c.bf16 %v2085_v14, %v2080_v18  ;;  %v4267_v23 = vpop.f32.mrb[24].mxu0  ;;  %v4289_v24 = vpop.f32.mrb[24].mxu1 }
 0x538   : > { %v2095_v26 = vadd.f32 %v4289_v24, %v3897_v51  ;;  %v1945_v27 = vpop.f32.mrb[25].mxu0  ;;  %v2089_v30 = vpop.f32.mrb[25].mxu1  ;;  %v1951_v37 = vadd.f32 %v4267_v23, %v3885_v9 }
 0x539   : > { %v1946_v31 = vadd.f32 %v3885_v9, %v1945_v27  ;;  %v2090_v32 = vadd.f32 %v3897_v51, %v2089_v30  ;;  %4310 = vmatprep.mubr.msk.f32.mxu1 %vm1096_vm1, %v1974_v19  ;;  %4512 = vmatprep.subr.msk.bf16.mxu0 %vm4982_vm2, %v4510_v22 }
 0x53a   : > { %4311 = vmatmul.mubr.msk.f32.vlgmr.msra.gmra.mrb[26].mxu1 %vm1096_vm1, %v1975_v25  ;;  %4515 = vmatpush3.bf16.xpose.msk.msra.mxu0 %vm4982_vm2, %v4510_v22  ;;  %v1977_v45 = vmul.f32 0.35355338, %v1951_v37 }
 0x53b   : > { %v1976_v33 = vmul.f32 0.35355338, %v1946_v31  ;;  %v4516_v34 = vpack.c.bf16 %v2095_v26, %v2090_v32  ;;  %4509 = vmatpush3.bf16.xpose.msk.msra.mxu1 %vm4982_vm2, %v4504_v10  ;;  %v4270_v35 = vpop.f32.mrb[26].mxu0  ;;  %v3919_v10 = vld [vmem:[%s5481_s17 + $0x18] sm:$0xff] }
 0x53c   : > { %v1961_v40 = vadd.f32 %v4270_v35, %v3885_v9  ;;  %v1955_v20 = vpop.f32.mrb[27].mxu0 }
 0x53d   : > { %v1956_v41 = vadd.f32 %v3885_v9, %v1955_v20  ;;  %4317 = vmatprep.mubr.msk.f32.mxu1 %vm1096_vm1, %v1976_v33  ;;  %4518 = vmatprep.subr.msk.bf16.mxu1 %vm4982_vm2, %v4516_v34 }
 0x53e   : > { %v1979_v28 = vmul.f32 0.35355338, %v1961_v40 }
 0x53f   : > { %v1978_v42 = vmul.f32 0.35355338, %v1956_v41  ;;  %v4273_v43 = vpop.f32.mrb[28].mxu0 }
 0x540   : > { %v1965_v21 = vpop.f32.mrb[29].mxu0  ;;  %v1971_v38 = vadd.f32 %v4273_v43, %v3885_v9 }
 0x541   : > { %v1966_v47 = vadd.f32 %v3885_v9, %v1965_v21  ;;  %4324 = vmatprep.mubr.msk.f32.mxu0 %vm1096_vm1, %v1978_v42 }
 0x542   : > { %4318 = vmatmul.mubr.msk.f32.vlgmr.msra.gmra.mrb[28].mxu1 %vm1096_vm1, %v1977_v45  ;;  %4325 = vmatmul.mubr.msk.f32.vlgmr.msra.gmra.mrb[38].mxu0 %vm1096_vm1, %v1979_v28  ;;  %v1981_v58 = vmul.f32 0.35355338, %v1971_v38 }
 0x543   : > { %v1980_v29 = vmul.f32 0.35355338, %v1966_v47  ;;  %4521 = vmatpush3.bf16.xpose.msk.msra.mxu1 %vm4982_vm2, %v4516_v34  ;;  %v4296_v60 = vpop.f32.mrb[30].mxu0 }
 0x544   : > { %v2181_v53 = vadd.f32 %v4296_v60, %v3909_v50  ;;  %v2175_v54 = vpop.f32.mrb[31].mxu0 }
 0x545   : > { %v2176_v55 = vadd.f32 %v3909_v50, %v2175_v54  ;;  %4331 = vmatprep.mubr.msk.f32.mxu1 %vm1096_vm1, %v1980_v29 }
 0x547   : > { %v4522_v56 = vpack.c.bf16 %v2181_v53, %v2176_v55  ;;  %v4299_v57 = vpop.f32.mrb[32].mxu0 }
 0x548   : > { %v2191_v49 = vadd.f32 %v4299_v57, %v3909_v50  ;;  %v2185_v61 = vpop.f32.mrb[33].mxu0 }
 0x549   : > { %v2186_v51 = vadd.f32 %v3909_v50, %v2185_v61  ;;  %4523 = vmatprep.subr.bf16.mxu0 %v4522_v56 }
 0x54a   : > { %4332 = vmatmul.mubr.msk.f32.vlgmr.msra.gmra.mrb[30].mxu1 %vm1096_vm1, %v1981_v58  ;;  %4525 = vmatpush3.bf16.msra.mxu0 %v4522_v56 }
 0x54b   : > { %v4526_v39 = vpack.c.bf16 %v2191_v49, %v2186_v51  ;;  %v4302_v4 = vpop.f32.mrb[34].mxu0 }
 0x54c   : > { %v2201_v62 = vadd.f32 %v4302_v4, %v3909_v50  ;;  %v2195_v63 = vpop.f32.mrb[35].mxu0 }
 0x54d   : > { %v2196_v59 = vadd.f32 %v3909_v50, %v2195_v63  ;;  %4527 = vmatprep.subr.bf16.mxu1 %v4526_v39 }
 0x54e   : > { %4529 = vmatpush3.bf16.msra.mxu1 %v4526_v39 }
 0x54f   : > { %v5173_v0 = vpack.c.bf16 %v2201_v62, %v2196_v59  ;;  %v4305_v3 = vpop.f32.mrb[36].mxu0 }
 0x550   : > { %v2211_v5 = vadd.f32 %v4305_v3, %v3909_v50  ;;  %v2205_v7 = vpop.f32.mrb[37].mxu0 }
 0x551   : > { %v2206_v8 = vadd.f32 %v3909_v50, %v2205_v7  ;;  %4531 = vmatprep.subr.bf16.mxu0 %v5173_v0 }
 0x553   : > { %v5176_v9 = vpack.c.bf16 %v2211_v5, %v2206_v8 }
 0x555   : > { %4535 = vmatprep.subr.bf16.mxu1 %v5176_v9 }
 0x60d   : > { %v4312_v12 = vpop.f32.mrb[26].mxu1 }
 0x60e   : > { %v2301_v13 = vadd.f32 %v4312_v12, %v3919_v10  ;;  %v2295_v14 = vpop.f32.mrb[27].mxu1 }
 0x60f   : > { %v2296_v15 = vadd.f32 %v3918_v11, %v2295_v14 }
 0x610   : > { %v2568_v16 = vsel %vm586_vm0, %v2301_v13, -inf }
 0x611   : > { %2569 = vmax.xlane.f32.xlu1 %v2568_v16  ;;  %v2565_v17 = vsel %vm586_vm0, %v2296_v15, -inf }
 0x612   : > { %2566 = vmax.xlane.f32.xlu0 %v2565_v17 }
 0x615   : > { %v4319_v18 = vpop.f32.mrb[28].mxu1  ;;  %v4326_v19 = vpop.f32.mrb[38].mxu0 }
 0x616   : > { %v2388_v22 = vadd.f32 %v4319_v18, %v3919_v10  ;;  %v2382_v23 = vpop.f32.mrb[29].mxu1  ;;  %v2469_v24 = vpop.f32.mrb[39].mxu0  ;;  %v2475_v26 = vadd.f32 %v4326_v19, %v3919_v10 }
 0x617   : > { %v2383_v25 = vadd.f32 %v3918_v11, %v2382_v23  ;;  %v2470_v30 = vadd.f32 %v3918_v11, %v2469_v24 }
 0x618   : > { %v2574_v27 = vsel %vm586_vm0, %v2388_v22, -inf  ;;  %v2580_v32 = vsel %vm586_vm0, %v2475_v26, -inf }
 0x619   : > { %2575 = vmax.xlane.f32.xlu1 %v2574_v27  ;;  %v2571_v31 = vsel %vm586_vm0, %v2383_v25, -inf  ;;  %v2577_v34 = vsel %vm586_vm0, %v2470_v30, -inf }
 0x61a   : > { %2572 = vmax.xlane.f32.xlu0 %v2571_v31 }
 0x61d   : > { %2581 = vmax.xlane.f32.xlu1 %v2580_v32  ;;  %v4333_v33 = vpop.f32.mrb[30].mxu1 }
 0x61e   : > { %v2562_v35 = vadd.f32 %v4333_v33, %v3919_v10  ;;  %v2556_v37 = vpop.f32.mrb[31].mxu1  ;;  %2578 = vmax.xlane.f32.xlu0 %v2577_v34 }
 0x61f   : > { %v2557_v40 = vadd.f32 %v3918_v11, %v2556_v37 }
 0x620   : > { %v2586_v20 = vsel %vm586_vm0, %v2562_v35, -inf }
 0x621   : > { %2587 = vmax.xlane.f32.xlu1 %v2586_v20  ;;  %v2583_v41 = vsel %vm586_vm0, %v2557_v40, -inf }
 0x622   : > { %2584 = vmax.xlane.f32.xlu0 %v2583_v41 }
 0x69e   : > { %v2570_v42 = vpop.xlane.xlu1 %2569 }
 0x69f   : > { %v2590_v43 = vsub.f32 %v2301_v13, %v2570_v42  ;;  %v2567_v45 = vpop.xlane.xlu0 %2566 }
 0x6a0   : > { %v2589_v28 = vsub.f32 %v2296_v15, %v2567_v45 }
 0x6a1   : > { %v2599_v21 = vmul.f32 1.442695, %v2590_v43 }
 0x6a2   : > { %v2597_v47 = vmul.f32 1.442695, %v2589_v28 }
 0x6a3   : > { %4622 = vpow2.f32 %v2599_v21 }
 0x6a4   : > { %4624 = vpow2.f32 %v2597_v47 }
 0x6a6   : > { %v2576_v50 = vpop.xlane.xlu1 %2575 }
 0x6a7   : > { %v2592_v29 = vsub.f32 %v2388_v22, %v2576_v50  ;;  %v2573_v60 = vpop.xlane.xlu0 %2572 }
 0x6a8   : > { %v2591_v38 = vsub.f32 %v2383_v25, %v2573_v60 }
 0x6a9   : > { %v2603_v53 = vmul.f32 1.442695, %v2592_v29 }
 0x6aa   : > { %v2601_v54 = vmul.f32 1.442695, %v2591_v38  ;;  %v2582_v55 = vpop.xlane.xlu1 %2581  ;;  %v3944_v38 = vld [vmem:[%s5473_s9 + $0x8] sm:$0xff] }
 0x6ab   : > { %4626 = vpow2.f32 %v2603_v53  ;;  %v2594_v56 = vsub.f32 %v2475_v26, %v2582_v55  ;;  %v2579_v57 = vpop.xlane.xlu0 %2578 }
 0x6ac   : > { %4628 = vpow2.f32 %v2601_v54  ;;  %v2593_v58 = vsub.f32 %v2470_v30, %v2579_v57 }
 0x6ad   : > { %v4623_v49 = vpop.eup %4622  ;;  %v2607_v61 = vmul.f32 1.442695, %v2594_v56 }
 0x6ae   : > { %v4625_v51 = vpop.eup %4624  ;;  %v2605_v39 = vmul.f32 1.442695, %v2593_v58  ;;  %v2588_v4 = vpop.xlane.xlu1 %2587  ;;  %v2616_v62 = vsel %vm586_vm0, %v4623_v49, 0.0 }
 0x6af   : > { %4630 = vpow2.f32 %v2607_v61  ;;  %v2596_v63 = vsub.f32 %v2562_v35, %v2588_v4  ;;  %v2585_v59 = vpop.xlane.xlu0 %2584  ;;  %2617 = vadd.xlane.f32.xlu1 %v2616_v62  ;;  %v2613_v3 = vsel %vm586_vm0, %v4625_v51, 0.0  ;;  %v4688_v62 = vld [vmem:[%s4813_s1 + $0x18] sm:$0xff] }
 0x6b0   : > { %4632 = vpow2.f32 %v2605_v39  ;;  %v2595_v5 = vsub.f32 %v2557_v40, %v2585_v59  ;;  %2614 = vadd.xlane.f32.xlu0 %v2613_v3  ;;  %v4687_v39 = vld [vmem:[%s4813_s1] sm:$0xff]  ;;  %v4689_v3 = vld [vmem:[%s4813_s1 + $0x10] sm:$0xff] }
 0x6b1   : > { %v2611_v7 = vmul.f32 1.442695, %v2596_v63 }
 0x6b2   : > { %v2609_v8 = vmul.f32 1.442695, %v2595_v5 }
 0x6b3   : > { %4634 = vpow2.f32 %v2611_v7 }
 0x6b4   : > { %4636 = vpow2.f32 %v2609_v8 }
 0x6b5   : > { %v4627_v10 = vpop.eup %4626 }
 0x6b6   : > { %v4629_v11 = vpop.eup %4628  ;;  %v2622_v12 = vsel %vm586_vm0, %v4627_v10, 0.0 }
 0x6b7   : > { %2623 = vadd.xlane.f32.xlu1 %v2622_v12  ;;  %v2619_v13 = vsel %vm586_vm0, %v4629_v11, 0.0  ;;  %v4690_v12 = vld [vmem:[%s4813_s1 + $0x28] sm:$0xff] }
 0x6b8   : > { %2620 = vadd.xlane.f32.xlu0 %v2619_v13 }
 0x6b9   : > { %v4631_v14 = vpop.eup %4630 }
 0x6ba   : > { %v4633_v15 = vpop.eup %4632  ;;  %v2628_v16 = vsel %vm586_vm0, %v4631_v14, 0.0 }
 0x6bb   : > { %2629 = vadd.xlane.f32.xlu1 %v2628_v16  ;;  %v2625_v17 = vsel %vm586_vm0, %v4633_v15, 0.0  ;;  %v4691_v16 = vld [vmem:[%s4813_s1 + $0x20] sm:$0xff] }
 0x6bc   : > { %2626 = vadd.xlane.f32.xlu0 %v2625_v17 }
 0x6bd   : > { %v4635_v18 = vpop.eup %4634 }
 0x6be   : > { %v4637_v19 = vpop.eup %4636  ;;  %v2634_v22 = vsel %vm586_vm0, %v4635_v18, 0.0 }
 0x6bf   : > { %2635 = vadd.xlane.f32.xlu1 %v2634_v22  ;;  %v2631_v23 = vsel %vm586_vm0, %v4637_v19, 0.0 }
 0x6c0   : > { %2632 = vadd.xlane.f32.xlu0 %v2631_v23 }
 0x73c   : > { %v2618_v24 = vpop.xlane.xlu1 %2617 }
 0x73d   : > { %4638 = vrcp.f32 %v2618_v24  ;;  %v2615_v25 = vpop.xlane.xlu0 %2614  ;;  %v4692_v24 = vld [vmem:[%s4813_s1 + $0x38] sm:$0xff] }
 0x73e   : > { %4640 = vrcp.f32 %v2615_v25 }
 0x744   : > { %v2624_v26 = vpop.xlane.xlu1 %2623 }
 0x745   : > { %4642 = vrcp.f32 %v2624_v26  ;;  %v2621_v27 = vpop.xlane.xlu0 %2620 }
 0x746   : > { %4644 = vrcp.f32 %v2621_v27 }
 0x747   : > { %v4639_v30 = vpop.eup %4638 }
 0x748   : > { %v4641_v31 = vpop.eup %4640  ;;  %v2630_v32 = vpop.xlane.xlu1 %2629  ;;  %v2640_v35 = vmul.f32 %v4639_v30, %v4623_v49  ;;  %v4693_v30 = vld [vmem:[%s4813_s1 + $0x30] sm:$0xff] }
 0x749   : > { %4646 = vrcp.f32 %v2630_v32  ;;  %v2627_v33 = vpop.xlane.xlu0 %2626  ;;  %v2638_v34 = vmul.f32 %v4641_v31, %v4625_v51 }
 0x74a   : > { %4648 = vrcp.f32 %v2627_v33 }
 0x74b   : > { %4338 = vmatprep.mubr.msk.f32.mxu0 %vm586_vm0, %v2638_v34 }
 0x74c   : > { %v2636_v37 = vpop.xlane.xlu1 %2635  ;;  %4339 = vmatmul.mubr.msk.f32.vlgmr.msra.gmra.mrb[40].mxu0 %vm586_vm0, %v2640_v35 }
 0x74d   : > { %4650 = vrcp.f32 %v2636_v37  ;;  %4533 = vmatpush3.bf16.msra.mxu0 %v5173_v0  ;;  %v2633_v40 = vpop.xlane.xlu0 %2632 }
 0x74e   : > { %4652 = vrcp.f32 %v2633_v40  ;;  %4362 = vmatprep.subr.mxu0 %v3944_v38 }
 0x74f   : > { %v4643_v20 = vpop.eup %4642 }
 0x750   : > { %v4645_v41 = vpop.eup %4644  ;;  %v2644_v43 = vmul.f32 %v4643_v20, %v4627_v10 }
 0x751   : > { %v2642_v42 = vmul.f32 %v4645_v41, %v4629_v11 }
 0x753   : > { %v4647_v45 = vpop.eup %4646  ;;  %4345 = vmatprep.mubr.msk.f32.mxu1 %vm586_vm0, %v2642_v42 }
 0x754   : > { %v4649_v28 = vpop.eup %4648  ;;  %4346 = vmatmul.mubr.msk.f32.vlgmr.msra.gmra.mrb[32].mxu1 %vm586_vm0, %v2644_v43  ;;  %v2648_v47 = vmul.f32 %v4647_v45, %v4631_v14 }
 0x755   : > { %4537 = vmatpush3.bf16.msra.mxu1 %v5176_v9  ;;  %v2646_v21 = vmul.f32 %v4649_v28, %v4633_v15  ;;  %v1857_v9 = vld [vmem:[%s5473_s9] sm:$0xff] }
 0x757   : > { %v4651_v50 = vpop.eup %4650  ;;  %4352 = vmatprep.mubr.msk.f32.mxu0 %vm586_vm0, %v2646_v21 }
 0x758   : > { %v4653_v0 = vpop.eup %4652  ;;  %4353 = vmatmul.mubr.msk.f32.vlgmr.msra.gmra.mrb[42].mxu0 %vm586_vm0, %v2648_v47  ;;  %v2652_v60 = vmul.f32 %v4651_v50, %v4635_v18 }
 0x759   : > { %v2650_v29 = vmul.f32 %v4653_v0, %v4637_v19  ;;  %4363 = vmatpush3.msra.mxu0 %v3944_v38 }
 0x75a   : > { %4376 = vmatprep.subr.mxu0 %v1857_v9 }
 0x75b   : > { %4359 = vmatprep.mubr.msk.f32.mxu1 %vm586_vm0, %v2650_v29 }
 0x75c   : > { %4360 = vmatmul.mubr.msk.f32.vlgmr.msra.gmra.mrb[34].mxu1 %vm586_vm0, %v2652_v60 }
 0x81f   : > { %v4340_v53 = vpop.f32.mrb[40].mxu0 }
 0x820   : > { %v2725_v54 = vpop.f32.mrb[41].mxu0 }
 0x821   : > { %4364 = vmatprep.mubr.msk.f32.mxu0 %vm1096_vm1, %v2725_v54 }
 0x822   : > { %4365 = vmatmul.mubr.msk.f32.vlgmr.msra.gmra.mrb[44].mxu0 %vm1096_vm1, %v4340_v53 }
 0x823   : > { %4377 = vmatpush3.msra.mxu0 %v1857_v9 }
 0x827   : > { %v4347_v55 = vpop.f32.mrb[32].mxu1 }
 0x828   : > { %v2806_v56 = vpop.f32.mrb[33].mxu1 }
 0x829   : > { %4367 = vmatprep.mubr.msk.f32.mxu0 %vm1096_vm1, %v2806_v56 }
 0x82a   : > { %4368 = vmatmul.mubr.msk.f32.gmra.mrb[46].mxu0 %vm1096_vm1, %v4347_v55 }
 0x82b   : > { %v4354_v57 = vpop.f32.mrb[42].mxu0 }
 0x82c   : > { %v2887_v58 = vpop.f32.mrb[43].mxu0 }
 0x82d   : > { %4370 = vmatprep.mubr.msk.f32.mxu0 %vm1096_vm1, %v2887_v58 }
 0x82e   : > { %4371 = vmatmul.mubr.msk.f32.gmra.mrb[48].mxu0 %vm1096_vm1, %v4354_v57 }
 0x82f   : > { %v4361_v49 = vpop.f32.mrb[34].mxu1 }
 0x830   : > { %v2968_v61 = vpop.f32.mrb[35].mxu1 }
 0x831   : > { %4373 = vmatprep.mubr.msk.f32.mxu0 %vm1096_vm1, %v2968_v61 }
 0x832   : > { %4374 = vmatmul.mubr.msk.f32.gmra.mrb[50].mxu0 %vm1096_vm1, %v4361_v49 }
 0x833   : > { %4378 = vmatprep.mubr.msk.f32.mxu0 %vm1096_vm1, %v5137_v48  ;;  %v4686_v48 = vld [vmem:[%s4813_s1 + $0x8] sm:$0xff] }
 0x836   : > { %4379 = vmatmul.mubr.msk.f32.vlgmr.msra.gmra.mrb[44].mxu0 %vm1096_vm1, %v5135_v52 }
 0x837   : > { %4381 = vmatprep.mubr.msk.f32.mxu0 %vm1096_vm1, %v5126_v44  ;;  %v3961_v44 = vld [vmem:[%s5474_s10] ss:$0 sm:$0xff] }
 0x83a   : > { %4382 = vmatmul.mubr.msk.f32.gmra.mrb[46].mxu0 %vm1096_vm1, %v5124_v36 }
 0x83b   : > { %4384 = vmatprep.mubr.msk.f32.mxu0 %vm1096_vm1, %v5141_v6 }
 0x83e   : > { %4385 = vmatmul.mubr.msk.f32.gmra.mrb[48].mxu0 %vm1096_vm1, %v5139_v1 }
 0x83f   : > { %4387 = vmatprep.mubr.msk.f32.mxu0 %vm1096_vm1, %v5130_v2 }
 0x842   : > { %4388 = vmatmul.mubr.msk.f32.gmra.mrb[50].mxu0 %vm1096_vm1, %v5128_v46 }
 0x909   : > { %v4380_v52 = vpop.f32.mrb[44].mxu0 }
 0x90a   : > { %v3238_v36 = vadd.f32 %v4686_v48, %v4380_v52  ;;  %v3198_v51 = vpop.f32.mrb[45].mxu0 }
 0x90b   : > { %v3237_v6 = vadd.f32 %v4687_v39, %v3198_v51 }
 0x90c   : > { %v5246_v4 = vadd.f32 %v3961_v44, %v3238_v36 }
 0x90d   : > { %v5248_v1 = vadd.f32 %v3961_v44, %v3237_v6  ;;  %v4383_v2 = vpop.f32.mrb[46].mxu0 }
 0x90e   : > { %v3240_v63 = vadd.f32 %v4688_v62, %v4383_v2  ;;  %v3208_v46 = vpop.f32.mrb[47].mxu0  ;;  %v3265_v59 = vsel %vm586_vm0, %v5246_v4, 0.0 }
 0x90f   : > { %v3239_v5 = vadd.f32 %v4689_v3, %v3208_v46  ;;  %3266 = vadd.xlane.f32.xlu1 %v3265_v59  ;;  %v3262_v7 = vsel %vm586_vm0, %v5248_v1, 0.0 }
 0x910   : > { %v5256_v8 = vadd.f32 %v3961_v44, %v3240_v63  ;;  %3263 = vadd.xlane.f32.xlu0 %v3262_v7 }
 0x911   : > { %v5258_v10 = vadd.f32 %v3961_v44, %v3239_v5  ;;  %v4386_v11 = vpop.f32.mrb[48].mxu0 }
 0x912   : > { %v3242_v13 = vadd.f32 %v4690_v12, %v4386_v11  ;;  %v3218_v14 = vpop.f32.mrb[49].mxu0  ;;  %v3271_v15 = vsel %vm586_vm0, %v5256_v8, 0.0 }
 0x913   : > { %v3241_v17 = vadd.f32 %v4691_v16, %v3218_v14  ;;  %3272 = vadd.xlane.f32.xlu1 %v3271_v15  ;;  %v3268_v18 = vsel %vm586_vm0, %v5258_v10, 0.0  ;;  %v3395_v14 = vld [vmem:[%s5477_s13 + $0x8] sm:$0xff] }
 0x914   : > { %v5266_v19 = vadd.f32 %v3961_v44, %v3242_v13  ;;  %3269 = vadd.xlane.f32.xlu0 %v3268_v18  ;;  %v3394_v13 = vld [vmem:[%s5477_s13] sm:$0xff] }
 0x915   : > { %v5268_v22 = vadd.f32 %v3961_v44, %v3241_v17  ;;  %v4389_v23 = vpop.f32.mrb[50].mxu0  ;;  %v4538_v15 = vpack.c.bf16 %v3395_v14, %v3394_v13 }
 0x916   : > { %v3244_v25 = vadd.f32 %v4692_v24, %v4389_v23  ;;  %v3228_v26 = vpop.f32.mrb[51].mxu0  ;;  %v3277_v27 = vsel %vm586_vm0, %v5266_v19, 0.0 }
 0x917   : > { %v3243_v31 = vadd.f32 %v4693_v30, %v3228_v26  ;;  %3278 = vadd.xlane.f32.xlu1 %v3277_v27  ;;  %v3274_v32 = vsel %vm586_vm0, %v5268_v22, 0.0  ;;  %4539 = vmatprep.subr.bf16.mxu1 %v4538_v15 }
 0x918   : > { %v5276_v33 = vadd.f32 %v3961_v44, %v3244_v25  ;;  %3275 = vadd.xlane.f32.xlu0 %v3274_v32  ;;  %4541 = vmatpush3.bf16.msra.mxu1 %v4538_v15 }
 0x919   : > { %v5278_v34 = vadd.f32 %v3961_v44, %v3243_v31 }
 0x91a   : > { %v3283_v35 = vsel %vm586_vm0, %v5276_v33, 0.0 }
 0x91b   : > { %3284 = vadd.xlane.f32.xlu1 %v3283_v35  ;;  %v3280_v37 = vsel %vm586_vm0, %v5278_v34, 0.0 }
 0x91c   : > { %3281 = vadd.xlane.f32.xlu0 %v3280_v37 }
 0x99c   : > { %v3267_v40 = vpop.xlane.xlu1 %3266 }
 0x99d   : > { %v3287_v20 = vmul.f32 0.0625, %v3267_v40  ;;  %v3264_v41 = vpop.xlane.xlu0 %3263 }
 0x99e   : > { %v3286_v42 = vmul.f32 0.0625, %v3264_v41 }
 0x99f   : > { %v5285_v43 = vsub.f32 %v5246_v4, %v3287_v20 }
 0x9a0   : > { %v5288_v45 = vsub.f32 %v5248_v1, %v3286_v42  ;;  %v3273_v28 = vpop.xlane.xlu1 %3272 }
 0x9a1   : > { %v3289_v21 = vmul.f32 0.0625, %v3273_v28  ;;  %v3270_v47 = vpop.xlane.xlu0 %3269  ;;  %v3303_v50 = vmul.f32 %v5285_v43, %v5285_v43 }
 0x9a2   : > { %v3288_v0 = vmul.f32 0.0625, %v3270_v47  ;;  %v3302_v29 = vmul.f32 %v5288_v45, %v5288_v45 }
 0x9a3   : > { %v5295_v60 = vsub.f32 %v5256_v8, %v3289_v21  ;;  %v3313_v38 = vsel %vm586_vm0, %v3303_v50, 0.0 }
 0x9a4   : > { %v5299_v9 = vsub.f32 %v5258_v10, %v3288_v0  ;;  %v3279_v53 = vpop.xlane.xlu1 %3278  ;;  %3314 = vadd.xlane.f32.xlu1 %v3313_v38  ;;  %v3310_v54 = vsel %vm586_vm0, %v3302_v29, 0.0 }
 0x9a5   : > { %v3291_v55 = vmul.f32 0.0625, %v3279_v53  ;;  %v3276_v56 = vpop.xlane.xlu0 %3275  ;;  %3311 = vadd.xlane.f32.xlu0 %v3310_v54  ;;  %v3305_v57 = vmul.f32 %v5295_v60, %v5295_v60  ;;  %v3962_v53 = vld [vmem:[%s5475_s11] ss:$0 sm:$0xff] }
 0x9a6   : > { %v3290_v58 = vmul.f32 0.0625, %v3276_v56  ;;  %v3304_v49 = vmul.f32 %v5299_v9, %v5299_v9 }
 0x9a7   : > { %v5307_v61 = vsub.f32 %v5266_v19, %v3291_v55  ;;  %v3319_v52 = vsel %vm586_vm0, %v3305_v57, 0.0 }
 0x9a8   : > { %v5311_v44 = vsub.f32 %v5268_v22, %v3290_v58  ;;  %3320 = vadd.xlane.f32.xlu1 %v3319_v52  ;;  %v3285_v48 = vpop.xlane.xlu1 %3284  ;;  %v3316_v36 = vsel %vm586_vm0, %v3304_v49, 0.0  ;;  %v3963_v58 = vld [vmem:[%s5476_s12] ss:$0 sm:$0xff] }
 0x9a9   : > { %v3293_v51 = vmul.f32 0.0625, %v3285_v48  ;;  %3317 = vadd.xlane.f32.xlu0 %v3316_v36  ;;  %v3282_v39 = vpop.xlane.xlu0 %3281  ;;  %v3307_v6 = vmul.f32 %v5307_v61, %v5307_v61 }
 0x9aa   : > { %v3292_v2 = vmul.f32 0.0625, %v3282_v39  ;;  %v3306_v62 = vmul.f32 %v5311_v44, %v5311_v44 }
 0x9ab   : > { %v5319_v63 = vsub.f32 %v5276_v33, %v3293_v51  ;;  %v3325_v46 = vsel %vm586_vm0, %v3307_v6, 0.0 }
 0x9ac   : > { %v5323_v59 = vsub.f32 %v5278_v34, %v3292_v2  ;;  %3326 = vadd.xlane.f32.xlu1 %v3325_v46  ;;  %v3322_v3 = vsel %vm586_vm0, %v3306_v62, 0.0 }
 0x9ad   : > { %3323 = vadd.xlane.f32.xlu0 %v3322_v3  ;;  %v3309_v5 = vmul.f32 %v5319_v63, %v5319_v63 }
 0x9ae   : > { %v3308_v7 = vmul.f32 %v5323_v59, %v5323_v59 }
 0x9af   : > { %v3331_v11 = vsel %vm586_vm0, %v3309_v5, 0.0 }
 0x9b0   : > { %3332 = vadd.xlane.f32.xlu1 %v3331_v11  ;;  %v3328_v12 = vsel %vm586_vm0, %v3308_v7, 0.0 }
 0x9b1   : > { %3329 = vadd.xlane.f32.xlu0 %v3328_v12 }
 0xa31   : > { %v3315_v16 = vpop.xlane.xlu1 %3314 }
 0xa32   : > { %v3335_v17 = vmul.f32 0.0625, %v3315_v16  ;;  %v3312_v18 = vpop.xlane.xlu0 %3311 }
 0xa33   : > { %v3334_v23 = vmul.f32 0.0625, %v3312_v18 }
 0xa34   : > { %v3343_v24 = vadd.f32 1e-05, %v3335_v17 }
 0xa35   : > { %v3342_v25 = vadd.f32 1e-05, %v3334_v23  ;;  %v3321_v26 = vpop.xlane.xlu1 %3320 }
 0xa36   : > { %4654 = vrsqrt.f32 %v3343_v24  ;;  %v3337_v27 = vmul.f32 0.0625, %v3321_v26  ;;  %v3318_v30 = vpop.xlane.xlu0 %3317  ;;  %v3607_v26 = vld [vmem:[%s5479_s15 + $0x18] sm:$0xff] }
 0xa37   : > { %4656 = vrsqrt.f32 %v3342_v25  ;;  %v3336_v31 = vmul.f32 0.0625, %v3318_v30  ;;  %v3606_v25 = vld [vmem:[%s5479_s15 + $0x10] sm:$0xff]  ;;  %v3608_v30 = vld [vmem:[%s5479_s15 + $0x20] sm:$0xff] }
 0xa38   : > { %v3345_v32 = vadd.f32 1e-05, %v3337_v27  ;;  %v4546_v27 = vpack.c.bf16 %v3607_v26, %v3606_v25 }
 0xa39   : > { %v3344_v35 = vadd.f32 1e-05, %v3336_v31  ;;  %v3327_v37 = vpop.xlane.xlu1 %3326  ;;  %v3609_v31 = vld [vmem:[%s5479_s15 + $0x28] sm:$0xff] }
 0xa3a   : > { %4658 = vrsqrt.f32 %v3345_v32  ;;  %v3339_v40 = vmul.f32 0.0625, %v3327_v37  ;;  %v3324_v20 = vpop.xlane.xlu0 %3323  ;;  %v4550_v32 = vpack.c.bf16 %v3609_v31, %v3608_v30  ;;  %v3611_v37 = vld [vmem:[%s5479_s15 + $0x38] sm:$0xff] }
 0xa3b   : > { %4660 = vrsqrt.f32 %v3344_v35  ;;  %v3338_v41 = vmul.f32 0.0625, %v3324_v20  ;;  %v3610_v35 = vld [vmem:[%s5479_s15 + $0x30] sm:$0xff]  ;;  %v3964_v20 = vld [vmem:[%s5478_s14] ss:$0 sm:$0xff] }
 0xa3c   : > { %v3347_v42 = vadd.f32 1e-05, %v3339_v40  ;;  %v4554_v40 = vpack.c.bf16 %v3611_v37, %v3610_v35 }
 0xa3d   : > { %v3346_v28 = vadd.f32 1e-05, %v3338_v41  ;;  %v3333_v21 = vpop.xlane.xlu1 %3332 }
 0xa3e   : > { %4662 = vrsqrt.f32 %v3347_v42  ;;  %v3341_v47 = vmul.f32 0.0625, %v3333_v21  ;;  %v3330_v50 = vpop.xlane.xlu0 %3329 }
 0xa3f   : > { %4664 = vrsqrt.f32 %v3346_v28  ;;  %v3340_v0 = vmul.f32 0.0625, %v3330_v50 }
 0xa40   : > { %v4655_v29 = vpop.eup %4654  ;;  %v3349_v38 = vadd.f32 1e-05, %v3341_v47 }
 0xa41   : > { %v4657_v54 = vpop.eup %4656  ;;  %v3359_v55 = vmul.f32 %v4655_v29, %v5285_v43  ;;  %v3348_v56 = vadd.f32 1e-05, %v3340_v0 }
 0xa42   : > { %4666 = vrsqrt.f32 %v3349_v38  ;;  %v3358_v57 = vmul.f32 %v4657_v54, %v5288_v45 }
 0xa43   : > { %4668 = vrsqrt.f32 %v3348_v56  ;;  %v3373_v49 = vmul.f32 %v3962_v53, %v3359_v55 }
 0xa44   : > { %v4659_v52 = vpop.eup %4658  ;;  %v3372_v48 = vmul.f32 %v3962_v53, %v3358_v57 }
 0xa45   : > { %v4661_v36 = vpop.eup %4660  ;;  %v3361_v51 = vmul.f32 %v4659_v52, %v5295_v60  ;;  %v3387_v2 = vadd.f32 %v3963_v58, %v3373_v49 }
 0xa46   : > { %v3386_v39 = vadd.f32 %v3963_v58, %v3372_v48  ;;  %v3360_v6 = vmul.f32 %v4661_v36, %v5299_v9 }
 0xa47   : > { %v3375_v43 = vmul.f32 %v3962_v53, %v3361_v51 }
 0xa48   : > { %v4663_v62 = vpop.eup %4662  ;;  %4394 = vmatprep.mubr.msk.f32.mxu1 %vm586_vm0, %v3386_v39  ;;  %v3374_v45 = vmul.f32 %v3962_v53, %v3360_v6 }
 0xa49   : > { %v4665_v46 = vpop.eup %4664  ;;  %4395 = vmatmul.mubr.msk.f32.vlgmr.msra.gmra.mrb[36].mxu1 %vm586_vm0, %v3387_v2  ;;  %v3363_v3 = vmul.f32 %v4663_v62, %v5307_v61  ;;  %v3389_v11 = vadd.f32 %v3963_v58, %v3375_v43 }
 0xa4a   : > { %v3388_v5 = vadd.f32 %v3963_v58, %v3374_v45  ;;  %v3362_v7 = vmul.f32 %v4665_v46, %v5311_v44 }
 0xa4b   : > { %v3377_v12 = vmul.f32 %v3962_v53, %v3363_v3 }
 0xa4c   : > { %v4667_v60 = vpop.eup %4666  ;;  %4397 = vmatprep.mubr.msk.f32.mxu1 %vm586_vm0, %v3388_v5  ;;  %v3376_v9 = vmul.f32 %v3962_v53, %v3362_v7 }
 0xa4d   : > { %v4669_v13 = vpop.eup %4668  ;;  %4398 = vmatmul.mubr.msk.f32.gmra.mrb[38].mxu1 %vm586_vm0, %v3389_v11  ;;  %v3365_v14 = vmul.f32 %v4667_v60, %v5319_v63  ;;  %v3391_v17 = vadd.f32 %v3963_v58, %v3377_v12  ;;  %v3604_v63 = vld [vmem:[%s5479_s15] sm:$0xff] }
 0xa4e   : > { %v3390_v15 = vadd.f32 %v3963_v58, %v3376_v9  ;;  %v3364_v16 = vmul.f32 %v4669_v13, %v5323_v59  ;;  %v3605_v59 = vld [vmem:[%s5479_s15 + $0x8] sm:$0xff] }
 0xa4f   : > { %v3379_v18 = vmul.f32 %v3962_v53, %v3365_v14  ;;  %v4542_v24 = vpack.c.bf16 %v3605_v59, %v3604_v63 }
 0xa50   : > { %4400 = vmatprep.mubr.msk.f32.mxu1 %vm586_vm0, %v3390_v15  ;;  %v3378_v61 = vmul.f32 %v3962_v53, %v3364_v16 }
 0xa51   : > { %4401 = vmatmul.mubr.msk.f32.gmra.mrb[40].mxu1 %vm586_vm0, %v3391_v17  ;;  %v3393_v23 = vadd.f32 %v3963_v58, %v3379_v18  ;;  %4543 = vmatprep.subr.bf16.mxu1 %v4542_v24 }
 0xa52   : > { %v3392_v44 = vadd.f32 %v3963_v58, %v3378_v61  ;;  %4545 = vmatpush3.bf16.msra.mxu1 %v4542_v24 }
 0xa53   : > { %4547 = vmatprep.subr.bf16.mxu1 %v4546_v27 }
 0xa54   : > { %4403 = vmatprep.mubr.msk.f32.mxu1 %vm586_vm0, %v3392_v44 }
 0xa55   : > { %4404 = vmatmul.mubr.msk.f32.gmra.mrb[42].mxu1 %vm586_vm0, %v3393_v23 }
 0xa56   : > { %4549 = vmatpush3.bf16.msra.mxu1 %v4546_v27 }
 0xa57   : > { %4551 = vmatprep.subr.bf16.mxu1 %v4550_v32 }
 0xa5a   : > { %4553 = vmatpush3.bf16.msra.mxu1 %v4550_v32 }
 0xa5b   : > { %4555 = vmatprep.subr.bf16.mxu1 %v4554_v40 }
 0xa5e   : > { %4557 = vmatpush3.bf16.msra.mxu1 %v4554_v40 }
 0xb1c   : > { %v4396_v41 = vpop.f32.mrb[36].mxu1 }
 0xb1d   : > { %v5387_v42 = vadd.f32 %v4396_v41, %v3964_v20  ;;  %v3493_v28 = vpop.f32.mrb[37].mxu1 }
 0xb1e   : > { %v3494_v21 = vadd.f32 %v3964_v20, %v3493_v28 }
 0xb1f   : > { %v3541_v47 = vmul.f32 0.044715, %v5387_v42 }
 0xb20   : > { %v3540_v50 = vmul.f32 0.044715, %v3494_v21  ;;  %v4399_v0 = vpop.f32.mrb[38].mxu1 }
 0xb21   : > { %v3549_v29 = vmul.f32 %v3541_v47, %v5387_v42  ;;  %v5391_v38 = vadd.f32 %v4399_v0, %v3964_v20  ;;  %v3503_v53 = vpop.f32.mrb[39].mxu1 }
 0xb22   : > { %v3548_v54 = vmul.f32 %v3540_v50, %v3494_v21  ;;  %v5393_v55 = vadd.f32 %v3964_v20, %v3503_v53  ;;  %v3532_v50 = vmul.f32 0.5, %v3494_v21 }
 0xb23   : > { %v3557_v56 = vmul.f32 %v3549_v29, %v5387_v42  ;;  %v3543_v57 = vmul.f32 0.044715, %v5391_v38  ;;  %v3533_v29 = vmul.f32 0.5, %v5387_v42 }
 0xb24   : > { %v3556_v58 = vmul.f32 %v3548_v54, %v3494_v21  ;;  %v3542_v49 = vmul.f32 0.044715, %v5393_v55  ;;  %v4402_v52 = vpop.f32.mrb[40].mxu1 }
 0xb25   : > { %v3565_v48 = vadd.f32 %v3557_v56, %v5387_v42  ;;  %v3551_v36 = vmul.f32 %v3543_v57, %v5391_v38  ;;  %v5400_v51 = vadd.f32 %v4402_v52, %v3964_v20  ;;  %v3513_v39 = vpop.f32.mrb[41].mxu1 }
 0xb26   : > { %v3564_v6 = vadd.f32 %v3556_v58, %v3494_v21  ;;  %v3550_v2 = vmul.f32 %v3542_v49, %v5393_v55  ;;  %v5403_v43 = vadd.f32 %v3964_v20, %v3513_v39  ;;  %v3534_v49 = vmul.f32 0.5, %v5393_v55 }
 0xb27   : > { %v3573_v62 = vmul.f32 0.7978846, %v3565_v48  ;;  %v3559_v45 = vmul.f32 %v3551_v36, %v5391_v38  ;;  %v3545_v46 = vmul.f32 0.044715, %v5400_v51  ;;  %v3535_v21 = vmul.f32 0.5, %v5391_v38 }
 0xb28   : > { %v3558_v3 = vmul.f32 %v3550_v2, %v5393_v55  ;;  %v3544_v5 = vmul.f32 0.044715, %v5403_v43  ;;  %v4405_v7 = vpop.f32.mrb[42].mxu1  ;;  %v3572_v11 = vmul.f32 0.7978846, %v3564_v6  ;;  %v3536_v2 = vmul.f32 0.5, %v5403_v43 }
 0xb29   : > { %4670 = vtanh.f32 %v3573_v62  ;;  %v3567_v12 = vadd.f32 %v3559_v45, %v5391_v38  ;;  %v3553_v60 = vmul.f32 %v3545_v46, %v5400_v51  ;;  %v5411_v9 = vadd.f32 %v4405_v7, %v3964_v20  ;;  %v3523_v13 = vpop.f32.mrb[43].mxu1 }
 0xb2a   : > { %v3566_v14 = vadd.f32 %v3558_v3, %v5393_v55  ;;  %v3552_v15 = vmul.f32 %v3544_v5, %v5403_v43  ;;  %v3524_v16 = vadd.f32 %v3964_v20, %v3523_v13  ;;  %4672 = vtanh.f32 %v3572_v11 }
 0xb2b   : > { %v3561_v17 = vmul.f32 %v3553_v60, %v5400_v51  ;;  %v3547_v18 = vmul.f32 0.044715, %v5411_v9  ;;  %v3575_v61 = vmul.f32 0.7978846, %v3567_v12  ;;  %v3537_v45 = vmul.f32 0.5, %v5400_v51 }
 0xb2c   : > { %v3560_v44 = vmul.f32 %v3552_v15, %v5403_v43  ;;  %v3546_v23 = vmul.f32 0.044715, %v3524_v16  ;;  %v3574_v63 = vmul.f32 0.7978846, %v3566_v14  ;;  %v3538_v7 = vmul.f32 0.5, %v3524_v16 }
 0xb2d   : > { %v3569_v59 = vadd.f32 %v3561_v17, %v5400_v51  ;;  %v3555_v24 = vmul.f32 %v3547_v18, %v5411_v9  ;;  %4674 = vtanh.f32 %v3575_v61  ;;  %v3539_v12 = vmul.f32 0.5, %v5411_v9  ;;  %v3973_v51 = vld [vmem:[%s5480_s16] ss:$0 sm:$0xff] }
 0xb2e   : > { %v3568_v25 = vadd.f32 %v3560_v44, %v5403_v43  ;;  %v3554_v26 = vmul.f32 %v3546_v23, %v3524_v16  ;;  %4676 = vtanh.f32 %v3574_v63 }
 0xb2f   : > { %v3563_v27 = vmul.f32 %v3555_v24, %v5411_v9  ;;  %v3577_v30 = vmul.f32 0.7978846, %v3569_v59 }
 0xb30   : > { %v3562_v31 = vmul.f32 %v3554_v26, %v3524_v16  ;;  %v3576_v32 = vmul.f32 0.7978846, %v3568_v25 }
 0xb31   : > { %v3571_v35 = vadd.f32 %v3563_v27, %v5411_v9  ;;  %4678 = vtanh.f32 %v3577_v30 }
 0xb32   : > { %v3570_v37 = vadd.f32 %v3562_v31, %v3524_v16  ;;  %4680 = vtanh.f32 %v3576_v32 }
 0xb33   : > { %v4671_v40 = vpop.eup %4670  ;;  %v3579_v20 = vmul.f32 0.7978846, %v3571_v35 }
 0xb34   : > { %v4673_v41 = vpop.eup %4672  ;;  %v3589_v28 = vadd.f32 1.0, %v4671_v40  ;;  %v3578_v47 = vmul.f32 0.7978846, %v3570_v37 }
 0xb35   : > { %v3588_v0 = vadd.f32 1.0, %v4673_v41  ;;  %4682 = vtanh.f32 %v3579_v20 }
 0xb36   : > { %4684 = vtanh.f32 %v3578_v47  ;;  %v3597_v57 = vmul.f32 %v3589_v28, %v3533_v29 }
 0xb37   : > { %v4675_v53 = vpop.eup %4674  ;;  %v3596_v54 = vmul.f32 %v3588_v0, %v3532_v50 }
 0xb38   : > { %v4677_v56 = vpop.eup %4676  ;;  %v3591_v58 = vadd.f32 1.0, %v4675_v53 }
 0xb39   : > { %4422 = vmatprep.mubr.msk.f32.mxu1 %vm3619_vm3, %v3596_v54  ;;  %v3590_v52 = vadd.f32 1.0, %v4677_v56 }
 0xb3a   : > { %4423 = vmatmul.mubr.msk.f32.vlgmr.msra.gmra.mrb[44].mxu1 %vm3619_vm3, %v3597_v57  ;;  %v3599_v42 = vmul.f32 %v3591_v58, %v3535_v21 }
 0xb3b   : > { %v4679_v48 = vpop.eup %4678  ;;  %v3598_v36 = vmul.f32 %v3590_v52, %v3534_v49 }
 0xb3c   : > { %v4681_v39 = vpop.eup %4680  ;;  %v3593_v6 = vadd.f32 1.0, %v4679_v48 }
 0xb3d   : > { %4425 = vmatprep.mubr.msk.f32.mxu1 %vm3619_vm3, %v3598_v36  ;;  %v3592_v62 = vadd.f32 1.0, %v4681_v39 }
 0xb3e   : > { %4426 = vmatmul.mubr.msk.f32.gmra.mrb[46].mxu1 %vm3619_vm3, %v3599_v42  ;;  %v3601_v5 = vmul.f32 %v3593_v6, %v3537_v45 }
 0xb3f   : > { %v4683_v55 = vpop.eup %4682  ;;  %v3600_v46 = vmul.f32 %v3592_v62, %v3536_v2 }
 0xb40   : > { %v4685_v3 = vpop.eup %4684  ;;  %v3595_v38 = vadd.f32 1.0, %v4683_v55 }
 0xb41   : > { %4428 = vmatprep.mubr.msk.f32.mxu1 %vm3619_vm3, %v3600_v46  ;;  %v3594_v11 = vadd.f32 1.0, %v4685_v3 }
 0xb42   : > { %4429 = vmatmul.mubr.msk.f32.gmra.mrb[48].mxu1 %vm3619_vm3, %v3601_v5  ;;  %v3603_v60 = vmul.f32 %v3595_v38, %v3539_v12 }
 0xb43   : > { %v3602_v43 = vmul.f32 %v3594_v11, %v3538_v7 }
 0xb45   : > { %4431 = vmatprep.mubr.msk.f32.mxu1 %vm3619_vm3, %v3602_v43 }
 0xb46   : > { %4432 = vmatmul.mubr.msk.f32.gmra.mrb[50].mxu1 %vm3619_vm3, %v3603_v60 }
 0xc0d   : > { %v4424_v13 = vpop.f32.mrb[44].mxu1 }
 0xc0e   : > { %v3716_v14 = vadd.f32 %v4424_v13, %v3973_v51  ;;  %v3710_v15 = vpop.f32.mrb[45].mxu1 }
 0xc0f   : > { %v3711_v16 = vadd.f32 %v3973_v51, %v3710_v15 }
 0xc10   : > { %v3750_v9 = vadd.f32 %v3716_v14, %v5246_v4 }
 0xc11   : > { %v3749_v17 = vadd.f32 %v3711_v16, %v5248_v1  ;;  %v4427_v18 = vpop.f32.mrb[46].mxu1 }
 0xc12   : > { %3758 = vst.msk [vmem:[%s575_s25 + $0x8] sm:$0xff] %vm586_vm0, %v3750_v9  ;;  %v3726_v61 = vadd.f32 %v4427_v18, %v3973_v51  ;;  %v3720_v44 = vpop.f32.mrb[47].mxu1 }
 0xc13   : > { %3757 = vst.msk [vmem:[%s575_s25] sm:$0xff] %vm586_vm0, %v3749_v17  ;;  %v3721_v23 = vadd.f32 %v3973_v51, %v3720_v44 }
 0xc14   : > { %v3752_v63 = vadd.f32 %v3726_v61, %v5256_v8 }
 0xc15   : > { %v3751_v59 = vadd.f32 %v3721_v23, %v5258_v10  ;;  %v4430_v24 = vpop.f32.mrb[48].mxu1 }
 0xc16   : > { %3760 = vst.msk [vmem:[%s575_s25 + $0x18] sm:$0xff] %vm586_vm0, %v3752_v63  ;;  %v3736_v25 = vadd.f32 %v4430_v24, %v3973_v51  ;;  %v3730_v26 = vpop.f32.mrb[49].mxu1 }
 0xc17   : > { %3759 = vst.msk [vmem:[%s575_s25 + $0x10] sm:$0xff] %vm586_vm0, %v3751_v59  ;;  %v3731_v4 = vadd.f32 %v3973_v51, %v3730_v26 }
 0xc18   : > { %v3754_v1 = vadd.f32 %v3736_v25, %v5266_v19 }
 0xc19   : > { %v3753_v27 = vadd.f32 %v3731_v4, %v5268_v22  ;;  %v4433_v30 = vpop.f32.mrb[50].mxu1 }
 0xc1a   : > { %3762 = vst.msk [vmem:[%s575_s25 + $0x28] sm:$0xff] %vm586_vm0, %v3754_v1  ;;  %v3746_v31 = vadd.f32 %v4433_v30, %v3973_v51  ;;  %v3740_v32 = vpop.f32.mrb[51].mxu1 }
 0xc1b   : > { %3761 = vst.msk [vmem:[%s575_s25 + $0x20] sm:$0xff] %vm586_vm0, %v3753_v27  ;;  %v3741_v8 = vadd.f32 %v3973_v51, %v3740_v32 }
 0xc1c   : > { %v3756_v10 = vadd.f32 %v3746_v31, %v5276_v33 }
 0xc1d   : > { %v3755_v35 = vadd.f32 %v3741_v8, %v5278_v34 }
 0xc1e   : > { %3764 = vst.msk [vmem:[%s575_s25 + $0x38] sm:$0xff] %vm586_vm0, %v3756_v10 }
 0xc1f   : > { %3763 = vst.msk [vmem:[%s575_s25 + $0x30] sm:$0xff] %vm586_vm0, %v3755_v35 }
 0xc20 PF: > { %s28_s27 = sadd.s32 1, %s4700_s27  }
 0xc21   : > { %p25_p4 = scmp.ge.s32.totalorder %s28_s27, 4  }
 0xc23   :  { %27 = sbr.rel (!%p25_p4) target bundleno = 4 (0x4), region = 130 }

// kernel: forward.9
= control target key start
LH: loop header
LB: loop body
LE: loop exit
PB: predicated region body
PF: predicated region fallthrough
CT: control target
= control target key end

     0   :  { %s4815_s27 = smov 0   ;;  %s5518_s0 = inlined_call_operand.vmem [shape: f32[2,64,16], index: 0, kind: input, shape index: {}]   ;;  %s5519_s1 = inlined_call_operand.vmem [shape: f32[1,16], index: 1, kind: input, shape index: {}, may-alias: {1,11}]   ;;  %s5520_s2 = inlined_call_operand.vmem [shape: f32[1,16], index: 2, kind: input, shape index: {}, may-alias: {2,10,12,16}]   ;;  %s5521_s3 = inlined_call_operand.vmem [shape: f32[2,16,8], index: 3, kind: input, shape index: {}]   ;;  %s5522_s4 = inlined_call_operand.vmem [shape: f32[2,16,8], index: 4, kind: input, shape index: {}]   ;;  %s5523_s5 = inlined_call_operand.vmem [shape: f32[2,16,8], index: 5, kind: input, shape index: {}]   ;;  %s5524_s6 = inlined_call_operand.vmem [shape: f32[2,1,8], index: 6, kind: input, shape index: {}, may-alias: {6,7,8}]   ;;  %s5525_s7 = inlined_call_operand.vmem [shape: f32[2,1,8], index: 7, kind: input, shape index: {}, may-alias: {6,7,8}]   ;;  %s5526_s8 = inlined_call_operand.vmem [shape: f32[2,1,8], index: 8, kind: input, shape index: {}, may-alias: {6,7,8}]   ;;  %s5527_s9 = inlined_call_operand.vmem [shape: f32[2,8,16], index: 9, kind: input, shape index: {}]   ;;  %s5528_s10 = inlined_call_operand.vmem [shape: f32[1,16], index: 10, kind: input, shape index: {}, may-alias: {2,10,12,16}]   ;;  %s5529_s11 = inlined_call_operand.vmem [shape: f32[1,16], index: 11, kind: input, shape index: {}, may-alias: {1,11}]   ;;  %s5530_s12 = inlined_call_operand.vmem [shape: f32[1,16], index: 12, kind: input, shape index: {}, may-alias: {2,10,12,16}]   ;;  %s5531_s13 = inlined_call_operand.vmem [shape: f32[16,64], index: 13, kind: input, shape index: {}]   ;;  %s5532_s14 = inlined_call_operand.vmem [shape: f32[1,64], index: 14, kind: input, shape index: {}]   ;;  %s5533_s15 = inlined_call_operand.vmem [shape: f32[64,16], index: 15, kind: input, shape index: {}]   ;;  %s5534_s16 = inlined_call_operand.vmem [shape: f32[1,16], index: 16, kind: input, shape index: {}, may-alias: {2,10,12,16}]   ;;  %s5535_s17 = inlined_call_operand.vmem [shape: f32[2,4,16,16], index: 17, kind: input, shape index: {}]   ;;  %s5536_s18 = inlined_call_operand.vmem [shape: f32[2,64,16], index: 18, kind: output, shape index: {}]  }
   0x1   :  { %5537 = sst [smem:[#allocation2_spill]] %s5518_s0 }
   0x2   :  { %5538 = sst [smem:[#allocation3_spill]] %s5519_s1 }
   0x3   :  { %5539 = sst [smem:[#allocation4_spill]] %s5520_s2 }
   0x4 LB: > { %s3832_s28 = sadd.s32 4294967295, %s4718_s27   ;;  %p3836_p0 = scmp.ge.s32.totalorder %s4718_s27, 1  ;;  %s4718_s27 = sphi %s4815_s27, %s28_s27  }
   0x5   : > { %p512_p1 = scmp.lt.s32.totalorder %s4718_s27, 3 }
   0x7   : > { %p513_p2 = pnand %p3836_p0, %p512_p1 }
   0x8   : > { %p566_p3 = scmp.lt.s32.totalorder (!%p513_p2), %s3832_s28, 1  ;;  %vm586_vm0 = vcmask (!%p513_p2), 130048   ;;  %s5540_s19 = sld [smem:[#allocation2_spill]] (!%p513_p2)  ;;  %v720_v56 = vld [vmem:[%s5521_s3] sm:$0xff] (!%p513_p2)  ;;  %v721_v57 = vld [vmem:[%s5521_s3 + $0x8] sm:$0xff] (!%p513_p2)  ;;  %vm1102_vm1 = vcmask (!%p513_p2), 64512  }
   0x9   : > { %516 = sbr.rel (%p513_p2) target bundleno = 3104 (0xc20), region = 92  ;;  %v866_v58 = vld [vmem:[%s5522_s4] sm:$0xff] (!%p513_p2)  ;;  %v4452_v59 = vpack.c.bf16 (!%p513_p2), %v721_v57, %v720_v56  ;;  %v867_v60 = vld [vmem:[%s5522_s4 + $0x8] sm:$0xff] (!%p513_p2)  ;;  %s5541_s2 = sld [smem:[#allocation3_spill]] (!%p513_p2)  ;;  %vm5000_vm2 = vmpackc.low (!%p513_p2), %vm1102_vm1, %vm1102_vm1  ;;  %vm3631_vm3 = vcmask (!%p513_p2), 523264  }
   0xa   : > { %v4456_v61 = vpack.c.bf16 (!%p513_p2), %v867_v60, %v866_v58  ;;  %v980_v62 = vld [vmem:[%s5523_s5] sm:$0xff] (!%p513_p2)  ;;  %v981_v63 = vld [vmem:[%s5523_s5 + $0x8] sm:$0xff] (!%p513_p2)  ;;  %s5542_s25 = sld [smem:[#allocation4_spill]] (!%p513_p2) }
   0xb   : > { %4453 = vmatprep.subr.bf16.mxu0 (!%p513_p2), %v4452_v59  ;;  %v4995_v60 = vld [vmem:[%s5524_s6] ss:$0 sm:$0xff] (!%p513_p2) }
   0xc   : > { %4457 = vmatprep.subr.bf16.mxu1 (!%p513_p2), %v4456_v61  ;;  %4455 = vmatpush3.bf16.msra.mxu0 (!%p513_p2), %v4452_v59 }
   0xd   : > { %4459 = vmatpush3.bf16.msra.mxu1 (!%p513_p2), %v4456_v61 }
  0x10   : > { %s5546_s28 = smov (!%p566_p3, %s3832_s28), 1 }
  0x11   : > { %s4002_s29 = sshll.u32 %s5546_s28, 6 }
  0x12   : > { %s4831_s1 = scalar_lea.vmem %s5540_s19, %s4002_s29  ;;  %s575_s30 = scalar_lea.vmem %s5536_s18, %s4002_s29 }
  0x13   : > { %v576_v0 = vld [vmem:[%s4831_s1] sm:$0xff]  ;;  %v578_v1 = vld [vmem:[%s4831_s1 + $0x10] sm:$0xff]  ;;  %v577_v2 = vld [vmem:[%s4831_s1 + $0x8] sm:$0xff] }
  0x14   : > { %v587_v3 = vsel %vm586_vm0, %v576_v0, 0.0  ;;  %v593_v4 = vsel %vm586_vm0, %v578_v1, 0.0  ;;  %v579_v5 = vld [vmem:[%s4831_s1 + $0x18] sm:$0xff]  ;;  %v590_v6 = vsel %vm586_vm0, %v577_v2, 0.0  ;;  %v580_v8 = vld [vmem:[%s4831_s1 + $0x20] sm:$0xff]  ;;  %v581_v9 = vld [vmem:[%s4831_s1 + $0x28] sm:$0xff] }
  0x15   : > { %588 = vadd.xlane.f32.xlu0 %v587_v3  ;;  %594 = vadd.xlane.f32.xlu1 %v593_v4  ;;  %v596_v7 = vsel %vm586_vm0, %v579_v5, 0.0  ;;  %v599_v10 = vsel %vm586_vm0, %v580_v8, 0.0  ;;  %v602_v11 = vsel %vm586_vm0, %v581_v9, 0.0  ;;  %v582_v12 = vld [vmem:[%s4831_s1 + $0x30] sm:$0xff]  ;;  %v583_v13 = vld [vmem:[%s4831_s1 + $0x38] sm:$0xff] }
  0x16   : > { %v605_v14 = vsel %vm586_vm0, %v582_v12, 0.0  ;;  %v608_v15 = vsel %vm586_vm0, %v583_v13, 0.0 }
  0x19   : > { %591 = vadd.xlane.f32.xlu0 %v590_v6  ;;  %597 = vadd.xlane.f32.xlu1 %v596_v7 }
  0x1d   : > { %600 = vadd.xlane.f32.xlu0 %v599_v10  ;;  %603 = vadd.xlane.f32.xlu1 %v602_v11 }
  0x21   : > { %606 = vadd.xlane.f32.xlu0 %v605_v14  ;;  %609 = vadd.xlane.f32.xlu1 %v608_v15 }
  0xa2   : > { %v589_v16 = vpop.xlane.xlu0 %588  ;;  %v595_v17 = vpop.xlane.xlu1 %594 }
  0xa3   : > { %v612_v18 = vmul.f32 0.0625, %v589_v16  ;;  %v614_v19 = vmul.f32 0.0625, %v595_v17 }
  0xa5   : > { %v4849_v20 = vsub.f32 %v576_v0, %v612_v18  ;;  %v4851_v21 = vsub.f32 %v578_v1, %v614_v19  ;;  %v4907_v0 = vpack.c.bf16 %v981_v63, %v980_v62 }
  0xa6   : > { %v592_v22 = vpop.xlane.xlu0 %591  ;;  %v598_v23 = vpop.xlane.xlu1 %597 }
  0xa7   : > { %v613_v24 = vmul.f32 0.0625, %v592_v22  ;;  %v615_v25 = vmul.f32 0.0625, %v598_v23  ;;  %v628_v26 = vmul.f32 %v4849_v20, %v4849_v20  ;;  %v630_v27 = vmul.f32 %v4851_v21, %v4851_v21  ;;  %4461 = vmatprep.subr.bf16.mxu0 %v4907_v0  ;;  %v3841_v23 = vld [vmem:[%s5541_s2] ss:$0 sm:$0xff] }
  0xa9   : > { %v4857_v28 = vsub.f32 %v577_v2, %v613_v24  ;;  %v4859_v29 = vsub.f32 %v579_v5, %v615_v25  ;;  %v636_v30 = vsel %vm586_vm0, %v628_v26, 0.0  ;;  %v642_v33 = vsel %vm586_vm0, %v630_v27, 0.0 }
  0xaa   : > { %637 = vadd.xlane.f32.xlu0 %v636_v30  ;;  %v601_v31 = vpop.xlane.xlu0 %600  ;;  %v604_v32 = vpop.xlane.xlu1 %603  ;;  %v3842_v30 = vld [vmem:[%s5542_s25] ss:$0 sm:$0xff] }
  0xab   : > { %v616_v34 = vmul.f32 0.0625, %v601_v31  ;;  %v617_v35 = vmul.f32 0.0625, %v604_v32  ;;  %v629_v36 = vmul.f32 %v4857_v28, %v4857_v28  ;;  %v631_v37 = vmul.f32 %v4859_v29, %v4859_v29 }
  0xad   : > { %v4867_v38 = vsub.f32 %v580_v8, %v616_v34  ;;  %v4869_v39 = vsub.f32 %v581_v9, %v617_v35  ;;  %v639_v40 = vsel %vm586_vm0, %v629_v36, 0.0  ;;  %v645_v43 = vsel %vm586_vm0, %v631_v37, 0.0 }
  0xae   : > { %643 = vadd.xlane.f32.xlu0 %v642_v33  ;;  %640 = vadd.xlane.f32.xlu1 %v639_v40  ;;  %v607_v41 = vpop.xlane.xlu0 %606  ;;  %v610_v42 = vpop.xlane.xlu1 %609 }
  0xaf   : > { %v618_v44 = vmul.f32 0.0625, %v607_v41  ;;  %v619_v45 = vmul.f32 0.0625, %v610_v42  ;;  %v632_v46 = vmul.f32 %v4867_v38, %v4867_v38  ;;  %v633_v47 = vmul.f32 %v4869_v39, %v4869_v39 }
  0xb1   : > { %v4877_v48 = vsub.f32 %v582_v12, %v618_v44  ;;  %v4879_v49 = vsub.f32 %v583_v13, %v619_v45  ;;  %v648_v50 = vsel %vm586_vm0, %v632_v46, 0.0  ;;  %v651_v51 = vsel %vm586_vm0, %v633_v47, 0.0 }
  0xb2   : > { %646 = vadd.xlane.f32.xlu1 %v645_v43  ;;  %649 = vadd.xlane.f32.xlu0 %v648_v50 }
  0xb3   : > { %v634_v52 = vmul.f32 %v4877_v48, %v4877_v48  ;;  %v635_v53 = vmul.f32 %v4879_v49, %v4879_v49 }
  0xb5   : > { %v654_v54 = vsel %vm586_vm0, %v634_v52, 0.0  ;;  %v657_v55 = vsel %vm586_vm0, %v635_v53, 0.0 }
  0xb6   : > { %652 = vadd.xlane.f32.xlu1 %v651_v51  ;;  %655 = vadd.xlane.f32.xlu0 %v654_v54 }
  0xba   : > { %658 = vadd.xlane.f32.xlu1 %v657_v55 }
 0x137   : > { %v638_v1 = vpop.xlane.xlu0 %637 }
 0x138   : > { %v660_v2 = vmul.f32 0.0625, %v638_v1 }
 0x13a   : > { %v668_v3 = vadd.f32 1e-05, %v660_v2 }
 0x13b   : > { %v641_v4 = vpop.xlane.xlu1 %640  ;;  %v644_v5 = vpop.xlane.xlu0 %643 }
 0x13c   : > { %4592 = vrsqrt.f32 %v668_v3  ;;  %v661_v6 = vmul.f32 0.0625, %v641_v4  ;;  %v662_v7 = vmul.f32 0.0625, %v644_v5 }
 0x13e   : > { %v669_v8 = vadd.f32 1e-05, %v661_v6  ;;  %v670_v9 = vadd.f32 1e-05, %v662_v7 }
 0x13f   : > { %v647_v10 = vpop.xlane.xlu1 %646  ;;  %v650_v11 = vpop.xlane.xlu0 %649 }
 0x140   : > { %4594 = vrsqrt.f32 %v669_v8  ;;  %v663_v12 = vmul.f32 0.0625, %v647_v10  ;;  %v664_v13 = vmul.f32 0.0625, %v650_v11 }
 0x141   : > { %4596 = vrsqrt.f32 %v670_v9 }
 0x142   : > { %v671_v14 = vadd.f32 1e-05, %v663_v12  ;;  %v672_v15 = vadd.f32 1e-05, %v664_v13 }
 0x143   : > { %v653_v16 = vpop.xlane.xlu1 %652  ;;  %v656_v17 = vpop.xlane.xlu0 %655 }
 0x144   : > { %4598 = vrsqrt.f32 %v671_v14  ;;  %v665_v18 = vmul.f32 0.0625, %v653_v16  ;;  %v666_v19 = vmul.f32 0.0625, %v656_v17 }
 0x145   : > { %4600 = vrsqrt.f32 %v672_v15 }
 0x146   : > { %v4593_v22 = vpop.eup %4592  ;;  %v673_v24 = vadd.f32 1e-05, %v665_v18  ;;  %v674_v25 = vadd.f32 1e-05, %v666_v19 }
 0x147   : > { %v684_v26 = vmul.f32 %v4593_v22, %v4849_v20  ;;  %v659_v27 = vpop.xlane.xlu1 %658 }
 0x148   : > { %4602 = vrsqrt.f32 %v673_v24  ;;  %v667_v31 = vmul.f32 0.0625, %v659_v27 }
 0x149   : > { %v698_v32 = vmul.f32 %v3841_v23, %v684_v26  ;;  %4604 = vrsqrt.f32 %v674_v25 }
 0x14a   : > { %v4595_v33 = vpop.eup %4594  ;;  %v675_v34 = vadd.f32 1e-05, %v667_v31 }
 0x14b   : > { %v4597_v35 = vpop.eup %4596  ;;  %v4917_v36 = vadd.f32 %v3842_v30, %v698_v32  ;;  %v685_v37 = vmul.f32 %v4595_v33, %v4857_v28 }
 0x14c   : > { %v686_v40 = vmul.f32 %v4597_v35, %v4851_v21  ;;  %4606 = vrsqrt.f32 %v675_v34 }
 0x14d   : > { %v699_v20 = vmul.f32 %v3841_v23, %v685_v37  ;;  %4176 = vmatprep.mubr.msk.f32.mxu0 %vm586_vm0, %v4917_v36  ;;  %4192 = vmatprep.mubr.msk.f32.mxu1 %vm586_vm0, %v4917_v36 }
 0x14e   : > { %v4599_v41 = vpop.eup %4598  ;;  %v700_v42 = vmul.f32 %v3841_v23, %v686_v40  ;;  %v3861_v40 = vld [vmem:[%s5526_s8] ss:$0 sm:$0xff] }
 0x14f   : > { %v4601_v43 = vpop.eup %4600  ;;  %v4925_v44 = vadd.f32 %v3842_v30, %v699_v20  ;;  %v687_v45 = vmul.f32 %v4599_v41, %v4859_v29 }
 0x150   : > { %v4928_v46 = vadd.f32 %v3842_v30, %v700_v42  ;;  %v688_v28 = vmul.f32 %v4601_v43, %v4867_v38 }
 0x151   : > { %v701_v21 = vmul.f32 %v3841_v23, %v687_v45  ;;  %4177 = vmatmul.mubr.msk.f32.vlgmr.msra.gmra.mrb[0].mxu0 %vm586_vm0, %v4925_v44  ;;  %4193 = vmatmul.mubr.msk.f32.vlgmr.msra.gmra.mrb[0].mxu1 %vm586_vm0, %v4925_v44 }
 0x152   : > { %v4603_v47 = vpop.eup %4602  ;;  %v702_v50 = vmul.f32 %v3841_v23, %v688_v28  ;;  %4179 = vmatprep.mubr.msk.f32.mxu0 %vm586_vm0, %v4928_v46  ;;  %4195 = vmatprep.mubr.msk.f32.mxu1 %vm586_vm0, %v4928_v46 }
 0x153   : > { %v4605_v29 = vpop.eup %4604  ;;  %v4939_v51 = vadd.f32 %v3842_v30, %v701_v21  ;;  %v689_v38 = vmul.f32 %v4603_v47, %v4869_v39  ;;  %4463 = vmatpush3.bf16.msra.mxu0 %v4907_v0 }
 0x154   : > { %v4943_v52 = vadd.f32 %v3842_v30, %v702_v50  ;;  %v690_v53 = vmul.f32 %v4605_v29, %v4877_v48 }
 0x155   : > { %v703_v54 = vmul.f32 %v3841_v23, %v689_v38  ;;  %4180 = vmatmul.mubr.msk.f32.gmra.mrb[2].mxu0 %vm586_vm0, %v4939_v51  ;;  %4196 = vmatmul.mubr.msk.f32.gmra.mrb[2].mxu1 %vm586_vm0, %v4939_v51 }
 0x156   : > { %v4607_v55 = vpop.eup %4606  ;;  %v704_v56 = vmul.f32 %v3841_v23, %v690_v53  ;;  %4182 = vmatprep.mubr.msk.f32.mxu0 %vm586_vm0, %v4943_v52  ;;  %4198 = vmatprep.mubr.msk.f32.mxu1 %vm586_vm0, %v4943_v52 }
 0x157   : > { %v4954_v39 = vadd.f32 %v3842_v30, %v703_v54  ;;  %v691_v57 = vmul.f32 %v4607_v55, %v4879_v49  ;;  %v3852_v49 = vld [vmem:[%s5525_s7] ss:$0 sm:$0xff] }
 0x158   : > { %v4957_v48 = vadd.f32 %v3842_v30, %v704_v56 }
 0x159   : > { %v705_v58 = vmul.f32 %v3841_v23, %v691_v57  ;;  %4183 = vmatmul.mubr.msk.f32.gmra.mrb[4].mxu0 %vm586_vm0, %v4954_v39  ;;  %4199 = vmatmul.mubr.msk.f32.gmra.mrb[4].mxu1 %vm586_vm0, %v4954_v39 }
 0x15a   : > { %4185 = vmatprep.mubr.msk.f32.mxu0 %vm586_vm0, %v4957_v48  ;;  %4201 = vmatprep.mubr.msk.f32.mxu1 %vm586_vm0, %v4957_v48 }
 0x15b   : > { %v4967_v59 = vadd.f32 %v3842_v30, %v705_v58 }
 0x15d   : > { %4186 = vmatmul.mubr.msk.f32.gmra.mrb[6].mxu0 %vm586_vm0, %v4967_v59  ;;  %4202 = vmatmul.mubr.msk.f32.gmra.mrb[6].mxu1 %vm586_vm0, %v4967_v59 }
 0x15e   : > { %4208 = vmatprep.mubr.msk.f32.mxu0 %vm586_vm0, %v4917_v36 }
 0x161   : > { %4209 = vmatmul.mubr.msk.f32.vlgmr.msra.gmra.mrb[8].mxu0 %vm586_vm0, %v4925_v44 }
 0x162   : > { %4211 = vmatprep.mubr.msk.f32.mxu0 %vm586_vm0, %v4928_v46 }
 0x165   : > { %4212 = vmatmul.mubr.msk.f32.gmra.mrb[10].mxu0 %vm586_vm0, %v4939_v51 }
 0x166   : > { %4214 = vmatprep.mubr.msk.f32.mxu0 %vm586_vm0, %v4943_v52 }
 0x169   : > { %4215 = vmatmul.mubr.msk.f32.gmra.mrb[12].mxu0 %vm586_vm0, %v4954_v39 }
 0x16a   : > { %4217 = vmatprep.mubr.msk.f32.mxu0 %vm586_vm0, %v4957_v48 }
 0x16d   : > { %4218 = vmatmul.mubr.msk.f32.gmra.mrb[14].mxu0 %vm586_vm0, %v4967_v59 }
 0x224   : > { %v4178_v61 = vpop.f32.mrb[0].mxu0  ;;  %v4194_v62 = vpop.f32.mrb[0].mxu1 }
 0x225   : > { %v947_v63 = vadd.f32 %v4194_v62, %v3852_v49  ;;  %v819_v0 = vpop.f32.mrb[1].mxu0  ;;  %v941_v1 = vpop.f32.mrb[1].mxu1  ;;  %v825_v13 = vadd.f32 %v4178_v61, %v4995_v60 }
 0x226   : > { %v820_v2 = vadd.f32 %v4995_v60, %v819_v0  ;;  %v942_v3 = vadd.f32 %v3852_v49, %v941_v1 }
 0x227   : > { %v859_v25 = vmul.f32 0.35355338, %v825_v13 }
 0x228   : > { %v858_v5 = vmul.f32 0.35355338, %v820_v2  ;;  %v4464_v6 = vpack.c.bf16 %v947_v63, %v942_v3  ;;  %v4181_v7 = vpop.f32.mrb[2].mxu0  ;;  %v4197_v8 = vpop.f32.mrb[2].mxu1 }
 0x229   : > { %v957_v9 = vadd.f32 %v4197_v8, %v3852_v49  ;;  %v829_v10 = vpop.f32.mrb[3].mxu0  ;;  %v951_v11 = vpop.f32.mrb[3].mxu1  ;;  %v835_v20 = vadd.f32 %v4181_v7, %v4995_v60 }
 0x22a   : > { %v952_v12 = vadd.f32 %v3852_v49, %v951_v11  ;;  %4466 = vmatprep.subr.msk.bf16.mxu1 %vm5000_vm2, %v4464_v6  ;;  %4224 = vmatprep.mubr.msk.f32.mxu1 %vm1102_vm1, %v858_v5  ;;  %v830_v22 = vadd.f32 %v4995_v60, %v829_v10  ;;  %v1097_v10 = vld [vmem:[%s5535_s17 + $0x18] sm:$0xff]  ;;  %v1096_v11 = vld [vmem:[%s5535_s17 + $0x10] sm:$0xff] }
 0x22b   : > { %4469 = vmatpush3.bf16.xpose.msk.msra.mxu1 %vm5000_vm2, %v4464_v6  ;;  %v861_v50 = vmul.f32 0.35355338, %v835_v20 }
 0x22c   : > { %v4470_v14 = vpack.c.bf16 %v957_v9, %v952_v12  ;;  %v4184_v15 = vpop.f32.mrb[4].mxu0  ;;  %v4200_v16 = vpop.f32.mrb[4].mxu1  ;;  %v860_v35 = vmul.f32 0.35355338, %v830_v22  ;;  %v1101_v22 = vld [vmem:[%s5535_s17 + $0x38] sm:$0xff] }
 0x22d   : > { %v967_v17 = vadd.f32 %v4200_v16, %v3852_v49  ;;  %v839_v18 = vpop.f32.mrb[5].mxu0  ;;  %v961_v19 = vpop.f32.mrb[5].mxu1  ;;  %v845_v43 = vadd.f32 %v4184_v15, %v4995_v60 }
 0x22e   : > { %v840_v23 = vadd.f32 %v4995_v60, %v839_v18  ;;  %v962_v24 = vadd.f32 %v3852_v49, %v961_v19  ;;  %4472 = vmatprep.subr.msk.bf16.mxu1 %vm5000_vm2, %v4470_v14 }
 0x22f   : > { %v863_v53 = vmul.f32 0.35355338, %v845_v43 }
 0x230   : > { %v862_v26 = vmul.f32 0.35355338, %v840_v23  ;;  %v4476_v27 = vpack.c.bf16 %v967_v17, %v962_v24  ;;  %v4187_v30 = vpop.f32.mrb[6].mxu0  ;;  %v4203_v31 = vpop.f32.mrb[6].mxu1  ;;  %v1100_v23 = vld [vmem:[%s5535_s17 + $0x30] sm:$0xff]  ;;  %v1095_v24 = vld [vmem:[%s5535_s17 + $0x8] sm:$0xff] }
 0x231   : > { %v977_v32 = vadd.f32 %v4203_v31, %v3852_v49  ;;  %v849_v33 = vpop.f32.mrb[7].mxu0  ;;  %v971_v34 = vpop.f32.mrb[7].mxu1  ;;  %v855_v58 = vadd.f32 %v4187_v30, %v4995_v60 }
 0x232   : > { %v972_v37 = vadd.f32 %v3852_v49, %v971_v34  ;;  %4225 = vmatmul.mubr.msk.f32.vlgmr.msra.gmra.mrb[8].mxu1 %vm1102_vm1, %v859_v25  ;;  %4478 = vmatprep.subr.msk.bf16.mxu0 %vm5000_vm2, %v4476_v27  ;;  %v850_v21 = vadd.f32 %v4995_v60, %v849_v33 }
 0x233   : > { %4238 = vmatprep.mubr.msk.f32.mxu0 %vm1102_vm1, %v862_v26  ;;  %4475 = vmatpush3.bf16.xpose.msk.msra.mxu1 %vm5000_vm2, %v4470_v14  ;;  %v865_v1 = vmul.f32 0.35355338, %v855_v58  ;;  %v1094_v26 = vld [vmem:[%s5535_s17] sm:$0xff] }
 0x234   : > { %v4482_v41 = vpack.c.bf16 %v977_v32, %v972_v37  ;;  %4231 = vmatprep.mubr.msk.f32.mxu1 %vm1102_vm1, %v860_v35  ;;  %4481 = vmatpush3.bf16.xpose.msk.msra.mxu0 %vm5000_vm2, %v4476_v27  ;;  %v4210_v42 = vpop.f32.mrb[8].mxu0  ;;  %v864_v56 = vmul.f32 0.35355338, %v850_v21  ;;  %v1099_v35 = vld [vmem:[%s5535_s17 + $0x28] sm:$0xff] }
 0x235   : > { %v1061_v45 = vadd.f32 %v4210_v42, %v3861_v40  ;;  %v1055_v28 = vpop.f32.mrb[9].mxu0 }
 0x236   : > { %v1056_v47 = vadd.f32 %v3861_v40, %v1055_v28  ;;  %4484 = vmatprep.subr.msk.bf16.mxu1 %vm5000_vm2, %v4482_v41 }
 0x238   : > { %v4488_v29 = vpack.c.bf16 %v1061_v45, %v1056_v47  ;;  %v4213_v38 = vpop.f32.mrb[10].mxu0 }
 0x239   : > { %v1071_v54 = vadd.f32 %v4213_v38, %v3861_v40  ;;  %v1065_v55 = vpop.f32.mrb[11].mxu0 }
 0x23a   : > { %v1066_v57 = vadd.f32 %v3861_v40, %v1065_v55  ;;  %4232 = vmatmul.mubr.msk.f32.vlgmr.msra.gmra.mrb[10].mxu1 %vm1102_vm1, %v861_v50  ;;  %4489 = vmatprep.subr.bf16.mxu0 %v4488_v29 }
 0x23b   : > { %4239 = vmatmul.mubr.msk.f32.vlgmr.msra.gmra.mrb[16].mxu0 %vm1102_vm1, %v863_v53  ;;  %4487 = vmatpush3.bf16.xpose.msk.msra.mxu1 %vm5000_vm2, %v4482_v41 }
 0x23c   : > { %v4492_v49 = vpack.c.bf16 %v1071_v54, %v1066_v57  ;;  %4245 = vmatprep.mubr.msk.f32.mxu1 %vm1102_vm1, %v864_v56  ;;  %4491 = vmatpush3.bf16.msra.mxu0 %v4488_v29  ;;  %v4216_v61 = vpop.f32.mrb[12].mxu0 }
 0x23d   : > { %v1081_v62 = vadd.f32 %v4216_v61, %v3861_v40  ;;  %v1075_v63 = vpop.f32.mrb[13].mxu0 }
 0x23e   : > { %v1076_v0 = vadd.f32 %v3861_v40, %v1075_v63  ;;  %4493 = vmatprep.subr.bf16.mxu1 %v4492_v49 }
 0x240   : > { %v5037_v2 = vpack.c.bf16 %v1081_v62, %v1076_v0  ;;  %v4219_v3 = vpop.f32.mrb[14].mxu0 }
 0x241   : > { %v1091_v5 = vadd.f32 %v4219_v3, %v3861_v40  ;;  %v1085_v6 = vpop.f32.mrb[15].mxu0 }
 0x242   : > { %v1086_v7 = vadd.f32 %v3861_v40, %v1085_v6  ;;  %4246 = vmatmul.mubr.msk.f32.vlgmr.msra.gmra.mrb[12].mxu1 %vm1102_vm1, %v865_v1  ;;  %4497 = vmatprep.subr.bf16.mxu0 %v5037_v2  ;;  %v1098_v40 = vld [vmem:[%s5535_s17 + $0x20] sm:$0xff] }
 0x243   : > { %4495 = vmatpush3.bf16.msra.mxu1 %v4492_v49 }
 0x244   : > { %v5041_v60 = vpack.c.bf16 %v1091_v5, %v1086_v7 }
 0x246   : > { %4501 = vmatprep.subr.bf16.mxu1 %v5041_v60 }
 0x305   : > { %v4226_v8 = vpop.f32.mrb[8].mxu1 }
 0x306   : > { %v1181_v9 = vpop.f32.mrb[9].mxu1  ;;  %v1187_v32 = vadd.f32 %v4226_v8, %v1095_v24 }
 0x307   : > { %v1182_v34 = vadd.f32 %v1181_v9, %v1094_v26 }
 0x308   : > { %v1454_v41 = vsel %vm586_vm0, %v1187_v32, -inf }
 0x309   : > { %v1451_v43 = vsel %vm586_vm0, %v1182_v34, -inf }
 0x30d   : > { %v4233_v12 = vpop.f32.mrb[10].mxu1 }
 0x30e   : > { %v1274_v13 = vadd.f32 %v4233_v12, %v1097_v10  ;;  %v4240_v14 = vpop.f32.mrb[16].mxu0  ;;  %v1268_v15 = vpop.f32.mrb[11].mxu1 }
 0x30f   : > { %v1269_v16 = vadd.f32 %v1268_v15, %v1096_v11  ;;  %v1355_v17 = vpop.f32.mrb[17].mxu0  ;;  %v1361_v20 = vadd.f32 %v4240_v14, %v1099_v35 }
 0x310   : > { %v1460_v18 = vsel %vm586_vm0, %v1274_v13, -inf  ;;  %v1356_v42 = vadd.f32 %v1355_v17, %v1098_v40  ;;  %v3907_v40 = vld [vmem:[%s5522_s4 + $0x18] sm:$0xff] }
 0x311   : > { %1461 = vmax.xlane.f32.xlu1 %v1460_v18  ;;  %v1457_v19 = vsel %vm586_vm0, %v1269_v16, -inf  ;;  %v1466_v45 = vsel %vm586_vm0, %v1361_v20, -inf }
 0x312   : > { %1458 = vmax.xlane.f32.xlu0 %v1457_v19  ;;  %v1463_v28 = vsel %vm586_vm0, %v1356_v42, -inf }
 0x315   : > { %v4247_v25 = vpop.f32.mrb[12].mxu1 }
 0x316   : > { %v1448_v27 = vadd.f32 %v4247_v25, %v1101_v22  ;;  %v1442_v30 = vpop.f32.mrb[13].mxu1 }
 0x317   : > { %v1443_v31 = vadd.f32 %v1442_v30, %v1100_v23 }
 0x318   : > { %v1472_v33 = vsel %vm586_vm0, %v1448_v27, -inf }
 0x319   : > { %1473 = vmax.xlane.f32.xlu1 %v1472_v33  ;;  %v1469_v37 = vsel %vm586_vm0, %v1443_v31, -inf }
 0x31a   : > { %1470 = vmax.xlane.f32.xlu0 %v1469_v37  ;;  %v3906_v37 = vld [vmem:[%s5522_s4 + $0x10] sm:$0xff] }
 0x31d   : > { %1455 = vmax.xlane.f32.xlu1 %v1454_v41 }
 0x31e   : > { %1452 = vmax.xlane.f32.xlu0 %v1451_v43 }
 0x321   : > { %1467 = vmax.xlane.f32.xlu1 %v1466_v45 }
 0x322   : > { %1464 = vmax.xlane.f32.xlu0 %v1463_v28  ;;  %v4508_v28 = vpack.c.bf16 %v3907_v40, %v3906_v37 }
 0x39e   : > { %v1462_v21 = vpop.xlane.xlu1 %1461 }
 0x39f   : > { %v1478_v47 = vsub.f32 %v1274_v13, %v1462_v21  ;;  %v1459_v50 = vpop.xlane.xlu0 %1458 }
 0x3a0   : > { %v1477_v29 = vsub.f32 %v1269_v16, %v1459_v50 }
 0x3a1   : > { %v1489_v38 = vmul.f32 1.442695, %v1478_v47 }
 0x3a2   : > { %v1487_v53 = vmul.f32 1.442695, %v1477_v29 }
 0x3a3   : > { %4608 = vpow2.f32 %v1489_v38 }
 0x3a4   : > { %4610 = vpow2.f32 %v1487_v53 }
 0x3a6   : > { %v1474_v54 = vpop.xlane.xlu1 %1473 }
 0x3a7   : > { %v1482_v55 = vsub.f32 %v1448_v27, %v1474_v54  ;;  %v1471_v56 = vpop.xlane.xlu0 %1470 }
 0x3a8   : > { %v1481_v57 = vsub.f32 %v1443_v31, %v1471_v56  ;;  %v3895_v56 = vld [vmem:[%s5521_s3 + $0x18] sm:$0xff] }
 0x3a9   : > { %v1497_v58 = vmul.f32 1.442695, %v1482_v55  ;;  %v3894_v55 = vld [vmem:[%s5521_s3 + $0x10] sm:$0xff] }
 0x3aa   : > { %v1495_v49 = vmul.f32 1.442695, %v1481_v57  ;;  %v1456_v61 = vpop.xlane.xlu1 %1455 }
 0x3ab   : > { %4612 = vpow2.f32 %v1497_v58  ;;  %v1476_v62 = vsub.f32 %v1187_v32, %v1456_v61  ;;  %v1453_v63 = vpop.xlane.xlu0 %1452 }
 0x3ac   : > { %4614 = vpow2.f32 %v1495_v49  ;;  %v1475_v0 = vsub.f32 %v1182_v34, %v1453_v63  ;;  %v4504_v49 = vpack.c.bf16 %v3895_v56, %v3894_v55  ;;  %v3919_v63 = vld [vmem:[%s5523_s5 + $0x18] sm:$0xff]  ;;  %v3921_v56 = vld [vmem:[%s5526_s8 + $0x1] ss:$0 sm:$0xff] }
 0x3ad   : > { %v4609_v1 = vpop.eup %4608  ;;  %v1485_v3 = vmul.f32 1.442695, %v1476_v62  ;;  %v3918_v62 = vld [vmem:[%s5523_s5 + $0x10] sm:$0xff] }
 0x3ae   : > { %v4611_v5 = vpop.eup %4610  ;;  %v1483_v6 = vmul.f32 1.442695, %v1475_v0  ;;  %v1468_v7 = vpop.xlane.xlu1 %1467  ;;  %v1508_v8 = vsel %vm586_vm0, %v4609_v1, 0.0 }
 0x3af   : > { %4616 = vpow2.f32 %v1485_v3  ;;  %v1480_v9 = vsub.f32 %v1361_v20, %v1468_v7  ;;  %1509 = vadd.xlane.f32.xlu1 %v1508_v8  ;;  %v1465_v10 = vpop.xlane.xlu0 %1464  ;;  %v1505_v11 = vsel %vm586_vm0, %v4611_v5, 0.0 }
 0x3b0   : > { %4618 = vpow2.f32 %v1483_v6  ;;  %v1479_v12 = vsub.f32 %v1356_v42, %v1465_v10  ;;  %1506 = vadd.xlane.f32.xlu0 %v1505_v11 }
 0x3b1   : > { %v1493_v13 = vmul.f32 1.442695, %v1480_v9 }
 0x3b2   : > { %v1491_v14 = vmul.f32 1.442695, %v1479_v12 }
 0x3b3   : > { %4620 = vpow2.f32 %v1493_v13 }
 0x3b4   : > { %4622 = vpow2.f32 %v1491_v14 }
 0x3b5   : > { %v4613_v15 = vpop.eup %4612 }
 0x3b6   : > { %v4615_v16 = vpop.eup %4614  ;;  %v1520_v17 = vsel %vm586_vm0, %v4613_v15, 0.0 }
 0x3b7   : > { %1521 = vadd.xlane.f32.xlu1 %v1520_v17  ;;  %v1517_v18 = vsel %vm586_vm0, %v4615_v16, 0.0 }
 0x3b8   : > { %1518 = vadd.xlane.f32.xlu0 %v1517_v18 }
 0x3b9   : > { %v4617_v19 = vpop.eup %4616 }
 0x3ba   : > { %v4619_v22 = vpop.eup %4618  ;;  %v1502_v23 = vsel %vm586_vm0, %v4617_v19, 0.0 }
 0x3bb   : > { %1503 = vadd.xlane.f32.xlu1 %v1502_v23  ;;  %v1499_v24 = vsel %vm586_vm0, %v4619_v22, 0.0 }
 0x3bc   : > { %1500 = vadd.xlane.f32.xlu0 %v1499_v24 }
 0x3bd   : > { %v4621_v25 = vpop.eup %4620 }
 0x3be   : > { %v4623_v26 = vpop.eup %4622  ;;  %v1514_v27 = vsel %vm586_vm0, %v4621_v25, 0.0 }
 0x3bf   : > { %1515 = vadd.xlane.f32.xlu1 %v1514_v27  ;;  %v1511_v30 = vsel %vm586_vm0, %v4623_v26, 0.0 }
 0x3c0   : > { %1512 = vadd.xlane.f32.xlu0 %v1511_v30 }
 0x43c   : > { %v1510_v31 = vpop.xlane.xlu1 %1509 }
 0x43d   : > { %4624 = vrcp.f32 %v1510_v31  ;;  %v1507_v32 = vpop.xlane.xlu0 %1506 }
 0x43e   : > { %4626 = vrcp.f32 %v1507_v32 }
 0x444   : > { %v1522_v33 = vpop.xlane.xlu1 %1521 }
 0x445   : > { %4628 = vrcp.f32 %v1522_v33  ;;  %v1519_v34 = vpop.xlane.xlu0 %1518 }
 0x446   : > { %4630 = vrcp.f32 %v1519_v34 }
 0x447   : > { %v4625_v35 = vpop.eup %4624 }
 0x448   : > { %v4627_v20 = vpop.eup %4626  ;;  %v1504_v41 = vpop.xlane.xlu1 %1503  ;;  %v1530_v45 = vmul.f32 %v4625_v35, %v4609_v1 }
 0x449   : > { %4632 = vrcp.f32 %v1504_v41  ;;  %v1501_v42 = vpop.xlane.xlu0 %1500  ;;  %v1528_v43 = vmul.f32 %v4627_v20, %v4611_v5  ;;  %v4512_v5 = vpack.c.bf16 %v3919_v63, %v3918_v62 }
 0x44a   : > { %4634 = vrcp.f32 %v1501_v42 }
 0x44b   : > { %4259 = vmatprep.mubr.msk.f32.mxu1 %vm586_vm0, %v1528_v43 }
 0x44c   : > { %v1516_v21 = vpop.xlane.xlu1 %1515  ;;  %4260 = vmatmul.mubr.msk.f32.vlgmr.msra.gmra.mrb[14].mxu1 %vm586_vm0, %v1530_v45 }
 0x44d   : > { %4636 = vrcp.f32 %v1516_v21  ;;  %4503 = vmatpush3.bf16.msra.mxu1 %v5041_v60  ;;  %v1513_v47 = vpop.xlane.xlu0 %1512 }
 0x44e   : > { %4638 = vrcp.f32 %v1513_v47  ;;  %4509 = vmatprep.subr.bf16.mxu1 %v4508_v28 }
 0x44f   : > { %v4629_v50 = vpop.eup %4628 }
 0x450   : > { %v4631_v29 = vpop.eup %4630  ;;  %v1538_v53 = vmul.f32 %v4629_v50, %v4613_v15  ;;  %v3897_v15 = vld [vmem:[%s5524_s6 + $0x1] ss:$0 sm:$0xff] }
 0x451   : > { %v1536_v38 = vmul.f32 %v4631_v29, %v4615_v16 }
 0x453   : > { %v4633_v54 = vpop.eup %4632  ;;  %4273 = vmatprep.mubr.msk.f32.mxu1 %vm586_vm0, %v1536_v38 }
 0x454   : > { %v4635_v57 = vpop.eup %4634  ;;  %4274 = vmatmul.mubr.msk.f32.vlgmr.msra.gmra.mrb[16].mxu1 %vm586_vm0, %v1538_v53  ;;  %v1526_v58 = vmul.f32 %v4633_v54, %v4617_v19 }
 0x455   : > { %4511 = vmatpush3.bf16.msra.mxu1 %v4508_v28  ;;  %4296 = vmatprep.mubr.msk.f32.mxu1 %vm586_vm0, %v4917_v36  ;;  %v1524_v60 = vmul.f32 %v4635_v57, %v4619_v22 }
 0x457   : > { %v4637_v61 = vpop.eup %4636  ;;  %4252 = vmatprep.mubr.msk.f32.mxu0 %vm586_vm0, %v1524_v60 }
 0x458   : > { %v4639_v0 = vpop.eup %4638  ;;  %4253 = vmatmul.mubr.msk.f32.vlgmr.msra.gmra.mrb[18].mxu0 %vm586_vm0, %v1526_v58  ;;  %4297 = vmatmul.mubr.msk.f32.vlgmr.msra.gmra.mrb[18].mxu1 %vm586_vm0, %v4925_v44  ;;  %v1534_v3 = vmul.f32 %v4637_v61, %v4621_v25 }
 0x459   : > { %4499 = vmatpush3.bf16.msra.mxu0 %v5037_v2  ;;  %4299 = vmatprep.mubr.msk.f32.mxu1 %vm586_vm0, %v4928_v46  ;;  %v1532_v1 = vmul.f32 %v4639_v0, %v4623_v26 }
 0x45a   : > { %4505 = vmatprep.subr.bf16.mxu0 %v4504_v49 }
 0x45b   : > { %4266 = vmatprep.mubr.msk.f32.mxu0 %vm586_vm0, %v1532_v1 }
 0x45c   : > { %4267 = vmatmul.mubr.msk.f32.vlgmr.msra.gmra.mrb[20].mxu0 %vm586_vm0, %v1534_v3  ;;  %4300 = vmatmul.mubr.msk.f32.gmra.mrb[20].mxu1 %vm586_vm0, %v4939_v51 }
 0x45d   : > { %4507 = vmatpush3.bf16.msra.mxu0 %v4504_v49  ;;  %4280 = vmatprep.mubr.msk.f32.mxu0 %vm586_vm0, %v4917_v36 }
 0x45e   : > { %4302 = vmatprep.mubr.msk.f32.mxu1 %vm586_vm0, %v4943_v52  ;;  %4513 = vmatprep.subr.bf16.mxu0 %v4512_v5 }
 0x460   : > { %4281 = vmatmul.mubr.msk.f32.vlgmr.msra.gmra.mrb[22].mxu0 %vm586_vm0, %v4925_v44  ;;  %4303 = vmatmul.mubr.msk.f32.gmra.mrb[22].mxu1 %vm586_vm0, %v4954_v39 }
 0x461   : > { %4283 = vmatprep.mubr.msk.f32.mxu0 %vm586_vm0, %v4928_v46  ;;  %4305 = vmatprep.mubr.msk.f32.mxu1 %vm586_vm0, %v4957_v48 }
 0x462   : > { %4515 = vmatpush3.bf16.msra.mxu0 %v4512_v5 }
 0x464   : > { %4284 = vmatmul.mubr.msk.f32.gmra.mrb[24].mxu0 %vm586_vm0, %v4939_v51  ;;  %4306 = vmatmul.mubr.msk.f32.gmra.mrb[24].mxu1 %vm586_vm0, %v4967_v59 }
 0x465   : > { %4286 = vmatprep.mubr.msk.f32.mxu0 %vm586_vm0, %v4943_v52 }
 0x468   : > { %4287 = vmatmul.mubr.msk.f32.gmra.mrb[26].mxu0 %vm586_vm0, %v4954_v39 }
 0x469   : > { %4289 = vmatprep.mubr.msk.f32.mxu0 %vm586_vm0, %v4957_v48 }
 0x46c   : > { %4290 = vmatmul.mubr.msk.f32.gmra.mrb[28].mxu0 %vm586_vm0, %v4967_v59 }
 0x46d   : > { %4312 = vmatprep.mubr.msk.f32.mxu0 %vm586_vm0, %v4917_v36 }
 0x470   : > { %4313 = vmatmul.mubr.msk.f32.vlgmr.msra.gmra.mrb[30].mxu0 %vm586_vm0, %v4925_v44 }
 0x471   : > { %4315 = vmatprep.mubr.msk.f32.mxu0 %vm586_vm0, %v4928_v46 }
 0x474   : > { %4316 = vmatmul.mubr.msk.f32.gmra.mrb[32].mxu0 %vm586_vm0, %v4939_v51  ;;  %v3909_v51 = vld [vmem:[%s5525_s7 + $0x1] ss:$0 sm:$0xff] }
 0x475   : > { %4318 = vmatprep.mubr.msk.f32.mxu0 %vm586_vm0, %v4943_v52 }
 0x478   : > { %4319 = vmatmul.mubr.msk.f32.gmra.mrb[34].mxu0 %vm586_vm0, %v4954_v39 }
 0x479   : > { %4321 = vmatprep.mubr.msk.f32.mxu0 %vm586_vm0, %v4957_v48 }
 0x47c   : > { %4322 = vmatmul.mubr.msk.f32.gmra.mrb[36].mxu0 %vm586_vm0, %v4967_v59 }
 0x51f   : > { %v5160_v36 = vpop.f32.mrb[14].mxu1 }
 0x520   : > { %v5162_v44 = vpop.f32.mrb[15].mxu1 }
 0x527   : > { %v5164_v46 = vpop.f32.mrb[16].mxu1 }
 0x528   : > { %v5166_v2 = vpop.f32.mrb[17].mxu1 }
 0x52b   : > { %v5171_v52 = vpop.f32.mrb[18].mxu0  ;;  %v4298_v39 = vpop.f32.mrb[18].mxu1 }
 0x52c   : > { %v2071_v6 = vadd.f32 %v4298_v39, %v3909_v51  ;;  %v5173_v48 = vpop.f32.mrb[19].mxu0  ;;  %v2065_v7 = vpop.f32.mrb[19].mxu1 }
 0x52d   : > { %v2066_v59 = vadd.f32 %v3909_v51, %v2065_v7 }
 0x52f   : > { %v4516_v8 = vpack.c.bf16 %v2071_v6, %v2066_v59  ;;  %v5175_v9 = vpop.f32.mrb[20].mxu0  ;;  %v4301_v10 = vpop.f32.mrb[20].mxu1 }
 0x530   : > { %v2081_v11 = vadd.f32 %v4301_v10, %v3909_v51  ;;  %v5177_v12 = vpop.f32.mrb[21].mxu0  ;;  %v2075_v13 = vpop.f32.mrb[21].mxu1 }
 0x531   : > { %v2076_v14 = vadd.f32 %v3909_v51, %v2075_v13  ;;  %4518 = vmatprep.subr.msk.bf16.mxu1 %vm5000_vm2, %v4516_v8 }
 0x532   : > { %4521 = vmatpush3.bf16.xpose.msk.msra.mxu1 %vm5000_vm2, %v4516_v8 }
 0x533   : > { %v4522_v16 = vpack.c.bf16 %v2081_v11, %v2076_v14  ;;  %v4282_v17 = vpop.f32.mrb[22].mxu0  ;;  %v4304_v18 = vpop.f32.mrb[22].mxu1 }
 0x534   : > { %v1947_v19 = vadd.f32 %v4282_v17, %v3897_v15  ;;  %v2091_v22 = vadd.f32 %v4304_v18, %v3909_v51  ;;  %v1941_v23 = vpop.f32.mrb[23].mxu0  ;;  %v2085_v24 = vpop.f32.mrb[23].mxu1  ;;  %v3930_v17 = vld [vmem:[%s5535_s17 + $0x40] sm:$0xff] }
 0x535   : > { %v1942_v25 = vadd.f32 %v3897_v15, %v1941_v23  ;;  %v2086_v26 = vadd.f32 %v3909_v51, %v2085_v24  ;;  %4524 = vmatprep.subr.msk.bf16.mxu1 %vm5000_vm2, %v4522_v16 }
 0x536   : > { %v1981_v33 = vmul.f32 0.35355338, %v1947_v19 }
 0x537   : > { %v1980_v27 = vmul.f32 0.35355338, %v1942_v25  ;;  %v4528_v30 = vpack.c.bf16 %v2091_v22, %v2086_v26  ;;  %v4285_v31 = vpop.f32.mrb[24].mxu0  ;;  %v4307_v32 = vpop.f32.mrb[24].mxu1  ;;  %v3933_v26 = vld [vmem:[%s5535_s17 + $0x58] sm:$0xff] }
 0x538   : > { %v2101_v34 = vadd.f32 %v4307_v32, %v3909_v51  ;;  %v1951_v35 = vpop.f32.mrb[25].mxu0  ;;  %v2095_v37 = vpop.f32.mrb[25].mxu1  ;;  %v1957_v45 = vadd.f32 %v4285_v31, %v3897_v15  ;;  %v3935_v31 = vld [vmem:[%s5535_s17 + $0x68] sm:$0xff] }
 0x539   : > { %v1952_v40 = vadd.f32 %v3897_v15, %v1951_v35  ;;  %v2096_v20 = vadd.f32 %v3909_v51, %v2095_v37  ;;  %4328 = vmatprep.mubr.msk.f32.mxu1 %vm1102_vm1, %v1980_v27  ;;  %4530 = vmatprep.subr.msk.bf16.mxu0 %vm5000_vm2, %v4528_v30  ;;  %v3932_v27 = vld [vmem:[%s5535_s17 + $0x50] sm:$0xff]  ;;  %v3934_v37 = vld [vmem:[%s5535_s17 + $0x60] sm:$0xff] }
 0x53a   : > { %4329 = vmatmul.mubr.msk.f32.vlgmr.msra.gmra.mrb[26].mxu1 %vm1102_vm1, %v1981_v33  ;;  %4533 = vmatpush3.bf16.xpose.msk.msra.mxu0 %vm5000_vm2, %v4528_v30  ;;  %v1983_v38 = vmul.f32 0.35355338, %v1957_v45  ;;  %v3937_v45 = vld [vmem:[%s5535_s17 + $0x78] sm:$0xff] }
 0x53b   : > { %v1982_v41 = vmul.f32 0.35355338, %v1952_v40  ;;  %v4534_v42 = vpack.c.bf16 %v2101_v34, %v2096_v20  ;;  %4527 = vmatpush3.bf16.xpose.msk.msra.mxu1 %vm5000_vm2, %v4522_v16  ;;  %v4288_v43 = vpop.f32.mrb[26].mxu0  ;;  %v3931_v16 = vld [vmem:[%s5535_s17 + $0x48] sm:$0xff] }
 0x53c   : > { %v1967_v28 = vadd.f32 %v4288_v43, %v3897_v15  ;;  %v1961_v21 = vpop.f32.mrb[27].mxu0 }
 0x53d   : > { %v1962_v47 = vadd.f32 %v3897_v15, %v1961_v21  ;;  %4335 = vmatprep.mubr.msk.f32.mxu1 %vm1102_vm1, %v1982_v41  ;;  %4536 = vmatprep.subr.msk.bf16.mxu1 %vm5000_vm2, %v4534_v42  ;;  %v3936_v21 = vld [vmem:[%s5535_s17 + $0x70] sm:$0xff] }
 0x53e   : > { %v1985_v53 = vmul.f32 0.35355338, %v1967_v28 }
 0x53f   : > { %v1984_v50 = vmul.f32 0.35355338, %v1962_v47  ;;  %v4291_v29 = vpop.f32.mrb[28].mxu0 }
 0x540   : > { %v1971_v54 = vpop.f32.mrb[29].mxu0  ;;  %v1977_v58 = vadd.f32 %v4291_v29, %v3897_v15 }
 0x541   : > { %v1972_v55 = vadd.f32 %v3897_v15, %v1971_v54  ;;  %4342 = vmatprep.mubr.msk.f32.mxu0 %vm1102_vm1, %v1984_v50 }
 0x542   : > { %4336 = vmatmul.mubr.msk.f32.vlgmr.msra.gmra.mrb[28].mxu1 %vm1102_vm1, %v1983_v38  ;;  %4343 = vmatmul.mubr.msk.f32.vlgmr.msra.gmra.mrb[38].mxu0 %vm1102_vm1, %v1985_v53  ;;  %v1987_v1 = vmul.f32 0.35355338, %v1977_v58 }
 0x543   : > { %v1986_v57 = vmul.f32 0.35355338, %v1972_v55  ;;  %4539 = vmatpush3.bf16.xpose.msk.msra.mxu1 %vm5000_vm2, %v4534_v42  ;;  %v4314_v60 = vpop.f32.mrb[30].mxu0 }
 0x544   : > { %v2187_v49 = vadd.f32 %v4314_v60, %v3921_v56  ;;  %v2181_v61 = vpop.f32.mrb[31].mxu0 }
 0x545   : > { %v2182_v62 = vadd.f32 %v3921_v56, %v2181_v61  ;;  %4349 = vmatprep.mubr.msk.f32.mxu1 %vm1102_vm1, %v1986_v57 }
 0x547   : > { %v4540_v63 = vpack.c.bf16 %v2187_v49, %v2182_v62  ;;  %v4317_v0 = vpop.f32.mrb[32].mxu0 }
 0x548   : > { %v2197_v3 = vadd.f32 %v4317_v0, %v3921_v56  ;;  %v2191_v5 = vpop.f32.mrb[33].mxu0 }
 0x549   : > { %v2192_v51 = vadd.f32 %v3921_v56, %v2191_v5  ;;  %4541 = vmatprep.subr.bf16.mxu0 %v4540_v63 }
 0x54a   : > { %4350 = vmatmul.mubr.msk.f32.vlgmr.msra.gmra.mrb[30].mxu1 %vm1102_vm1, %v1987_v1  ;;  %4543 = vmatpush3.bf16.msra.mxu0 %v4540_v63 }
 0x54b   : > { %v4544_v39 = vpack.c.bf16 %v2197_v3, %v2192_v51  ;;  %v4320_v4 = vpop.f32.mrb[34].mxu0 }
 0x54c   : > { %v2207_v6 = vadd.f32 %v4320_v4, %v3921_v56  ;;  %v2201_v7 = vpop.f32.mrb[35].mxu0 }
 0x54d   : > { %v2202_v59 = vadd.f32 %v3921_v56, %v2201_v7  ;;  %4545 = vmatprep.subr.bf16.mxu1 %v4544_v39 }
 0x54e   : > { %4547 = vmatpush3.bf16.msra.mxu1 %v4544_v39 }
 0x54f   : > { %v5209_v8 = vpack.c.bf16 %v2207_v6, %v2202_v59  ;;  %v4323_v10 = vpop.f32.mrb[36].mxu0 }
 0x550   : > { %v2217_v11 = vadd.f32 %v4323_v10, %v3921_v56  ;;  %v2211_v13 = vpop.f32.mrb[37].mxu0 }
 0x551   : > { %v2212_v14 = vadd.f32 %v3921_v56, %v2211_v13  ;;  %4549 = vmatprep.subr.bf16.mxu0 %v5209_v8 }
 0x553   : > { %v5212_v15 = vpack.c.bf16 %v2217_v11, %v2212_v14 }
 0x555   : > { %4553 = vmatprep.subr.bf16.mxu1 %v5212_v15 }
 0x60d   : > { %v4330_v18 = vpop.f32.mrb[26].mxu1 }
 0x60e   : > { %v2313_v19 = vadd.f32 %v4330_v18, %v3931_v16  ;;  %v2307_v22 = vpop.f32.mrb[27].mxu1 }
 0x60f   : > { %v2308_v23 = vadd.f32 %v3930_v17, %v2307_v22 }
 0x610   : > { %v2580_v24 = vsel %vm586_vm0, %v2313_v19, -inf }
 0x611   : > { %2581 = vmax.xlane.f32.xlu1 %v2580_v24  ;;  %v2577_v25 = vsel %vm586_vm0, %v2308_v23, -inf }
 0x612   : > { %2578 = vmax.xlane.f32.xlu0 %v2577_v25 }
 0x615   : > { %v4337_v30 = vpop.f32.mrb[28].mxu1  ;;  %v4344_v32 = vpop.f32.mrb[38].mxu0 }
 0x616   : > { %v2400_v33 = vadd.f32 %v4337_v30, %v3933_v26  ;;  %v2394_v34 = vpop.f32.mrb[29].mxu1  ;;  %v2481_v35 = vpop.f32.mrb[39].mxu0  ;;  %v2487_v20 = vadd.f32 %v4344_v32, %v3935_v31 }
 0x617   : > { %v2395_v40 = vadd.f32 %v3932_v27, %v2394_v34  ;;  %v2482_v42 = vadd.f32 %v3934_v37, %v2481_v35 }
 0x618   : > { %v2586_v41 = vsel %vm586_vm0, %v2400_v33, -inf  ;;  %v2592_v28 = vsel %vm586_vm0, %v2487_v20, -inf }
 0x619   : > { %2587 = vmax.xlane.f32.xlu1 %v2586_v41  ;;  %v2583_v43 = vsel %vm586_vm0, %v2395_v40, -inf  ;;  %v2589_v50 = vsel %vm586_vm0, %v2482_v42, -inf }
 0x61a   : > { %2584 = vmax.xlane.f32.xlu0 %v2583_v43 }
 0x61d   : > { %2593 = vmax.xlane.f32.xlu1 %v2592_v28  ;;  %v4351_v47 = vpop.f32.mrb[30].mxu1 }
 0x61e   : > { %v2574_v29 = vadd.f32 %v4351_v47, %v3937_v45  ;;  %v2568_v38 = vpop.f32.mrb[31].mxu1  ;;  %2590 = vmax.xlane.f32.xlu0 %v2589_v50 }
 0x61f   : > { %v2569_v53 = vadd.f32 %v3936_v21, %v2568_v38 }
 0x620   : > { %v2598_v54 = vsel %vm586_vm0, %v2574_v29, -inf }
 0x621   : > { %2599 = vmax.xlane.f32.xlu1 %v2598_v54  ;;  %v2595_v55 = vsel %vm586_vm0, %v2569_v53, -inf }
 0x622   : > { %2596 = vmax.xlane.f32.xlu0 %v2595_v55 }
 0x69e   : > { %v2582_v56 = vpop.xlane.xlu1 %2581 }
 0x69f   : > { %v2602_v57 = vsub.f32 %v2313_v19, %v2582_v56  ;;  %v2579_v60 = vpop.xlane.xlu0 %2578 }
 0x6a0   : > { %v2601_v58 = vsub.f32 %v2308_v23, %v2579_v60 }
 0x6a1   : > { %v2611_v49 = vmul.f32 1.442695, %v2602_v57 }
 0x6a2   : > { %v2609_v61 = vmul.f32 1.442695, %v2601_v58 }
 0x6a3   : > { %4640 = vpow2.f32 %v2611_v49 }
 0x6a4   : > { %4642 = vpow2.f32 %v2609_v61 }
 0x6a6   : > { %v2588_v62 = vpop.xlane.xlu1 %2587 }
 0x6a7   : > { %v2604_v63 = vsub.f32 %v2400_v33, %v2588_v62  ;;  %v2585_v0 = vpop.xlane.xlu0 %2584 }
 0x6a8   : > { %v2603_v1 = vsub.f32 %v2395_v40, %v2585_v0 }
 0x6a9   : > { %v2615_v3 = vmul.f32 1.442695, %v2604_v63 }
 0x6aa   : > { %v2613_v5 = vmul.f32 1.442695, %v2603_v1  ;;  %v2594_v51 = vpop.xlane.xlu1 %2593  ;;  %v3962_v1 = vld [vmem:[%s5527_s9 + $0x8] sm:$0xff] }
 0x6ab   : > { %4644 = vpow2.f32 %v2615_v3  ;;  %v2606_v39 = vsub.f32 %v2487_v20, %v2594_v51  ;;  %v2591_v4 = vpop.xlane.xlu0 %2590 }
 0x6ac   : > { %4646 = vpow2.f32 %v2613_v5  ;;  %v2605_v6 = vsub.f32 %v2482_v42, %v2591_v4 }
 0x6ad   : > { %v4641_v7 = vpop.eup %4640  ;;  %v2619_v59 = vmul.f32 1.442695, %v2606_v39 }
 0x6ae   : > { %v4643_v10 = vpop.eup %4642  ;;  %v2617_v11 = vmul.f32 1.442695, %v2605_v6  ;;  %v2600_v13 = vpop.xlane.xlu1 %2599  ;;  %v2628_v14 = vsel %vm586_vm0, %v4641_v7, 0.0 }
 0x6af   : > { %4648 = vpow2.f32 %v2619_v59  ;;  %v2608_v16 = vsub.f32 %v2574_v29, %v2600_v13  ;;  %v2597_v17 = vpop.xlane.xlu0 %2596  ;;  %2629 = vadd.xlane.f32.xlu1 %v2628_v14  ;;  %v2625_v18 = vsel %vm586_vm0, %v4643_v10, 0.0  ;;  %v4706_v14 = vld [vmem:[%s4831_s1 + $0x18] sm:$0xff] }
 0x6b0   : > { %4650 = vpow2.f32 %v2617_v11  ;;  %v2607_v19 = vsub.f32 %v2569_v53, %v2597_v17  ;;  %2626 = vadd.xlane.f32.xlu0 %v2625_v18  ;;  %v4705_v11 = vld [vmem:[%s4831_s1] sm:$0xff]  ;;  %v4707_v18 = vld [vmem:[%s4831_s1 + $0x10] sm:$0xff] }
 0x6b1   : > { %v2623_v22 = vmul.f32 1.442695, %v2608_v16 }
 0x6b2   : > { %v2621_v23 = vmul.f32 1.442695, %v2607_v19 }
 0x6b3   : > { %4652 = vpow2.f32 %v2623_v22 }
 0x6b4   : > { %4654 = vpow2.f32 %v2621_v23 }
 0x6b5   : > { %v4645_v24 = vpop.eup %4644 }
 0x6b6   : > { %v4647_v25 = vpop.eup %4646  ;;  %v2634_v26 = vsel %vm586_vm0, %v4645_v24, 0.0 }
 0x6b7   : > { %2635 = vadd.xlane.f32.xlu1 %v2634_v26  ;;  %v2631_v27 = vsel %vm586_vm0, %v4647_v25, 0.0  ;;  %v4708_v26 = vld [vmem:[%s4831_s1 + $0x28] sm:$0xff] }
 0x6b8   : > { %2632 = vadd.xlane.f32.xlu0 %v2631_v27 }
 0x6b9   : > { %v4649_v30 = vpop.eup %4648 }
 0x6ba   : > { %v4651_v31 = vpop.eup %4650  ;;  %v2640_v32 = vsel %vm586_vm0, %v4649_v30, 0.0 }
 0x6bb   : > { %2641 = vadd.xlane.f32.xlu1 %v2640_v32  ;;  %v2637_v33 = vsel %vm586_vm0, %v4651_v31, 0.0  ;;  %v4709_v32 = vld [vmem:[%s4831_s1 + $0x20] sm:$0xff] }
 0x6bc   : > { %2638 = vadd.xlane.f32.xlu0 %v2637_v33 }
 0x6bd   : > { %v4653_v34 = vpop.eup %4652 }
 0x6be   : > { %v4655_v35 = vpop.eup %4654  ;;  %v2646_v37 = vsel %vm586_vm0, %v4653_v34, 0.0 }
 0x6bf   : > { %2647 = vadd.xlane.f32.xlu1 %v2646_v37  ;;  %v2643_v40 = vsel %vm586_vm0, %v4655_v35, 0.0 }
 0x6c0   : > { %2644 = vadd.xlane.f32.xlu0 %v2643_v40 }
 0x73c   : > { %v2630_v20 = vpop.xlane.xlu1 %2629 }
 0x73d   : > { %4656 = vrcp.f32 %v2630_v20  ;;  %v2627_v41 = vpop.xlane.xlu0 %2626  ;;  %v4710_v20 = vld [vmem:[%s4831_s1 + $0x38] sm:$0xff] }
 0x73e   : > { %4658 = vrcp.f32 %v2627_v41 }
 0x744   : > { %v2636_v42 = vpop.xlane.xlu1 %2635 }
 0x745   : > { %4660 = vrcp.f32 %v2636_v42  ;;  %v2633_v43 = vpop.xlane.xlu0 %2632 }
 0x746   : > { %4662 = vrcp.f32 %v2633_v43 }
 0x747   : > { %v4657_v45 = vpop.eup %4656 }
 0x748   : > { %v4659_v28 = vpop.eup %4658  ;;  %v2642_v21 = vpop.xlane.xlu1 %2641  ;;  %v2652_v29 = vmul.f32 %v4657_v45, %v4641_v7  ;;  %v4711_v45 = vld [vmem:[%s4831_s1 + $0x30] sm:$0xff] }
 0x749   : > { %4664 = vrcp.f32 %v2642_v21  ;;  %v2639_v47 = vpop.xlane.xlu0 %2638  ;;  %v2650_v50 = vmul.f32 %v4659_v28, %v4643_v10 }
 0x74a   : > { %4666 = vrcp.f32 %v2639_v47 }
 0x74b   : > { %4356 = vmatprep.mubr.msk.f32.mxu0 %vm586_vm0, %v2650_v50 }
 0x74c   : > { %v2648_v38 = vpop.xlane.xlu1 %2647  ;;  %4357 = vmatmul.mubr.msk.f32.vlgmr.msra.gmra.mrb[40].mxu0 %vm586_vm0, %v2652_v29 }
 0x74d   : > { %4668 = vrcp.f32 %v2648_v38  ;;  %4551 = vmatpush3.bf16.msra.mxu0 %v5209_v8  ;;  %v2645_v53 = vpop.xlane.xlu0 %2644 }
 0x74e   : > { %4670 = vrcp.f32 %v2645_v53  ;;  %4380 = vmatprep.subr.mxu0 %v3962_v1 }
 0x74f   : > { %v4661_v54 = vpop.eup %4660 }
 0x750   : > { %v4663_v55 = vpop.eup %4662  ;;  %v2656_v57 = vmul.f32 %v4661_v54, %v4645_v24 }
 0x751   : > { %v2654_v56 = vmul.f32 %v4663_v55, %v4647_v25 }
 0x753   : > { %v4665_v60 = vpop.eup %4664  ;;  %4363 = vmatprep.mubr.msk.f32.mxu1 %vm586_vm0, %v2654_v56 }
 0x754   : > { %v4667_v58 = vpop.eup %4666  ;;  %4364 = vmatmul.mubr.msk.f32.vlgmr.msra.gmra.mrb[32].mxu1 %vm586_vm0, %v2656_v57  ;;  %v2660_v61 = vmul.f32 %v4665_v60, %v4649_v30 }
 0x755   : > { %4555 = vmatpush3.bf16.msra.mxu1 %v5212_v15  ;;  %v2658_v49 = vmul.f32 %v4667_v58, %v4651_v31  ;;  %v1863_v15 = vld [vmem:[%s5527_s9] sm:$0xff] }
 0x757   : > { %v4669_v62 = vpop.eup %4668  ;;  %4370 = vmatprep.mubr.msk.f32.mxu0 %vm586_vm0, %v2658_v49 }
 0x758   : > { %v4671_v8 = vpop.eup %4670  ;;  %4371 = vmatmul.mubr.msk.f32.vlgmr.msra.gmra.mrb[42].mxu0 %vm586_vm0, %v2660_v61  ;;  %v2664_v0 = vmul.f32 %v4669_v62, %v4653_v34 }
 0x759   : > { %v2662_v63 = vmul.f32 %v4671_v8, %v4655_v35  ;;  %4381 = vmatpush3.msra.mxu0 %v3962_v1 }
 0x75a   : > { %4394 = vmatprep.subr.mxu0 %v1863_v15 }
 0x75b   : > { %4377 = vmatprep.mubr.msk.f32.mxu1 %vm586_vm0, %v2662_v63 }
 0x75c   : > { %4378 = vmatmul.mubr.msk.f32.vlgmr.msra.gmra.mrb[34].mxu1 %vm586_vm0, %v2664_v0 }
 0x81f   : > { %v4358_v3 = vpop.f32.mrb[40].mxu0 }
 0x820   : > { %v2737_v5 = vpop.f32.mrb[41].mxu0 }
 0x821   : > { %4382 = vmatprep.mubr.msk.f32.mxu0 %vm1102_vm1, %v2737_v5 }
 0x822   : > { %4383 = vmatmul.mubr.msk.f32.vlgmr.msra.gmra.mrb[44].mxu0 %vm1102_vm1, %v4358_v3 }
 0x823   : > { %4395 = vmatpush3.msra.mxu0 %v1863_v15 }
 0x827   : > { %v4365_v51 = vpop.f32.mrb[32].mxu1 }
 0x828   : > { %v2818_v39 = vpop.f32.mrb[33].mxu1 }
 0x829   : > { %4385 = vmatprep.mubr.msk.f32.mxu0 %vm1102_vm1, %v2818_v39 }
 0x82a   : > { %4386 = vmatmul.mubr.msk.f32.gmra.mrb[46].mxu0 %vm1102_vm1, %v4365_v51 }
 0x82b   : > { %v4372_v4 = vpop.f32.mrb[42].mxu0 }
 0x82c   : > { %v2899_v6 = vpop.f32.mrb[43].mxu0 }
 0x82d   : > { %4388 = vmatprep.mubr.msk.f32.mxu0 %vm1102_vm1, %v2899_v6 }
 0x82e   : > { %4389 = vmatmul.mubr.msk.f32.gmra.mrb[48].mxu0 %vm1102_vm1, %v4372_v4 }
 0x82f   : > { %v4379_v7 = vpop.f32.mrb[34].mxu1 }
 0x830   : > { %v2980_v59 = vpop.f32.mrb[35].mxu1 }
 0x831   : > { %4391 = vmatprep.mubr.msk.f32.mxu0 %vm1102_vm1, %v2980_v59 }
 0x832   : > { %4392 = vmatmul.mubr.msk.f32.gmra.mrb[50].mxu0 %vm1102_vm1, %v4379_v7 }
 0x833   : > { %4396 = vmatprep.mubr.msk.f32.mxu0 %vm1102_vm1, %v5173_v48  ;;  %v4704_v48 = vld [vmem:[%s4831_s1 + $0x8] sm:$0xff] }
 0x836   : > { %4397 = vmatmul.mubr.msk.f32.vlgmr.msra.gmra.mrb[44].mxu0 %vm1102_vm1, %v5171_v52 }
 0x837   : > { %4399 = vmatprep.mubr.msk.f32.mxu0 %vm1102_vm1, %v5162_v44  ;;  %v3979_v44 = vld [vmem:[%s5528_s10] ss:$0 sm:$0xff] }
 0x83a   : > { %4400 = vmatmul.mubr.msk.f32.gmra.mrb[46].mxu0 %vm1102_vm1, %v5160_v36 }
 0x83b   : > { %4402 = vmatprep.mubr.msk.f32.mxu0 %vm1102_vm1, %v5177_v12 }
 0x83e   : > { %4403 = vmatmul.mubr.msk.f32.gmra.mrb[48].mxu0 %vm1102_vm1, %v5175_v9 }
 0x83f   : > { %4405 = vmatprep.mubr.msk.f32.mxu0 %vm1102_vm1, %v5166_v2 }
 0x842   : > { %4406 = vmatmul.mubr.msk.f32.gmra.mrb[50].mxu0 %vm1102_vm1, %v5164_v46 }
 0x909   : > { %v4398_v52 = vpop.f32.mrb[44].mxu0 }
 0x90a   : > { %v3250_v36 = vadd.f32 %v4704_v48, %v4398_v52  ;;  %v3210_v10 = vpop.f32.mrb[45].mxu0 }
 0x90b   : > { %v3249_v12 = vadd.f32 %v4705_v11, %v3210_v10 }
 0x90c   : > { %v5300_v13 = vadd.f32 %v3979_v44, %v3250_v36 }
 0x90d   : > { %v5302_v9 = vadd.f32 %v3979_v44, %v3249_v12  ;;  %v4401_v2 = vpop.f32.mrb[46].mxu0 }
 0x90e   : > { %v3252_v16 = vadd.f32 %v4706_v14, %v4401_v2  ;;  %v3220_v46 = vpop.f32.mrb[47].mxu0  ;;  %v3277_v17 = vsel %vm586_vm0, %v5300_v13, 0.0 }
 0x90f   : > { %v3251_v19 = vadd.f32 %v4707_v18, %v3220_v46  ;;  %3278 = vadd.xlane.f32.xlu1 %v3277_v17  ;;  %v3274_v22 = vsel %vm586_vm0, %v5302_v9, 0.0 }
 0x910   : > { %v5310_v23 = vadd.f32 %v3979_v44, %v3252_v16  ;;  %3275 = vadd.xlane.f32.xlu0 %v3274_v22 }
 0x911   : > { %v5312_v24 = vadd.f32 %v3979_v44, %v3251_v19  ;;  %v4404_v25 = vpop.f32.mrb[48].mxu0 }
 0x912   : > { %v3254_v27 = vadd.f32 %v4708_v26, %v4404_v25  ;;  %v3230_v30 = vpop.f32.mrb[49].mxu0  ;;  %v3283_v31 = vsel %vm586_vm0, %v5310_v23, 0.0 }
 0x913   : > { %v3253_v33 = vadd.f32 %v4709_v32, %v3230_v30  ;;  %3284 = vadd.xlane.f32.xlu1 %v3283_v31  ;;  %v3280_v34 = vsel %vm586_vm0, %v5312_v24, 0.0  ;;  %v3407_v30 = vld [vmem:[%s5531_s13 + $0x8] sm:$0xff] }
 0x914   : > { %v5320_v35 = vadd.f32 %v3979_v44, %v3254_v27  ;;  %3281 = vadd.xlane.f32.xlu0 %v3280_v34  ;;  %v3406_v27 = vld [vmem:[%s5531_s13] sm:$0xff] }
 0x915   : > { %v5322_v37 = vadd.f32 %v3979_v44, %v3253_v33  ;;  %v4407_v40 = vpop.f32.mrb[50].mxu0  ;;  %v4556_v31 = vpack.c.bf16 %v3407_v30, %v3406_v27 }
 0x916   : > { %v3256_v41 = vadd.f32 %v4710_v20, %v4407_v40  ;;  %v3240_v42 = vpop.f32.mrb[51].mxu0  ;;  %v3289_v43 = vsel %vm586_vm0, %v5320_v35, 0.0 }
 0x917   : > { %v3255_v28 = vadd.f32 %v4711_v45, %v3240_v42  ;;  %3290 = vadd.xlane.f32.xlu1 %v3289_v43  ;;  %v3286_v21 = vsel %vm586_vm0, %v5322_v37, 0.0  ;;  %4557 = vmatprep.subr.bf16.mxu1 %v4556_v31 }
 0x918   : > { %v5330_v47 = vadd.f32 %v3979_v44, %v3256_v41  ;;  %3287 = vadd.xlane.f32.xlu0 %v3286_v21  ;;  %4559 = vmatpush3.bf16.msra.mxu1 %v4556_v31 }
 0x919   : > { %v5332_v50 = vadd.f32 %v3979_v44, %v3255_v28 }
 0x91a   : > { %v3295_v29 = vsel %vm586_vm0, %v5330_v47, 0.0 }
 0x91b   : > { %3296 = vadd.xlane.f32.xlu1 %v3295_v29  ;;  %v3292_v38 = vsel %vm586_vm0, %v5332_v50, 0.0 }
 0x91c   : > { %3293 = vadd.xlane.f32.xlu0 %v3292_v38 }
 0x99c   : > { %v3279_v53 = vpop.xlane.xlu1 %3278 }
 0x99d   : > { %v3299_v54 = vmul.f32 0.0625, %v3279_v53  ;;  %v3276_v55 = vpop.xlane.xlu0 %3275 }
 0x99e   : > { %v3298_v56 = vmul.f32 0.0625, %v3276_v55 }
 0x99f   : > { %v5339_v57 = vsub.f32 %v5300_v13, %v3299_v54 }
 0x9a0   : > { %v5342_v60 = vsub.f32 %v5302_v9, %v3298_v56  ;;  %v3285_v58 = vpop.xlane.xlu1 %3284 }
 0x9a1   : > { %v3301_v49 = vmul.f32 0.0625, %v3285_v58  ;;  %v3282_v61 = vpop.xlane.xlu0 %3281  ;;  %v3315_v62 = vmul.f32 %v5339_v57, %v5339_v57 }
 0x9a2   : > { %v3300_v8 = vmul.f32 0.0625, %v3282_v61  ;;  %v3314_v63 = vmul.f32 %v5342_v60, %v5342_v60 }
 0x9a3   : > { %v5349_v0 = vsub.f32 %v5310_v23, %v3301_v49  ;;  %v3325_v1 = vsel %vm586_vm0, %v3315_v62, 0.0 }
 0x9a4   : > { %v5353_v15 = vsub.f32 %v5312_v24, %v3300_v8  ;;  %v3291_v3 = vpop.xlane.xlu1 %3290  ;;  %3326 = vadd.xlane.f32.xlu1 %v3325_v1  ;;  %v3322_v5 = vsel %vm586_vm0, %v3314_v63, 0.0 }
 0x9a5   : > { %v3303_v51 = vmul.f32 0.0625, %v3291_v3  ;;  %v3288_v39 = vpop.xlane.xlu0 %3287  ;;  %3323 = vadd.xlane.f32.xlu0 %v3322_v5  ;;  %v3317_v4 = vmul.f32 %v5349_v0, %v5349_v0  ;;  %v3980_v3 = vld [vmem:[%s5529_s11] ss:$0 sm:$0xff] }
 0x9a6   : > { %v3302_v6 = vmul.f32 0.0625, %v3288_v39  ;;  %v3316_v7 = vmul.f32 %v5353_v15, %v5353_v15 }
 0x9a7   : > { %v5361_v59 = vsub.f32 %v5320_v35, %v3303_v51  ;;  %v3331_v52 = vsel %vm586_vm0, %v3317_v4, 0.0 }
 0x9a8   : > { %v5365_v44 = vsub.f32 %v5322_v37, %v3302_v6  ;;  %3332 = vadd.xlane.f32.xlu1 %v3331_v52  ;;  %v3297_v48 = vpop.xlane.xlu1 %3296  ;;  %v3328_v36 = vsel %vm586_vm0, %v3316_v7, 0.0  ;;  %v3981_v6 = vld [vmem:[%s5530_s12] ss:$0 sm:$0xff] }
 0x9a9   : > { %v3305_v10 = vmul.f32 0.0625, %v3297_v48  ;;  %3329 = vadd.xlane.f32.xlu0 %v3328_v36  ;;  %v3294_v11 = vpop.xlane.xlu0 %3293  ;;  %v3319_v12 = vmul.f32 %v5361_v59, %v5361_v59 }
 0x9aa   : > { %v3304_v2 = vmul.f32 0.0625, %v3294_v11  ;;  %v3318_v14 = vmul.f32 %v5365_v44, %v5365_v44 }
 0x9ab   : > { %v5373_v16 = vsub.f32 %v5330_v47, %v3305_v10  ;;  %v3337_v46 = vsel %vm586_vm0, %v3319_v12, 0.0 }
 0x9ac   : > { %v5377_v17 = vsub.f32 %v5332_v50, %v3304_v2  ;;  %3338 = vadd.xlane.f32.xlu1 %v3337_v46  ;;  %v3334_v18 = vsel %vm586_vm0, %v3318_v14, 0.0 }
 0x9ad   : > { %3335 = vadd.xlane.f32.xlu0 %v3334_v18  ;;  %v3321_v19 = vmul.f32 %v5373_v16, %v5373_v16 }
 0x9ae   : > { %v3320_v22 = vmul.f32 %v5377_v17, %v5377_v17 }
 0x9af   : > { %v3343_v25 = vsel %vm586_vm0, %v3321_v19, 0.0 }
 0x9b0   : > { %3344 = vadd.xlane.f32.xlu1 %v3343_v25  ;;  %v3340_v26 = vsel %vm586_vm0, %v3320_v22, 0.0 }
 0x9b1   : > { %3341 = vadd.xlane.f32.xlu0 %v3340_v26 }
 0xa31   : > { %v3327_v32 = vpop.xlane.xlu1 %3326 }
 0xa32   : > { %v3347_v33 = vmul.f32 0.0625, %v3327_v32  ;;  %v3324_v34 = vpop.xlane.xlu0 %3323 }
 0xa33   : > { %v3346_v40 = vmul.f32 0.0625, %v3324_v34 }
 0xa34   : > { %v3355_v20 = vadd.f32 1e-05, %v3347_v33 }
 0xa35   : > { %v3354_v41 = vadd.f32 1e-05, %v3346_v40  ;;  %v3333_v42 = vpop.xlane.xlu1 %3332 }
 0xa36   : > { %4672 = vrsqrt.f32 %v3355_v20  ;;  %v3349_v43 = vmul.f32 0.0625, %v3333_v42  ;;  %v3330_v45 = vpop.xlane.xlu0 %3329  ;;  %v3619_v42 = vld [vmem:[%s5533_s15 + $0x18] sm:$0xff] }
 0xa37   : > { %4674 = vrsqrt.f32 %v3354_v41  ;;  %v3348_v28 = vmul.f32 0.0625, %v3330_v45  ;;  %v3618_v41 = vld [vmem:[%s5533_s15 + $0x10] sm:$0xff]  ;;  %v3620_v45 = vld [vmem:[%s5533_s15 + $0x20] sm:$0xff] }
 0xa38   : > { %v3357_v21 = vadd.f32 1e-05, %v3349_v43  ;;  %v4564_v43 = vpack.c.bf16 %v3619_v42, %v3618_v41 }
 0xa39   : > { %v3356_v29 = vadd.f32 1e-05, %v3348_v28  ;;  %v3339_v38 = vpop.xlane.xlu1 %3338  ;;  %v3621_v28 = vld [vmem:[%s5533_s15 + $0x28] sm:$0xff] }
 0xa3a   : > { %4676 = vrsqrt.f32 %v3357_v21  ;;  %v3351_v53 = vmul.f32 0.0625, %v3339_v38  ;;  %v3336_v54 = vpop.xlane.xlu0 %3335  ;;  %v4568_v21 = vpack.c.bf16 %v3621_v28, %v3620_v45  ;;  %v3623_v38 = vld [vmem:[%s5533_s15 + $0x38] sm:$0xff] }
 0xa3b   : > { %4678 = vrsqrt.f32 %v3356_v29  ;;  %v3350_v55 = vmul.f32 0.0625, %v3336_v54  ;;  %v3622_v29 = vld [vmem:[%s5533_s15 + $0x30] sm:$0xff]  ;;  %v3982_v54 = vld [vmem:[%s5532_s14] ss:$0 sm:$0xff] }
 0xa3c   : > { %v3359_v56 = vadd.f32 1e-05, %v3351_v53  ;;  %v4572_v53 = vpack.c.bf16 %v3623_v38, %v3622_v29 }
 0xa3d   : > { %v3358_v58 = vadd.f32 1e-05, %v3350_v55  ;;  %v3345_v49 = vpop.xlane.xlu1 %3344 }
 0xa3e   : > { %4680 = vrsqrt.f32 %v3359_v56  ;;  %v3353_v61 = vmul.f32 0.0625, %v3345_v49  ;;  %v3342_v62 = vpop.xlane.xlu0 %3341 }
 0xa3f   : > { %4682 = vrsqrt.f32 %v3358_v58  ;;  %v3352_v8 = vmul.f32 0.0625, %v3342_v62 }
 0xa40   : > { %v4673_v63 = vpop.eup %4672  ;;  %v3361_v1 = vadd.f32 1e-05, %v3353_v61 }
 0xa41   : > { %v4675_v5 = vpop.eup %4674  ;;  %v3371_v51 = vmul.f32 %v4673_v63, %v5339_v57  ;;  %v3360_v39 = vadd.f32 1e-05, %v3352_v8 }
 0xa42   : > { %4684 = vrsqrt.f32 %v3361_v1  ;;  %v3370_v4 = vmul.f32 %v4675_v5, %v5342_v60 }
 0xa43   : > { %4686 = vrsqrt.f32 %v3360_v39  ;;  %v3385_v7 = vmul.f32 %v3980_v3, %v3371_v51 }
 0xa44   : > { %v4677_v52 = vpop.eup %4676  ;;  %v3384_v48 = vmul.f32 %v3980_v3, %v3370_v4 }
 0xa45   : > { %v4679_v36 = vpop.eup %4678  ;;  %v3373_v10 = vmul.f32 %v4677_v52, %v5349_v0  ;;  %v3399_v2 = vadd.f32 %v3981_v6, %v3385_v7 }
 0xa46   : > { %v3398_v11 = vadd.f32 %v3981_v6, %v3384_v48  ;;  %v3372_v12 = vmul.f32 %v4679_v36, %v5353_v15 }
 0xa47   : > { %v3387_v57 = vmul.f32 %v3980_v3, %v3373_v10 }
 0xa48   : > { %v4681_v14 = vpop.eup %4680  ;;  %4412 = vmatprep.mubr.msk.f32.mxu1 %vm586_vm0, %v3398_v11  ;;  %v3386_v60 = vmul.f32 %v3980_v3, %v3372_v12 }
 0xa49   : > { %v4683_v46 = vpop.eup %4682  ;;  %4413 = vmatmul.mubr.msk.f32.vlgmr.msra.gmra.mrb[36].mxu1 %vm586_vm0, %v3399_v2  ;;  %v3375_v18 = vmul.f32 %v4681_v14, %v5361_v59  ;;  %v3401_v25 = vadd.f32 %v3981_v6, %v3387_v57 }
 0xa4a   : > { %v3400_v19 = vadd.f32 %v3981_v6, %v3386_v60  ;;  %v3374_v22 = vmul.f32 %v4683_v46, %v5365_v44 }
 0xa4b   : > { %v3389_v26 = vmul.f32 %v3980_v3, %v3375_v18 }
 0xa4c   : > { %v4685_v0 = vpop.eup %4684  ;;  %4415 = vmatprep.mubr.msk.f32.mxu1 %vm586_vm0, %v3400_v19  ;;  %v3388_v15 = vmul.f32 %v3980_v3, %v3374_v22 }
 0xa4d   : > { %v4687_v27 = vpop.eup %4686  ;;  %4416 = vmatmul.mubr.msk.f32.gmra.mrb[38].mxu1 %vm586_vm0, %v3401_v25  ;;  %v3377_v30 = vmul.f32 %v4685_v0, %v5373_v16  ;;  %v3403_v33 = vadd.f32 %v3981_v6, %v3389_v26  ;;  %v3616_v16 = vld [vmem:[%s5533_s15] sm:$0xff] }
 0xa4e   : > { %v3402_v31 = vadd.f32 %v3981_v6, %v3388_v15  ;;  %v3376_v32 = vmul.f32 %v4687_v27, %v5377_v17  ;;  %v3617_v17 = vld [vmem:[%s5533_s15 + $0x8] sm:$0xff] }
 0xa4f   : > { %v3391_v34 = vmul.f32 %v3980_v3, %v3377_v30  ;;  %v4560_v20 = vpack.c.bf16 %v3617_v17, %v3616_v16 }
 0xa50   : > { %4418 = vmatprep.mubr.msk.f32.mxu1 %vm586_vm0, %v3402_v31  ;;  %v3390_v59 = vmul.f32 %v3980_v3, %v3376_v32 }
 0xa51   : > { %4419 = vmatmul.mubr.msk.f32.gmra.mrb[40].mxu1 %vm586_vm0, %v3403_v33  ;;  %v3405_v40 = vadd.f32 %v3981_v6, %v3391_v34  ;;  %4561 = vmatprep.subr.bf16.mxu1 %v4560_v20 }
 0xa52   : > { %v3404_v44 = vadd.f32 %v3981_v6, %v3390_v59  ;;  %4563 = vmatpush3.bf16.msra.mxu1 %v4560_v20 }
 0xa53   : > { %4565 = vmatprep.subr.bf16.mxu1 %v4564_v43 }
 0xa54   : > { %4421 = vmatprep.mubr.msk.f32.mxu1 %vm586_vm0, %v3404_v44 }
 0xa55   : > { %4422 = vmatmul.mubr.msk.f32.gmra.mrb[42].mxu1 %vm586_vm0, %v3405_v40 }
 0xa56   : > { %4567 = vmatpush3.bf16.msra.mxu1 %v4564_v43 }
 0xa57   : > { %4569 = vmatprep.subr.bf16.mxu1 %v4568_v21 }
 0xa5a   : > { %4571 = vmatpush3.bf16.msra.mxu1 %v4568_v21 }
 0xa5b   : > { %4573 = vmatprep.subr.bf16.mxu1 %v4572_v53 }
 0xa5e   : > { %4575 = vmatpush3.bf16.msra.mxu1 %v4572_v53 }
 0xb1c   : > { %v4414_v55 = vpop.f32.mrb[36].mxu1 }
 0xb1d   : > { %v5441_v56 = vadd.f32 %v4414_v55, %v3982_v54  ;;  %v3505_v58 = vpop.f32.mrb[37].mxu1 }
 0xb1e   : > { %v3506_v49 = vadd.f32 %v3982_v54, %v3505_v58 }
 0xb1f   : > { %v3553_v61 = vmul.f32 0.044715, %v5441_v56 }
 0xb20   : > { %v3552_v62 = vmul.f32 0.044715, %v3506_v49  ;;  %v4417_v8 = vpop.f32.mrb[38].mxu1 }
 0xb21   : > { %v3561_v63 = vmul.f32 %v3553_v61, %v5441_v56  ;;  %v5445_v1 = vadd.f32 %v4417_v8, %v3982_v54  ;;  %v3515_v3 = vpop.f32.mrb[39].mxu1 }
 0xb22   : > { %v3560_v5 = vmul.f32 %v3552_v62, %v3506_v49  ;;  %v5447_v51 = vadd.f32 %v3982_v54, %v3515_v3  ;;  %v3544_v62 = vmul.f32 0.5, %v3506_v49 }
 0xb23   : > { %v3569_v39 = vmul.f32 %v3561_v63, %v5441_v56  ;;  %v3555_v4 = vmul.f32 0.044715, %v5445_v1  ;;  %v3545_v63 = vmul.f32 0.5, %v5441_v56 }
 0xb24   : > { %v3568_v6 = vmul.f32 %v3560_v5, %v3506_v49  ;;  %v3554_v7 = vmul.f32 0.044715, %v5447_v51  ;;  %v4420_v52 = vpop.f32.mrb[40].mxu1 }
 0xb25   : > { %v3577_v48 = vadd.f32 %v3569_v39, %v5441_v56  ;;  %v3563_v36 = vmul.f32 %v3555_v4, %v5445_v1  ;;  %v5454_v10 = vadd.f32 %v4420_v52, %v3982_v54  ;;  %v3525_v11 = vpop.f32.mrb[41].mxu1 }
 0xb26   : > { %v3576_v12 = vadd.f32 %v3568_v6, %v3506_v49  ;;  %v3562_v2 = vmul.f32 %v3554_v7, %v5447_v51  ;;  %v5457_v57 = vadd.f32 %v3982_v54, %v3525_v11  ;;  %v3546_v7 = vmul.f32 0.5, %v5447_v51 }
 0xb27   : > { %v3585_v14 = vmul.f32 0.7978846, %v3577_v48  ;;  %v3571_v60 = vmul.f32 %v3563_v36, %v5445_v1  ;;  %v3557_v46 = vmul.f32 0.044715, %v5454_v10  ;;  %v3547_v49 = vmul.f32 0.5, %v5445_v1 }
 0xb28   : > { %v3570_v18 = vmul.f32 %v3562_v2, %v5447_v51  ;;  %v3556_v19 = vmul.f32 0.044715, %v5457_v57  ;;  %v4423_v22 = vpop.f32.mrb[42].mxu1  ;;  %v3584_v25 = vmul.f32 0.7978846, %v3576_v12  ;;  %v3548_v2 = vmul.f32 0.5, %v5457_v57 }
 0xb29   : > { %4688 = vtanh.f32 %v3585_v14  ;;  %v3579_v26 = vadd.f32 %v3571_v60, %v5445_v1  ;;  %v3565_v0 = vmul.f32 %v3557_v46, %v5454_v10  ;;  %v5465_v15 = vadd.f32 %v4423_v22, %v3982_v54  ;;  %v3535_v27 = vpop.f32.mrb[43].mxu1 }
 0xb2a   : > { %v3578_v30 = vadd.f32 %v3570_v18, %v5447_v51  ;;  %v3564_v31 = vmul.f32 %v3556_v19, %v5457_v57  ;;  %v3536_v32 = vadd.f32 %v3982_v54, %v3535_v27  ;;  %4690 = vtanh.f32 %v3584_v25 }
 0xb2b   : > { %v3573_v33 = vmul.f32 %v3565_v0, %v5454_v10  ;;  %v3559_v34 = vmul.f32 0.044715, %v5465_v15  ;;  %v3587_v59 = vmul.f32 0.7978846, %v3579_v26  ;;  %v3549_v60 = vmul.f32 0.5, %v5454_v10 }
 0xb2c   : > { %v3572_v44 = vmul.f32 %v3564_v31, %v5457_v57  ;;  %v3558_v40 = vmul.f32 0.044715, %v3536_v32  ;;  %v3586_v16 = vmul.f32 0.7978846, %v3578_v30  ;;  %v3550_v22 = vmul.f32 0.5, %v3536_v32 }
 0xb2d   : > { %v3581_v17 = vadd.f32 %v3573_v33, %v5454_v10  ;;  %v3567_v20 = vmul.f32 %v3559_v34, %v5465_v15  ;;  %4692 = vtanh.f32 %v3587_v59  ;;  %v3551_v26 = vmul.f32 0.5, %v5465_v15  ;;  %v3991_v10 = vld [vmem:[%s5534_s16] ss:$0 sm:$0xff] }
 0xb2e   : > { %v3580_v41 = vadd.f32 %v3572_v44, %v5457_v57  ;;  %v3566_v42 = vmul.f32 %v3558_v40, %v3536_v32  ;;  %4694 = vtanh.f32 %v3586_v16 }
 0xb2f   : > { %v3575_v43 = vmul.f32 %v3567_v20, %v5465_v15  ;;  %v3589_v45 = vmul.f32 0.7978846, %v3581_v17 }
 0xb30   : > { %v3574_v28 = vmul.f32 %v3566_v42, %v3536_v32  ;;  %v3588_v21 = vmul.f32 0.7978846, %v3580_v41 }
 0xb31   : > { %v3583_v29 = vadd.f32 %v3575_v43, %v5465_v15  ;;  %4696 = vtanh.f32 %v3589_v45 }
 0xb32   : > { %v3582_v38 = vadd.f32 %v3574_v28, %v3536_v32  ;;  %4698 = vtanh.f32 %v3588_v21 }
 0xb33   : > { %v4689_v53 = vpop.eup %4688  ;;  %v3591_v54 = vmul.f32 0.7978846, %v3583_v29 }
 0xb34   : > { %v4691_v55 = vpop.eup %4690  ;;  %v3601_v58 = vadd.f32 1.0, %v4689_v53  ;;  %v3590_v61 = vmul.f32 0.7978846, %v3582_v38 }
 0xb35   : > { %v3600_v8 = vadd.f32 1.0, %v4691_v55  ;;  %4700 = vtanh.f32 %v3591_v54 }
 0xb36   : > { %4702 = vtanh.f32 %v3590_v61  ;;  %v3609_v4 = vmul.f32 %v3601_v58, %v3545_v63 }
 0xb37   : > { %v4693_v3 = vpop.eup %4692  ;;  %v3608_v5 = vmul.f32 %v3600_v8, %v3544_v62 }
 0xb38   : > { %v4695_v39 = vpop.eup %4694  ;;  %v3603_v6 = vadd.f32 1.0, %v4693_v3 }
 0xb39   : > { %4440 = vmatprep.mubr.msk.f32.mxu1 %vm3631_vm3, %v3608_v5  ;;  %v3602_v52 = vadd.f32 1.0, %v4695_v39 }
 0xb3a   : > { %4441 = vmatmul.mubr.msk.f32.vlgmr.msra.gmra.mrb[44].mxu1 %vm3631_vm3, %v3609_v4  ;;  %v3611_v56 = vmul.f32 %v3603_v6, %v3547_v49 }
 0xb3b   : > { %v4697_v48 = vpop.eup %4696  ;;  %v3610_v36 = vmul.f32 %v3602_v52, %v3546_v7 }
 0xb3c   : > { %v4699_v11 = vpop.eup %4698  ;;  %v3605_v12 = vadd.f32 1.0, %v4697_v48 }
 0xb3d   : > { %4443 = vmatprep.mubr.msk.f32.mxu1 %vm3631_vm3, %v3610_v36  ;;  %v3604_v14 = vadd.f32 1.0, %v4699_v11 }
 0xb3e   : > { %4444 = vmatmul.mubr.msk.f32.gmra.mrb[46].mxu1 %vm3631_vm3, %v3611_v56  ;;  %v3613_v19 = vmul.f32 %v3605_v12, %v3549_v60 }
 0xb3f   : > { %v4701_v51 = vpop.eup %4700  ;;  %v3612_v46 = vmul.f32 %v3604_v14, %v3548_v2 }
 0xb40   : > { %v4703_v18 = vpop.eup %4702  ;;  %v3607_v1 = vadd.f32 1.0, %v4701_v51 }
 0xb41   : > { %4446 = vmatprep.mubr.msk.f32.mxu1 %vm3631_vm3, %v3612_v46  ;;  %v3606_v25 = vadd.f32 1.0, %v4703_v18 }
 0xb42   : > { %4447 = vmatmul.mubr.msk.f32.gmra.mrb[48].mxu1 %vm3631_vm3, %v3613_v19  ;;  %v3615_v0 = vmul.f32 %v3607_v1, %v3551_v26 }
 0xb43   : > { %v3614_v57 = vmul.f32 %v3606_v25, %v3550_v22 }
 0xb45   : > { %4449 = vmatprep.mubr.msk.f32.mxu1 %vm3631_vm3, %v3614_v57 }
 0xb46   : > { %4450 = vmatmul.mubr.msk.f32.gmra.mrb[50].mxu1 %vm3631_vm3, %v3615_v0 }
 0xc0d   : > { %v4442_v27 = vpop.f32.mrb[44].mxu1 }
 0xc0e   : > { %v3728_v30 = vadd.f32 %v4442_v27, %v3991_v10  ;;  %v3722_v31 = vpop.f32.mrb[45].mxu1 }
 0xc0f   : > { %v3723_v32 = vadd.f32 %v3991_v10, %v3722_v31 }
 0xc10   : > { %v3762_v15 = vadd.f32 %v3728_v30, %v5300_v13 }
 0xc11   : > { %v3761_v33 = vadd.f32 %v3723_v32, %v5302_v9  ;;  %v4445_v34 = vpop.f32.mrb[46].mxu1 }
 0xc12   : > { %3770 = vst.msk [vmem:[%s575_s30 + $0x8] sm:$0xff] %vm586_vm0, %v3762_v15  ;;  %v3738_v59 = vadd.f32 %v4445_v34, %v3991_v10  ;;  %v3732_v44 = vpop.f32.mrb[47].mxu1 }
 0xc13   : > { %3769 = vst.msk [vmem:[%s575_s30] sm:$0xff] %vm586_vm0, %v3761_v33  ;;  %v3733_v40 = vadd.f32 %v3991_v10, %v3732_v44 }
 0xc14   : > { %v3764_v16 = vadd.f32 %v3738_v59, %v5310_v23 }
 0xc15   : > { %v3763_v17 = vadd.f32 %v3733_v40, %v5312_v24  ;;  %v4448_v20 = vpop.f32.mrb[48].mxu1 }
 0xc16   : > { %3772 = vst.msk [vmem:[%s575_s30 + $0x18] sm:$0xff] %vm586_vm0, %v3764_v16  ;;  %v3748_v41 = vadd.f32 %v4448_v20, %v3991_v10  ;;  %v3742_v42 = vpop.f32.mrb[49].mxu1 }
 0xc17   : > { %3771 = vst.msk [vmem:[%s575_s30 + $0x10] sm:$0xff] %vm586_vm0, %v3763_v17  ;;  %v3743_v13 = vadd.f32 %v3991_v10, %v3742_v42 }
 0xc18   : > { %v3766_v9 = vadd.f32 %v3748_v41, %v5320_v35 }
 0xc19   : > { %v3765_v43 = vadd.f32 %v3743_v13, %v5322_v37  ;;  %v4451_v45 = vpop.f32.mrb[50].mxu1 }
 0xc1a   : > { %3774 = vst.msk [vmem:[%s575_s30 + $0x28] sm:$0xff] %vm586_vm0, %v3766_v9  ;;  %v3758_v28 = vadd.f32 %v4451_v45, %v3991_v10  ;;  %v3752_v21 = vpop.f32.mrb[51].mxu1 }
 0xc1b   : > { %3773 = vst.msk [vmem:[%s575_s30 + $0x20] sm:$0xff] %vm586_vm0, %v3765_v43  ;;  %v3753_v23 = vadd.f32 %v3991_v10, %v3752_v21 }
 0xc1c   : > { %v3768_v24 = vadd.f32 %v3758_v28, %v5330_v47 }
 0xc1d   : > { %v3767_v29 = vadd.f32 %v3753_v23, %v5332_v50 }
 0xc1e   : > { %3776 = vst.msk [vmem:[%s575_s30 + $0x38] sm:$0xff] %vm586_vm0, %v3768_v24 }
 0xc1f   : > { %3775 = vst.msk [vmem:[%s575_s30 + $0x30] sm:$0xff] %vm586_vm0, %v3767_v29 }
 0xc20 PF: > { %s28_s27 = sadd.s32 1, %s4718_s27  }
 0xc21   : > { %p25_p4 = scmp.ge.s32.totalorder %s28_s27, 4  }
 0xc23   :  { %27 = sbr.rel (!%p25_p4) target bundleno = 4 (0x4), region = 130 }

// kernel: forward.11
= control target key start
LH: loop header
LB: loop body
LE: loop exit
PB: predicated region body
PF: predicated region fallthrough
CT: control target
= control target key end

     0   :  { %s3993_s27 = smov 0   ;;  %s4466_s0 = inlined_call_operand.vmem [shape: f32[2,16,32], index: 0, kind: input, shape index: {}]   ;;  %s4467_s1 = inlined_call_operand.vmem [shape: f32[1,32], index: 1, kind: input, shape index: {}, may-alias: {1,11}]   ;;  %s4468_s2 = inlined_call_operand.vmem [shape: f32[1,32], index: 2, kind: input, shape index: {}, may-alias: {2,10,12,16}]   ;;  %s4469_s3 = inlined_call_operand.vmem [shape: f32[4,32,8], index: 3, kind: input, shape index: {}]   ;;  %s4470_s4 = inlined_call_operand.vmem [shape: f32[4,32,8], index: 4, kind: input, shape index: {}]   ;;  %s4471_s5 = inlined_call_operand.vmem [shape: f32[4,32,8], index: 5, kind: input, shape index: {}]   ;;  %s4472_s6 = inlined_call_operand.vmem [shape: f32[4,1,8], index: 6, kind: input, shape index: {}, may-alias: {6,7,8}]   ;;  %s4473_s7 = inlined_call_operand.vmem [shape: f32[4,1,8], index: 7, kind: input, shape index: {}, may-alias: {6,7,8}]   ;;  %s4474_s8 = inlined_call_operand.vmem [shape: f32[4,1,8], index: 8, kind: input, shape index: {}, may-alias: {6,7,8}]   ;;  %s4475_s9 = inlined_call_operand.vmem [shape: f32[4,8,32], index: 9, kind: input, shape index: {}]   ;;  %s4476_s10 = inlined_call_operand.vmem [shape: f32[1,32], index: 10, kind: input, shape index: {}, may-alias: {2,10,12,16}]   ;;  %s4477_s11 = inlined_call_operand.vmem [shape: f32[1,32], index: 11, kind: input, shape index: {}, may-alias: {1,11}]   ;;  %s4478_s12 = inlined_call_operand.vmem [shape: f32[1,32], index: 12, kind: input, shape index: {}, may-alias: {2,10,12,16}]   ;;  %s4479_s13 = inlined_call_operand.vmem [shape: f32[32,128], index: 13, kind: input, shape index: {}]   ;;  %s4480_s14 = inlined_call_operand.vmem [shape: f32[1,128], index: 14, kind: input, shape index: {}]   ;;  %s4481_s15 = inlined_call_operand.vmem [shape: f32[128,32], index: 15, kind: input, shape index: {}]   ;;  %s4482_s16 = inlined_call_operand.vmem [shape: f32[1,32], index: 16, kind: input, shape index: {}, may-alias: {2,10,12,16}]   ;;  %s4483_s17 = inlined_call_operand.vmem [shape: f32[4,1,16,16], index: 17, kind: input, shape index: {}]   ;;  %s4484_s18 = inlined_call_operand.vmem [shape: f32[2,16,32], index: 18, kind: output, shape index: {}]  }
   0x1   :  { %4485 = sst [smem:[#allocation2_spill]] %s4466_s0 }
   0x2   :  { %4486 = sst [smem:[#allocation3_spill]] %s4467_s1 }
   0x3   :  { %4487 = sst [smem:[#allocation4_spill]] %s4468_s2 }
   0x4 LB: > { %s3118_s28 = sadd.s32 4294967295, %s3896_s27   ;;  %p3122_p0 = scmp.ge.s32.totalorder %s3896_s27, 1  ;;  %s3896_s27 = sphi %s3993_s27, %s28_s27  }
   0x5   : > { %p512_p1 = scmp.lt.s32.totalorder %s3896_s27, 3 }
   0x7   : > { %p513_p2 = pnand %p3122_p0, %p512_p1 }
   0x8   : > { %p566_p3 = scmp.lt.s32.totalorder (!%p513_p2), %s3118_s28, 1  ;;  %vm580_vm0 = vcmask (!%p513_p2), 261120   ;;  %s4488_s19 = sld [smem:[#allocation2_spill]] (!%p513_p2)  ;;  %v624_v14 = vld [vmem:[%s4469_s3] sm:$0xff] (!%p513_p2)  ;;  %v625_v15 = vld [vmem:[%s4469_s3 + $0x8] sm:$0xff] (!%p513_p2)  ;;  %v626_v17 = vld [vmem:[%s4469_s3 + $0x10] sm:$0xff] (!%p513_p2) }
   0x9   : > { %516 = sbr.rel (%p513_p2) target bundleno = 5029 (0x13a5), region = 92  ;;  %v3656_v16 = vpack.c.bf16 (!%p513_p2), %v625_v15, %v624_v14  ;;  %v627_v18 = vld [vmem:[%s4469_s3 + $0x18] sm:$0xff] (!%p513_p2)  ;;  %v718_v20 = vld [vmem:[%s4470_s4] sm:$0xff] (!%p513_p2)  ;;  %v719_v21 = vld [vmem:[%s4470_s4 + $0x8] sm:$0xff] (!%p513_p2)  ;;  %s4489_s22 = sld [smem:[#allocation3_spill]] (!%p513_p2)  ;;  %vm892_vm1 = vcmask (!%p513_p2), 64512  }
   0xa   : > { %v3660_v19 = vpack.c.bf16 (!%p513_p2), %v627_v18, %v626_v17  ;;  %v3664_v22 = vpack.c.bf16 (!%p513_p2), %v719_v21, %v718_v20  ;;  %s4490_s24 = sld [smem:[#allocation4_spill]] (!%p513_p2)  ;;  %v720_v37 = vld [vmem:[%s4470_s4 + $0x10] sm:$0xff] (!%p513_p2)  ;;  %v721_v38 = vld [vmem:[%s4470_s4 + $0x18] sm:$0xff] (!%p513_p2)  ;;  %v804_v42 = vld [vmem:[%s4471_s5] sm:$0xff] (!%p513_p2)  ;;  %vm980_vm3 = vcmask (!%p513_p2), 130048  }
   0xb   : > { %3657 = vmatprep.subr.bf16.mxu1 (!%p513_p2), %v3656_v16  ;;  %v3668_v41 = vpack.c.bf16 (!%p513_p2), %v721_v38, %v720_v37  ;;  %v805_v43 = vld [vmem:[%s4471_s5 + $0x8] sm:$0xff] (!%p513_p2)  ;;  %v806_v45 = vld [vmem:[%s4471_s5 + $0x10] sm:$0xff] (!%p513_p2)  ;;  %v807_v46 = vld [vmem:[%s4471_s5 + $0x18] sm:$0xff] (!%p513_p2) }
   0xc   : > { %3659 = vmatpush3.bf16.msra.mxu1 (!%p513_p2), %v3656_v16  ;;  %v3672_v44 = vpack.c.bf16 (!%p513_p2), %v805_v43, %v804_v42  ;;  %v3676_v47 = vpack.c.bf16 (!%p513_p2), %v807_v46, %v806_v45  ;;  %v3129_v48 = vld [vmem:[%s4472_s6] ss:$0 sm:$0xff] (!%p513_p2)  ;;  %v3145_v58 = vld [vmem:[%s4469_s3 + $0x28] sm:$0xff] (!%p513_p2)  ;;  %vm4094_vm2 = vmpackc.low (!%p513_p2), %vm892_vm1, %vm892_vm1 }
   0xd   : > { %3661 = vmatprep.subr.bf16.mxu1 (!%p513_p2), %v3660_v19  ;;  %v3132_v53 = vld [vmem:[%s4473_s7] ss:$0 sm:$0xff] (!%p513_p2)  ;;  %v3162_v15 = vld [vmem:[%s4471_s5 + $0x30] sm:$0xff] (!%p513_p2)  ;;  %v3163_v16 = vld [vmem:[%s4471_s5 + $0x38] sm:$0xff] (!%p513_p2) }
   0xe   : > { %v3144_v57 = vld [vmem:[%s4469_s3 + $0x20] sm:$0xff] (!%p513_p2)  ;;  %v3710_v17 = vpack.c.bf16 (!%p513_p2), %v3163_v16, %v3162_v15  ;;  %v891_v18 = vld [vmem:[%s4483_s17 + $0x8] sm:$0xff] (!%p513_p2) }
   0xf   : > { %v3127_v30 = vld [vmem:[%s4489_s22] ss:$0 sm:$0xff] (!%p513_p2)  ;;  %v3690_v62 = vpack.c.bf16 (!%p513_p2), %v3145_v58, %v3144_v57 }
  0x10   : > { %s4494_s28 = smov (!%p566_p3, %s3118_s28), 1  ;;  %3663 = vmatpush3.bf16.msra.mxu1 %v3660_v19  ;;  %v3128_v32 = vld [vmem:[%s4490_s24] ss:$0 sm:$0xff] }
  0x11   : > { %s3260_s29 = sshll.u32 %s4494_s28, 4  ;;  %3665 = vmatprep.subr.bf16.mxu1 %v3664_v22  ;;  %v3135_v63 = vld [vmem:[%s4474_s8] ss:$0 sm:$0xff] }
  0x12   : > { %s570_s1 = scalar_lea.vmem %s4488_s19, %s3260_s29  ;;  %v890_v19 = vld [vmem:[%s4483_s17] sm:$0xff]  ;;  %s575_s19 = scalar_lea.vmem %s4484_s18, %s3260_s29 }
  0x13   : > { %v4009_v0 = vld [vmem:[%s570_s1] sm:$0xff]  ;;  %v4011_v1 = vld [vmem:[%s570_s1 + $0x8] sm:$0xff] }
  0x14   : > { %v581_v2 = vsel %vm580_vm0, %v4009_v0, 0.0  ;;  %v584_v3 = vsel %vm580_vm0, %v4011_v1, 0.0 }
  0x15   : > { %582 = vadd.xlane.f32.xlu0 %v581_v2 }
  0x19   : > { %585 = vadd.xlane.f32.xlu0 %v584_v3 }
  0xa2   : > { %v583_v4 = vpop.xlane.xlu0 %582 }
  0xa3   : > { %v588_v5 = vmul.f32 0.03125, %v583_v4 }
  0xa5   : > { %v590_v6 = vsub.f32 %v4009_v0, %v588_v5 }
  0xa6   : > { %v586_v7 = vpop.xlane.xlu0 %585 }
  0xa7   : > { %v589_v8 = vmul.f32 0.03125, %v586_v7  ;;  %v592_v9 = vmul.f32 %v590_v6, %v590_v6  ;;  %v3147_v7 = vld [vmem:[%s4469_s3 + $0x38] sm:$0xff] }
  0xa9   : > { %v591_v10 = vsub.f32 %v4011_v1, %v589_v8  ;;  %v594_v11 = vsel %vm580_vm0, %v592_v9, 0.0 }
  0xaa   : > { %595 = vadd.xlane.f32.xlu1 %v594_v11 }
  0xab   : > { %v593_v12 = vmul.f32 %v591_v10, %v591_v10 }
  0xad   : > { %v597_v13 = vsel %vm580_vm0, %v593_v12, 0.0  ;;  %v3160_v12 = vld [vmem:[%s4471_s5 + $0x20] sm:$0xff] }
  0xae   : > { %598 = vadd.xlane.f32.xlu1 %v597_v13  ;;  %v3161_v13 = vld [vmem:[%s4471_s5 + $0x28] sm:$0xff] }
  0xaf   : > { %v3706_v14 = vpack.c.bf16 %v3161_v13, %v3160_v12 }
 0x137   : > { %v596_v23 = vpop.xlane.xlu1 %595 }
 0x138   : > { %v600_v24 = vmul.f32 0.03125, %v596_v23 }
 0x13a   : > { %v602_v25 = vadd.f32 1e-05, %v600_v24 }
 0x13b   : > { %v599_v26 = vpop.xlane.xlu1 %598 }
 0x13c   : > { %3846 = vrsqrt.f32 %v602_v25  ;;  %v601_v27 = vmul.f32 0.03125, %v599_v26  ;;  %v3149_v26 = vld [vmem:[%s4472_s6 + $0x1] ss:$0 sm:$0xff] }
 0x13e   : > { %v603_v28 = vadd.f32 1e-05, %v601_v27 }
 0x140   : > { %3848 = vrsqrt.f32 %v603_v28 }
 0x146   : > { %v3847_v29 = vpop.eup %3846 }
 0x147   : > { %v606_v31 = vmul.f32 %v3847_v29, %v590_v6  ;;  %v3146_v6 = vld [vmem:[%s4469_s3 + $0x30] sm:$0xff] }
 0x148   : > { %v3694_v11 = vpack.c.bf16 %v3147_v7, %v3146_v6 }
 0x149   : > { %v614_v33 = vmul.f32 %v3127_v30, %v606_v31 }
 0x14a   : > { %v3849_v34 = vpop.eup %3848 }
 0x14b   : > { %v4045_v35 = vadd.f32 %v3128_v32, %v614_v33  ;;  %v607_v36 = vmul.f32 %v3849_v34, %v591_v10 }
 0x14d   : > { %v615_v39 = vmul.f32 %v3127_v30, %v607_v36  ;;  %3410 = vmatprep.mubr.msk.f32.mxu1 %vm580_vm0, %v4045_v35  ;;  %v3165_v30 = vld [vmem:[%s4474_s8 + $0x1] ss:$0 sm:$0xff] }
 0x14f   : > { %v4055_v40 = vadd.f32 %v3128_v32, %v615_v39 }
 0x151   : > { %3411 = vmatmul.mubr.msk.f32.vlgmr.msra.gmra.mrb[0].mxu1 %vm580_vm0, %v4055_v40 }
 0x152   : > { %3667 = vmatpush3.bf16.msra.mxu1 %v3664_v22  ;;  %3421 = vmatprep.mubr.msk.f32.mxu1 %vm580_vm0, %v4045_v35 }
 0x153   : > { %3669 = vmatprep.subr.bf16.mxu1 %v3668_v41 }
 0x156   : > { %3671 = vmatpush3.bf16.msra.mxu1 %v3668_v41 }
 0x157   : > { %3673 = vmatprep.subr.bf16.mxu1 %v3672_v44 }
 0x159   : > { %3422 = vmatmul.mubr.msk.f32.vlgmr.msra.gmra.mrb[2].mxu1 %vm580_vm0, %v4055_v40 }
 0x15a   : > { %3675 = vmatpush3.bf16.msra.mxu1 %v3672_v44  ;;  %3432 = vmatprep.mubr.msk.f32.mxu1 %vm580_vm0, %v4045_v35 }
 0x15b   : > { %3677 = vmatprep.subr.bf16.mxu1 %v3676_v47 }
 0x15e   : > { %3679 = vmatpush3.bf16.msra.mxu1 %v3676_v47 }
 0x161   : > { %3433 = vmatmul.mubr.msk.f32.vlgmr.msra.gmra.mrb[4].mxu1 %vm580_vm0, %v4055_v40 }
 0x224   : > { %v3412_v49 = vpop.f32.mrb[0].mxu1 }
 0x225   : > { %v707_v50 = vpop.f32.mrb[1].mxu1  ;;  %v713_v2 = vadd.f32 %v3412_v49, %v3129_v48  ;;  %v3153_v49 = vld [vmem:[%s4470_s4 + $0x28] sm:$0xff] }
 0x226   : > { %v708_v51 = vadd.f32 %v3129_v48, %v707_v50  ;;  %v3152_v48 = vld [vmem:[%s4470_s4 + $0x20] sm:$0xff] }
 0x227   : > { %v717_v9 = vmul.f32 0.35355338, %v713_v2  ;;  %v3698_v50 = vpack.c.bf16 %v3153_v49, %v3152_v48  ;;  %v1084_v49 = vld [vmem:[%s4475_s9] sm:$0xff] }
 0x228   : > { %v716_v52 = vmul.f32 0.35355338, %v708_v51 }
 0x22a   : > { %3439 = vmatprep.mubr.msk.f32.mxu1 %vm892_vm1, %v716_v52 }
 0x22c   : > { %v3423_v54 = vpop.f32.mrb[2].mxu1 }
 0x22d   : > { %v801_v55 = vadd.f32 %v3423_v54, %v3132_v53  ;;  %v795_v56 = vpop.f32.mrb[3].mxu1  ;;  %v3154_v54 = vld [vmem:[%s4470_s4 + $0x30] sm:$0xff] }
 0x22e   : > { %v796_v59 = vadd.f32 %v3132_v53, %v795_v56 }
 0x230   : > { %v3680_v61 = vpack.c.bf16 %v801_v55, %v796_v59  ;;  %v3155_v55 = vld [vmem:[%s4470_s4 + $0x38] sm:$0xff] }
 0x231   : > { %v3702_v59 = vpack.c.bf16 %v3155_v55, %v3154_v54  ;;  %v3186_v55 = vld [vmem:[%s4472_s6 + $0x2] ss:$0 sm:$0xff] }
 0x232   : > { %3682 = vmatprep.subr.msk.bf16.mxu1 %vm4094_vm2, %v3680_v61 }
 0x233   : > { %3685 = vmatpush3.bf16.xpose.msk.msra.mxu1 %vm4094_vm2, %v3680_v61 }
 0x234   : > { %v3434_v3 = vpop.f32.mrb[4].mxu1  ;;  %3691 = vmatprep.subr.bf16.mxu1 %v3690_v62 }
 0x235   : > { %v887_v4 = vadd.f32 %v3434_v3, %v3135_v63  ;;  %v881_v5 = vpop.f32.mrb[5].mxu1  ;;  %v3157_v3 = vld [vmem:[%s4473_s7 + $0x1] ss:$0 sm:$0xff] }
 0x236   : > { %v882_v8 = vadd.f32 %v3135_v63, %v881_v5 }
 0x238   : > { %v3686_v10 = vpack.c.bf16 %v887_v4, %v882_v8 }
 0x23a   : > { %3440 = vmatmul.mubr.msk.f32.vlgmr.msra.gmra.mrb[6].mxu1 %vm892_vm1, %v717_v9  ;;  %3687 = vmatprep.subr.bf16.mxu0 %v3686_v10 }
 0x23b   : > { %3689 = vmatpush3.bf16.msra.mxu0 %v3686_v10  ;;  %3693 = vmatpush3.bf16.msra.mxu1 %v3690_v62  ;;  %v3169_v10 = vld [vmem:[%s4483_s17 + $0x18] sm:$0xff] }
 0x23c   : > { %3457 = vmatprep.mubr.msk.f32.mxu1 %vm580_vm0, %v4045_v35  ;;  %3695 = vmatprep.subr.bf16.mxu1 %v3694_v11 }
 0x23d   : > { %3699 = vmatprep.subr.bf16.mxu0 %v3698_v50 }
 0x23f   : > { %3697 = vmatpush3.bf16.msra.mxu1 %v3694_v11  ;;  %v3168_v11 = vld [vmem:[%s4483_s17 + $0x10] sm:$0xff] }
 0x240   : > { %3707 = vmatprep.subr.bf16.mxu1 %v3706_v14 }
 0x242   : > { %3458 = vmatmul.mubr.msk.f32.vlgmr.msra.gmra.mrb[8].mxu1 %vm580_vm0, %v4055_v40 }
 0x243   : > { %3709 = vmatpush3.bf16.msra.mxu1 %v3706_v14  ;;  %3479 = vmatprep.mubr.msk.f32.mxu1 %vm580_vm0, %v4045_v35 }
 0x244   : > { %3711 = vmatprep.subr.bf16.mxu1 %v3710_v17 }
 0x247   : > { %3713 = vmatpush3.bf16.msra.mxu1 %v3710_v17 }
 0x24a   : > { %3480 = vmatmul.mubr.msk.f32.vlgmr.msra.gmra.mrb[10].mxu1 %vm580_vm0, %v4055_v40 }
 0x30d   : > { %v3441_v20 = vpop.f32.mrb[6].mxu1 }
 0x30e   : > { %v977_v21 = vadd.f32 %v3441_v20, %v891_v18  ;;  %v971_v22 = vpop.f32.mrb[7].mxu1 }
 0x30f   : > { %v972_v23 = vadd.f32 %v971_v22, %v890_v19 }
 0x310   : > { %v984_v24 = vsel %vm980_vm3, %v977_v21, -inf }
 0x311   : > { %985 = vmax.xlane.f32.xlu1 %v984_v24  ;;  %v981_v25 = vsel %vm980_vm3, %v972_v23, -inf }
 0x312   : > { %982 = vmax.xlane.f32.xlu0 %v981_v25 }
 0x315   : > { %v3459_v27 = vpop.f32.mrb[8].mxu1 }
 0x316   : > { %v1170_v28 = vadd.f32 %v3459_v27, %v3149_v26  ;;  %v1164_v29 = vpop.f32.mrb[9].mxu1 }
 0x317   : > { %v1165_v61 = vadd.f32 %v3149_v26, %v1164_v29  ;;  %v3182_v29 = vld [vmem:[%s4469_s3 + $0x48] sm:$0xff] }
 0x318   : > { %v1174_v9 = vmul.f32 0.35355338, %v1170_v28  ;;  %v3181_v28 = vld [vmem:[%s4469_s3 + $0x40] sm:$0xff] }
 0x319   : > { %v1173_v62 = vmul.f32 0.35355338, %v1165_v61 }
 0x31d   : > { %v3481_v31 = vpop.f32.mrb[10].mxu1 }
 0x31e   : > { %v1348_v32 = vadd.f32 %v3481_v31, %v3165_v30  ;;  %v1342_v33 = vpop.f32.mrb[11].mxu1  ;;  %v3176_v31 = vld [vmem:[%s4475_s9 + $0x8] sm:$0xff] }
 0x31f   : > { %v1343_v34 = vadd.f32 %v3165_v30, %v1342_v33  ;;  %v3724_v30 = vpack.c.bf16 %v3182_v29, %v3181_v28 }
 0x321   : > { %v3720_v36 = vpack.c.bf16 %v1348_v32, %v1343_v34 }
 0x323   : > { %3721 = vmatprep.subr.bf16.mxu1 %v3720_v36 }
 0x324   : > { %3723 = vmatpush3.bf16.msra.mxu1 %v3720_v36  ;;  %v3183_v36 = vld [vmem:[%s4469_s3 + $0x50] sm:$0xff] }
 0x325   : > { %3725 = vmatprep.subr.bf16.mxu1 %v3724_v30 }
 0x39e   : > { %v986_v37 = vpop.xlane.xlu1 %985 }
 0x39f   : > { %v988_v38 = vsub.f32 %v977_v21, %v986_v37  ;;  %v983_v39 = vpop.xlane.xlu0 %982  ;;  %v3184_v37 = vld [vmem:[%s4469_s3 + $0x58] sm:$0xff] }
 0x3a0   : > { %v987_v41 = vsub.f32 %v972_v23, %v983_v39 }
 0x3a1   : > { %v991_v42 = vmul.f32 1.442695, %v988_v38 }
 0x3a2   : > { %v989_v43 = vmul.f32 1.442695, %v987_v41 }
 0x3a3   : > { %3850 = vpow2.f32 %v991_v42  ;;  %v3728_v42 = vpack.c.bf16 %v3184_v37, %v3183_v36  ;;  %v3217_v36 = vld [vmem:[%s4469_s3 + $0x68] sm:$0xff] }
 0x3a4   : > { %3852 = vpow2.f32 %v989_v43  ;;  %v3197_v43 = vld [vmem:[%s4471_s5 + $0x40] sm:$0xff] }
 0x3ad   : > { %v3851_v44 = vpop.eup %3850 }
 0x3ae   : > { %v3853_v45 = vpop.eup %3852  ;;  %v996_v46 = vsel %vm980_vm3, %v3851_v44, 0.0 }
 0x3af   : > { %997 = vadd.xlane.f32.xlu1 %v996_v46  ;;  %v993_v47 = vsel %vm980_vm3, %v3853_v45, 0.0  ;;  %v3199_v46 = vld [vmem:[%s4471_s5 + $0x50] sm:$0xff] }
 0x3b0   : > { %994 = vadd.xlane.f32.xlu0 %v993_v47  ;;  %v3200_v47 = vld [vmem:[%s4471_s5 + $0x58] sm:$0xff] }
 0x3b1   : > { %v3744_v48 = vpack.c.bf16 %v3200_v47, %v3199_v46 }
 0x43c   : > { %v998_v51 = vpop.xlane.xlu1 %997 }
 0x43d   : > { %3854 = vrcp.f32 %v998_v51  ;;  %v995_v52 = vpop.xlane.xlu0 %994  ;;  %v3190_v51 = vld [vmem:[%s4470_s4 + $0x48] sm:$0xff] }
 0x43e   : > { %3856 = vrcp.f32 %v995_v52 }
 0x447   : > { %v3855_v53 = vpop.eup %3854 }
 0x448   : > { %v3857_v56 = vpop.eup %3856  ;;  %v1002_v58 = vmul.f32 %v3855_v53, %v3851_v44  ;;  %v3198_v44 = vld [vmem:[%s4471_s5 + $0x48] sm:$0xff] }
 0x449   : > { %v1000_v57 = vmul.f32 %v3857_v56, %v3853_v45  ;;  %v3740_v45 = vpack.c.bf16 %v3198_v44, %v3197_v43  ;;  %v3191_v56 = vld [vmem:[%s4470_s4 + $0x50] sm:$0xff]  ;;  %v3219_v44 = vld [vmem:[%s4469_s3 + $0x78] sm:$0xff] }
 0x44a   : > { %v3218_v43 = vld [vmem:[%s4469_s3 + $0x70] sm:$0xff] }
 0x44b   : > { %3446 = vmatprep.mubr.msk.f32.mxu0 %vm980_vm3, %v1000_v57  ;;  %v3192_v57 = vld [vmem:[%s4470_s4 + $0x58] sm:$0xff] }
 0x44c   : > { %3447 = vmatmul.mubr.msk.f32.vlgmr.msra.gmra.mrb[0].mxu0 %vm980_vm3, %v1002_v58 }
 0x44d   : > { %3701 = vmatpush3.bf16.msra.mxu0 %v3698_v50  ;;  %3468 = vmatprep.mubr.msk.f32.mxu0 %vm580_vm0, %v4045_v35  ;;  %v3189_v50 = vld [vmem:[%s4470_s4 + $0x40] sm:$0xff] }
 0x44e   : > { %3703 = vmatprep.subr.bf16.mxu0 %v3702_v59  ;;  %v3732_v54 = vpack.c.bf16 %v3190_v51, %v3189_v50  ;;  %v3233_v50 = vld [vmem:[%s4471_s5 + $0x68] sm:$0xff] }
 0x451   : > { %3705 = vmatpush3.bf16.msra.mxu0 %v3702_v59 }
 0x454   : > { %3469 = vmatmul.mubr.msk.f32.vlgmr.msra.gmra.mrb[2].mxu0 %vm580_vm0, %v4055_v40 }
 0x455   : > { %3486 = vmatprep.mubr.msk.f32.mxu0 %vm892_vm1, %v1173_v62  ;;  %v3736_v62 = vpack.c.bf16 %v3192_v57, %v3191_v56  ;;  %v3225_v56 = vld [vmem:[%s4470_s4 + $0x68] sm:$0xff] }
 0x51f   : > { %v4167_v63 = vpop.f32.mrb[0].mxu0 }
 0x520   : > { %v4169_v2 = vpop.f32.mrb[1].mxu0 }
 0x527   : > { %v3470_v4 = vpop.f32.mrb[2].mxu0 }
 0x528   : > { %v1260_v5 = vadd.f32 %v3470_v4, %v3157_v3  ;;  %v1254_v6 = vpop.f32.mrb[3].mxu0 }
 0x529   : > { %v1255_v7 = vadd.f32 %v3157_v3, %v1254_v6  ;;  %v3202_v3 = vld [vmem:[%s4474_s8 + $0x2] ss:$0 sm:$0xff] }
 0x52b   : > { %v3714_v8 = vpack.c.bf16 %v1260_v5, %v1255_v7 }
 0x52d   : > { %3716 = vmatprep.subr.msk.bf16.mxu0 %vm4094_vm2, %v3714_v8 }
 0x52e   : > { %3719 = vmatpush3.bf16.xpose.msk.msra.mxu0 %vm4094_vm2, %v3714_v8 }
 0x52f   : > { %3496 = vmatprep.subr.mxu0 %v3176_v31 }
 0x535   : > { %3487 = vmatmul.mubr.msk.f32.vlgmr.msra.gmra.mrb[4].mxu0 %vm892_vm1, %v1174_v9  ;;  %v3194_v9 = vld [vmem:[%s4473_s7 + $0x2] ss:$0 sm:$0xff] }
 0x536   : > { %3497 = vmatpush3.msra.mxu0 %v3176_v31 }
 0x537   : > { %3501 = vmatprep.subr.mxu0 %v1084_v49 }
 0x608   : > { %v3488_v12 = vpop.f32.mrb[4].mxu0 }
 0x609   : > { %v1438_v13 = vadd.f32 %v3488_v12, %v3169_v10  ;;  %v1432_v14 = vpop.f32.mrb[5].mxu0 }
 0x60a   : > { %v1433_v15 = vadd.f32 %v3168_v11, %v1432_v14 }
 0x60b   : > { %v1444_v16 = vsel %vm980_vm3, %v1438_v13, -inf }
 0x60c   : > { %1445 = vmax.xlane.f32.xlu1 %v1444_v16  ;;  %v1441_v17 = vsel %vm980_vm3, %v1433_v15, -inf  ;;  %v3206_v16 = vld [vmem:[%s4483_s17 + $0x28] sm:$0xff] }
 0x60d   : > { %1442 = vmax.xlane.f32.xlu0 %v1441_v17  ;;  %v3205_v17 = vld [vmem:[%s4483_s17 + $0x20] sm:$0xff] }
 0x699   : > { %v1446_v18 = vpop.xlane.xlu1 %1445 }
 0x69a   : > { %v1448_v19 = vsub.f32 %v1438_v13, %v1446_v18  ;;  %v1443_v20 = vpop.xlane.xlu0 %1442 }
 0x69b   : > { %v1447_v21 = vsub.f32 %v1433_v15, %v1443_v20 }
 0x69c   : > { %v1451_v22 = vmul.f32 1.442695, %v1448_v19 }
 0x69d   : > { %v1449_v23 = vmul.f32 1.442695, %v1447_v21 }
 0x69e   : > { %3858 = vpow2.f32 %v1451_v22 }
 0x69f   : > { %3860 = vpow2.f32 %v1449_v23 }
 0x6a8   : > { %v3859_v24 = vpop.eup %3858 }
 0x6a9   : > { %v3861_v25 = vpop.eup %3860  ;;  %v1456_v26 = vsel %vm980_vm3, %v3859_v24, 0.0 }
 0x6aa   : > { %1457 = vadd.xlane.f32.xlu1 %v1456_v26  ;;  %v1453_v27 = vsel %vm980_vm3, %v3861_v25, 0.0 }
 0x6ab   : > { %1454 = vadd.xlane.f32.xlu0 %v1453_v27 }
 0x737   : > { %v1458_v32 = vpop.xlane.xlu1 %1457 }
 0x738   : > { %3862 = vrcp.f32 %v1458_v32  ;;  %v1455_v33 = vpop.xlane.xlu0 %1454 }
 0x739   : > { %3864 = vrcp.f32 %v1455_v33 }
 0x742   : > { %v3863_v34 = vpop.eup %3862 }
 0x743   : > { %v3865_v38 = vpop.eup %3864  ;;  %v1462_v41 = vmul.f32 %v3863_v34, %v3859_v24  ;;  %v3216_v34 = vld [vmem:[%s4469_s3 + $0x60] sm:$0xff] }
 0x744   : > { %v1460_v39 = vmul.f32 %v3865_v38, %v3861_v25  ;;  %v3758_v37 = vpack.c.bf16 %v3217_v36, %v3216_v34  ;;  %v3213_v38 = vld [vmem:[%s4475_s9 + $0x10] sm:$0xff] }
 0x746   : > { %3493 = vmatprep.mubr.msk.f32.mxu1 %vm980_vm3, %v1460_v39 }
 0x747   : > { %3494 = vmatmul.mubr.msk.f32.vlgmr.msra.gmra.mrb[12].mxu1 %vm980_vm3, %v1462_v41 }
 0x748   : > { %3727 = vmatpush3.bf16.msra.mxu1 %v3724_v30  ;;  %3514 = vmatprep.mubr.msk.f32.mxu1 %vm580_vm0, %v4045_v35 }
 0x749   : > { %3729 = vmatprep.subr.bf16.mxu1 %v3728_v42 }
 0x74c   : > { %3731 = vmatpush3.bf16.msra.mxu1 %v3728_v42 }
 0x74d   : > { %3741 = vmatprep.subr.bf16.mxu1 %v3740_v45 }
 0x74f   : > { %3515 = vmatmul.mubr.msk.f32.vlgmr.msra.gmra.mrb[14].mxu1 %vm580_vm0, %v4055_v40 }
 0x750   : > { %3743 = vmatpush3.bf16.msra.mxu1 %v3740_v45  ;;  %3536 = vmatprep.mubr.msk.f32.mxu1 %vm580_vm0, %v4045_v35 }
 0x751   : > { %3745 = vmatprep.subr.bf16.mxu1 %v3744_v48 }
 0x754   : > { %3747 = vmatpush3.bf16.msra.mxu1 %v3744_v48  ;;  %v3762_v48 = vpack.c.bf16 %v3219_v44, %v3218_v43 }
 0x757   : > { %3537 = vmatmul.mubr.msk.f32.vlgmr.msra.gmra.mrb[16].mxu1 %vm580_vm0, %v4055_v40 }
 0x81a   : > { %v3495_v52 = vpop.f32.mrb[12].mxu1 }
 0x81b   : > { %v1535_v53 = vpop.f32.mrb[13].mxu1 }
 0x81c   : > { %3498 = vmatprep.mubr.msk.f32.mxu0 %vm892_vm1, %v1535_v53  ;;  %v3235_v53 = vld [vmem:[%s4471_s5 + $0x78] sm:$0xff] }
 0x81d   : > { %3499 = vmatmul.mubr.msk.f32.vlgmr.msra.gmra.mrb[6].mxu0 %vm892_vm1, %v3495_v52  ;;  %v3234_v52 = vld [vmem:[%s4471_s5 + $0x70] sm:$0xff] }
 0x81e   : > { %3502 = vmatpush3.msra.mxu0 %v1084_v49  ;;  %3503 = vmatprep.mubr.msk.f32.mxu0 %vm892_vm1, %v4169_v2  ;;  %v3232_v49 = vld [vmem:[%s4471_s5 + $0x60] sm:$0xff] }
 0x81f   : > { %3733 = vmatprep.subr.bf16.mxu0 %v3732_v54  ;;  %v3774_v51 = vpack.c.bf16 %v3233_v50, %v3232_v49 }
 0x822   : > { %v3516_v58 = vpop.f32.mrb[14].mxu1 }
 0x823   : > { %v1793_v59 = vadd.f32 %v3516_v58, %v3186_v55  ;;  %v1787_v61 = vpop.f32.mrb[15].mxu1  ;;  %v3226_v58 = vld [vmem:[%s4470_s4 + $0x70] sm:$0xff] }
 0x824   : > { %v1788_v2 = vadd.f32 %v3186_v55, %v1787_v61  ;;  %v3224_v55 = vld [vmem:[%s4470_s4 + $0x60] sm:$0xff] }
 0x825   : > { %3504 = vmatmul.mubr.msk.f32.vlgmr.msra.gmra.mrb[6].mxu0 %vm892_vm1, %v4167_v63  ;;  %v1797_v15 = vmul.f32 0.35355338, %v1793_v59  ;;  %v3766_v57 = vpack.c.bf16 %v3225_v56, %v3224_v55  ;;  %v3227_v59 = vld [vmem:[%s4470_s4 + $0x78] sm:$0xff] }
 0x826   : > { %3735 = vmatpush3.bf16.msra.mxu0 %v3732_v54  ;;  %3525 = vmatprep.mubr.msk.f32.mxu0 %vm580_vm0, %v4045_v35  ;;  %v1796_v7 = vmul.f32 0.35355338, %v1788_v2  ;;  %v3778_v54 = vpack.c.bf16 %v3235_v53, %v3234_v52  ;;  %v3770_v2 = vpack.c.bf16 %v3227_v59, %v3226_v58 }
 0x827   : > { %3737 = vmatprep.subr.bf16.mxu0 %v3736_v62 }
 0x82a   : > { %3739 = vmatpush3.bf16.msra.mxu0 %v3736_v62  ;;  %v3538_v4 = vpop.f32.mrb[16].mxu1 }
 0x82b   : > { %v1971_v5 = vadd.f32 %v3538_v4, %v3202_v3  ;;  %v1965_v6 = vpop.f32.mrb[17].mxu1 }
 0x82c   : > { %v1966_v8 = vadd.f32 %v3202_v3, %v1965_v6  ;;  %v3221_v3 = vld [vmem:[%s4472_s6 + $0x3] ss:$0 sm:$0xff] }
 0x82d   : > { %3526 = vmatmul.mubr.msk.f32.vlgmr.msra.gmra.mrb[8].mxu0 %vm580_vm0, %v4055_v40 }
 0x82e   : > { %v3754_v63 = vpack.c.bf16 %v1971_v5, %v1966_v8  ;;  %3543 = vmatprep.mubr.msk.f32.mxu0 %vm892_vm1, %v1796_v7 }
 0x830   : > { %3755 = vmatprep.subr.bf16.mxu1 %v3754_v63 }
 0x831   : > { %3757 = vmatpush3.bf16.msra.mxu1 %v3754_v63 }
 0x832   : > { %3759 = vmatprep.subr.bf16.mxu1 %v3758_v37 }
 0x900   : > { %v3527_v10 = vpop.f32.mrb[8].mxu0 }
 0x901   : > { %v1883_v11 = vadd.f32 %v3527_v10, %v3194_v9  ;;  %v1877_v12 = vpop.f32.mrb[9].mxu0 }
 0x902   : > { %v1878_v13 = vadd.f32 %v3194_v9, %v1877_v12 }
 0x904   : > { %v3748_v14 = vpack.c.bf16 %v1883_v11, %v1878_v13  ;;  %v3229_v13 = vld [vmem:[%s4473_s7 + $0x3] ss:$0 sm:$0xff] }
 0x906   : > { %3750 = vmatprep.subr.msk.bf16.mxu0 %vm4094_vm2, %v3748_v14 }
 0x907   : > { %3753 = vmatpush3.bf16.xpose.msk.msra.mxu0 %vm4094_vm2, %v3748_v14 }
 0x908   : > { %3553 = vmatprep.subr.mxu0 %v3213_v38 }
 0x90e   : > { %3544 = vmatmul.mubr.msk.f32.vlgmr.msra.gmra.mrb[10].mxu0 %vm892_vm1, %v1797_v15 }
 0x90f   : > { %3554 = vmatpush3.msra.mxu0 %v3213_v38 }
 0x910   : > { %3767 = vmatprep.subr.bf16.mxu0 %v3766_v57 }
 0x9e1   : > { %v3545_v18 = vpop.f32.mrb[10].mxu0 }
 0x9e2   : > { %v2061_v19 = vadd.f32 %v3545_v18, %v3206_v16  ;;  %v2055_v20 = vpop.f32.mrb[11].mxu0 }
 0x9e3   : > { %v2056_v21 = vadd.f32 %v3205_v17, %v2055_v20  ;;  %v3240_v20 = vld [vmem:[%s4483_s17 + $0x30] sm:$0xff] }
 0x9e4   : > { %v2067_v22 = vsel %vm980_vm3, %v2061_v19, -inf }
 0x9e5   : > { %2068 = vmax.xlane.f32.xlu1 %v2067_v22  ;;  %v2064_v23 = vsel %vm980_vm3, %v2056_v21, -inf }
 0x9e6   : > { %2065 = vmax.xlane.f32.xlu0 %v2064_v23 }
 0xa72   : > { %v2069_v24 = vpop.xlane.xlu1 %2068 }
 0xa73   : > { %v2071_v25 = vsub.f32 %v2061_v19, %v2069_v24  ;;  %v2066_v26 = vpop.xlane.xlu0 %2065  ;;  %v3241_v19 = vld [vmem:[%s4483_s17 + $0x38] sm:$0xff] }
 0xa74   : > { %v2070_v27 = vsub.f32 %v2056_v21, %v2066_v26 }
 0xa75   : > { %v2074_v28 = vmul.f32 1.442695, %v2071_v25 }
 0xa76   : > { %v2072_v29 = vmul.f32 1.442695, %v2070_v27 }
 0xa77   : > { %3866 = vpow2.f32 %v2074_v28 }
 0xa78   : > { %3868 = vpow2.f32 %v2072_v29 }
 0xa81   : > { %v3867_v30 = vpop.eup %3866 }
 0xa82   : > { %v3869_v31 = vpop.eup %3868  ;;  %v2079_v32 = vsel %vm980_vm3, %v3867_v30, 0.0 }
 0xa83   : > { %2080 = vadd.xlane.f32.xlu1 %v2079_v32  ;;  %v2076_v33 = vsel %vm980_vm3, %v3869_v31, 0.0 }
 0xa84   : > { %2077 = vadd.xlane.f32.xlu0 %v2076_v33 }
 0xb10   : > { %v2081_v39 = vpop.xlane.xlu1 %2080 }
 0xb11   : > { %3870 = vrcp.f32 %v2081_v39  ;;  %v2078_v41 = vpop.xlane.xlu0 %2077 }
 0xb12   : > { %3872 = vrcp.f32 %v2078_v41 }
 0xb1b   : > { %v3871_v42 = vpop.eup %3870 }
 0xb1c   : > { %v3873_v45 = vpop.eup %3872  ;;  %v2085_v47 = vmul.f32 %v3871_v42, %v3867_v30 }
 0xb1d   : > { %v2083_v46 = vmul.f32 %v3873_v45, %v3869_v31 }
 0xb1f   : > { %3550 = vmatprep.mubr.msk.f32.mxu1 %vm980_vm3, %v2083_v46 }
 0xb20   : > { %3551 = vmatmul.mubr.msk.f32.vlgmr.msra.gmra.mrb[18].mxu1 %vm980_vm3, %v2085_v47 }
 0xb21   : > { %3761 = vmatpush3.bf16.msra.mxu1 %v3758_v37  ;;  %3566 = vmatprep.mubr.msk.f32.mxu1 %vm580_vm0, %v4045_v35  ;;  %v3248_v37 = vld [vmem:[%s4475_s9 + $0x18] sm:$0xff] }
 0xb22   : > { %3763 = vmatprep.subr.bf16.mxu1 %v3762_v48 }
 0xb25   : > { %3765 = vmatpush3.bf16.msra.mxu1 %v3762_v48  ;;  %v3251_v48 = vld [vmem:[%s4476_s10] ss:$0 sm:$0xff] }
 0xb26   : > { %3775 = vmatprep.subr.bf16.mxu1 %v3774_v51 }
 0xb28   : > { %3567 = vmatmul.mubr.msk.f32.vlgmr.msra.gmra.mrb[20].mxu1 %vm580_vm0, %v4055_v40 }
 0xb29   : > { %3777 = vmatpush3.bf16.msra.mxu1 %v3774_v51  ;;  %3588 = vmatprep.mubr.msk.f32.mxu1 %vm580_vm0, %v4045_v35 }
 0xb2a   : > { %3779 = vmatprep.subr.bf16.mxu1 %v3778_v54 }
 0xb2d   : > { %3781 = vmatpush3.bf16.msra.mxu1 %v3778_v54 }
 0xb30   : > { %3589 = vmatmul.mubr.msk.f32.vlgmr.msra.gmra.mrb[22].mxu1 %vm580_vm0, %v4055_v40 }
 0xbf3   : > { %v3552_v61 = vpop.f32.mrb[18].mxu1 }
 0xbf4   : > { %v2158_v62 = vpop.f32.mrb[19].mxu1 }
 0xbf5   : > { %3555 = vmatprep.mubr.msk.f32.mxu0 %vm892_vm1, %v2158_v62 }
 0xbf6   : > { %3556 = vmatmul.mubr.msk.f32.vlgmr.msra.gmra.mrb[6].mxu0 %vm892_vm1, %v3552_v61 }
 0xbf7   : > { %3769 = vmatpush3.bf16.msra.mxu0 %v3766_v57  ;;  %3577 = vmatprep.mubr.msk.f32.mxu0 %vm580_vm0, %v4045_v35  ;;  %v3237_v35 = vld [vmem:[%s4474_s8 + $0x3] ss:$0 sm:$0xff] }
 0xbf8   : > { %3771 = vmatprep.subr.bf16.mxu0 %v3770_v2 }
 0xbfb   : > { %v3568_v4 = vpop.f32.mrb[20].mxu1  ;;  %3773 = vmatpush3.bf16.msra.mxu0 %v3770_v2 }
 0xbfc   : > { %v2337_v5 = vadd.f32 %v3568_v4, %v3221_v3  ;;  %v2331_v6 = vpop.f32.mrb[21].mxu1  ;;  %v2851_v4 = vld [vmem:[%s4479_s13] sm:$0xff] }
 0xbfd   : > { %v2332_v7 = vadd.f32 %v3221_v3, %v2331_v6 }
 0xbfe   : > { %3578 = vmatmul.mubr.msk.f32.vlgmr.msra.gmra.mrb[12].mxu0 %vm580_vm0, %v4055_v40  ;;  %v2341_v18 = vmul.f32 0.35355338, %v2337_v5  ;;  %v2852_v5 = vld [vmem:[%s4479_s13 + $0x8] sm:$0xff] }
 0xbff   : > { %v2340_v8 = vmul.f32 0.35355338, %v2332_v7  ;;  %v3792_v6 = vpack.c.bf16 %v2852_v5, %v2851_v4  ;;  %v2853_v7 = vld [vmem:[%s4479_s13 + $0x10] sm:$0xff] }
 0xc01   : > { %3595 = vmatprep.mubr.msk.f32.mxu0 %vm892_vm1, %v2340_v8  ;;  %v2854_v8 = vld [vmem:[%s4479_s13 + $0x18] sm:$0xff] }
 0xc03   : > { %v3590_v63 = vpop.f32.mrb[22].mxu1 }
 0xc04   : > { %v2515_v9 = vadd.f32 %v3590_v63, %v3237_v35  ;;  %v2509_v10 = vpop.f32.mrb[23].mxu1  ;;  %v2961_v63 = vld [vmem:[%s4481_s15] sm:$0xff] }
 0xc05   : > { %v2510_v11 = vadd.f32 %v3237_v35, %v2509_v10  ;;  %v3796_v35 = vpack.c.bf16 %v2854_v8, %v2853_v7 }
 0xc07   : > { %v3788_v12 = vpack.c.bf16 %v2515_v9, %v2510_v11  ;;  %v2962_v9 = vld [vmem:[%s4481_s15 + $0x8] sm:$0xff] }
 0xc08   : > { %v3800_v10 = vpack.c.bf16 %v2962_v9, %v2961_v63  ;;  %v3257_v9 = vld [vmem:[%s4482_s16] ss:$0 sm:$0xff] }
 0xc09   : > { %3789 = vmatprep.subr.bf16.mxu1 %v3788_v12 }
 0xc0a   : > { %3791 = vmatpush3.bf16.msra.mxu1 %v3788_v12 }
 0xc0b   : > { %3793 = vmatprep.subr.bf16.mxu1 %v3792_v6 }
 0xcd1   : > { %v3579_v14 = vpop.f32.mrb[12].mxu0 }
 0xcd2   : > { %v2427_v40 = vadd.f32 %v3579_v14, %v3229_v13  ;;  %v2421_v15 = vpop.f32.mrb[13].mxu0 }
 0xcd3   : > { %v2422_v16 = vadd.f32 %v3229_v13, %v2421_v15 }
 0xcd5   : > { %v3782_v17 = vpack.c.bf16 %v2427_v40, %v2422_v16 }
 0xcd7   : > { %3784 = vmatprep.subr.msk.bf16.mxu0 %vm4094_vm2, %v3782_v17 }
 0xcd8   : > { %3787 = vmatpush3.bf16.xpose.msk.msra.mxu0 %vm4094_vm2, %v3782_v17  ;;  %v3252_v17 = vld [vmem:[%s4477_s11] ss:$0 sm:$0xff] }
 0xcd9   : > { %3605 = vmatprep.subr.mxu0 %v3248_v37 }
 0xcdf   : > { %3596 = vmatmul.mubr.msk.f32.vlgmr.msra.gmra.mrb[14].mxu0 %vm892_vm1, %v2341_v18 }
 0xce0   : > { %3606 = vmatpush3.msra.mxu0 %v3248_v37  ;;  %v2971_v37 = vld [vmem:[%s4481_s15 + $0x50] sm:$0xff] }
 0xce1   : > { %3801 = vmatprep.subr.bf16.mxu0 %v3800_v10 }
 0xdb2   : > { %v3597_v21 = vpop.f32.mrb[14].mxu0 }
 0xdb3   : > { %v2605_v22 = vadd.f32 %v3597_v21, %v3241_v19  ;;  %v2599_v23 = vpop.f32.mrb[15].mxu0  ;;  %v3253_v21 = vld [vmem:[%s4478_s12] ss:$0 sm:$0xff] }
 0xdb4   : > { %v2600_v24 = vadd.f32 %v3240_v20, %v2599_v23 }
 0xdb5   : > { %v2611_v25 = vsel %vm980_vm3, %v2605_v22, -inf }
 0xdb6   : > { %2612 = vmax.xlane.f32.xlu1 %v2611_v25  ;;  %v2608_v60 = vsel %vm980_vm3, %v2600_v24, -inf }
 0xdb7   : > { %2609 = vmax.xlane.f32.xlu0 %v2608_v60  ;;  %v2963_v60 = vld [vmem:[%s4481_s15 + $0x10] sm:$0xff] }
 0xe43   : > { %v2613_v26 = vpop.xlane.xlu1 %2612 }
 0xe44   : > { %v2615_v27 = vsub.f32 %v2605_v22, %v2613_v26  ;;  %v2610_v28 = vpop.xlane.xlu0 %2609  ;;  %v2964_v26 = vld [vmem:[%s4481_s15 + $0x18] sm:$0xff] }
 0xe45   : > { %v2614_v29 = vsub.f32 %v2600_v24, %v2610_v28  ;;  %v2965_v28 = vld [vmem:[%s4481_s15 + $0x20] sm:$0xff] }
 0xe46   : > { %v2618_v30 = vmul.f32 1.442695, %v2615_v27  ;;  %v3804_v27 = vpack.c.bf16 %v2964_v26, %v2963_v60 }
 0xe47   : > { %v2616_v31 = vmul.f32 1.442695, %v2614_v29  ;;  %v2966_v29 = vld [vmem:[%s4481_s15 + $0x28] sm:$0xff] }
 0xe48   : > { %3874 = vpow2.f32 %v2618_v30  ;;  %v3808_v30 = vpack.c.bf16 %v2966_v29, %v2965_v28 }
 0xe49   : > { %3876 = vpow2.f32 %v2616_v31  ;;  %v2967_v31 = vld [vmem:[%s4481_s15 + $0x30] sm:$0xff] }
 0xe52   : > { %v3875_v32 = vpop.eup %3874 }
 0xe53   : > { %v3877_v33 = vpop.eup %3876  ;;  %v2623_v34 = vsel %vm980_vm3, %v3875_v32, 0.0 }
 0xe54   : > { %2624 = vadd.xlane.f32.xlu1 %v2623_v34  ;;  %v2620_v36 = vsel %vm980_vm3, %v3877_v33, 0.0  ;;  %v2969_v34 = vld [vmem:[%s4481_s15 + $0x40] sm:$0xff] }
 0xe55   : > { %2621 = vadd.xlane.f32.xlu0 %v2620_v36  ;;  %v2970_v36 = vld [vmem:[%s4481_s15 + $0x48] sm:$0xff] }
 0xee1   : > { %v2625_v38 = vpop.xlane.xlu1 %2624 }
 0xee2   : > { %3878 = vrcp.f32 %v2625_v38  ;;  %v2622_v39 = vpop.xlane.xlu0 %2621  ;;  %v3816_v38 = vpack.c.bf16 %v2970_v36, %v2969_v34 }
 0xee3   : > { %3880 = vrcp.f32 %v2622_v39  ;;  %v2972_v39 = vld [vmem:[%s4481_s15 + $0x58] sm:$0xff] }
 0xeec   : > { %v3879_v41 = vpop.eup %3878 }
 0xeed   : > { %v3881_v42 = vpop.eup %3880  ;;  %v2629_v44 = vmul.f32 %v3879_v41, %v3875_v32  ;;  %v2968_v32 = vld [vmem:[%s4481_s15 + $0x38] sm:$0xff]  ;;  %v3820_v41 = vpack.c.bf16 %v2972_v39, %v2971_v37 }
 0xeee   : > { %v2627_v43 = vmul.f32 %v3881_v42, %v3877_v33  ;;  %v3812_v33 = vpack.c.bf16 %v2968_v32, %v2967_v31  ;;  %v2973_v42 = vld [vmem:[%s4481_s15 + $0x60] sm:$0xff] }
 0xef0   : > { %3602 = vmatprep.mubr.msk.f32.mxu1 %vm980_vm3, %v2627_v43  ;;  %v2974_v43 = vld [vmem:[%s4481_s15 + $0x68] sm:$0xff] }
 0xef1   : > { %3603 = vmatmul.mubr.msk.f32.vlgmr.msra.gmra.mrb[24].mxu1 %vm980_vm3, %v2629_v44  ;;  %v3824_v44 = vpack.c.bf16 %v2974_v43, %v2973_v42 }
 0xef2   : > { %3795 = vmatpush3.bf16.msra.mxu1 %v3792_v6 }
 0xef3   : > { %3797 = vmatprep.subr.bf16.mxu1 %v3796_v35 }
 0xef6   : > { %3799 = vmatpush3.bf16.msra.mxu1 %v3796_v35 }
 0xfc4   : > { %v3604_v45 = vpop.f32.mrb[24].mxu1 }
 0xfc5   : > { %v2702_v46 = vpop.f32.mrb[25].mxu1 }
 0xfc6   : > { %3607 = vmatprep.mubr.msk.f32.mxu0 %vm892_vm1, %v2702_v46  ;;  %v2976_v46 = vld [vmem:[%s4481_s15 + $0x78] sm:$0xff] }
 0xfc7   : > { %3608 = vmatmul.mubr.msk.f32.vlgmr.msra.gmra.mrb[6].mxu0 %vm892_vm1, %v3604_v45  ;;  %v2975_v45 = vld [vmem:[%s4481_s15 + $0x70] sm:$0xff] }
 0xfc8   : > { %3803 = vmatpush3.bf16.msra.mxu0 %v3800_v10 }
 0xfc9   : > { %3805 = vmatprep.subr.bf16.mxu0 %v3804_v27 }
 0xfcc   : > { %3807 = vmatpush3.bf16.msra.mxu0 %v3804_v27 }
 0xfcd   : > { %3809 = vmatprep.subr.bf16.mxu0 %v3808_v30 }
 0xfd0   : > { %3811 = vmatpush3.bf16.msra.mxu0 %v3808_v30 }
 0xfd1   : > { %3813 = vmatprep.subr.bf16.mxu0 %v3812_v33 }
 0xfd4   : > { %3815 = vmatpush3.bf16.msra.mxu0 %v3812_v33 }
 0xfd5   : > { %3817 = vmatprep.subr.bf16.mxu0 %v3816_v38 }
 0xfd8   : > { %3819 = vmatpush3.bf16.msra.mxu0 %v3816_v38 }
 0xfd9   : > { %3821 = vmatprep.subr.bf16.mxu0 %v3820_v41 }
 0xfdc   : > { %3823 = vmatpush3.bf16.msra.mxu0 %v3820_v41 }
 0xfdd   : > { %3825 = vmatprep.subr.bf16.mxu0 %v3824_v44 }
 0xfe0   : > { %3827 = vmatpush3.bf16.msra.mxu0 %v3824_v44 }
0x109a   : > { %v3609_v47 = vpop.f32.mrb[6].mxu0 }
0x109b   : > { %v2797_v49 = vadd.f32 %v3609_v47, %v4011_v1  ;;  %v2785_v50 = vpop.f32.mrb[7].mxu0  ;;  %v3828_v47 = vpack.c.bf16 %v2976_v46, %v2975_v45 }
0x109c   : > { %v2796_v51 = vadd.f32 %v2785_v50, %v4009_v0 }
0x109d   : > { %v4368_v52 = vadd.f32 %v3251_v48, %v2797_v49  ;;  %3829 = vmatprep.subr.bf16.mxu0 %v3828_v47 }
0x109e   : > { %v4370_v53 = vadd.f32 %v3251_v48, %v2796_v51  ;;  %3831 = vmatpush3.bf16.msra.mxu0 %v3828_v47  ;;  %v3254_v48 = vld [vmem:[%s4480_s14] ss:$0 sm:$0xff] }
0x109f   : > { %v2812_v54 = vsel %vm580_vm0, %v4368_v52, 0.0 }
0x10a0   : > { %2813 = vadd.xlane.f32.xlu1 %v2812_v54  ;;  %v2809_v55 = vsel %vm580_vm0, %v4370_v53, 0.0 }
0x10a1   : > { %2810 = vadd.xlane.f32.xlu0 %v2809_v55 }
0x112d   : > { %v2814_v56 = vpop.xlane.xlu1 %2813 }
0x112e   : > { %v2816_v57 = vmul.f32 0.03125, %v2814_v56  ;;  %v2811_v58 = vpop.xlane.xlu0 %2810 }
0x112f   : > { %v2815_v59 = vmul.f32 0.03125, %v2811_v58 }
0x1130   : > { %v2818_v1 = vsub.f32 %v4368_v52, %v2816_v57 }
0x1131   : > { %v2817_v0 = vsub.f32 %v4370_v53, %v2815_v59 }
0x1132   : > { %v2820_v61 = vmul.f32 %v2818_v1, %v2818_v1 }
0x1133   : > { %v2819_v62 = vmul.f32 %v2817_v0, %v2817_v0 }
0x1134   : > { %v2824_v2 = vsel %vm580_vm0, %v2820_v61, 0.0 }
0x1135   : > { %2825 = vadd.xlane.f32.xlu1 %v2824_v2  ;;  %v2821_v3 = vsel %vm580_vm0, %v2819_v62, 0.0 }
0x1136   : > { %2822 = vadd.xlane.f32.xlu0 %v2821_v3 }
0x11c2   : > { %v2826_v11 = vpop.xlane.xlu1 %2825 }
0x11c3   : > { %v2828_v12 = vmul.f32 0.03125, %v2826_v11  ;;  %v2823_v13 = vpop.xlane.xlu0 %2822 }
0x11c4   : > { %v2827_v14 = vmul.f32 0.03125, %v2823_v13 }
0x11c5   : > { %v2830_v40 = vadd.f32 1e-05, %v2828_v12 }
0x11c6   : > { %v2829_v15 = vadd.f32 1e-05, %v2827_v14 }
0x11c7   : > { %3882 = vrsqrt.f32 %v2830_v40 }
0x11c8   : > { %3884 = vrsqrt.f32 %v2829_v15 }
0x11d1   : > { %v3883_v16 = vpop.eup %3882 }
0x11d2   : > { %v3885_v18 = vpop.eup %3884  ;;  %v2834_v19 = vmul.f32 %v3883_v16, %v2818_v1 }
0x11d3   : > { %v2833_v20 = vmul.f32 %v3885_v18, %v2817_v0 }
0x11d4   : > { %v2842_v22 = vmul.f32 %v3252_v17, %v2834_v19 }
0x11d5   : > { %v2841_v23 = vmul.f32 %v3252_v17, %v2833_v20 }
0x11d6   : > { %v2850_v25 = vadd.f32 %v3253_v21, %v2842_v22 }
0x11d7   : > { %v2849_v24 = vadd.f32 %v3253_v21, %v2841_v23 }
0x11d9   : > { %3618 = vmatprep.mubr.msk.f32.mxu1 %vm580_vm0, %v2849_v24 }
0x11da   : > { %3619 = vmatmul.mubr.msk.f32.vlgmr.msra.gmra.mrb[26].mxu1 %vm580_vm0, %v2850_v25 }
0x12ad   : > { %v3620_v49 = vpop.f32.mrb[26].mxu1 }
0x12ae   : > { %v2940_v50 = vadd.f32 %v3620_v49, %v3254_v48  ;;  %v2934_v51 = vpop.f32.mrb[27].mxu1 }
0x12af   : > { %v2935_v54 = vadd.f32 %v3254_v48, %v2934_v51 }
0x12b0   : > { %v2946_v55 = vmul.f32 0.044715, %v2940_v50  ;;  %v2944_v8 = vmul.f32 0.5, %v2940_v50 }
0x12b1   : > { %v2945_v56 = vmul.f32 0.044715, %v2935_v54  ;;  %v2943_v6 = vmul.f32 0.5, %v2935_v54 }
0x12b2   : > { %v2948_v57 = vmul.f32 %v2946_v55, %v2940_v50 }
0x12b3   : > { %v2947_v58 = vmul.f32 %v2945_v56, %v2935_v54 }
0x12b4   : > { %v2950_v59 = vmul.f32 %v2948_v57, %v2940_v50 }
0x12b5   : > { %v2949_v1 = vmul.f32 %v2947_v58, %v2935_v54 }
0x12b6   : > { %v2952_v0 = vadd.f32 %v2950_v59, %v2940_v50 }
0x12b7   : > { %v2951_v61 = vadd.f32 %v2949_v1, %v2935_v54 }
0x12b8   : > { %v2954_v62 = vmul.f32 0.7978846, %v2952_v0 }
0x12b9   : > { %v2953_v2 = vmul.f32 0.7978846, %v2951_v61 }
0x12ba   : > { %3886 = vtanh.f32 %v2954_v62 }
0x12bb   : > { %3888 = vtanh.f32 %v2953_v2 }
0x12c4   : > { %v3887_v3 = vpop.eup %3886 }
0x12c5   : > { %v3889_v4 = vpop.eup %3888  ;;  %v2958_v5 = vadd.f32 1.0, %v3887_v3 }
0x12c6   : > { %v2957_v7 = vadd.f32 1.0, %v3889_v4 }
0x12c7   : > { %v2960_v63 = vmul.f32 %v2958_v5, %v2944_v8 }
0x12c8   : > { %v2959_v35 = vmul.f32 %v2957_v7, %v2943_v6 }
0x12ca   : > { %3653 = vmatprep.mubr.f32.mxu0 %v2959_v35 }
0x12cb   : > { %3654 = vmatmul.mubr.f32.vlgmr.msra.gmra.mrb[16].mxu0 %v2960_v63 }
0x139e   : > { %v3655_v10 = vpop.f32.mrb[16].mxu0 }
0x139f   : > { %v3056_v11 = vadd.f32 %v3655_v10, %v3257_v9  ;;  %v3050_v12 = vpop.f32.mrb[17].mxu0 }
0x13a0   : > { %v3051_v13 = vadd.f32 %v3257_v9, %v3050_v12 }
0x13a1   : > { %v3060_v14 = vadd.f32 %v3056_v11, %v4368_v52 }
0x13a2   : > { %v3059_v40 = vadd.f32 %v3051_v13, %v4370_v53 }
0x13a3   : > { %3062 = vst.msk [vmem:[%s575_s19 + $0x8] sm:$0xff] %vm580_vm0, %v3060_v14 }
0x13a4   : > { %3061 = vst.msk [vmem:[%s575_s19] sm:$0xff] %vm580_vm0, %v3059_v40 }
0x13a5 PF: > { %s28_s27 = sadd.s32 1, %s3896_s27  }
0x13a6   : > { %p25_p4 = scmp.ge.s32.totalorder %s28_s27, 4  }
0x13a8   :  { %27 = sbr.rel (!%p25_p4) target bundleno = 4 (0x4), region = 146 }

// kernel: forward.13
= control target key start
LH: loop header
LB: loop body
LE: loop exit
PB: predicated region body
PF: predicated region fallthrough
CT: control target
= control target key end

     0   :  { %s7268_s11 = smov 0   ;;  %s9045_s0 = inlined_call_operand.vmem [shape: f32[2,32,16], index: 0, kind: input, shape index: {}]   ;;  %s9046_s1 = inlined_call_operand.vmem [shape: f32[32,1], index: 1, kind: input, shape index: {}]   ;;  %s9047_s2 = inlined_call_operand.vmem [shape: f32[32,1], index: 2, kind: input, shape index: {}]   ;;  %s9048_s3 = inlined_call_operand.vmem [shape: f32[9,16,16], index: 3, kind: input, shape index: {}]   ;;  %s9049_s4 = inlined_call_operand.vmem [shape: f32[9,256,32], index: 4, kind: input, shape index: {}]   ;;  %s9050_s5 = inlined_call_operand.vmem [shape: f32[256,1], index: 5, kind: input, shape index: {}]   ;;  %s9051_s6 = inlined_call_operand.vmem [shape: f32[16,256], index: 6, kind: input, shape index: {}]   ;;  %s9052_s7 = inlined_call_operand.vmem [shape: f32[1,256], index: 7, kind: input, shape index: {}]   ;;  %s9053_s8 = inlined_call_operand.<no memory space> [shape: f32[1,1], index: 8, kind: input, shape index: {}]   ;;  %s9054_s9 = inlined_call_operand.vmem [shape: f32[2,1,256], index: 9, kind: output, shape index: {}]  }
   0x1   :  { %v14_v0 = vstv %s9053_s8 }
   0x2   :  { %15 = vst [vmem:[#allocation2] sm:$0x1] %v14_v0 }
   0x3 LB: > { %s5164_s12 = sadd.s32 4294967295, %s7210_s11   ;;  %p5168_p0 = scmp.ge.s32.totalorder %s7210_s11, 1  ;;  %s7210_s11 = sphi %s7268_s11, %s21_s11  }
   0x4   : > { %p289_p1 = scmp.lt.s32.totalorder %s7210_s11, 3 }
   0x6   : > { %p290_p2 = pnand %p5168_p0, %p289_p1 }
   0x8   : > { %293 = sbr.rel (%p290_p2) target bundleno = 2023 (0x7e7), region = 56 }
   0xf   : > { %v409_v1 = vld [vmem:[%s9047_s2] sm:$0xff]  ;;  %p324_p3 = scmp.lt.s32.totalorder %s5164_s12, 1  ;;  %v7212_v3 = vmov 0   ;;  %v410_v4 = vld [vmem:[%s9047_s2 + $0x8] sm:$0xff]  ;;  %v384_v6 = vld [vmem:[%s9046_s1 + $0x18] sm:$0xff]  ;;  %vm337_vm0 = vcmask 130048  }
  0x10   : > { %v381_v2 = vld [vmem:[%s9046_s1] sm:$0xff]  ;;  %7193 = vset.pattern.permute.xlu1 %v7212_v3  ;;  %7192 = vset.pattern.permute.xlu0 %v7212_v3  ;;  %v382_v5 = vld [vmem:[%s9046_s1 + $0x8] sm:$0xff]  ;;  %v383_v7 = vld [vmem:[%s9046_s1 + $0x10] sm:$0xff]  ;;  %vm689_vm1 = vcmask 261120  }
  0x11   : > { %415 = vperm.xlu1 %7193, %v409_v1   ;;  %387 = vperm.xlu0 %7192, %v381_v2   ;;  %s9139_s12 = smov (!%p324_p3, %s5164_s12), 1  ;;  %v412_v8 = vld [vmem:[%s9047_s2 + $0x18] sm:$0xff]  ;;  %v411_v9 = vld [vmem:[%s9047_s2 + $0x10] sm:$0xff]  ;;  %v4667_v11 = vld [vmem:[%s9050_s5 + $0x88] sm:$0xff] }
  0x12   : > { %s5773_s24 = sshll.u32 %s9139_s12, 5  ;;  %v4666_v12 = vld [vmem:[%s9050_s5 + $0x80] sm:$0xff]  ;;  %v438_v17 = vld [vmem:[%s9048_s3 + $0x8] sm:$0xff]  ;;  %v5176_v18 = vld [vmem:[%s9048_s3 + $0x10] sm:$0xff]  ;;  %s5171_s18 = sshll.u32 %s9139_s12, 1 }
  0x13   : > { %s328_s27 = scalar_lea.vmem %s9045_s0, %s5773_s24  ;;  %v437_v16 = vld [vmem:[%s9048_s3] sm:$0xff]  ;;  %v5177_v21 = vld [vmem:[%s9048_s3 + $0x18] sm:$0xff]  ;;  %v4651_v24 = vld [vmem:[%s9050_s5 + $0x8] sm:$0xff]  ;;  %s332_s21 = scalar_lea.vmem %s9054_s9, %s5171_s18 }
  0x14   : > { %v7306_v10 = vld [vmem:[%s328_s27] sm:$0xff]  ;;  %v7314_v13 = vld [vmem:[%s328_s27 + $0x8] sm:$0xff]  ;;  %v7329_v19 = vld [vmem:[%s328_s27 + $0x10] sm:$0xff]  ;;  %v6781_v20 = vpack.c.bf16 %v438_v17, %v437_v16  ;;  %v6785_v22 = vpack.c.bf16 %v5177_v21, %v5176_v18 }
  0x15   : > { %420 = vperm.xlu1 %7193, %v410_v4   ;;  %392 = vperm.xlu0 %7192, %v382_v5   ;;  %v338_v14 = vsel %vm337_vm0, %v7306_v10, 0.0  ;;  %v339_v15 = vsel %vm337_vm0, %v7314_v13, 0.0  ;;  %v4650_v25 = vld [vmem:[%s9050_s5] sm:$0xff]  ;;  %v341_v26 = vsel %vm337_vm0, %v7329_v19, 0.0  ;;  %v7342_v27 = vld [vmem:[%s328_s27 + $0x18] sm:$0xff]  ;;  %v4668_v30 = vld [vmem:[%s9050_s5 + $0x90] sm:$0xff] }
  0x16   : > { %v340_v23 = vadd.f32 %v339_v15, %v338_v14  ;;  %6782 = vmatprep.subr.bf16.mxu0 %v6781_v20  ;;  %6786 = vmatprep.subr.bf16.mxu1 %v6785_v22  ;;  %v4669_v29 = vld [vmem:[%s9050_s5 + $0x98] sm:$0xff]  ;;  %v343_v31 = vsel %vm337_vm0, %v7342_v27, 0.0  ;;  %v4652_v34 = vld [vmem:[%s9050_s5 + $0x10] sm:$0xff]  ;;  %v4671_v36 = vld [vmem:[%s9050_s5 + $0xa8] sm:$0xff] }
  0x17   : > { %6784 = vmatpush3.bf16.msra.mxu0 %v6781_v20  ;;  %6788 = vmatpush3.bf16.msra.mxu1 %v6785_v22  ;;  %v4653_v33 = vld [vmem:[%s9050_s5 + $0x18] sm:$0xff]  ;;  %v4670_v37 = vld [vmem:[%s9050_s5 + $0xa0] sm:$0xff]  ;;  %v4655_v39 = vld [vmem:[%s9050_s5 + $0x28] sm:$0xff] }
  0x18   : > { %v342_v28 = vadd.f32 %v341_v26, %v340_v23  ;;  %v4654_v40 = vld [vmem:[%s9050_s5 + $0x20] sm:$0xff]  ;;  %v4673_v42 = vld [vmem:[%s9050_s5 + $0xb8] sm:$0xff]  ;;  %v4672_v43 = vld [vmem:[%s9050_s5 + $0xb0] sm:$0xff] }
  0x19   : > { %402 = vperm.xlu1 %7193, %v384_v6   ;;  %397 = vperm.xlu0 %7192, %v383_v7   ;;  %v4657_v45 = vld [vmem:[%s9050_s5 + $0x38] sm:$0xff]  ;;  %v4656_v46 = vld [vmem:[%s9050_s5 + $0x30] sm:$0xff]  ;;  %v4675_v48 = vld [vmem:[%s9050_s5 + $0xc8] sm:$0xff] }
  0x1a   : > { %v344_v32 = vadd.f32 %v343_v31, %v342_v28  ;;  %v4674_v49 = vld [vmem:[%s9050_s5 + $0xc0] sm:$0xff]  ;;  %v4659_v51 = vld [vmem:[%s9050_s5 + $0x48] sm:$0xff]  ;;  %v4677_v54 = vld [vmem:[%s9050_s5 + $0xd8] sm:$0xff] }
  0x1b   : > { %v4658_v52 = vld [vmem:[%s9050_s5 + $0x40] sm:$0xff]  ;;  %v4676_v55 = vld [vmem:[%s9050_s5 + $0xd0] sm:$0xff]  ;;  %v4661_v58 = vld [vmem:[%s9050_s5 + $0x58] sm:$0xff] }
  0x1c   : > { %v345_v35 = vrot.slane %v344_v32, 4  ;;  %v4660_v59 = vld [vmem:[%s9050_s5 + $0x50] sm:$0xff]  ;;  %v4679_v63 = vld [vmem:[%s9050_s5 + $0xe8] sm:$0xff]  ;;  %v4678_v0 = vld [vmem:[%s9050_s5 + $0xe0] sm:$0xff] }
  0x1d   : > { %430 = vperm.xlu1 %7193, %v412_v8   ;;  %425 = vperm.xlu0 %7192, %v411_v9   ;;  %v4663_v5 = vld [vmem:[%s9050_s5 + $0x68] sm:$0xff]  ;;  %v4662_v6 = vld [vmem:[%s9050_s5 + $0x60] sm:$0xff]  ;;  %v4665_v14 = vld [vmem:[%s9050_s5 + $0x78] sm:$0xff] }
  0x1e   : > { %v346_v38 = vadd.f32 %v345_v35, %v344_v32  ;;  %v4664_v15 = vld [vmem:[%s9050_s5 + $0x70] sm:$0xff]  ;;  %v4992_v17 = vld [vmem:[#allocation2] sm:$0x1] }
  0x20   : > { %v347_v41 = vrot.slane %v346_v38, 2 }
  0x21   : > { %4769 = vperm.xlu1 %7193, %v4667_v11   ;;  %4764 = vperm.xlu0 %7192, %v4666_v12   ;;  %v4680_v11 = vld [vmem:[%s9050_s5 + $0xf0] sm:$0xff] }
  0x22   : > { %v348_v44 = vadd.f32 %v347_v41, %v346_v38 }
  0x24   : > { %v349_v47 = vrot.slane %v348_v44, 1 }
  0x25   : > { %4689 = vperm.xlu1 %7193, %v4651_v24   ;;  %4684 = vperm.xlu0 %7192, %v4650_v25  }
  0x26   : > { %v350_v50 = vadd.f32 %v349_v47, %v348_v44  ;;  %v5182_v47 = vld [vmem:[%s9049_s4 + $0x100] sm:$0xff] }
  0x28   : > { %v352_v53 = vmul.f32 0.03125, %v350_v50 }
  0x29   : > { %4779 = vperm.xlu1 %7193, %v4669_v29   ;;  %4774 = vperm.xlu0 %7192, %v4668_v30  }
  0x2a   : > { %v353_v56 = vsub.f32 %v7306_v10, %v352_v53  ;;  %v354_v57 = vsub.f32 %v7314_v13, %v352_v53  ;;  %v355_v60 = vsub.f32 %v7329_v19, %v352_v53  ;;  %v356_v1 = vsub.f32 %v7342_v27, %v352_v53  ;;  %v4681_v10 = vld [vmem:[%s9050_s5 + $0xf8] sm:$0xff] }
  0x2c   : > { %v357_v61 = vmul.f32 %v353_v56, %v353_v56  ;;  %v358_v62 = vmul.f32 %v354_v57, %v354_v57  ;;  %v359_v2 = vmul.f32 %v355_v60, %v355_v60  ;;  %v360_v8 = vmul.f32 %v356_v1, %v356_v1 }
  0x2d   : > { %4699 = vperm.xlu1 %7193, %v4653_v33   ;;  %4694 = vperm.xlu0 %7192, %v4652_v34  }
  0x2e   : > { %v361_v3 = vsel %vm337_vm0, %v357_v61, 0.0  ;;  %v362_v4 = vsel %vm337_vm0, %v358_v62, 0.0  ;;  %v364_v9 = vsel %vm337_vm0, %v359_v2, 0.0  ;;  %v366_v13 = vsel %vm337_vm0, %v360_v8, 0.0  ;;  %v5184_v61 = vld [vmem:[%s9049_s4 + $0x110] sm:$0xff]  ;;  %v5278_v62 = vld [vmem:[%s9048_s3 + $0x20] sm:$0xff] }
  0x2f   : > { %v363_v7 = vadd.f32 %v362_v4, %v361_v3  ;;  %v5187_v3 = vld [vmem:[%s9049_s4 + $0x128] sm:$0xff]  ;;  %v5188_v4 = vld [vmem:[%s9049_s4 + $0x130] sm:$0xff] }
  0x30   : > { %v5192_v8 = vld [vmem:[%s9049_s4 + $0x150] sm:$0xff] }
  0x31   : > { %4789 = vperm.xlu1 %7193, %v4671_v36   ;;  %4784 = vperm.xlu0 %7192, %v4670_v37   ;;  %v365_v12 = vadd.f32 %v364_v9, %v363_v7  ;;  %v5191_v7 = vld [vmem:[%s9049_s4 + $0x148] sm:$0xff]  ;;  %v5193_v9 = vld [vmem:[%s9049_s4 + $0x158] sm:$0xff] }
  0x33   : > { %v367_v16 = vadd.f32 %v366_v13, %v365_v12  ;;  %v5196_v12 = vld [vmem:[%s9049_s4 + $0x170] sm:$0xff]  ;;  %v5197_v13 = vld [vmem:[%s9049_s4 + $0x178] sm:$0xff] }
  0x35   : > { %4709 = vperm.xlu1 %7193, %v4655_v39   ;;  %4704 = vperm.xlu0 %7192, %v4654_v40   ;;  %v368_v18 = vrot.slane %v367_v16, 4 }
  0x37   : > { %v369_v19 = vadd.f32 %v368_v18, %v367_v16  ;;  %v5200_v16 = vld [vmem:[%s9049_s4 + $0x190] sm:$0xff]  ;;  %v5202_v18 = vld [vmem:[%s9049_s4 + $0x1a0] sm:$0xff] }
  0x39   : > { %4799 = vperm.xlu1 %7193, %v4673_v42   ;;  %4794 = vperm.xlu0 %7192, %v4672_v43   ;;  %v370_v20 = vrot.slane %v369_v19, 2 }
  0x3b   : > { %v371_v21 = vadd.f32 %v370_v20, %v369_v19  ;;  %v5203_v19 = vld [vmem:[%s9049_s4 + $0x1a8] sm:$0xff]  ;;  %v5204_v20 = vld [vmem:[%s9049_s4 + $0x1b0] sm:$0xff] }
  0x3d   : > { %4719 = vperm.xlu1 %7193, %v4657_v45   ;;  %4714 = vperm.xlu0 %7192, %v4656_v46   ;;  %v372_v22 = vrot.slane %v371_v21, 1 }
  0x3f   : > { %v373_v23 = vadd.f32 %v372_v22, %v371_v21  ;;  %v5205_v21 = vld [vmem:[%s9049_s4 + $0x1b8] sm:$0xff]  ;;  %v5206_v22 = vld [vmem:[%s9049_s4 + $0x1c0] sm:$0xff] }
  0x41   : > { %4809 = vperm.xlu1 %7193, %v4675_v48   ;;  %4804 = vperm.xlu0 %7192, %v4674_v49   ;;  %v374_v24 = vmul.f32 0.03125, %v373_v23  ;;  %v5207_v23 = vld [vmem:[%s9049_s4 + $0x1c8] sm:$0xff] }
  0x43   : > { %v375_v25 = vadd.f32 1e-05, %v374_v24  ;;  %v5208_v24 = vld [vmem:[%s9049_s4 + $0x1d0] sm:$0xff] }
  0x45   : > { %4729 = vperm.xlu1 %7193, %v4659_v51   ;;  %4724 = vperm.xlu0 %7192, %v4658_v52   ;;  %7194 = vrsqrt.f32 %v375_v25  ;;  %v5209_v25 = vld [vmem:[%s9049_s4 + $0x1d8] sm:$0xff] }
  0x49   : > { %4819 = vperm.xlu1 %7193, %v4677_v54   ;;  %4814 = vperm.xlu0 %7192, %v4676_v55  }
  0x4d   : > { %4739 = vperm.xlu1 %7193, %v4661_v58   ;;  %4734 = vperm.xlu0 %7192, %v4660_v59  }
  0x4f   : > { %v7195_v26 = vpop.eup %7194 }
  0x50   : > { %v377_v27 = vmul.f32 %v7195_v26, %v353_v56  ;;  %v378_v31 = vmul.f32 %v7195_v26, %v354_v57  ;;  %v380_v37 = vmul.f32 %v7195_v26, %v356_v1  ;;  %v379_v38 = vmul.f32 %v7195_v26, %v355_v60  ;;  %v5183_v60 = vld [vmem:[%s9049_s4 + $0x108] sm:$0xff]  ;;  %v5186_v1 = vld [vmem:[%s9049_s4 + $0x120] sm:$0xff] }
  0x51   : > { %4829 = vperm.xlu1 %7193, %v4679_v63   ;;  %4824 = vperm.xlu0 %7192, %v4678_v0   ;;  %v5279_v63 = vld [vmem:[%s9048_s3 + $0x28] sm:$0xff]  ;;  %v5185_v0 = vld [vmem:[%s9049_s4 + $0x118] sm:$0xff]  ;;  %v5210_v26 = vld [vmem:[%s9049_s4 + $0x1e0] sm:$0xff] }
  0x52   : > { %v7486_v2 = vpack.c.bf16 %v5279_v63, %v5278_v62  ;;  %v564_v62 = vld [vmem:[%s9049_s4 + $0xe0] sm:$0xff]  ;;  %v565_v63 = vld [vmem:[%s9049_s4 + $0xe8] sm:$0xff] }
  0x55   : > { %4749 = vperm.xlu1 %7193, %v4663_v5   ;;  %4744 = vperm.xlu0 %7192, %v4662_v6   ;;  %v5189_v5 = vld [vmem:[%s9049_s4 + $0x138] sm:$0xff]  ;;  %v5190_v6 = vld [vmem:[%s9049_s4 + $0x140] sm:$0xff] }
  0x59   : > { %4839 = vperm.xlu1 %7193, %v4681_v10   ;;  %4834 = vperm.xlu0 %7192, %v4680_v11   ;;  %v5194_v10 = vld [vmem:[%s9049_s4 + $0x160] sm:$0xff]  ;;  %v5195_v11 = vld [vmem:[%s9049_s4 + $0x168] sm:$0xff] }
  0x5d   : > { %4759 = vperm.xlu1 %7193, %v4665_v14   ;;  %4754 = vperm.xlu0 %7192, %v4664_v15   ;;  %v5198_v14 = vld [vmem:[%s9049_s4 + $0x180] sm:$0xff]  ;;  %v5199_v15 = vld [vmem:[%s9049_s4 + $0x188] sm:$0xff] }
  0x61   : > { %4995 = vperm.xlu0 %7192, %v4992_v17   ;;  %v5201_v17 = vld [vmem:[%s9049_s4 + $0x198] sm:$0xff] }
  0x90   : > { %v416_v28 = vpop.permute.xlu1 %415  ;;  %v388_v29 = vpop.permute.xlu0 %387 }
  0x91   : > { %v405_v30 = vmul.f32 %v388_v29, %v377_v27  ;;  %v5211_v27 = vld [vmem:[%s9049_s4 + $0x1e8] sm:$0xff]  ;;  %v5213_v29 = vld [vmem:[%s9049_s4 + $0x1f8] sm:$0xff] }
  0x93   : > { %v7438_v32 = vadd.f32 %v416_v28, %v405_v30  ;;  %v5212_v28 = vld [vmem:[%s9049_s4 + $0x1f0] sm:$0xff]  ;;  %v536_v30 = vld [vmem:[%s9049_s4] sm:$0xff] }
  0x94   : > { %v421_v33 = vpop.permute.xlu1 %420  ;;  %v393_v34 = vpop.permute.xlu0 %392 }
  0x95   : > { %v406_v35 = vmul.f32 %v393_v34, %v378_v31  ;;  %6191 = vmatprep.mubr.msk.f32.mxu0 %vm337_vm0, %v7438_v32  ;;  %6201 = vmatprep.mubr.msk.f32.mxu1 %vm337_vm0, %v7438_v32  ;;  %v537_v31 = vld [vmem:[%s9049_s4 + $0x8] sm:$0xff]  ;;  %v539_v34 = vld [vmem:[%s9049_s4 + $0x18] sm:$0xff] }
  0x97   : > { %v7444_v36 = vadd.f32 %v421_v33, %v406_v35  ;;  %v538_v33 = vld [vmem:[%s9049_s4 + $0x10] sm:$0xff]  ;;  %v540_v35 = vld [vmem:[%s9049_s4 + $0x20] sm:$0xff] }
  0x98   : > { %v403_v39 = vpop.permute.xlu1 %402  ;;  %v398_v40 = vpop.permute.xlu0 %397 }
  0x99   : > { %6192 = vmatmul.mubr.msk.f32.vlgmr.msra.gmra.mrb[0].mxu0 %vm337_vm0, %v7444_v36  ;;  %6202 = vmatmul.mubr.msk.f32.vlgmr.msra.gmra.mrb[0].mxu1 %vm337_vm0, %v7444_v36  ;;  %v408_v41 = vmul.f32 %v403_v39, %v380_v37  ;;  %v407_v42 = vmul.f32 %v398_v40, %v379_v38  ;;  %v541_v37 = vld [vmem:[%s9049_s4 + $0x28] sm:$0xff]  ;;  %v542_v38 = vld [vmem:[%s9049_s4 + $0x30] sm:$0xff]  ;;  %v543_v39 = vld [vmem:[%s9049_s4 + $0x38] sm:$0xff] }
  0x9a   : > { %v544_v40 = vld [vmem:[%s9049_s4 + $0x40] sm:$0xff] }
  0x9c   : > { %v431_v43 = vpop.permute.xlu1 %430  ;;  %v426_v44 = vpop.permute.xlu0 %425 }
  0x9d   : > { %v7450_v45 = vadd.f32 %v431_v43, %v408_v41  ;;  %v7452_v46 = vadd.f32 %v426_v44, %v407_v42  ;;  %v545_v41 = vld [vmem:[%s9049_s4 + $0x48] sm:$0xff]  ;;  %v546_v42 = vld [vmem:[%s9049_s4 + $0x50] sm:$0xff]  ;;  %v547_v43 = vld [vmem:[%s9049_s4 + $0x58] sm:$0xff] }
  0x9e   : > { %v548_v44 = vld [vmem:[%s9049_s4 + $0x60] sm:$0xff] }
  0x9f   : > { %6194 = vmatprep.mubr.msk.f32.mxu0 %vm337_vm0, %v7452_v46  ;;  %6204 = vmatprep.mubr.msk.f32.mxu1 %vm337_vm0, %v7452_v46 }
  0xa0   : > { %6195 = vmatmul.mubr.msk.f32.gmra.mrb[2].mxu0 %vm337_vm0, %v7450_v45  ;;  %6205 = vmatmul.mubr.msk.f32.gmra.mrb[2].mxu1 %vm337_vm0, %v7450_v45 }
  0xa1   : > { %6215 = vmatprep.mubr.msk.f32.mxu1 %vm689_vm1, %v5182_v47  ;;  %v549_v47 = vld [vmem:[%s9049_s4 + $0x68] sm:$0xff] }
 0x16c   : > { %v6193_v48 = vpop.f32.mrb[0].mxu0  ;;  %v6203_v49 = vpop.f32.mrb[0].mxu1 }
 0x16d   : > { %v517_v50 = vpop.f32.mrb[1].mxu0  ;;  %v637_v51 = vpop.f32.mrb[1].mxu1 }
 0x16e   : > { %v6797_v52 = vpack.c.bf16 %v6193_v48, %v517_v50  ;;  %v6789_v53 = vpack.c.bf16 %v6203_v49, %v637_v51  ;;  %v550_v48 = vld [vmem:[%s9049_s4 + $0x70] sm:$0xff]  ;;  %v551_v49 = vld [vmem:[%s9049_s4 + $0x78] sm:$0xff]  ;;  %v552_v50 = vld [vmem:[%s9049_s4 + $0x80] sm:$0xff] }
 0x16f   : > { %v553_v51 = vld [vmem:[%s9049_s4 + $0x88] sm:$0xff] }
 0x170   : > { %6790 = vmatprep.subr.bf16.mxu1 %v6789_v53 }
 0x171   : > { %6792 = vmatpush3.bf16.msra.mxu1 %v6789_v53  ;;  %v555_v53 = vld [vmem:[%s9049_s4 + $0x98] sm:$0xff] }
 0x173   : > { %v6196_v54 = vpop.f32.mrb[2].mxu0  ;;  %v6206_v55 = vpop.f32.mrb[2].mxu1 }
 0x174   : > { %v527_v56 = vpop.f32.mrb[3].mxu0  ;;  %v647_v57 = vpop.f32.mrb[3].mxu1 }
 0x175   : > { %v6801_v58 = vpack.c.bf16 %v6196_v54, %v527_v56  ;;  %v6793_v59 = vpack.c.bf16 %v6206_v55, %v647_v57  ;;  %v556_v54 = vld [vmem:[%s9049_s4 + $0xa0] sm:$0xff]  ;;  %v557_v55 = vld [vmem:[%s9049_s4 + $0xa8] sm:$0xff]  ;;  %v558_v56 = vld [vmem:[%s9049_s4 + $0xb0] sm:$0xff] }
 0x176   : > { %v559_v57 = vld [vmem:[%s9049_s4 + $0xb8] sm:$0xff] }
 0x177   : > { %6794 = vmatprep.subr.bf16.mxu1 %v6793_v59 }
 0x178   : > { %6796 = vmatpush3.bf16.msra.mxu1 %v6793_v59  ;;  %v561_v59 = vld [vmem:[%s9049_s4 + $0xc8] sm:$0xff] }
 0x179   : > { %6798 = vmatprep.subr.bf16.mxu1 %v6797_v52 }
 0x17b   : > { %6216 = vmatmul.mubr.msk.f32.vlgmr.msra.gmra.mrb[4].mxu1 %vm689_vm1, %v5183_v60  ;;  %v562_v60 = vld [vmem:[%s9049_s4 + $0xd0] sm:$0xff] }
 0x17c   : > { %6800 = vmatpush3.bf16.msra.mxu1 %v6797_v52  ;;  %6218 = vmatprep.mubr.msk.f32.mxu1 %vm689_vm1, %v5184_v61  ;;  %v554_v52 = vld [vmem:[%s9049_s4 + $0x90] sm:$0xff]  ;;  %v563_v61 = vld [vmem:[%s9049_s4 + $0xd8] sm:$0xff] }
 0x17d   : > { %6802 = vmatprep.subr.bf16.mxu1 %v6801_v58 }
 0x17f   : > { %6219 = vmatmul.mubr.msk.f32.gmra.mrb[6].mxu1 %vm689_vm1, %v5185_v0  ;;  %v566_v0 = vld [vmem:[%s9049_s4 + $0xf0] sm:$0xff] }
 0x180   : > { %6804 = vmatpush3.bf16.msra.mxu1 %v6801_v58  ;;  %6221 = vmatprep.mubr.msk.f32.mxu1 %vm689_vm1, %v5186_v1  ;;  %v560_v58 = vld [vmem:[%s9049_s4 + $0xc0] sm:$0xff]  ;;  %v567_v1 = vld [vmem:[%s9049_s4 + $0xf8] sm:$0xff] }
 0x181   : > { %6806 = vmatprep.subr.bf16.mxu1 %v7486_v2 }
 0x183   : > { %6222 = vmatmul.mubr.msk.f32.gmra.mrb[8].mxu1 %vm689_vm1, %v5187_v3 }
 0x184   : > { %6224 = vmatprep.mubr.msk.f32.mxu1 %vm689_vm1, %v5188_v4 }
 0x187   : > { %6225 = vmatmul.mubr.msk.f32.gmra.mrb[10].mxu1 %vm689_vm1, %v5189_v5 }
 0x188   : > { %6227 = vmatprep.mubr.msk.f32.mxu1 %vm689_vm1, %v5190_v6  ;;  %v5348_v6 = vld [vmem:[%s9048_s3 + $0x30] sm:$0xff] }
 0x18b   : > { %6228 = vmatmul.mubr.msk.f32.gmra.mrb[12].mxu1 %vm689_vm1, %v5191_v7  ;;  %v5349_v7 = vld [vmem:[%s9048_s3 + $0x38] sm:$0xff] }
 0x18c   : > { %6230 = vmatprep.mubr.msk.f32.mxu1 %vm689_vm1, %v5192_v8 }
 0x18f   : > { %6231 = vmatmul.mubr.msk.f32.gmra.mrb[14].mxu1 %vm689_vm1, %v5193_v9 }
 0x190   : > { %6233 = vmatprep.mubr.msk.f32.mxu1 %vm689_vm1, %v5194_v10 }
 0x193   : > { %6234 = vmatmul.mubr.msk.f32.gmra.mrb[16].mxu1 %vm689_vm1, %v5195_v11  ;;  %v6817_v11 = vpack.c.bf16 %v5349_v7, %v5348_v6 }
 0x194   : > { %6236 = vmatprep.mubr.msk.f32.mxu1 %vm689_vm1, %v5196_v12  ;;  %v5418_v12 = vld [vmem:[%s9048_s3 + $0x40] sm:$0xff] }
 0x197   : > { %6237 = vmatmul.mubr.msk.f32.gmra.mrb[18].mxu1 %vm689_vm1, %v5197_v13  ;;  %v5419_v13 = vld [vmem:[%s9048_s3 + $0x48] sm:$0xff] }
 0x198   : > { %6239 = vmatprep.mubr.msk.f32.mxu1 %vm689_vm1, %v5198_v14  ;;  %v5285_v14 = vld [vmem:[%s9049_s4 + $0x208] sm:$0xff] }
 0x19b   : > { %6240 = vmatmul.mubr.msk.f32.gmra.mrb[20].mxu1 %vm689_vm1, %v5199_v15  ;;  %v5286_v15 = vld [vmem:[%s9049_s4 + $0x210] sm:$0xff] }
 0x19c   : > { %6242 = vmatprep.mubr.msk.f32.mxu1 %vm689_vm1, %v5200_v16  ;;  %v7758_v16 = vpack.c.bf16 %v5419_v13, %v5418_v12 }
 0x19f   : > { %6243 = vmatmul.mubr.msk.f32.gmra.mrb[22].mxu1 %vm689_vm1, %v5201_v17  ;;  %v5287_v17 = vld [vmem:[%s9049_s4 + $0x218] sm:$0xff] }
 0x1a0   : > { %6245 = vmatprep.mubr.msk.f32.mxu1 %vm689_vm1, %v5202_v18  ;;  %v5288_v18 = vld [vmem:[%s9049_s4 + $0x220] sm:$0xff] }
 0x1a3   : > { %6246 = vmatmul.mubr.msk.f32.gmra.mrb[24].mxu1 %vm689_vm1, %v5203_v19  ;;  %v5289_v19 = vld [vmem:[%s9049_s4 + $0x228] sm:$0xff] }
 0x1a4   : > { %6248 = vmatprep.mubr.msk.f32.mxu1 %vm689_vm1, %v5204_v20  ;;  %v5290_v20 = vld [vmem:[%s9049_s4 + $0x230] sm:$0xff] }
 0x1a7   : > { %6249 = vmatmul.mubr.msk.f32.gmra.mrb[26].mxu1 %vm689_vm1, %v5205_v21  ;;  %v5291_v21 = vld [vmem:[%s9049_s4 + $0x238] sm:$0xff] }
 0x1a8   : > { %6251 = vmatprep.mubr.msk.f32.mxu1 %vm689_vm1, %v5206_v22  ;;  %v5292_v22 = vld [vmem:[%s9049_s4 + $0x240] sm:$0xff] }
 0x1ab   : > { %6252 = vmatmul.mubr.msk.f32.gmra.mrb[28].mxu1 %vm689_vm1, %v5207_v23  ;;  %v5293_v23 = vld [vmem:[%s9049_s4 + $0x248] sm:$0xff] }
 0x1ac   : > { %6254 = vmatprep.mubr.msk.f32.mxu1 %vm689_vm1, %v5208_v24  ;;  %v5294_v24 = vld [vmem:[%s9049_s4 + $0x250] sm:$0xff] }
 0x1af   : > { %6255 = vmatmul.mubr.msk.f32.gmra.mrb[30].mxu1 %vm689_vm1, %v5209_v25  ;;  %v5295_v25 = vld [vmem:[%s9049_s4 + $0x258] sm:$0xff] }
 0x1b0   : > { %6257 = vmatprep.mubr.msk.f32.mxu1 %vm689_vm1, %v5210_v26  ;;  %v5296_v26 = vld [vmem:[%s9049_s4 + $0x260] sm:$0xff] }
 0x1b3   : > { %6258 = vmatmul.mubr.msk.f32.gmra.mrb[32].mxu1 %vm689_vm1, %v5211_v27  ;;  %v5297_v27 = vld [vmem:[%s9049_s4 + $0x268] sm:$0xff] }
 0x1b4   : > { %6260 = vmatprep.mubr.msk.f32.mxu1 %vm689_vm1, %v5212_v28  ;;  %v5298_v28 = vld [vmem:[%s9049_s4 + $0x270] sm:$0xff] }
 0x1b7   : > { %6261 = vmatmul.mubr.msk.f32.gmra.mrb[34].mxu1 %vm689_vm1, %v5213_v29  ;;  %v5299_v29 = vld [vmem:[%s9049_s4 + $0x278] sm:$0xff] }
 0x1b8   : > { %6271 = vmatprep.mubr.msk.f32.mxu1 %vm689_vm1, %v536_v30  ;;  %v5300_v30 = vld [vmem:[%s9049_s4 + $0x280] sm:$0xff] }
 0x1bb   : > { %6272 = vmatmul.mubr.msk.f32.vlgmr.msra.gmra.mrb[4].mxu1 %vm689_vm1, %v537_v31  ;;  %v5301_v31 = vld [vmem:[%s9049_s4 + $0x288] sm:$0xff] }
 0x1bc   : > { %6274 = vmatprep.mubr.msk.f32.mxu1 %vm689_vm1, %v538_v33  ;;  %6808 = vmatpush3.bf16.msra.mxu1 %v7486_v2  ;;  %v5284_v2 = vld [vmem:[%s9049_s4 + $0x200] sm:$0xff]  ;;  %v5302_v33 = vld [vmem:[%s9049_s4 + $0x290] sm:$0xff] }
 0x1bf   : > { %6275 = vmatmul.mubr.msk.f32.gmra.mrb[6].mxu1 %vm689_vm1, %v539_v34  ;;  %v5303_v34 = vld [vmem:[%s9049_s4 + $0x298] sm:$0xff] }
 0x1c0   : > { %6277 = vmatprep.mubr.msk.f32.mxu1 %vm689_vm1, %v540_v35  ;;  %v5304_v35 = vld [vmem:[%s9049_s4 + $0x2a0] sm:$0xff] }
 0x1c3   : > { %6278 = vmatmul.mubr.msk.f32.gmra.mrb[8].mxu1 %vm689_vm1, %v541_v37  ;;  %v5305_v37 = vld [vmem:[%s9049_s4 + $0x2a8] sm:$0xff] }
 0x1c4   : > { %6280 = vmatprep.mubr.msk.f32.mxu1 %vm689_vm1, %v542_v38  ;;  %v5306_v38 = vld [vmem:[%s9049_s4 + $0x2b0] sm:$0xff] }
 0x1c7   : > { %6281 = vmatmul.mubr.msk.f32.gmra.mrb[10].mxu1 %vm689_vm1, %v543_v39  ;;  %v5307_v39 = vld [vmem:[%s9049_s4 + $0x2b8] sm:$0xff] }
 0x1c8   : > { %6283 = vmatprep.mubr.msk.f32.mxu1 %vm689_vm1, %v544_v40  ;;  %v5308_v40 = vld [vmem:[%s9049_s4 + $0x2c0] sm:$0xff] }
 0x1cb   : > { %6284 = vmatmul.mubr.msk.f32.gmra.mrb[12].mxu1 %vm689_vm1, %v545_v41  ;;  %v5309_v41 = vld [vmem:[%s9049_s4 + $0x2c8] sm:$0xff] }
 0x1cc   : > { %6286 = vmatprep.mubr.msk.f32.mxu1 %vm689_vm1, %v546_v42  ;;  %v5310_v42 = vld [vmem:[%s9049_s4 + $0x2d0] sm:$0xff] }
 0x1cf   : > { %6287 = vmatmul.mubr.msk.f32.gmra.mrb[14].mxu1 %vm689_vm1, %v547_v43  ;;  %v5311_v43 = vld [vmem:[%s9049_s4 + $0x2d8] sm:$0xff] }
 0x1d0   : > { %6289 = vmatprep.mubr.msk.f32.mxu1 %vm689_vm1, %v548_v44  ;;  %v5312_v44 = vld [vmem:[%s9049_s4 + $0x2e0] sm:$0xff] }
 0x1d3   : > { %6290 = vmatmul.mubr.msk.f32.gmra.mrb[16].mxu1 %vm689_vm1, %v549_v47  ;;  %v5313_v47 = vld [vmem:[%s9049_s4 + $0x2e8] sm:$0xff] }
 0x1d4   : > { %6292 = vmatprep.mubr.msk.f32.mxu1 %vm689_vm1, %v550_v48  ;;  %v5314_v48 = vld [vmem:[%s9049_s4 + $0x2f0] sm:$0xff] }
 0x1d7   : > { %6293 = vmatmul.mubr.msk.f32.gmra.mrb[18].mxu1 %vm689_vm1, %v551_v49  ;;  %v5315_v49 = vld [vmem:[%s9049_s4 + $0x2f8] sm:$0xff] }
 0x1d8   : > { %6295 = vmatprep.mubr.msk.f32.mxu1 %vm689_vm1, %v552_v50  ;;  %v5488_v50 = vld [vmem:[%s9048_s3 + $0x50] sm:$0xff] }
 0x1db   : > { %6296 = vmatmul.mubr.msk.f32.gmra.mrb[20].mxu1 %vm689_vm1, %v553_v51  ;;  %v5489_v51 = vld [vmem:[%s9048_s3 + $0x58] sm:$0xff] }
 0x1dc   : > { %6298 = vmatprep.mubr.msk.f32.mxu1 %vm689_vm1, %v554_v52  ;;  %v6841_v52 = vpack.c.bf16 %v5489_v51, %v5488_v50  ;;  %v5360_v51 = vld [vmem:[%s9049_s4 + $0x330] sm:$0xff] }
 0x1df   : > { %6299 = vmatmul.mubr.msk.f32.gmra.mrb[22].mxu1 %vm689_vm1, %v555_v53  ;;  %v5558_v53 = vld [vmem:[%s9048_s3 + $0x60] sm:$0xff] }
 0x1e0   : > { %6301 = vmatprep.mubr.msk.f32.mxu1 %vm689_vm1, %v556_v54  ;;  %v5559_v54 = vld [vmem:[%s9048_s3 + $0x68] sm:$0xff] }
 0x1e3   : > { %6302 = vmatmul.mubr.msk.f32.gmra.mrb[24].mxu1 %vm689_vm1, %v557_v55  ;;  %v6853_v55 = vpack.c.bf16 %v5559_v54, %v5558_v53  ;;  %v5361_v54 = vld [vmem:[%s9049_s4 + $0x338] sm:$0xff] }
 0x1e4   : > { %6304 = vmatprep.mubr.msk.f32.mxu1 %vm689_vm1, %v558_v56  ;;  %v5628_v56 = vld [vmem:[%s9048_s3 + $0x70] sm:$0xff] }
 0x1e7   : > { %6305 = vmatmul.mubr.msk.f32.gmra.mrb[26].mxu1 %vm689_vm1, %v559_v57  ;;  %v5629_v57 = vld [vmem:[%s9048_s3 + $0x78] sm:$0xff] }
 0x1e8   : > { %6307 = vmatprep.mubr.msk.f32.mxu1 %vm689_vm1, %v560_v58  ;;  %v6865_v58 = vpack.c.bf16 %v5629_v57, %v5628_v56  ;;  %v5362_v56 = vld [vmem:[%s9049_s4 + $0x340] sm:$0xff] }
 0x1eb   : > { %6308 = vmatmul.mubr.msk.f32.gmra.mrb[28].mxu1 %vm689_vm1, %v561_v59  ;;  %v5698_v59 = vld [vmem:[%s9048_s3 + $0x80] sm:$0xff] }
 0x1ec   : > { %6310 = vmatprep.mubr.msk.f32.mxu1 %vm689_vm1, %v562_v60  ;;  %v5699_v60 = vld [vmem:[%s9048_s3 + $0x88] sm:$0xff] }
 0x1ef   : > { %6311 = vmatmul.mubr.msk.f32.gmra.mrb[30].mxu1 %vm689_vm1, %v563_v61  ;;  %v6877_v61 = vpack.c.bf16 %v5699_v60, %v5698_v59  ;;  %v5363_v59 = vld [vmem:[%s9049_s4 + $0x348] sm:$0xff] }
 0x1f0   : > { %6313 = vmatprep.mubr.msk.f32.mxu1 %vm689_vm1, %v564_v62  ;;  %v5354_v62 = vld [vmem:[%s9049_s4 + $0x300] sm:$0xff] }
 0x1f1   : > { %6403 = vmatprep.mubr.msk.f32.mxu0 %vm689_vm1, %v5354_v62 }
 0x1f3   : > { %6314 = vmatmul.mubr.msk.f32.gmra.mrb[32].mxu1 %vm689_vm1, %v565_v63 }
 0x1f4   : > { %6316 = vmatprep.mubr.msk.f32.mxu1 %vm689_vm1, %v566_v0 }
 0x1f7   : > { %6317 = vmatmul.mubr.msk.f32.gmra.mrb[34].mxu1 %vm689_vm1, %v567_v1 }
 0x1f8   : > { %6323 = vmatprep.mubr.msk.f32.mxu1 %vm337_vm0, %v7438_v32 }
 0x1fb   : > { %6324 = vmatmul.mubr.msk.f32.vlgmr.msra.gmra.mrb[36].mxu1 %vm337_vm0, %v7444_v36 }
 0x1fc   : > { %6326 = vmatprep.mubr.msk.f32.mxu1 %vm337_vm0, %v7452_v46 }
 0x1ff   : > { %6327 = vmatmul.mubr.msk.f32.gmra.mrb[38].mxu1 %vm337_vm0, %v7450_v45 }
 0x200   : > { %6337 = vmatprep.mubr.msk.f32.mxu1 %vm689_vm1, %v5284_v2 }
 0x2ce   : > { %v6325_v3 = vpop.f32.mrb[36].mxu1 }
 0x2cf   : > { %v1401_v4 = vpop.f32.mrb[37].mxu1 }
 0x2d0   : > { %v6809_v5 = vpack.c.bf16 %v6325_v3, %v1401_v4 }
 0x2d2   : > { %v6328_v8 = vpop.f32.mrb[38].mxu1  ;;  %6810 = vmatprep.subr.bf16.mxu1 %v6809_v5 }
 0x2d3   : > { %v1411_v9 = vpop.f32.mrb[39].mxu1  ;;  %6812 = vmatpush3.bf16.msra.mxu1 %v6809_v5 }
 0x2d4   : > { %v6813_v10 = vpack.c.bf16 %v6328_v8, %v1411_v9 }
 0x2d6   : > { %6814 = vmatprep.subr.bf16.mxu1 %v6813_v10 }
 0x2d7   : > { %6816 = vmatpush3.bf16.msra.mxu1 %v6813_v10 }
 0x2d8   : > { %6818 = vmatprep.subr.bf16.mxu1 %v6817_v11 }
 0x2da   : > { %6338 = vmatmul.mubr.msk.f32.vlgmr.msra.gmra.mrb[4].mxu1 %vm689_vm1, %v5285_v14 }
 0x2db   : > { %6340 = vmatprep.mubr.msk.f32.mxu1 %vm689_vm1, %v5286_v15  ;;  %6820 = vmatpush3.bf16.msra.mxu1 %v6817_v11 }
 0x2dc   : > { %6830 = vmatprep.subr.bf16.mxu1 %v7758_v16 }
 0x2de   : > { %6341 = vmatmul.mubr.msk.f32.gmra.mrb[6].mxu1 %vm689_vm1, %v5287_v17 }
 0x2df   : > { %6343 = vmatprep.mubr.msk.f32.mxu1 %vm689_vm1, %v5288_v18 }
 0x2e2   : > { %6344 = vmatmul.mubr.msk.f32.gmra.mrb[8].mxu1 %vm689_vm1, %v5289_v19 }
 0x2e3   : > { %6346 = vmatprep.mubr.msk.f32.mxu1 %vm689_vm1, %v5290_v20 }
 0x2e6   : > { %6347 = vmatmul.mubr.msk.f32.gmra.mrb[10].mxu1 %vm689_vm1, %v5291_v21 }
 0x2e7   : > { %6349 = vmatprep.mubr.msk.f32.mxu1 %vm689_vm1, %v5292_v22 }
 0x2ea   : > { %6350 = vmatmul.mubr.msk.f32.gmra.mrb[12].mxu1 %vm689_vm1, %v5293_v23 }
 0x2eb   : > { %6352 = vmatprep.mubr.msk.f32.mxu1 %vm689_vm1, %v5294_v24 }
 0x2ee   : > { %6353 = vmatmul.mubr.msk.f32.gmra.mrb[14].mxu1 %vm689_vm1, %v5295_v25 }
 0x2ef   : > { %6355 = vmatprep.mubr.msk.f32.mxu1 %vm689_vm1, %v5296_v26 }
 0x2f2   : > { %6356 = vmatmul.mubr.msk.f32.gmra.mrb[16].mxu1 %vm689_vm1, %v5297_v27 }
 0x2f3   : > { %6358 = vmatprep.mubr.msk.f32.mxu1 %vm689_vm1, %v5298_v28 }
 0x2f6   : > { %6359 = vmatmul.mubr.msk.f32.gmra.mrb[18].mxu1 %vm689_vm1, %v5299_v29 }
 0x2f7   : > { %6361 = vmatprep.mubr.msk.f32.mxu1 %vm689_vm1, %v5300_v30 }
 0x2fa   : > { %6362 = vmatmul.mubr.msk.f32.gmra.mrb[20].mxu1 %vm689_vm1, %v5301_v31 }
 0x2fb   : > { %6364 = vmatprep.mubr.msk.f32.mxu1 %vm689_vm1, %v5302_v33 }
 0x2fe   : > { %6365 = vmatmul.mubr.msk.f32.gmra.mrb[22].mxu1 %vm689_vm1, %v5303_v34 }
 0x2ff   : > { %6367 = vmatprep.mubr.msk.f32.mxu1 %vm689_vm1, %v5304_v35 }
 0x302   : > { %6368 = vmatmul.mubr.msk.f32.gmra.mrb[24].mxu1 %vm689_vm1, %v5305_v37  ;;  %v5355_v37 = vld [vmem:[%s9049_s4 + $0x308] sm:$0xff] }
 0x303   : > { %6370 = vmatprep.mubr.msk.f32.mxu1 %vm689_vm1, %v5306_v38 }
 0x306   : > { %6371 = vmatmul.mubr.msk.f32.gmra.mrb[26].mxu1 %vm689_vm1, %v5307_v39  ;;  %v5356_v39 = vld [vmem:[%s9049_s4 + $0x310] sm:$0xff] }
 0x307   : > { %6373 = vmatprep.mubr.msk.f32.mxu1 %vm689_vm1, %v5308_v40 }
 0x30a   : > { %6374 = vmatmul.mubr.msk.f32.gmra.mrb[28].mxu1 %vm689_vm1, %v5309_v41 }
 0x30b   : > { %6376 = vmatprep.mubr.msk.f32.mxu1 %vm689_vm1, %v5310_v42  ;;  %v5357_v42 = vld [vmem:[%s9049_s4 + $0x318] sm:$0xff] }
 0x30e   : > { %6377 = vmatmul.mubr.msk.f32.gmra.mrb[30].mxu1 %vm689_vm1, %v5311_v43 }
 0x30f   : > { %6379 = vmatprep.mubr.msk.f32.mxu1 %vm689_vm1, %v5312_v44  ;;  %v5358_v44 = vld [vmem:[%s9049_s4 + $0x320] sm:$0xff] }
 0x312   : > { %6380 = vmatmul.mubr.msk.f32.gmra.mrb[32].mxu1 %vm689_vm1, %v5313_v47 }
 0x313   : > { %6382 = vmatprep.mubr.msk.f32.mxu1 %vm689_vm1, %v5314_v48 }
 0x316   : > { %6383 = vmatmul.mubr.msk.f32.gmra.mrb[34].mxu1 %vm689_vm1, %v5315_v49  ;;  %v5359_v49 = vld [vmem:[%s9049_s4 + $0x328] sm:$0xff] }
 0x317   : > { %6389 = vmatprep.mubr.msk.f32.mxu1 %vm337_vm0, %v7438_v32 }
 0x31a   : > { %6390 = vmatmul.mubr.msk.f32.vlgmr.msra.gmra.mrb[40].mxu1 %vm337_vm0, %v7444_v36 }
 0x31b   : > { %6392 = vmatprep.mubr.msk.f32.mxu1 %vm337_vm0, %v7452_v46  ;;  %6832 = vmatpush3.bf16.msra.mxu1 %v7758_v16 }
 0x31c   : > { %6842 = vmatprep.subr.bf16.mxu1 %v6841_v52 }
 0x31e   : > { %6393 = vmatmul.mubr.msk.f32.gmra.mrb[42].mxu1 %vm337_vm0, %v7450_v45 }
 0x31f   : > { %6455 = vmatprep.mubr.msk.f32.mxu1 %vm337_vm0, %v7438_v32 }
 0x322   : > { %6456 = vmatmul.mubr.msk.f32.vlgmr.msra.gmra.mrb[44].mxu1 %vm337_vm0, %v7444_v36 }
 0x323   : > { %6458 = vmatprep.mubr.msk.f32.mxu1 %vm337_vm0, %v7452_v46  ;;  %6844 = vmatpush3.bf16.msra.mxu1 %v6841_v52 }
 0x324   : > { %6854 = vmatprep.subr.bf16.mxu1 %v6853_v55 }
 0x326   : > { %6459 = vmatmul.mubr.msk.f32.gmra.mrb[46].mxu1 %vm337_vm0, %v7450_v45 }
 0x327   : > { %6521 = vmatprep.mubr.msk.f32.mxu1 %vm337_vm0, %v7438_v32 }
 0x32a   : > { %6522 = vmatmul.mubr.msk.f32.vlgmr.msra.gmra.mrb[48].mxu1 %vm337_vm0, %v7444_v36 }
 0x32b   : > { %6524 = vmatprep.mubr.msk.f32.mxu1 %vm337_vm0, %v7452_v46  ;;  %6856 = vmatpush3.bf16.msra.mxu1 %v6853_v55 }
 0x32c   : > { %6866 = vmatprep.subr.bf16.mxu1 %v6865_v58 }
 0x32e   : > { %6525 = vmatmul.mubr.msk.f32.gmra.mrb[50].mxu1 %vm337_vm0, %v7450_v45 }
 0x32f   : > { %6587 = vmatprep.mubr.msk.f32.mxu1 %vm337_vm0, %v7438_v32 }
 0x332   : > { %6588 = vmatmul.mubr.msk.f32.vlgmr.msra.gmra.mrb[52].mxu1 %vm337_vm0, %v7444_v36 }
 0x333   : > { %6590 = vmatprep.mubr.msk.f32.mxu1 %vm337_vm0, %v7452_v46  ;;  %6868 = vmatpush3.bf16.msra.mxu1 %v6865_v58 }
 0x334   : > { %6878 = vmatprep.subr.bf16.mxu1 %v6877_v61 }
 0x336   : > { %6591 = vmatmul.mubr.msk.f32.gmra.mrb[54].mxu1 %vm337_vm0, %v7450_v45 }
 0x337   : > { %6653 = vmatprep.mubr.msk.f32.mxu1 %vm337_vm0, %v7438_v32 }
 0x33a   : > { %6654 = vmatmul.mubr.msk.f32.vlgmr.msra.gmra.mrb[56].mxu1 %vm337_vm0, %v7444_v36 }
 0x33b   : > { %6656 = vmatprep.mubr.msk.f32.mxu1 %vm337_vm0, %v7452_v46  ;;  %6880 = vmatpush3.bf16.msra.mxu1 %v6877_v61  ;;  %v5364_v61 = vld [vmem:[%s9049_s4 + $0x350] sm:$0xff] }
 0x33e   : > { %6657 = vmatmul.mubr.msk.f32.gmra.mrb[58].mxu1 %vm337_vm0, %v7450_v45 }
 0x33f   : > { %6719 = vmatprep.mubr.msk.f32.mxu1 %vm337_vm0, %v7438_v32 }
 0x342   : > { %6720 = vmatmul.mubr.msk.f32.vlgmr.msra.gmra.mrb[60].mxu1 %vm337_vm0, %v7444_v36 }
 0x343   : > { %6722 = vmatprep.mubr.msk.f32.mxu1 %vm337_vm0, %v7452_v46 }
 0x346   : > { %6723 = vmatmul.mubr.msk.f32.gmra.mrb[62].mxu1 %vm337_vm0, %v7450_v45 }
 0x3ad   : > { %v7956_v63 = vpop.f32.mrb[4].mxu1 }
 0x3ae   : > { %v7958_v0 = vpop.f32.mrb[5].mxu1 }
 0x3b1   : > { %v7960_v32 = vpop.f32.mrb[6].mxu1 }
 0x3b2   : > { %v7962_v1 = vpop.f32.mrb[7].mxu1 }
 0x3b5   : > { %v7964_v36 = vpop.f32.mrb[8].mxu1 }
 0x3b6   : > { %v7966_v46 = vpop.f32.mrb[9].mxu1 }
 0x3b9   : > { %v7968_v2 = vpop.f32.mrb[10].mxu1 }
 0x3ba   : > { %v7970_v45 = vpop.f32.mrb[11].mxu1 }
 0x3bd   : > { %v7972_v3 = vpop.f32.mrb[12].mxu1 }
 0x3be   : > { %v7974_v4 = vpop.f32.mrb[13].mxu1 }
 0x3c1   : > { %v7976_v5 = vpop.f32.mrb[14].mxu1 }
 0x3c2   : > { %v7978_v6 = vpop.f32.mrb[15].mxu1 }
 0x3c5   : > { %v7980_v7 = vpop.f32.mrb[16].mxu1 }
 0x3c6   : > { %v7982_v8 = vpop.f32.mrb[17].mxu1 }
 0x3c9   : > { %v7984_v9 = vpop.f32.mrb[18].mxu1 }
 0x3ca   : > { %v7986_v10 = vpop.f32.mrb[19].mxu1 }
 0x3cd   : > { %v7988_v11 = vpop.f32.mrb[20].mxu1 }
 0x3ce   : > { %v7990_v12 = vpop.f32.mrb[21].mxu1 }
 0x3d1   : > { %v7992_v13 = vpop.f32.mrb[22].mxu1 }
 0x3d2   : > { %v7994_v14 = vpop.f32.mrb[23].mxu1 }
 0x3d3   : > { %9059 = vst [vmem:[#allocation3_spill] sm:$0xff] %v7994_v14 }
 0x3d5   : > { %v7996_v15 = vpop.f32.mrb[24].mxu1 }
 0x3d6   : > { %9060 = vst [vmem:[#allocation4_spill] sm:$0xff] %v7996_v15  ;;  %v7998_v16 = vpop.f32.mrb[25].mxu1 }
 0x3d7   : > { %9061 = vst [vmem:[#allocation5_spill] sm:$0xff] %v7998_v16 }
 0x3d9   : > { %v8000_v17 = vpop.f32.mrb[26].mxu1 }
 0x3da   : > { %9062 = vst [vmem:[#allocation6_spill] sm:$0xff] %v8000_v17  ;;  %v8002_v18 = vpop.f32.mrb[27].mxu1 }
 0x3db   : > { %9063 = vst [vmem:[#allocation7_spill] sm:$0xff] %v8002_v18 }
 0x3dd   : > { %v8004_v19 = vpop.f32.mrb[28].mxu1 }
 0x3de   : > { %9064 = vst [vmem:[#allocation8_spill] sm:$0xff] %v8004_v19  ;;  %v8006_v20 = vpop.f32.mrb[29].mxu1 }
 0x3df   : > { %9065 = vst [vmem:[#allocation9_spill] sm:$0xff] %v8006_v20 }
 0x3e1   : > { %v8008_v21 = vpop.f32.mrb[30].mxu1 }
 0x3e2   : > { %9066 = vst [vmem:[#allocation10_spill] sm:$0xff] %v8008_v21  ;;  %v8010_v22 = vpop.f32.mrb[31].mxu1 }
 0x3e3   : > { %9067 = vst [vmem:[#allocation11_spill] sm:$0xff] %v8010_v22 }
 0x3e5   : > { %v8012_v23 = vpop.f32.mrb[32].mxu1 }
 0x3e6   : > { %9068 = vst [vmem:[#allocation12_spill] sm:$0xff] %v8012_v23  ;;  %v8014_v24 = vpop.f32.mrb[33].mxu1  ;;  %v8877_v23 = vpop.permute.xlu0 %4764 }
 0x3e7   : > { %9069 = vst [vmem:[#allocation13_spill] sm:$0xff] %v8014_v24 }
 0x3e9   : > { %v8016_v25 = vpop.f32.mrb[34].mxu1 }
 0x3ea   : > { %9070 = vst [vmem:[#allocation14_spill] sm:$0xff] %v8016_v25  ;;  %v8018_v26 = vpop.f32.mrb[35].mxu1  ;;  %v8872_v25 = vpop.permute.xlu1 %4769 }
 0x3eb   : > { %9071 = vst [vmem:[#allocation15_spill] sm:$0xff] %v8018_v26  ;;  %v9055_v26 = vlaneseq }
 0x3ed   : > { %v6391_v27 = vpop.f32.mrb[40].mxu1  ;;  %v8875_v24 = vshrl.u32 %v9055_v26, 7 }
 0x3ee   : > { %v1875_v28 = vpop.f32.mrb[41].mxu1 }
 0x3ef   : > { %v6821_v29 = vpack.c.bf16 %v6391_v27, %v1875_v28  ;;  %v5365_v28 = vld [vmem:[%s9049_s4 + $0x358] sm:$0xff]  ;;  %9086 = vst [vmem:[#allocation30_spill] sm:$0xff] %v8875_v24 }
 0x3f1   : > { %v6394_v30 = vpop.f32.mrb[42].mxu1  ;;  %6822 = vmatprep.subr.bf16.mxu0 %v6821_v29 }
 0x3f2   : > { %v1885_v31 = vpop.f32.mrb[43].mxu1  ;;  %6824 = vmatpush3.bf16.msra.mxu0 %v6821_v29 }
 0x3f3   : > { %v6825_v33 = vpack.c.bf16 %v6394_v30, %v1885_v31  ;;  %v5366_v30 = vld [vmem:[%s9049_s4 + $0x360] sm:$0xff] }
 0x3f5   : > { %6826 = vmatprep.subr.bf16.mxu0 %v6825_v33  ;;  %v6457_v34 = vpop.f32.mrb[44].mxu1 }
 0x3f6   : > { %6828 = vmatpush3.bf16.msra.mxu0 %v6825_v33  ;;  %v2349_v35 = vpop.f32.mrb[45].mxu1 }
 0x3f7   : > { %v6833_v38 = vpack.c.bf16 %v6457_v34, %v2349_v35  ;;  %v5367_v34 = vld [vmem:[%s9049_s4 + $0x368] sm:$0xff] }
 0x3f9   : > { %6404 = vmatmul.mubr.msk.f32.vlgmr.msra.gmra.mrb[4].mxu0 %vm689_vm1, %v5355_v37  ;;  %v6460_v40 = vpop.f32.mrb[46].mxu1  ;;  %6834 = vmatprep.subr.bf16.mxu0 %v6833_v38  ;;  %v5368_v37 = vld [vmem:[%s9049_s4 + $0x370] sm:$0xff] }
 0x3fa   : > { %v2359_v41 = vpop.f32.mrb[47].mxu1  ;;  %6836 = vmatpush3.bf16.msra.mxu0 %v6833_v38  ;;  %6406 = vmatprep.mubr.msk.f32.mxu0 %vm689_vm1, %v5356_v39 }
 0x3fb   : > { %v6837_v43 = vpack.c.bf16 %v6460_v40, %v2359_v41  ;;  %v5369_v40 = vld [vmem:[%s9049_s4 + $0x378] sm:$0xff] }
 0x3fd   : > { %6407 = vmatmul.mubr.msk.f32.gmra.mrb[6].mxu0 %vm689_vm1, %v5357_v42  ;;  %6838 = vmatprep.subr.bf16.mxu0 %v6837_v43  ;;  %v6523_v47 = vpop.f32.mrb[48].mxu1  ;;  %v5370_v42 = vld [vmem:[%s9049_s4 + $0x380] sm:$0xff] }
 0x3fe   : > { %6840 = vmatpush3.bf16.msra.mxu0 %v6837_v43  ;;  %v2823_v48 = vpop.f32.mrb[49].mxu1  ;;  %6409 = vmatprep.mubr.msk.f32.mxu0 %vm689_vm1, %v5358_v44 }
 0x3ff   : > { %v8039_v50 = vpack.c.bf16 %v6523_v47, %v2823_v48  ;;  %v5371_v47 = vld [vmem:[%s9049_s4 + $0x388] sm:$0xff] }
 0x401   : > { %6410 = vmatmul.mubr.msk.f32.gmra.mrb[8].mxu0 %vm689_vm1, %v5359_v49  ;;  %v6526_v52 = vpop.f32.mrb[50].mxu1  ;;  %6846 = vmatprep.subr.bf16.mxu0 %v8039_v50  ;;  %v5372_v49 = vld [vmem:[%s9049_s4 + $0x390] sm:$0xff] }
 0x402   : > { %v2833_v53 = vpop.f32.mrb[51].mxu1  ;;  %6412 = vmatprep.mubr.msk.f32.mxu0 %vm689_vm1, %v5360_v51 }
 0x403   : > { %v8050_v55 = vpack.c.bf16 %v6526_v52, %v2833_v53  ;;  %v5373_v53 = vld [vmem:[%s9049_s4 + $0x398] sm:$0xff] }
 0x405   : > { %6413 = vmatmul.mubr.msk.f32.gmra.mrb[10].mxu0 %vm689_vm1, %v5361_v54  ;;  %v6589_v57 = vpop.f32.mrb[52].mxu1 }
 0x406   : > { %v3297_v58 = vpop.f32.mrb[53].mxu1  ;;  %6415 = vmatprep.mubr.msk.f32.mxu0 %vm689_vm1, %v5362_v56  ;;  %v5374_v56 = vld [vmem:[%s9049_s4 + $0x3a0] sm:$0xff] }
 0x407   : > { %v8060_v60 = vpack.c.bf16 %v6589_v57, %v3297_v58  ;;  %v5375_v57 = vld [vmem:[%s9049_s4 + $0x3a8] sm:$0xff]  ;;  %v5376_v58 = vld [vmem:[%s9049_s4 + $0x3b0] sm:$0xff] }
 0x409   : > { %6416 = vmatmul.mubr.msk.f32.gmra.mrb[12].mxu0 %vm689_vm1, %v5363_v59  ;;  %v6592_v62 = vpop.f32.mrb[54].mxu1  ;;  %v5377_v59 = vld [vmem:[%s9049_s4 + $0x3b8] sm:$0xff] }
 0x40a   : > { %v3307_v27 = vpop.f32.mrb[55].mxu1  ;;  %6418 = vmatprep.mubr.msk.f32.mxu0 %vm689_vm1, %v5364_v61  ;;  %v5378_v61 = vld [vmem:[%s9049_s4 + $0x3c0] sm:$0xff] }
 0x40b   : > { %v8070_v29 = vpack.c.bf16 %v6592_v62, %v3307_v27  ;;  %v5379_v62 = vld [vmem:[%s9049_s4 + $0x3c8] sm:$0xff]  ;;  %v5380_v27 = vld [vmem:[%s9049_s4 + $0x3d0] sm:$0xff] }
 0x40d   : > { %6419 = vmatmul.mubr.msk.f32.gmra.mrb[14].mxu0 %vm689_vm1, %v5365_v28  ;;  %v6655_v31 = vpop.f32.mrb[56].mxu1  ;;  %v5381_v28 = vld [vmem:[%s9049_s4 + $0x3d8] sm:$0xff] }
 0x40e   : > { %v3771_v33 = vpop.f32.mrb[57].mxu1  ;;  %6421 = vmatprep.mubr.msk.f32.mxu0 %vm689_vm1, %v5366_v30  ;;  %v5382_v30 = vld [vmem:[%s9049_s4 + $0x3e0] sm:$0xff] }
 0x40f   : > { %v8080_v35 = vpack.c.bf16 %v6655_v31, %v3771_v33  ;;  %v5383_v31 = vld [vmem:[%s9049_s4 + $0x3e8] sm:$0xff]  ;;  %v5384_v33 = vld [vmem:[%s9049_s4 + $0x3f0] sm:$0xff] }
 0x411   : > { %6422 = vmatmul.mubr.msk.f32.gmra.mrb[16].mxu0 %vm689_vm1, %v5367_v34  ;;  %v6658_v38 = vpop.f32.mrb[58].mxu1  ;;  %v5385_v34 = vld [vmem:[%s9049_s4 + $0x3f8] sm:$0xff] }
 0x412   : > { %v3781_v39 = vpop.f32.mrb[59].mxu1  ;;  %6424 = vmatprep.mubr.msk.f32.mxu0 %vm689_vm1, %v5368_v37  ;;  %v5424_v37 = vld [vmem:[%s9049_s4 + $0x400] sm:$0xff] }
 0x413   : > { %v8090_v41 = vpack.c.bf16 %v6658_v38, %v3781_v39  ;;  %v5425_v38 = vld [vmem:[%s9049_s4 + $0x408] sm:$0xff]  ;;  %v5426_v39 = vld [vmem:[%s9049_s4 + $0x410] sm:$0xff] }
 0x415   : > { %6425 = vmatmul.mubr.msk.f32.gmra.mrb[18].mxu0 %vm689_vm1, %v5369_v40  ;;  %v6721_v43 = vpop.f32.mrb[60].mxu1  ;;  %v5427_v40 = vld [vmem:[%s9049_s4 + $0x418] sm:$0xff] }
 0x416   : > { %v4245_v44 = vpop.f32.mrb[61].mxu1  ;;  %6427 = vmatprep.mubr.msk.f32.mxu0 %vm689_vm1, %v5370_v42  ;;  %v5428_v42 = vld [vmem:[%s9049_s4 + $0x420] sm:$0xff] }
 0x417   : > { %v6881_v48 = vpack.c.bf16 %v6721_v43, %v4245_v44  ;;  %v5430_v43 = vld [vmem:[%s9049_s4 + $0x430] sm:$0xff]  ;;  %v5432_v44 = vld [vmem:[%s9049_s4 + $0x440] sm:$0xff] }
 0x419   : > { %6428 = vmatmul.mubr.msk.f32.gmra.mrb[20].mxu0 %vm689_vm1, %v5371_v47  ;;  %v6724_v51 = vpop.f32.mrb[62].mxu1  ;;  %6882 = vmatprep.subr.bf16.mxu1 %v6881_v48  ;;  %v5433_v47 = vld [vmem:[%s9049_s4 + $0x448] sm:$0xff] }
 0x41a   : > { %v4255_v52 = vpop.f32.mrb[63].mxu1  ;;  %6884 = vmatpush3.bf16.msra.mxu1 %v6881_v48  ;;  %6430 = vmatprep.mubr.msk.f32.mxu0 %vm689_vm1, %v5372_v49  ;;  %v5434_v48 = vld [vmem:[%s9049_s4 + $0x450] sm:$0xff]  ;;  %v5435_v49 = vld [vmem:[%s9049_s4 + $0x458] sm:$0xff] }
 0x41b   : > { %v6885_v54 = vpack.c.bf16 %v6724_v51, %v4255_v52  ;;  %v5436_v51 = vld [vmem:[%s9049_s4 + $0x460] sm:$0xff]  ;;  %v5437_v52 = vld [vmem:[%s9049_s4 + $0x468] sm:$0xff] }
 0x41d   : > { %6431 = vmatmul.mubr.msk.f32.gmra.mrb[22].mxu0 %vm689_vm1, %v5373_v53  ;;  %6886 = vmatprep.subr.bf16.mxu1 %v6885_v54  ;;  %v5438_v53 = vld [vmem:[%s9049_s4 + $0x470] sm:$0xff] }
 0x41e   : > { %6888 = vmatpush3.bf16.msra.mxu1 %v6885_v54  ;;  %6433 = vmatprep.mubr.msk.f32.mxu0 %vm689_vm1, %v5374_v56  ;;  %v5439_v54 = vld [vmem:[%s9049_s4 + $0x478] sm:$0xff]  ;;  %v5440_v56 = vld [vmem:[%s9049_s4 + $0x480] sm:$0xff] }
 0x421   : > { %6434 = vmatmul.mubr.msk.f32.gmra.mrb[24].mxu0 %vm689_vm1, %v5375_v57  ;;  %v5441_v57 = vld [vmem:[%s9049_s4 + $0x488] sm:$0xff] }
 0x422   : > { %6436 = vmatprep.mubr.msk.f32.mxu0 %vm689_vm1, %v5376_v58  ;;  %v5442_v58 = vld [vmem:[%s9049_s4 + $0x490] sm:$0xff] }
 0x425   : > { %6437 = vmatmul.mubr.msk.f32.gmra.mrb[26].mxu0 %vm689_vm1, %v5377_v59  ;;  %v5443_v59 = vld [vmem:[%s9049_s4 + $0x498] sm:$0xff] }
 0x426   : > { %6439 = vmatprep.mubr.msk.f32.mxu0 %vm689_vm1, %v5378_v61  ;;  %v5444_v61 = vld [vmem:[%s9049_s4 + $0x4a0] sm:$0xff] }
 0x429   : > { %6440 = vmatmul.mubr.msk.f32.gmra.mrb[28].mxu0 %vm689_vm1, %v5379_v62  ;;  %v5445_v62 = vld [vmem:[%s9049_s4 + $0x4a8] sm:$0xff] }
 0x42a   : > { %6442 = vmatprep.mubr.msk.f32.mxu0 %vm689_vm1, %v5380_v27  ;;  %v5446_v27 = vld [vmem:[%s9049_s4 + $0x4b0] sm:$0xff] }
 0x42d   : > { %6443 = vmatmul.mubr.msk.f32.gmra.mrb[30].mxu0 %vm689_vm1, %v5381_v28  ;;  %v5447_v28 = vld [vmem:[%s9049_s4 + $0x4b8] sm:$0xff] }
 0x42e   : > { %6445 = vmatprep.mubr.msk.f32.mxu0 %vm689_vm1, %v5382_v30  ;;  %v5448_v30 = vld [vmem:[%s9049_s4 + $0x4c0] sm:$0xff] }
 0x431   : > { %6446 = vmatmul.mubr.msk.f32.gmra.mrb[32].mxu0 %vm689_vm1, %v5383_v31  ;;  %v5449_v31 = vld [vmem:[%s9049_s4 + $0x4c8] sm:$0xff] }
 0x432   : > { %6448 = vmatprep.mubr.msk.f32.mxu0 %vm689_vm1, %v5384_v33  ;;  %v5450_v33 = vld [vmem:[%s9049_s4 + $0x4d0] sm:$0xff] }
 0x435   : > { %6449 = vmatmul.mubr.msk.f32.gmra.mrb[34].mxu0 %vm689_vm1, %v5385_v34  ;;  %v5451_v34 = vld [vmem:[%s9049_s4 + $0x4d8] sm:$0xff] }
 0x436   : > { %6469 = vmatprep.mubr.msk.f32.mxu0 %vm689_vm1, %v5424_v37  ;;  %v5452_v37 = vld [vmem:[%s9049_s4 + $0x4e0] sm:$0xff] }
 0x439   : > { %6470 = vmatmul.mubr.msk.f32.vlgmr.msra.gmra.mrb[4].mxu0 %vm689_vm1, %v5425_v38  ;;  %v5453_v38 = vld [vmem:[%s9049_s4 + $0x4e8] sm:$0xff] }
 0x43a   : > { %6848 = vmatpush3.bf16.msra.mxu0 %v8039_v50  ;;  %6472 = vmatprep.mubr.msk.f32.mxu0 %vm689_vm1, %v5426_v39  ;;  %v5429_v50 = vld [vmem:[%s9049_s4 + $0x428] sm:$0xff]  ;;  %v5454_v39 = vld [vmem:[%s9049_s4 + $0x4f0] sm:$0xff] }
 0x43b   : > { %6850 = vmatprep.subr.bf16.mxu0 %v8050_v55 }
 0x43d   : > { %6473 = vmatmul.mubr.msk.f32.gmra.mrb[6].mxu0 %vm689_vm1, %v5427_v40  ;;  %v5455_v40 = vld [vmem:[%s9049_s4 + $0x4f8] sm:$0xff] }
 0x43e   : > { %6852 = vmatpush3.bf16.msra.mxu0 %v8050_v55  ;;  %6475 = vmatprep.mubr.msk.f32.mxu0 %vm689_vm1, %v5428_v42  ;;  %v5431_v55 = vld [vmem:[%s9049_s4 + $0x438] sm:$0xff]  ;;  %v5494_v42 = vld [vmem:[%s9049_s4 + $0x500] sm:$0xff] }
 0x43f   : > { %6858 = vmatprep.subr.bf16.mxu0 %v8060_v60 }
 0x441   : > { %6476 = vmatmul.mubr.msk.f32.gmra.mrb[8].mxu0 %vm689_vm1, %v5429_v50  ;;  %v5495_v50 = vld [vmem:[%s9049_s4 + $0x508] sm:$0xff] }
 0x442   : > { %6478 = vmatprep.mubr.msk.f32.mxu0 %vm689_vm1, %v5430_v43  ;;  %v5496_v43 = vld [vmem:[%s9049_s4 + $0x510] sm:$0xff] }
 0x445   : > { %6479 = vmatmul.mubr.msk.f32.gmra.mrb[10].mxu0 %vm689_vm1, %v5431_v55  ;;  %v5704_v55 = vld [vmem:[%s9049_s4 + $0x800] sm:$0xff] }
 0x446   : > { %6481 = vmatprep.mubr.msk.f32.mxu0 %vm689_vm1, %v5432_v44  ;;  %v5705_v44 = vld [vmem:[%s9049_s4 + $0x808] sm:$0xff]  ;;  %6733 = vmatprep.mubr.msk.f32.mxu1 %vm689_vm1, %v5704_v55 }
 0x447   : > { %6734 = vmatmul.mubr.msk.f32.vlgmr.msra.gmra.mrb[64].mxu1 %vm689_vm1, %v5705_v44  ;;  %v5511_v55 = vld [vmem:[%s9049_s4 + $0x588] sm:$0xff]  ;;  %v5512_v44 = vld [vmem:[%s9049_s4 + $0x590] sm:$0xff] }
 0x449   : > { %6482 = vmatmul.mubr.msk.f32.gmra.mrb[12].mxu0 %vm689_vm1, %v5433_v47  ;;  %v5497_v47 = vld [vmem:[%s9049_s4 + $0x518] sm:$0xff] }
 0x44a   : > { %6484 = vmatprep.mubr.msk.f32.mxu0 %vm689_vm1, %v5434_v48  ;;  %v5498_v48 = vld [vmem:[%s9049_s4 + $0x520] sm:$0xff] }
 0x44d   : > { %6485 = vmatmul.mubr.msk.f32.gmra.mrb[14].mxu0 %vm689_vm1, %v5435_v49  ;;  %v5707_v49 = vld [vmem:[%s9049_s4 + $0x818] sm:$0xff] }
 0x44e   : > { %6487 = vmatprep.mubr.msk.f32.mxu0 %vm689_vm1, %v5436_v51  ;;  %v5499_v51 = vld [vmem:[%s9049_s4 + $0x528] sm:$0xff] }
 0x451   : > { %6488 = vmatmul.mubr.msk.f32.gmra.mrb[16].mxu0 %vm689_vm1, %v5437_v52  ;;  %v5500_v52 = vld [vmem:[%s9049_s4 + $0x530] sm:$0xff] }
 0x452   : > { %6490 = vmatprep.mubr.msk.f32.mxu0 %vm689_vm1, %v5438_v53  ;;  %v5709_v53 = vld [vmem:[%s9049_s4 + $0x828] sm:$0xff] }
 0x455   : > { %6491 = vmatmul.mubr.msk.f32.gmra.mrb[18].mxu0 %vm689_vm1, %v5439_v54  ;;  %v5501_v54 = vld [vmem:[%s9049_s4 + $0x538] sm:$0xff] }
 0x456   : > { %6493 = vmatprep.mubr.msk.f32.mxu0 %vm689_vm1, %v5440_v56  ;;  %v5502_v56 = vld [vmem:[%s9049_s4 + $0x540] sm:$0xff] }
 0x459   : > { %6494 = vmatmul.mubr.msk.f32.gmra.mrb[20].mxu0 %vm689_vm1, %v5441_v57  ;;  %v5710_v57 = vld [vmem:[%s9049_s4 + $0x830] sm:$0xff] }
 0x45a   : > { %6496 = vmatprep.mubr.msk.f32.mxu0 %vm689_vm1, %v5442_v58  ;;  %v5711_v58 = vld [vmem:[%s9049_s4 + $0x838] sm:$0xff] }
 0x45d   : > { %6497 = vmatmul.mubr.msk.f32.gmra.mrb[22].mxu0 %vm689_vm1, %v5443_v59  ;;  %v5503_v59 = vld [vmem:[%s9049_s4 + $0x548] sm:$0xff] }
 0x45e   : > { %6499 = vmatprep.mubr.msk.f32.mxu0 %vm689_vm1, %v5444_v61  ;;  %v5504_v61 = vld [vmem:[%s9049_s4 + $0x550] sm:$0xff] }
 0x461   : > { %6500 = vmatmul.mubr.msk.f32.gmra.mrb[24].mxu0 %vm689_vm1, %v5445_v62  ;;  %v5712_v62 = vld [vmem:[%s9049_s4 + $0x840] sm:$0xff] }
 0x462   : > { %6502 = vmatprep.mubr.msk.f32.mxu0 %vm689_vm1, %v5446_v27  ;;  %v5713_v27 = vld [vmem:[%s9049_s4 + $0x848] sm:$0xff] }
 0x465   : > { %6503 = vmatmul.mubr.msk.f32.gmra.mrb[26].mxu0 %vm689_vm1, %v5447_v28  ;;  %v5505_v28 = vld [vmem:[%s9049_s4 + $0x558] sm:$0xff] }
 0x466   : > { %6505 = vmatprep.mubr.msk.f32.mxu0 %vm689_vm1, %v5448_v30  ;;  %v5506_v30 = vld [vmem:[%s9049_s4 + $0x560] sm:$0xff] }
 0x469   : > { %6506 = vmatmul.mubr.msk.f32.gmra.mrb[28].mxu0 %vm689_vm1, %v5449_v31  ;;  %v5714_v31 = vld [vmem:[%s9049_s4 + $0x850] sm:$0xff] }
 0x46a   : > { %6508 = vmatprep.mubr.msk.f32.mxu0 %vm689_vm1, %v5450_v33  ;;  %v5715_v33 = vld [vmem:[%s9049_s4 + $0x858] sm:$0xff] }
 0x46d   : > { %6509 = vmatmul.mubr.msk.f32.gmra.mrb[30].mxu0 %vm689_vm1, %v5451_v34  ;;  %v5507_v34 = vld [vmem:[%s9049_s4 + $0x568] sm:$0xff] }
 0x46e   : > { %6511 = vmatprep.mubr.msk.f32.mxu0 %vm689_vm1, %v5452_v37  ;;  %v5508_v37 = vld [vmem:[%s9049_s4 + $0x570] sm:$0xff] }
 0x471   : > { %6512 = vmatmul.mubr.msk.f32.gmra.mrb[32].mxu0 %vm689_vm1, %v5453_v38  ;;  %v5716_v38 = vld [vmem:[%s9049_s4 + $0x860] sm:$0xff] }
 0x472   : > { %6514 = vmatprep.mubr.msk.f32.mxu0 %vm689_vm1, %v5454_v39  ;;  %v5717_v39 = vld [vmem:[%s9049_s4 + $0x868] sm:$0xff] }
 0x475   : > { %6515 = vmatmul.mubr.msk.f32.gmra.mrb[34].mxu0 %vm689_vm1, %v5455_v40  ;;  %v5509_v40 = vld [vmem:[%s9049_s4 + $0x578] sm:$0xff] }
 0x476   : > { %6535 = vmatprep.mubr.msk.f32.mxu0 %vm689_vm1, %v5494_v42  ;;  %v5510_v42 = vld [vmem:[%s9049_s4 + $0x580] sm:$0xff] }
 0x479   : > { %6536 = vmatmul.mubr.msk.f32.vlgmr.msra.gmra.mrb[4].mxu0 %vm689_vm1, %v5495_v50  ;;  %v5718_v50 = vld [vmem:[%s9049_s4 + $0x870] sm:$0xff] }
 0x47a   : > { %6860 = vmatpush3.bf16.msra.mxu0 %v8060_v60  ;;  %6538 = vmatprep.mubr.msk.f32.mxu0 %vm689_vm1, %v5496_v43  ;;  %v5706_v60 = vld [vmem:[%s9049_s4 + $0x810] sm:$0xff]  ;;  %v5719_v43 = vld [vmem:[%s9049_s4 + $0x878] sm:$0xff] }
 0x47b   : > { %6862 = vmatprep.subr.bf16.mxu0 %v8070_v29  ;;  %6736 = vmatprep.mubr.msk.f32.mxu1 %vm689_vm1, %v5706_v60  ;;  %v5513_v60 = vld [vmem:[%s9049_s4 + $0x598] sm:$0xff] }
 0x47c   : > { %6737 = vmatmul.mubr.msk.f32.gmra.mrb[66].mxu1 %vm689_vm1, %v5707_v49  ;;  %v5514_v49 = vld [vmem:[%s9049_s4 + $0x5a0] sm:$0xff] }
 0x47d   : > { %6539 = vmatmul.mubr.msk.f32.gmra.mrb[6].mxu0 %vm689_vm1, %v5497_v47  ;;  %v5720_v47 = vld [vmem:[%s9049_s4 + $0x880] sm:$0xff] }
 0x47e   : > { %6864 = vmatpush3.bf16.msra.mxu0 %v8070_v29  ;;  %6541 = vmatprep.mubr.msk.f32.mxu0 %vm689_vm1, %v5498_v48  ;;  %v5708_v29 = vld [vmem:[%s9049_s4 + $0x820] sm:$0xff]  ;;  %v5721_v48 = vld [vmem:[%s9049_s4 + $0x888] sm:$0xff] }
 0x47f   : > { %6870 = vmatprep.subr.bf16.mxu0 %v8080_v35  ;;  %6739 = vmatprep.mubr.msk.f32.mxu1 %vm689_vm1, %v5708_v29  ;;  %v5515_v29 = vld [vmem:[%s9049_s4 + $0x5a8] sm:$0xff] }
 0x480   : > { %6740 = vmatmul.mubr.msk.f32.gmra.mrb[68].mxu1 %vm689_vm1, %v5709_v53  ;;  %v5516_v53 = vld [vmem:[%s9049_s4 + $0x5b0] sm:$0xff] }
 0x481   : > { %6542 = vmatmul.mubr.msk.f32.gmra.mrb[8].mxu0 %vm689_vm1, %v5499_v51  ;;  %6742 = vmatprep.mubr.msk.f32.mxu1 %vm689_vm1, %v5710_v57  ;;  %v5722_v51 = vld [vmem:[%s9049_s4 + $0x890] sm:$0xff]  ;;  %v5517_v57 = vld [vmem:[%s9049_s4 + $0x5b8] sm:$0xff] }
 0x482   : > { %6544 = vmatprep.mubr.msk.f32.mxu0 %vm689_vm1, %v5500_v52  ;;  %v5723_v52 = vld [vmem:[%s9049_s4 + $0x898] sm:$0xff] }
 0x484   : > { %6743 = vmatmul.mubr.msk.f32.gmra.mrb[70].mxu1 %vm689_vm1, %v5711_v58  ;;  %v5518_v58 = vld [vmem:[%s9049_s4 + $0x5c0] sm:$0xff] }
 0x485   : > { %6545 = vmatmul.mubr.msk.f32.gmra.mrb[10].mxu0 %vm689_vm1, %v5501_v54  ;;  %6745 = vmatprep.mubr.msk.f32.mxu1 %vm689_vm1, %v5712_v62  ;;  %v5724_v54 = vld [vmem:[%s9049_s4 + $0x8a0] sm:$0xff]  ;;  %v5519_v62 = vld [vmem:[%s9049_s4 + $0x5c8] sm:$0xff] }
 0x486   : > { %6547 = vmatprep.mubr.msk.f32.mxu0 %vm689_vm1, %v5502_v56  ;;  %v5725_v56 = vld [vmem:[%s9049_s4 + $0x8a8] sm:$0xff] }
 0x488   : > { %6746 = vmatmul.mubr.msk.f32.gmra.mrb[72].mxu1 %vm689_vm1, %v5713_v27  ;;  %v5520_v27 = vld [vmem:[%s9049_s4 + $0x5d0] sm:$0xff] }
 0x489   : > { %6548 = vmatmul.mubr.msk.f32.gmra.mrb[12].mxu0 %vm689_vm1, %v5503_v59  ;;  %6748 = vmatprep.mubr.msk.f32.mxu1 %vm689_vm1, %v5714_v31  ;;  %v5726_v59 = vld [vmem:[%s9049_s4 + $0x8b0] sm:$0xff]  ;;  %v5521_v31 = vld [vmem:[%s9049_s4 + $0x5d8] sm:$0xff] }
 0x48a   : > { %6550 = vmatprep.mubr.msk.f32.mxu0 %vm689_vm1, %v5504_v61  ;;  %v5727_v61 = vld [vmem:[%s9049_s4 + $0x8b8] sm:$0xff] }
 0x48c   : > { %6749 = vmatmul.mubr.msk.f32.gmra.mrb[74].mxu1 %vm689_vm1, %v5715_v33  ;;  %v5522_v33 = vld [vmem:[%s9049_s4 + $0x5e0] sm:$0xff] }
 0x48d   : > { %6551 = vmatmul.mubr.msk.f32.gmra.mrb[14].mxu0 %vm689_vm1, %v5505_v28  ;;  %6751 = vmatprep.mubr.msk.f32.mxu1 %vm689_vm1, %v5716_v38  ;;  %v5728_v28 = vld [vmem:[%s9049_s4 + $0x8c0] sm:$0xff]  ;;  %v5523_v38 = vld [vmem:[%s9049_s4 + $0x5e8] sm:$0xff] }
 0x48e   : > { %6553 = vmatprep.mubr.msk.f32.mxu0 %vm689_vm1, %v5506_v30  ;;  %v5729_v30 = vld [vmem:[%s9049_s4 + $0x8c8] sm:$0xff] }
 0x490   : > { %6752 = vmatmul.mubr.msk.f32.gmra.mrb[76].mxu1 %vm689_vm1, %v5717_v39  ;;  %v5524_v39 = vld [vmem:[%s9049_s4 + $0x5f0] sm:$0xff] }
 0x491   : > { %6554 = vmatmul.mubr.msk.f32.gmra.mrb[16].mxu0 %vm689_vm1, %v5507_v34  ;;  %6754 = vmatprep.mubr.msk.f32.mxu1 %vm689_vm1, %v5718_v50  ;;  %v5730_v34 = vld [vmem:[%s9049_s4 + $0x8d0] sm:$0xff]  ;;  %v5525_v50 = vld [vmem:[%s9049_s4 + $0x5f8] sm:$0xff] }
 0x492   : > { %6556 = vmatprep.mubr.msk.f32.mxu0 %vm689_vm1, %v5508_v37  ;;  %v5731_v37 = vld [vmem:[%s9049_s4 + $0x8d8] sm:$0xff] }
 0x494   : > { %6755 = vmatmul.mubr.msk.f32.gmra.mrb[78].mxu1 %vm689_vm1, %v5719_v43  ;;  %v5564_v43 = vld [vmem:[%s9049_s4 + $0x600] sm:$0xff] }
 0x495   : > { %6557 = vmatmul.mubr.msk.f32.gmra.mrb[18].mxu0 %vm689_vm1, %v5509_v40  ;;  %6757 = vmatprep.mubr.msk.f32.mxu1 %vm689_vm1, %v5720_v47  ;;  %v5732_v40 = vld [vmem:[%s9049_s4 + $0x8e0] sm:$0xff]  ;;  %v5565_v47 = vld [vmem:[%s9049_s4 + $0x608] sm:$0xff] }
 0x496   : > { %6559 = vmatprep.mubr.msk.f32.mxu0 %vm689_vm1, %v5510_v42  ;;  %v5733_v42 = vld [vmem:[%s9049_s4 + $0x8e8] sm:$0xff] }
 0x498   : > { %6758 = vmatmul.mubr.msk.f32.gmra.mrb[80].mxu1 %vm689_vm1, %v5721_v48  ;;  %v5566_v48 = vld [vmem:[%s9049_s4 + $0x610] sm:$0xff] }
 0x499   : > { %6560 = vmatmul.mubr.msk.f32.gmra.mrb[20].mxu0 %vm689_vm1, %v5511_v55  ;;  %6760 = vmatprep.mubr.msk.f32.mxu1 %vm689_vm1, %v5722_v51  ;;  %v5734_v55 = vld [vmem:[%s9049_s4 + $0x8f0] sm:$0xff] }
 0x49a   : > { %6562 = vmatprep.mubr.msk.f32.mxu0 %vm689_vm1, %v5512_v44  ;;  %v5735_v44 = vld [vmem:[%s9049_s4 + $0x8f8] sm:$0xff]  ;;  %v5570_v51 = vld [vmem:[%s9049_s4 + $0x630] sm:$0xff] }
 0x49c   : > { %6761 = vmatmul.mubr.msk.f32.gmra.mrb[82].mxu1 %vm689_vm1, %v5723_v52  ;;  %v5571_v52 = vld [vmem:[%s9049_s4 + $0x638] sm:$0xff] }
 0x49d   : > { %6563 = vmatmul.mubr.msk.f32.gmra.mrb[22].mxu0 %vm689_vm1, %v5513_v60  ;;  %6763 = vmatprep.mubr.msk.f32.mxu1 %vm689_vm1, %v5724_v54  ;;  %v5567_v60 = vld [vmem:[%s9049_s4 + $0x618] sm:$0xff] }
 0x49e   : > { %6565 = vmatprep.mubr.msk.f32.mxu0 %vm689_vm1, %v5514_v49  ;;  %v5568_v49 = vld [vmem:[%s9049_s4 + $0x620] sm:$0xff]  ;;  %v5575_v54 = vld [vmem:[%s9049_s4 + $0x658] sm:$0xff] }
 0x4a0   : > { %6764 = vmatmul.mubr.msk.f32.gmra.mrb[84].mxu1 %vm689_vm1, %v5725_v56  ;;  %v5576_v56 = vld [vmem:[%s9049_s4 + $0x660] sm:$0xff] }
 0x4a1   : > { %6566 = vmatmul.mubr.msk.f32.gmra.mrb[24].mxu0 %vm689_vm1, %v5515_v29  ;;  %6766 = vmatprep.mubr.msk.f32.mxu1 %vm689_vm1, %v5726_v59  ;;  %v5573_v29 = vld [vmem:[%s9049_s4 + $0x648] sm:$0xff]  ;;  %v5579_v59 = vld [vmem:[%s9049_s4 + $0x678] sm:$0xff] }
 0x4a2   : > { %6568 = vmatprep.mubr.msk.f32.mxu0 %vm689_vm1, %v5516_v53  ;;  %v5574_v53 = vld [vmem:[%s9049_s4 + $0x650] sm:$0xff] }
 0x4a4   : > { %6767 = vmatmul.mubr.msk.f32.gmra.mrb[86].mxu1 %vm689_vm1, %v5727_v61  ;;  %v5580_v61 = vld [vmem:[%s9049_s4 + $0x680] sm:$0xff] }
 0x4a5   : > { %6569 = vmatmul.mubr.msk.f32.gmra.mrb[26].mxu0 %vm689_vm1, %v5517_v57  ;;  %6769 = vmatprep.mubr.msk.f32.mxu1 %vm689_vm1, %v5728_v28  ;;  %v5577_v57 = vld [vmem:[%s9049_s4 + $0x668] sm:$0xff]  ;;  %v5583_v28 = vld [vmem:[%s9049_s4 + $0x698] sm:$0xff] }
 0x4a6   : > { %6571 = vmatprep.mubr.msk.f32.mxu0 %vm689_vm1, %v5518_v58  ;;  %v5578_v58 = vld [vmem:[%s9049_s4 + $0x670] sm:$0xff] }
 0x4a8   : > { %6770 = vmatmul.mubr.msk.f32.gmra.mrb[88].mxu1 %vm689_vm1, %v5729_v30  ;;  %v5584_v30 = vld [vmem:[%s9049_s4 + $0x6a0] sm:$0xff] }
 0x4a9   : > { %6572 = vmatmul.mubr.msk.f32.gmra.mrb[28].mxu0 %vm689_vm1, %v5519_v62  ;;  %6772 = vmatprep.mubr.msk.f32.mxu1 %vm689_vm1, %v5730_v34  ;;  %v5581_v62 = vld [vmem:[%s9049_s4 + $0x688] sm:$0xff]  ;;  %v5587_v34 = vld [vmem:[%s9049_s4 + $0x6b8] sm:$0xff] }
 0x4aa   : > { %6574 = vmatprep.mubr.msk.f32.mxu0 %vm689_vm1, %v5520_v27  ;;  %v5582_v27 = vld [vmem:[%s9049_s4 + $0x690] sm:$0xff] }
 0x4ac   : > { %6773 = vmatmul.mubr.msk.f32.gmra.mrb[90].mxu1 %vm689_vm1, %v5731_v37  ;;  %v5588_v37 = vld [vmem:[%s9049_s4 + $0x6c0] sm:$0xff] }
 0x4ad   : > { %6575 = vmatmul.mubr.msk.f32.gmra.mrb[30].mxu0 %vm689_vm1, %v5521_v31  ;;  %6775 = vmatprep.mubr.msk.f32.mxu1 %vm689_vm1, %v5732_v40  ;;  %v5585_v31 = vld [vmem:[%s9049_s4 + $0x6a8] sm:$0xff]  ;;  %v5591_v40 = vld [vmem:[%s9049_s4 + $0x6d8] sm:$0xff] }
 0x4ae   : > { %6577 = vmatprep.mubr.msk.f32.mxu0 %vm689_vm1, %v5522_v33  ;;  %v5586_v33 = vld [vmem:[%s9049_s4 + $0x6b0] sm:$0xff] }
 0x4b0   : > { %6776 = vmatmul.mubr.msk.f32.gmra.mrb[92].mxu1 %vm689_vm1, %v5733_v42  ;;  %v5592_v42 = vld [vmem:[%s9049_s4 + $0x6e0] sm:$0xff] }
 0x4b1   : > { %6578 = vmatmul.mubr.msk.f32.gmra.mrb[32].mxu0 %vm689_vm1, %v5523_v38  ;;  %6778 = vmatprep.mubr.msk.f32.mxu1 %vm689_vm1, %v5734_v55  ;;  %v5589_v38 = vld [vmem:[%s9049_s4 + $0x6c8] sm:$0xff]  ;;  %v5595_v55 = vld [vmem:[%s9049_s4 + $0x6f8] sm:$0xff] }
 0x4b2   : > { %6580 = vmatprep.mubr.msk.f32.mxu0 %vm689_vm1, %v5524_v39  ;;  %v5590_v39 = vld [vmem:[%s9049_s4 + $0x6d0] sm:$0xff] }
 0x4b4   : > { %6779 = vmatmul.mubr.msk.f32.gmra.mrb[94].mxu1 %vm689_vm1, %v5735_v44  ;;  %v5634_v44 = vld [vmem:[%s9049_s4 + $0x700] sm:$0xff] }
 0x4b5   : > { %6581 = vmatmul.mubr.msk.f32.gmra.mrb[34].mxu0 %vm689_vm1, %v5525_v50  ;;  %v5593_v50 = vld [vmem:[%s9049_s4 + $0x6e8] sm:$0xff] }
 0x4b6   : > { %6601 = vmatprep.mubr.msk.f32.mxu0 %vm689_vm1, %v5564_v43  ;;  %v5594_v43 = vld [vmem:[%s9049_s4 + $0x6f0] sm:$0xff] }
 0x4b9   : > { %6602 = vmatmul.mubr.msk.f32.vlgmr.msra.gmra.mrb[4].mxu0 %vm689_vm1, %v5565_v47  ;;  %v5635_v47 = vld [vmem:[%s9049_s4 + $0x708] sm:$0xff] }
 0x4ba   : > { %6872 = vmatpush3.bf16.msra.mxu0 %v8080_v35  ;;  %6604 = vmatprep.mubr.msk.f32.mxu0 %vm689_vm1, %v5566_v48  ;;  %v5569_v35 = vld [vmem:[%s9049_s4 + $0x628] sm:$0xff]  ;;  %v5636_v48 = vld [vmem:[%s9049_s4 + $0x710] sm:$0xff] }
 0x4bb   : > { %6874 = vmatprep.subr.bf16.mxu0 %v8090_v41 }
 0x4bd   : > { %6605 = vmatmul.mubr.msk.f32.gmra.mrb[6].mxu0 %vm689_vm1, %v5567_v60  ;;  %v5637_v60 = vld [vmem:[%s9049_s4 + $0x718] sm:$0xff] }
 0x4be   : > { %6876 = vmatpush3.bf16.msra.mxu0 %v8090_v41  ;;  %6607 = vmatprep.mubr.msk.f32.mxu0 %vm689_vm1, %v5568_v49  ;;  %v5572_v41 = vld [vmem:[%s9049_s4 + $0x640] sm:$0xff] }
 0x4bf   : > { %v5638_v49 = vld [vmem:[%s9049_s4 + $0x720] sm:$0xff] }
 0x4c1   : > { %6608 = vmatmul.mubr.msk.f32.gmra.mrb[8].mxu0 %vm689_vm1, %v5569_v35  ;;  %v5639_v35 = vld [vmem:[%s9049_s4 + $0x728] sm:$0xff] }
 0x4c2   : > { %6610 = vmatprep.mubr.msk.f32.mxu0 %vm689_vm1, %v5570_v51  ;;  %v5640_v51 = vld [vmem:[%s9049_s4 + $0x730] sm:$0xff] }
 0x4c5   : > { %6611 = vmatmul.mubr.msk.f32.gmra.mrb[10].mxu0 %vm689_vm1, %v5571_v52  ;;  %v5641_v52 = vld [vmem:[%s9049_s4 + $0x738] sm:$0xff] }
 0x4c6   : > { %6613 = vmatprep.mubr.msk.f32.mxu0 %vm689_vm1, %v5572_v41  ;;  %v5642_v41 = vld [vmem:[%s9049_s4 + $0x740] sm:$0xff] }
 0x4c9   : > { %6614 = vmatmul.mubr.msk.f32.gmra.mrb[12].mxu0 %vm689_vm1, %v5573_v29  ;;  %v5643_v29 = vld [vmem:[%s9049_s4 + $0x748] sm:$0xff] }
 0x4ca   : > { %6616 = vmatprep.mubr.msk.f32.mxu0 %vm689_vm1, %v5574_v53  ;;  %v5644_v53 = vld [vmem:[%s9049_s4 + $0x750] sm:$0xff] }
 0x4cd   : > { %6617 = vmatmul.mubr.msk.f32.gmra.mrb[14].mxu0 %vm689_vm1, %v5575_v54  ;;  %v5645_v54 = vld [vmem:[%s9049_s4 + $0x758] sm:$0xff] }
 0x4ce   : > { %6619 = vmatprep.mubr.msk.f32.mxu0 %vm689_vm1, %v5576_v56  ;;  %v5646_v56 = vld [vmem:[%s9049_s4 + $0x760] sm:$0xff] }
 0x4d1   : > { %6620 = vmatmul.mubr.msk.f32.gmra.mrb[16].mxu0 %vm689_vm1, %v5577_v57  ;;  %v5647_v57 = vld [vmem:[%s9049_s4 + $0x768] sm:$0xff] }
 0x4d2   : > { %6622 = vmatprep.mubr.msk.f32.mxu0 %vm689_vm1, %v5578_v58  ;;  %v5648_v58 = vld [vmem:[%s9049_s4 + $0x770] sm:$0xff] }
 0x4d5   : > { %6623 = vmatmul.mubr.msk.f32.gmra.mrb[18].mxu0 %vm689_vm1, %v5579_v59  ;;  %v5649_v59 = vld [vmem:[%s9049_s4 + $0x778] sm:$0xff] }
 0x4d6   : > { %6625 = vmatprep.mubr.msk.f32.mxu0 %vm689_vm1, %v5580_v61  ;;  %v5650_v61 = vld [vmem:[%s9049_s4 + $0x780] sm:$0xff] }
 0x4d9   : > { %6626 = vmatmul.mubr.msk.f32.gmra.mrb[20].mxu0 %vm689_vm1, %v5581_v62  ;;  %v5651_v62 = vld [vmem:[%s9049_s4 + $0x788] sm:$0xff] }
 0x4da   : > { %6628 = vmatprep.mubr.msk.f32.mxu0 %vm689_vm1, %v5582_v27  ;;  %v5652_v27 = vld [vmem:[%s9049_s4 + $0x790] sm:$0xff] }
 0x4dd   : > { %6629 = vmatmul.mubr.msk.f32.gmra.mrb[22].mxu0 %vm689_vm1, %v5583_v28  ;;  %v5653_v28 = vld [vmem:[%s9049_s4 + $0x798] sm:$0xff] }
 0x4de   : > { %6631 = vmatprep.mubr.msk.f32.mxu0 %vm689_vm1, %v5584_v30  ;;  %v5654_v30 = vld [vmem:[%s9049_s4 + $0x7a0] sm:$0xff] }
 0x4e1   : > { %6632 = vmatmul.mubr.msk.f32.gmra.mrb[24].mxu0 %vm689_vm1, %v5585_v31  ;;  %v5655_v31 = vld [vmem:[%s9049_s4 + $0x7a8] sm:$0xff] }
 0x4e2   : > { %6634 = vmatprep.mubr.msk.f32.mxu0 %vm689_vm1, %v5586_v33  ;;  %v5656_v33 = vld [vmem:[%s9049_s4 + $0x7b0] sm:$0xff] }
 0x4e5   : > { %6635 = vmatmul.mubr.msk.f32.gmra.mrb[26].mxu0 %vm689_vm1, %v5587_v34  ;;  %v5657_v34 = vld [vmem:[%s9049_s4 + $0x7b8] sm:$0xff] }
 0x4e6   : > { %6637 = vmatprep.mubr.msk.f32.mxu0 %vm689_vm1, %v5588_v37  ;;  %v5658_v37 = vld [vmem:[%s9049_s4 + $0x7c0] sm:$0xff] }
 0x4e9   : > { %6638 = vmatmul.mubr.msk.f32.gmra.mrb[28].mxu0 %vm689_vm1, %v5589_v38  ;;  %v5659_v38 = vld [vmem:[%s9049_s4 + $0x7c8] sm:$0xff] }
 0x4ea   : > { %6640 = vmatprep.mubr.msk.f32.mxu0 %vm689_vm1, %v5590_v39  ;;  %v5660_v39 = vld [vmem:[%s9049_s4 + $0x7d0] sm:$0xff] }
 0x4ed   : > { %6641 = vmatmul.mubr.msk.f32.gmra.mrb[30].mxu0 %vm689_vm1, %v5591_v40  ;;  %v5661_v40 = vld [vmem:[%s9049_s4 + $0x7d8] sm:$0xff] }
 0x4ee   : > { %6643 = vmatprep.mubr.msk.f32.mxu0 %vm689_vm1, %v5592_v42  ;;  %v5662_v42 = vld [vmem:[%s9049_s4 + $0x7e0] sm:$0xff] }
 0x4f1   : > { %6644 = vmatmul.mubr.msk.f32.gmra.mrb[32].mxu0 %vm689_vm1, %v5593_v50  ;;  %v5663_v50 = vld [vmem:[%s9049_s4 + $0x7e8] sm:$0xff] }
 0x4f2   : > { %6646 = vmatprep.mubr.msk.f32.mxu0 %vm689_vm1, %v5594_v43  ;;  %v5664_v43 = vld [vmem:[%s9049_s4 + $0x7f0] sm:$0xff] }
 0x4f5   : > { %6647 = vmatmul.mubr.msk.f32.gmra.mrb[34].mxu0 %vm689_vm1, %v5595_v55  ;;  %v5665_v55 = vld [vmem:[%s9049_s4 + $0x7f8] sm:$0xff] }
 0x4f6   : > { %6667 = vmatprep.mubr.msk.f32.mxu0 %vm689_vm1, %v5634_v44 }
 0x4f9   : > { %6668 = vmatmul.mubr.msk.f32.vlgmr.msra.gmra.mrb[4].mxu0 %vm689_vm1, %v5635_v47 }
 0x4fa   : > { %6670 = vmatprep.mubr.msk.f32.mxu0 %vm689_vm1, %v5636_v48 }
 0x4fd   : > { %6671 = vmatmul.mubr.msk.f32.gmra.mrb[6].mxu0 %vm689_vm1, %v5637_v60 }
 0x4fe   : > { %6673 = vmatprep.mubr.msk.f32.mxu0 %vm689_vm1, %v5638_v49 }
 0x501   : > { %6674 = vmatmul.mubr.msk.f32.gmra.mrb[8].mxu0 %vm689_vm1, %v5639_v35 }
 0x502   : > { %6676 = vmatprep.mubr.msk.f32.mxu0 %vm689_vm1, %v5640_v51 }
 0x505   : > { %6677 = vmatmul.mubr.msk.f32.gmra.mrb[10].mxu0 %vm689_vm1, %v5641_v52 }
 0x506   : > { %6679 = vmatprep.mubr.msk.f32.mxu0 %vm689_vm1, %v5642_v41 }
 0x509   : > { %6680 = vmatmul.mubr.msk.f32.gmra.mrb[12].mxu0 %vm689_vm1, %v5643_v29 }
 0x50a   : > { %6682 = vmatprep.mubr.msk.f32.mxu0 %vm689_vm1, %v5644_v53 }
 0x50d   : > { %6683 = vmatmul.mubr.msk.f32.gmra.mrb[14].mxu0 %vm689_vm1, %v5645_v54 }
 0x50e   : > { %6685 = vmatprep.mubr.msk.f32.mxu0 %vm689_vm1, %v5646_v56 }
 0x511   : > { %6686 = vmatmul.mubr.msk.f32.gmra.mrb[16].mxu0 %vm689_vm1, %v5647_v57 }
 0x512   : > { %6688 = vmatprep.mubr.msk.f32.mxu0 %vm689_vm1, %v5648_v58 }
 0x515   : > { %6689 = vmatmul.mubr.msk.f32.gmra.mrb[18].mxu0 %vm689_vm1, %v5649_v59 }
 0x516   : > { %6691 = vmatprep.mubr.msk.f32.mxu0 %vm689_vm1, %v5650_v61 }
 0x519   : > { %6692 = vmatmul.mubr.msk.f32.gmra.mrb[20].mxu0 %vm689_vm1, %v5651_v62 }
 0x51a   : > { %6694 = vmatprep.mubr.msk.f32.mxu0 %vm689_vm1, %v5652_v27  ;;  %v8808_v44 = vpop.f32.mrb[64].mxu1 }
 0x51b   : > { %v8810_v47 = vpop.f32.mrb[65].mxu1 }
 0x51d   : > { %6695 = vmatmul.mubr.msk.f32.gmra.mrb[22].mxu0 %vm689_vm1, %v5653_v28 }
 0x51e   : > { %6697 = vmatprep.mubr.msk.f32.mxu0 %vm689_vm1, %v5654_v30 }
 0x521   : > { %6698 = vmatmul.mubr.msk.f32.gmra.mrb[24].mxu0 %vm689_vm1, %v5655_v31 }
 0x522   : > { %6700 = vmatprep.mubr.msk.f32.mxu0 %vm689_vm1, %v5656_v33 }
 0x525   : > { %6701 = vmatmul.mubr.msk.f32.gmra.mrb[26].mxu0 %vm689_vm1, %v5657_v34 }
 0x526   : > { %6703 = vmatprep.mubr.msk.f32.mxu0 %vm689_vm1, %v5658_v37 }
 0x529   : > { %6704 = vmatmul.mubr.msk.f32.gmra.mrb[28].mxu0 %vm689_vm1, %v5659_v38 }
 0x52a   : > { %6706 = vmatprep.mubr.msk.f32.mxu0 %vm689_vm1, %v5660_v39 }
 0x52d   : > { %6707 = vmatmul.mubr.msk.f32.gmra.mrb[30].mxu0 %vm689_vm1, %v5661_v40 }
 0x52e   : > { %6709 = vmatprep.mubr.msk.f32.mxu0 %vm689_vm1, %v5662_v42 }
 0x531   : > { %6710 = vmatmul.mubr.msk.f32.gmra.mrb[32].mxu0 %vm689_vm1, %v5663_v50 }
 0x532   : > { %6712 = vmatprep.mubr.msk.f32.mxu0 %vm689_vm1, %v5664_v43 }
 0x535   : > { %6713 = vmatmul.mubr.msk.f32.gmra.mrb[34].mxu0 %vm689_vm1, %v5665_v55 }
 0x54f   : > { %v8812_v48 = vpop.f32.mrb[66].mxu1 }
 0x550   : > { %v8814_v60 = vpop.f32.mrb[67].mxu1 }
 0x553   : > { %v8816_v49 = vpop.f32.mrb[68].mxu1 }
 0x554   : > { %v8818_v35 = vpop.f32.mrb[69].mxu1 }
 0x557   : > { %v8820_v51 = vpop.f32.mrb[70].mxu1 }
 0x558   : > { %v8822_v52 = vpop.f32.mrb[71].mxu1 }
 0x55b   : > { %v8824_v41 = vpop.f32.mrb[72].mxu1 }
 0x55c   : > { %v8826_v29 = vpop.f32.mrb[73].mxu1 }
 0x55f   : > { %v8828_v53 = vpop.f32.mrb[74].mxu1 }
 0x560   : > { %v8830_v54 = vpop.f32.mrb[75].mxu1 }
 0x563   : > { %v8832_v56 = vpop.f32.mrb[76].mxu1 }
 0x564   : > { %v8834_v57 = vpop.f32.mrb[77].mxu1 }
 0x567   : > { %v8836_v58 = vpop.f32.mrb[78].mxu1 }
 0x568   : > { %v8838_v59 = vpop.f32.mrb[79].mxu1 }
 0x56b   : > { %v8840_v61 = vpop.f32.mrb[80].mxu1 }
 0x56c   : > { %v8842_v62 = vpop.f32.mrb[81].mxu1 }
 0x56f   : > { %v8844_v27 = vpop.f32.mrb[82].mxu1 }
 0x570   : > { %9072 = vst [vmem:[#allocation16_spill] sm:$0xff] %v8844_v27  ;;  %v8846_v28 = vpop.f32.mrb[83].mxu1 }
 0x571   : > { %9073 = vst [vmem:[#allocation17_spill] sm:$0xff] %v8846_v28 }
 0x573   : > { %v8848_v30 = vpop.f32.mrb[84].mxu1 }
 0x574   : > { %9074 = vst [vmem:[#allocation18_spill] sm:$0xff] %v8848_v30  ;;  %v8850_v31 = vpop.f32.mrb[85].mxu1 }
 0x575   : > { %9075 = vst [vmem:[#allocation19_spill] sm:$0xff] %v8850_v31 }
 0x577   : > { %v8852_v33 = vpop.f32.mrb[86].mxu1 }
 0x578   : > { %9076 = vst [vmem:[#allocation20_spill] sm:$0xff] %v8852_v33  ;;  %v8854_v34 = vpop.f32.mrb[87].mxu1 }
 0x579   : > { %9077 = vst [vmem:[#allocation21_spill] sm:$0xff] %v8854_v34 }
 0x57b   : > { %v8856_v37 = vpop.f32.mrb[88].mxu1 }
 0x57c   : > { %9078 = vst [vmem:[#allocation22_spill] sm:$0xff] %v8856_v37  ;;  %v8858_v38 = vpop.f32.mrb[89].mxu1 }
 0x57d   : > { %9079 = vst [vmem:[#allocation23_spill] sm:$0xff] %v8858_v38 }
 0x57f   : > { %v8860_v39 = vpop.f32.mrb[90].mxu1 }
 0x580   : > { %9080 = vst [vmem:[#allocation24_spill] sm:$0xff] %v8860_v39  ;;  %v8862_v40 = vpop.f32.mrb[91].mxu1 }
 0x581   : > { %9081 = vst [vmem:[#allocation25_spill] sm:$0xff] %v8862_v40  ;;  %v8882_v40 = vld [vmem:[%s9052_s7] sm:$0x3] }
 0x582   : > { %9087 = vst [vmem:[#allocation31_spill] sm:$0xff] %v8882_v40 }
 0x583   : > { %v8864_v42 = vpop.f32.mrb[92].mxu1 }
 0x584   : > { %9082 = vst [vmem:[#allocation26_spill] sm:$0xff] %v8864_v42  ;;  %v8866_v50 = vpop.f32.mrb[93].mxu1  ;;  %v4914_v42 = vsub.s32 1, %v8875_v24 }
 0x585   : > { %9083 = vst [vmem:[#allocation27_spill] sm:$0xff] %v8866_v50 }
 0x586   : > { %v4915_v50 = vrot.slane %v8882_v40, %v4914_v42 }
 0x587   : > { %v8868_v43 = vpop.f32.mrb[94].mxu1 }
 0x588   : > { %9084 = vst [vmem:[#allocation28_spill] sm:$0xff] %v8868_v43  ;;  %v8870_v55 = vpop.f32.mrb[95].mxu1  ;;  %v4690_v43 = vpop.permute.xlu1 %4689  ;;  %4982 = vmatprep.mubr.f32.mxu1 %v4915_v50 }
 0x589   : > { %9085 = vst [vmem:[#allocation29_spill] sm:$0xff] %v8870_v55  ;;  %v4685_v55 = vpop.permute.xlu0 %4684 }
 0x58c   : > { %v8886_v39 = vpop.permute.xlu1 %4779 }
 0x58d   : > { %9088 = vst [vmem:[#allocation32_spill] sm:$0xff] %v8886_v39  ;;  %v8888_v22 = vpop.permute.xlu0 %4774 }
 0x58e   : > { %9089 = vst [vmem:[#allocation33_spill] sm:$0xff] %v8888_v22 }
 0x590   : > { %v4700_v26 = vpop.permute.xlu1 %4699 }
 0x591   : > { %v4695_v21 = vpop.permute.xlu0 %4694 }
 0x594   : > { %v8890_v38 = vpop.permute.xlu1 %4789 }
 0x595   : > { %9090 = vst [vmem:[#allocation34_spill] sm:$0xff] %v8890_v38  ;;  %v8892_v37 = vpop.permute.xlu0 %4784 }
 0x596   : > { %9091 = vst [vmem:[#allocation35_spill] sm:$0xff] %v8892_v37 }
 0x598   : > { %v4710_v20 = vpop.permute.xlu1 %4709 }
 0x599   : > { %v4705_v19 = vpop.permute.xlu0 %4704 }
 0x59c   : > { %v8894_v34 = vpop.permute.xlu1 %4799 }
 0x59d   : > { %9092 = vst [vmem:[#allocation36_spill] sm:$0xff] %v8894_v34  ;;  %v8896_v24 = vpop.permute.xlu0 %4794 }
 0x59e   : > { %9093 = vst [vmem:[#allocation37_spill] sm:$0xff] %v8896_v24 }
 0x5a0   : > { %v4720_v42 = vpop.permute.xlu1 %4719 }
 0x5a1   : > { %v4715_v40 = vpop.permute.xlu0 %4714 }
 0x5a4   : > { %v8898_v50 = vpop.permute.xlu1 %4809 }
 0x5a5   : > { %9094 = vst [vmem:[#allocation38_spill] sm:$0xff] %v8898_v50  ;;  %v8900_v33 = vpop.permute.xlu0 %4804 }
 0x5a6   : > { %9095 = vst [vmem:[#allocation39_spill] sm:$0xff] %v8900_v33 }
 0x5a8   : > { %v4730_v18 = vpop.permute.xlu1 %4729 }
 0x5a9   : > { %v8902_v17 = vpop.permute.xlu0 %4724 }
 0x5ac   : > { %v8905_v37 = vpop.permute.xlu1 %4819 }
 0x5ad   : > { %9096 = vst [vmem:[#allocation40_spill] sm:$0xff] %v8905_v37  ;;  %v8908_v34 = vpop.permute.xlu0 %4814 }
 0x5ae   : > { %9097 = vst [vmem:[#allocation41_spill] sm:$0xff] %v8908_v34 }
 0x5b0   : > { %v4740_v37 = vpop.permute.xlu1 %4739 }
 0x5b1   : > { %v4735_v34 = vpop.permute.xlu0 %4734 }
 0x5cc   : > { %v6669_v31 = vpop.f32.mrb[4].mxu0 }
 0x5cd   : > { %v6925_v38 = vadd.f32 %v6669_v31, %v7956_v63  ;;  %v3985_v30 = vpop.f32.mrb[5].mxu0 }
 0x5ce   : > { %v6927_v16 = vadd.f32 %v3985_v30, %v7958_v0 }
 0x5cf   : > { %v6926_v24 = vadd.f32 %v6925_v38, %v8808_v44 }
 0x5d0   : > { %v6928_v22 = vadd.f32 %v6927_v16, %v8810_v47  ;;  %v6672_v50 = vpop.f32.mrb[6].mxu0 }
 0x5d1   : > { %v4843_v15 = vadd.f32 %v6926_v24, %v4690_v43  ;;  %v6929_v33 = vadd.f32 %v6672_v50, %v7960_v32  ;;  %v3995_v39 = vpop.f32.mrb[7].mxu0 }
 0x5d2   : > { %v4842_v28 = vadd.f32 %v6928_v22, %v4685_v55  ;;  %v6931_v27 = vadd.f32 %v3995_v39, %v7962_v1  ;;  %v8928_v39 = vpop.permute.xlu0 %4824 }
 0x5d3   : > { %v4875_v63 = vmax.f32 %v4843_v15, 0.0  ;;  %v6930_v31 = vadd.f32 %v6929_v33, %v8812_v48 }
 0x5d4   : > { %v4874_v14 = vmax.f32 %v4842_v28, 0.0  ;;  %v6932_v0 = vadd.f32 %v6931_v27, %v8814_v60  ;;  %v6675_v30 = vpop.f32.mrb[8].mxu0 }
 0x5d5   : > { %v4845_v44 = vadd.f32 %v6930_v31, %v4700_v26  ;;  %v6933_v16 = vadd.f32 %v6675_v30, %v7964_v36  ;;  %v4005_v47 = vpop.f32.mrb[9].mxu0  ;;  %v8923_v26 = vpop.permute.xlu1 %4829 }
 0x5d6   : > { %v8917_v24 = vpack.c.bf16 %v4875_v63, %v4874_v14  ;;  %v4844_v32 = vadd.f32 %v6932_v0, %v4695_v21  ;;  %v6935_v22 = vadd.f32 %v4005_v47, %v7966_v46  ;;  %v4745_v47 = vpop.permute.xlu0 %4744 }
 0x5d7   : > { %v4877_v38 = vmax.f32 %v4845_v44, 0.0  ;;  %v6934_v1 = vadd.f32 %v6933_v16, %v8816_v49 }
 0x5d8   : > { %v4876_v15 = vmax.f32 %v4844_v32, 0.0  ;;  %v6936_v48 = vadd.f32 %v6935_v22, %v8818_v35  ;;  %v6678_v28 = vpop.f32.mrb[10].mxu0 }
 0x5d9   : > { %v4847_v33 = vadd.f32 %v6934_v1, %v4710_v20  ;;  %v6937_v60 = vadd.f32 %v6678_v28, %v7968_v2  ;;  %v4015_v27 = vpop.f32.mrb[11].mxu0  ;;  %v4750_v30 = vpop.permute.xlu1 %4749 }
 0x5da   : > { %v8925_v36 = vpack.c.bf16 %v4877_v38, %v4876_v15  ;;  %v4846_v14 = vadd.f32 %v6936_v48, %v4705_v19  ;;  %v6939_v21 = vadd.f32 %v4015_v27, %v7970_v45 }
 0x5db   : > { %v4879_v46 = vmax.f32 %v4847_v33, 0.0  ;;  %v6938_v49 = vadd.f32 %v6937_v60, %v8820_v51  ;;  %v8951_v60 = vpop.permute.xlu0 %4834 }
 0x5dc   : > { %v4878_v43 = vmax.f32 %v4846_v14, 0.0  ;;  %v6940_v35 = vadd.f32 %v6939_v21, %v8822_v52  ;;  %v6681_v55 = vpop.f32.mrb[12].mxu0 }
 0x5dd   : > { %v4849_v20 = vadd.f32 %v6938_v49, %v4720_v42  ;;  %v6941_v2 = vadd.f32 %v6681_v55, %v7972_v3  ;;  %v4025_v50 = vpop.f32.mrb[13].mxu0  ;;  %v8946_v28 = vpop.permute.xlu1 %4839 }
 0x5de   : > { %v8933_v63 = vpack.c.bf16 %v4879_v46, %v4878_v43  ;;  %v4848_v31 = vadd.f32 %v6940_v35, %v4715_v40  ;;  %v6943_v19 = vadd.f32 %v4025_v50, %v7974_v4 }
 0x5df   : > { %v4881_v0 = vmax.f32 %v4849_v20, 0.0  ;;  %v6942_v45 = vadd.f32 %v6941_v2, %v8824_v41  ;;  %v4755_v2 = vpop.permute.xlu0 %4754 }
 0x5e0   : > { %v4880_v44 = vmax.f32 %v4848_v31, 0.0  ;;  %v6944_v51 = vadd.f32 %v6943_v19, %v8826_v29  ;;  %v6684_v16 = vpop.f32.mrb[14].mxu0 }
 0x5e1   : > { %v4851_v52 = vadd.f32 %v6942_v45, %v4730_v18  ;;  %v6945_v42 = vadd.f32 %v6684_v16, %v7976_v5  ;;  %v4035_v32 = vpop.f32.mrb[15].mxu0  ;;  %v4760_v35 = vpop.permute.xlu1 %4759 }
 0x5e2   : > { %v8939_v3 = vpack.c.bf16 %v4881_v0, %v4880_v44  ;;  %v4850_v22 = vadd.f32 %v6944_v51, %v8902_v17  ;;  %v6947_v40 = vadd.f32 %v4035_v32, %v7978_v6 }
 0x5e3   : > { %v4883_v4 = vmax.f32 %v4851_v52, 0.0  ;;  %v6946_v38 = vadd.f32 %v6945_v42, %v8828_v53  ;;  %v9098_v52 = vld [vmem:[#allocation3_spill] sm:$0xff] }
 0x5e4   : > { %v4882_v41 = vmax.f32 %v4850_v22, 0.0  ;;  %v6948_v1 = vadd.f32 %v6947_v40, %v8830_v54  ;;  %v6687_v15 = vpop.f32.mrb[16].mxu0 }
 0x5e5   : > { %v4853_v29 = vadd.f32 %v6946_v38, %v4740_v37  ;;  %v6949_v48 = vadd.f32 %v6687_v15, %v7980_v7  ;;  %v4045_v18 = vpop.f32.mrb[17].mxu0 }
 0x5e6   : > { %v8948_v5 = vpack.c.bf16 %v4883_v4, %v4882_v41  ;;  %v4852_v33 = vadd.f32 %v6948_v1, %v4735_v34  ;;  %v6951_v17 = vadd.f32 %v4045_v18, %v7982_v8  ;;  %v9102_v1 = vld [vmem:[#allocation4_spill] sm:$0xff] }
 0x5e7   : > { %v4885_v6 = vmax.f32 %v4853_v29, 0.0  ;;  %v6950_v53 = vadd.f32 %v6949_v48, %v8832_v56  ;;  %v9104_v48 = vld [vmem:[#allocation5_spill] sm:$0xff] }
 0x5e8   : > { %v4884_v27 = vmax.f32 %v4852_v33, 0.0  ;;  %v6952_v54 = vadd.f32 %v6951_v17, %v8834_v57  ;;  %v6690_v14 = vpop.f32.mrb[18].mxu0  ;;  %v9105_v17 = vld [vmem:[#allocation18_spill] sm:$0xff] }
 0x5e9   : > { %v4855_v37 = vadd.f32 %v6950_v53, %v4750_v30  ;;  %v6953_v7 = vadd.f32 %v6690_v14, %v7984_v9  ;;  %v4055_v21 = vpop.f32.mrb[19].mxu0 }
 0x5ea   : > { %v8956_v46 = vpack.c.bf16 %v4885_v6, %v4884_v27  ;;  %v4854_v49 = vadd.f32 %v6952_v54, %v4745_v47  ;;  %v6955_v34 = vadd.f32 %v4055_v21, %v7986_v10  ;;  %v9106_v27 = vld [vmem:[#allocation19_spill] sm:$0xff]  ;;  %v9108_v21 = vld [vmem:[#allocation6_spill] sm:$0xff] }
 0x5eb   : > { %v4887_v43 = vmax.f32 %v4855_v37, 0.0  ;;  %v6954_v8 = vadd.f32 %v6953_v7, %v8836_v58  ;;  %v9107_v37 = vld [vmem:[#allocation34_spill] sm:$0xff] }
 0x5ec   : > { %v4886_v55 = vmax.f32 %v4854_v49, 0.0  ;;  %v6956_v56 = vadd.f32 %v6955_v34, %v8838_v59  ;;  %v6693_v20 = vpop.f32.mrb[20].mxu0 }
 0x5ed   : > { %v4857_v57 = vadd.f32 %v6954_v8, %v4760_v35  ;;  %v6957_v50 = vadd.f32 %v6693_v20, %v7988_v11  ;;  %v4065_v31 = vpop.f32.mrb[21].mxu0  ;;  %v9110_v35 = vld [vmem:[#allocation7_spill] sm:$0xff] }
 0x5ee   : > { %v8962_v9 = vpack.c.bf16 %v4887_v43, %v4886_v55  ;;  %v4856_v19 = vadd.f32 %v6956_v56, %v4755_v2  ;;  %v6959_v0 = vadd.f32 %v4065_v31, %v7990_v12  ;;  %v9099_v12 = vld [vmem:[#allocation16_spill] sm:$0xff]  ;;  %v9109_v43 = vld [vmem:[#allocation35_spill] sm:$0xff]  ;;  %v9112_v31 = vld [vmem:[#allocation21_spill] sm:$0xff] }
 0x5ef   : > { %v4889_v45 = vmax.f32 %v4857_v57, 0.0  ;;  %v6958_v10 = vadd.f32 %v6957_v50, %v8840_v61  ;;  %v9100_v61 = vld [vmem:[#allocation17_spill] sm:$0xff]  ;;  %v9111_v2 = vld [vmem:[#allocation20_spill] sm:$0xff] }
 0x5f0   : > { %v4888_v30 = vmax.f32 %v4856_v19, 0.0  ;;  %v6960_v58 = vadd.f32 %v6959_v0, %v8842_v62  ;;  %v6696_v44 = vpop.f32.mrb[22].mxu0  ;;  %v9101_v62 = vld [vmem:[#allocation32_spill] sm:$0xff] }
 0x5f1   : > { %v4859_v59 = vadd.f32 %v6958_v10, %v8872_v25  ;;  %v6961_v51 = vadd.f32 %v6696_v44, %v7992_v13  ;;  %v4075_v16 = vpop.f32.mrb[23].mxu0  ;;  %v9103_v13 = vld [vmem:[#allocation33_spill] sm:$0xff] }
 0x5f2   : > { %v8969_v47 = vpack.c.bf16 %v4889_v45, %v4888_v30  ;;  %v4858_v11 = vadd.f32 %v6960_v58, %v8877_v23  ;;  %v6963_v42 = vadd.f32 %v4075_v16, %v9098_v52  ;;  %v9113_v45 = vld [vmem:[#allocation36_spill] sm:$0xff] }
 0x5f3   : > { %v4891_v32 = vmax.f32 %v4859_v59, 0.0  ;;  %v6962_v22 = vadd.f32 %v6961_v51, %v9099_v12  ;;  %v9114_v30 = vld [vmem:[#allocation8_spill] sm:$0xff]  ;;  %v9116_v51 = vld [vmem:[#allocation9_spill] sm:$0xff] }
 0x5f4   : > { %v4890_v40 = vmax.f32 %v4858_v11, 0.0  ;;  %v6964_v4 = vadd.f32 %v6963_v42, %v9100_v61  ;;  %v6699_v38 = vpop.f32.mrb[24].mxu0  ;;  %v9117_v42 = vld [vmem:[#allocation22_spill] sm:$0xff] }
 0x5f5   : > { %v4861_v41 = vadd.f32 %v6962_v22, %v9101_v62  ;;  %v6965_v25 = vadd.f32 %v6699_v38, %v9102_v1  ;;  %v4085_v15 = vpop.f32.mrb[25].mxu0  ;;  %v9118_v22 = vld [vmem:[#allocation23_spill] sm:$0xff]  ;;  %v9120_v62 = vld [vmem:[#allocation10_spill] sm:$0xff] }
 0x5f6   : > { %v4860_v29 = vadd.f32 %v6964_v4, %v9103_v13  ;;  %v6967_v18 = vadd.f32 %v4085_v15, %v9104_v48  ;;  %v6889_v33 = vpack.c.bf16 %v4891_v32, %v4890_v40  ;;  %v9119_v4 = vld [vmem:[#allocation38_spill] sm:$0xff]  ;;  %v9122_v15 = vld [vmem:[#allocation11_spill] sm:$0xff] }
 0x5f7   : > { %v4893_v23 = vmax.f32 %v4861_v41, 0.0  ;;  %v6966_v6 = vadd.f32 %v6965_v25, %v9105_v17  ;;  %v9124_v17 = vld [vmem:[#allocation25_spill] sm:$0xff] }
 0x5f8   : > { %v4892_v53 = vmax.f32 %v4860_v29, 0.0  ;;  %v6968_v54 = vadd.f32 %v6967_v18, %v9106_v27  ;;  %v6702_v14 = vpop.f32.mrb[26].mxu0  ;;  %6890 = vmatprep.subr.bf16.mxu1 %v6889_v33  ;;  %v9123_v18 = vld [vmem:[#allocation24_spill] sm:$0xff] }
 0x5f9   : > { %v4863_v7 = vadd.f32 %v6966_v6, %v9107_v37  ;;  %v6969_v49 = vadd.f32 %v6702_v14, %v9108_v21  ;;  %v4095_v34 = vpop.f32.mrb[27].mxu0  ;;  %6892 = vmatpush3.bf16.msra.mxu1 %v8917_v24  ;;  %v9115_v24 = vld [vmem:[#allocation37_spill] sm:$0xff]  ;;  %v9125_v27 = vld [vmem:[#allocation40_spill] sm:$0xff] }
 0x5fa   : > { %v4862_v8 = vadd.f32 %v6968_v54, %v9109_v43  ;;  %v6971_v55 = vadd.f32 %v4095_v34, %v9110_v35  ;;  %v6893_v56 = vpack.c.bf16 %v4893_v23, %v4892_v53  ;;  %v9126_v14 = vld [vmem:[#allocation12_spill] sm:$0xff]  ;;  %v9129_v35 = vld [vmem:[#allocation26_spill] sm:$0xff] }
 0x5fb   : > { %v4895_v20 = vmax.f32 %v4863_v7, 0.0  ;;  %v6970_v57 = vadd.f32 %v6969_v49, %v9111_v2  ;;  %v9128_v49 = vld [vmem:[#allocation13_spill] sm:$0xff] }
 0x5fc   : > { %v4894_v50 = vmax.f32 %v4862_v8, 0.0  ;;  %v6972_v19 = vadd.f32 %v6971_v55, %v9112_v31  ;;  %v6705_v0 = vpop.f32.mrb[28].mxu0  ;;  %6894 = vmatprep.subr.bf16.mxu1 %v6893_v56  ;;  %v9131_v31 = vld [vmem:[#allocation14_spill] sm:$0xff] }
 0x5fd   : > { %v4865_v10 = vadd.f32 %v6970_v57, %v9113_v45  ;;  %v6973_v58 = vadd.f32 %v6705_v0, %v9114_v30  ;;  %v4105_v44 = vpop.f32.mrb[29].mxu0  ;;  %6896 = vmatpush3.bf16.msra.mxu1 %v8925_v36  ;;  %v9121_v36 = vld [vmem:[#allocation39_spill] sm:$0xff] }
 0x5fe   : > { %v4864_v59 = vadd.f32 %v6972_v19, %v9115_v24  ;;  %v6975_v16 = vadd.f32 %v4105_v44, %v9116_v51  ;;  %v6897_v11 = vpack.c.bf16 %v4895_v20, %v4894_v50  ;;  %v9130_v20 = vld [vmem:[#allocation27_spill] sm:$0xff]  ;;  %v9133_v44 = vld [vmem:[#allocation28_spill] sm:$0xff]  ;;  %v9134_v51 = vld [vmem:[#allocation29_spill] sm:$0xff] }
 0x5ff   : > { %v4897_v52 = vmax.f32 %v4865_v10, 0.0  ;;  %v6974_v32 = vadd.f32 %v6973_v58, %v9117_v42  ;;  %v9132_v45 = vld [vmem:[#allocation15_spill] sm:$0xff] }
 0x600   : > { %v4896_v12 = vmax.f32 %v4864_v59, 0.0  ;;  %v6976_v40 = vadd.f32 %v6975_v16, %v9118_v22  ;;  %v6708_v61 = vpop.f32.mrb[30].mxu0  ;;  %6898 = vmatprep.subr.bf16.mxu1 %v6897_v11  ;;  %v9136_v22 = vld [vmem:[#allocation31_spill] sm:$0xff] }
 0x601   : > { %v4867_v38 = vadd.f32 %v6974_v32, %v9119_v4  ;;  %v6977_v41 = vadd.f32 %v6708_v61, %v9120_v62  ;;  %v4115_v1 = vpop.f32.mrb[31].mxu0  ;;  %6900 = vmatpush3.bf16.msra.mxu1 %v8933_v63  ;;  %v9127_v63 = vld [vmem:[#allocation41_spill] sm:$0xff] }
 0x602   : > { %v4866_v25 = vadd.f32 %v6976_v40, %v9121_v36  ;;  %v6979_v13 = vadd.f32 %v4115_v1, %v9122_v15  ;;  %v6901_v29 = vpack.c.bf16 %v4897_v52, %v4896_v12  ;;  %v4990_v61 = vld [vmem:[%s9051_s6 + $0x10] sm:$0xff]  ;;  %v4996_v1 = vpop.permute.xlu0 %4995 }
 0x603   : > { %v4899_v48 = vmax.f32 %v4867_v38, 0.0  ;;  %v6978_v33 = vadd.f32 %v6977_v41, %v9123_v18 }
 0x604   : > { %v4898_v23 = vmax.f32 %v4866_v25, 0.0  ;;  %v6980_v6 = vadd.f32 %v6979_v13, %v9124_v17  ;;  %v6711_v53 = vpop.f32.mrb[32].mxu0  ;;  %6902 = vmatprep.subr.bf16.mxu1 %v6901_v29 }
 0x605   : > { %v4869_v54 = vadd.f32 %v6978_v33, %v9125_v27  ;;  %v6981_v37 = vadd.f32 %v6711_v53, %v9126_v14  ;;  %v4125_v7 = vpop.f32.mrb[33].mxu0  ;;  %6904 = vmatpush3.bf16.msra.mxu1 %v8939_v3  ;;  %v7214_v53 = vmov 1966171168  }
 0x606   : > { %v4868_v21 = vadd.f32 %v6980_v6, %v9127_v63  ;;  %v6983_v34 = vadd.f32 %v4125_v7, %v9128_v49  ;;  %v6905_v43 = vpack.c.bf16 %v4899_v48, %v4898_v23  ;;  %v5092_v27 = vunpack.c.l.s4 %v7214_v53 }
 0x607   : > { %v4901_v8 = vmax.f32 %v4869_v54, 0.0  ;;  %v6982_v55 = vadd.f32 %v6981_v37, %v9129_v35  ;;  %v9137_v49 = vlaneseq }
 0x608   : > { %v4900_v56 = vmax.f32 %v4868_v21, 0.0  ;;  %v6984_v2 = vadd.f32 %v6983_v34, %v9130_v20  ;;  %v6714_v57 = vpop.f32.mrb[34].mxu0  ;;  %6906 = vmatprep.subr.bf16.mxu1 %v6905_v43  ;;  %v5093_v54 = vunpack.c.0.s8 %v5092_v27 }
 0x609   : > { %v4871_v50 = vadd.f32 %v6982_v55, %v8923_v26  ;;  %v6985_v19 = vadd.f32 %v6714_v57, %v9131_v31  ;;  %v4135_v0 = vpop.f32.mrb[35].mxu0  ;;  %6908 = vmatpush3.bf16.msra.mxu1 %v8948_v5  ;;  %vm5108_vm2 = vcmp.lt.s32.totalorder %v9137_v49, 256 }
 0x60a   : > { %v4870_v3 = vadd.f32 %v6984_v2, %v8928_v39  ;;  %v6987_v10 = vadd.f32 %v4135_v0, %v9132_v45  ;;  %v6909_v30 = vpack.c.bf16 %v4901_v8, %v4900_v56  ;;  %v9135_v39 = vld [vmem:[#allocation30_spill] sm:$0xff] }
 0x60b   : > { %v4903_v58 = vmax.f32 %v4871_v50, 0.0  ;;  %v6986_v24 = vadd.f32 %v6985_v19, %v9133_v44  ;;  %v4910_v32 = vsub.s32 0, %v9135_v39  ;;  %v5096_v37 = vsub.s32 %v5093_v54, %v9135_v39 }
 0x60c   : > { %v4902_v59 = vmax.f32 %v4870_v3, 0.0  ;;  %v6988_v16 = vadd.f32 %v6987_v10, %v9134_v51  ;;  %6910 = vmatprep.subr.bf16.mxu1 %v6909_v30 }
 0x60d   : > { %v4873_v11 = vadd.f32 %v6986_v24, %v8946_v28  ;;  %6912 = vmatpush3.bf16.msra.mxu1 %v8956_v46  ;;  %v4911_v40 = vrot.slane %v9136_v22, %v4910_v32  ;;  %v4989_v28 = vld [vmem:[%s9051_s6 + $0x8] sm:$0xff]  ;;  %v5001_v36 = vrot.slane %v4996_v1, %v4910_v32 }
 0x60e   : > { %v4872_v26 = vadd.f32 %v6988_v16, %v8951_v60  ;;  %v6913_v52 = vpack.c.bf16 %v4903_v58, %v4902_v59  ;;  %v4991_v60 = vld [vmem:[%s9051_s6 + $0x18] sm:$0xff] }
 0x60f   : > { %v4905_v5 = vmax.f32 %v4873_v11, 0.0  ;;  %v6921_v46 = vpack.c.bf16 %v4991_v60, %v4989_v28 }
 0x610   : > { %v4904_v42 = vmax.f32 %v4872_v26, 0.0  ;;  %6914 = vmatprep.subr.bf16.mxu1 %v6913_v52 }
 0x611   : > { %6916 = vmatpush3.bf16.msra.mxu1 %v8962_v9  ;;  %v4988_v9 = vld [vmem:[%s9051_s6] sm:$0xff] }
 0x612   : > { %v6917_v12 = vpack.c.bf16 %v4905_v5, %v4904_v42  ;;  %v6923_v4 = vpack.c.bf16 %v4990_v61, %v4988_v9 }
 0x614   : > { %6918 = vmatprep.subr.bf16.mxu1 %v6917_v12 }
 0x615   : > { %6920 = vmatpush3.bf16.msra.mxu1 %v8969_v47  ;;  %v7213_v47 = vmov 0.0  }
 0x616   : > { %6922 = vmatprep.subr.bf16.mxu1 %v6921_v46 }
 0x618   : > { %4983 = vmatmul.mubr.f32.vlgmr.msra.gmra.mrb[96].mxu1 %v4911_v40 }
 0x619   : > { %6924 = vmatpush1.bf16.msra.mxu1 %v6923_v4  ;;  %5069 = vmatprep.mubr.f32.mxu1 %v7213_v47 }
 0x6eb   : > { %v6184_v38 = vpop.f32.mrb[96].mxu1 }
 0x6ec   : > { %v6185_v62 = vpop.f32.mrb[97].mxu1 }
 0x6ed   : > { %v6186_v41 = vadd.f32 %v6185_v62, %v6184_v38 }
 0x6ef   : > { %5768 = vmatmul.mubr.msk.f32.vlgmr.msra.gmra.mrb[98].mxu1 %vm337_vm0, %v6186_v41 }
 0x7c2   : > { %v5071_v25 = vpop.f32.mrb[98].mxu1 }
 0x7c3   : > { %v5072_v15 = vadd.f32 %v5071_v25, %v5001_v36  ;;  %v5073_v13 = vpop.f32.mrb[99].mxu1 }
 0x7c4   : > { %v5074_v29 = vadd.f32 %v5073_v13, %v5001_v36 }
 0x7c5   : > { %v5769_v48 = vmul.f32 -1.442695, %v5072_v15 }
 0x7c6   : > { %v5770_v18 = vmul.f32 -1.442695, %v5074_v29 }
 0x7c7   : > { %7196 = vpow2.f32 %v5769_v48 }
 0x7c8   : > { %7198 = vpow2.f32 %v5770_v18 }
 0x7d1   : > { %v7197_v33 = vpop.eup %7196 }
 0x7d2   : > { %v7199_v23 = vpop.eup %7198  ;;  %v5082_v17 = vadd.f32 1.0, %v7197_v33 }
 0x7d3   : > { %v5083_v6 = vadd.f32 1.0, %v7199_v23 }
 0x7d4   : > { %7200 = vrcp.f32 %v5082_v17 }
 0x7d5   : > { %7202 = vrcp.f32 %v5083_v6 }
 0x7de   : > { %v7201_v14 = vpop.eup %7200 }
 0x7df   : > { %v7203_v7 = vpop.eup %7202 }
 0x7e0   : > { %v5090_v63 = vcombine.low %v7201_v14, %v7203_v7 }
 0x7e2   : > { %v5097_v21 = vrot.slane %v5090_v63, %v5096_v37 }
 0x7e4   : > { %v5104_v34 = vrot.slane %v5097_v21, %v5096_v37 }
 0x7e6   : > { %5110 = vst.msk [vmem:[%s332_s21] sm:$0x3] %vm5108_vm2, %v5104_v34 }
 0x7e7 PF: > { %s21_s11 = sadd.s32 1, %s7210_s11  }
 0x7e8   : > { %p18_p4 = scmp.ge.s32.totalorder %s21_s11, 4  }
 0x7ea   :  { %20 = sbr.rel (!%p18_p4) target bundleno = 3 (0x3), region = 102 }

</bundles_post_ra>
